<compile_context>
chip_gen: v7x
topology: tpu7x:2x2x1
jax: 0.10.0
libtpu: 0.0.40
codegen_flags: <defaults>
</compile_context>

<pallas_src>
import functools

import jax
import jax.numpy as jnp
from jax.experimental import pallas as pl
from jax.experimental.pallas import tpu as pltpu


# ---------------------------------------------------------------------------
# Kernels
# ---------------------------------------------------------------------------

def _embed_kernel_natural(txt_ref, img_ref, out_ref, *, n_valid, precision):
    """MXU-natural matmul + small in-kernel result transpose.

    txt_ref : (C, Np)  normalized text, transposed & zero-padded to Np=128k lanes
    img_ref : (TP, C)  image-embedding pixel tile
    out_ref : (N, TP)  logits tile (lane-dense stores along TP)
    """
    r = jnp.dot(img_ref[...], txt_ref[...],
                preferred_element_type=jnp.float32,
                precision=precision)                        # (TP, Np): no big transpose
    out_ref[...] = r.T[:n_valid, :].astype(out_ref.dtype)   # tiny XLU transpose + slice


def _embed_kernel_transposed_contraction(txt_ref, img_ref, out_ref, *, precision):
    """Fallback (previously validated): contract both operands on their last dim.

    txt_ref : (N, C); img_ref : (TP, C); out_ref : (N, TP)
    """
    out_ref[...] = jax.lax.dot_general(
        txt_ref[...], img_ref[...],
        dimension_numbers=(((1,), (1,)), ((), ())),
        preferred_element_type=jnp.float32,
        precision=precision,
    ).astype(out_ref.dtype)


# ---------------------------------------------------------------------------
# Tiling heuristics
# ---------------------------------------------------------------------------

def _tile_params():
    """Per-TPU-generation (pixel-tile target rows, scoped-VMEM override bytes)."""
    try:
        kind = jax.devices()[0].device_kind.lower()
    except Exception:
        kind = ""
    if "v5 lite" in kind or "v5e" in kind or "v5litepod" in kind:
        # 2048-row tiles already sit ~85% of the HBM roofline; raise the 16 MiB
        # default scoped limit a bit for triple buffering (128 MiB physical).
        return 2048, 32 << 20
    if "v6" in kind:
        # 128 MiB physical VMEM: 4096-row tiles + triple buffering.
        return 4096, 64 << 20
    if "v7" in kind:
        # 64 MiB physical VMEM: 4096-row tiles, leave headroom below physical.
        return 4096, 48 << 20
    # Unknown / older generations: conservative default, default scoped limit.
    return 2048, None


def _choose_pixel_tile(P, B, target):
    """Pixel tile: multiple of 128 (or the full P), <= target.

    * Prefers a tile that evenly divides P, but never drops below half the
      target while searching (tiny tiles cost 2-3x on the HBM roofline); an
      uneven masked tail block is cheaper than small tiles.
    * When B == 1, caps the tile so the grid has >= 2 steps and both v7x
      TensorCores get work (no effect on single-TC v5e/v6e).
    """
    if B < 2:
        target = min(target, max(128, 128 * pl.cdiv(pl.cdiv(P, 2), 128)))
    if P <= target:
        return P
    target = max(128, (target // 128) * 128)
    floor = max(128, target // 2)
    t = target
    while t >= floor:
        if P % t == 0:
            return t
        t -= 128
    return target            # no nice divisor: accept the masked tail block


# ---------------------------------------------------------------------------
# pallas_call wrapper
# ---------------------------------------------------------------------------

@functools.partial(jax.jit, static_argnames=("transposed_store", "buffers", "precision"))
def _forward_impl(image_embeddings, text_vector, *, transposed_store, buffers, precision):
    B, H, W, C = image_embeddings.shape
    N, _ = text_vector.shape
    out_dtype = image_embeddings.dtype

    # Normalize the tiny text table once, outside the kernel (grid-invariant).
    # NOTE: faithful to PyTorch -- no epsilon, an all-zero row yields inf/nan.
    t = text_vector.astype(jnp.float32)
    t_norm = (t / jnp.linalg.norm(t, axis=-1, keepdims=True)).astype(out_dtype)

    P = H * W
    img3d = image_embeddings.reshape(B, P, C)            # pure reshape, no copy

    target, vmem_limit = _tile_params()
    tp = _choose_pixel_tile(P, B, target)
    grid = (B, pl.cdiv(P, tp))

    itemsize = jnp.dtype(out_dtype).itemsize
    cost = pl.CostEstimate(
        flops=2 * B * P * N * C,
        transcendentals=0,
        bytes_accessed=B * P * C * itemsize + B * N * P * itemsize + N * C * itemsize,
    )

    # Image stream: triple-buffer if requested (compute << DMA per tile).
    img_idx = lambda b, p: (b, p, 0)
    if buffers > 2:
        try:
            img_spec = pl.BlockSpec((None, tp, C), img_idx,
                                    pipeline_mode=pl.Buffered(buffers))
        except TypeError:  # BlockSpec without pipeline_mode support
            img_spec = pl.BlockSpec((None, tp, C), img_idx)
    else:
        img_spec = pl.BlockSpec((None, tp, C), img_idx)

    if transposed_store:
        # Zero-pad the text table to a full 128-lane tile: the MXU spends the
        # same cycles either way (N=8 wastes those lanes regardless) and it
        # keeps the in-kernel result transpose on a native (8,128)-tiled shape.
        n_pad = 128 * pl.cdiv(N, 128)
        txt = jnp.zeros((C, n_pad), out_dtype).at[:, :N].set(t_norm.T)
        txt_spec = pl.BlockSpec((C, n_pad), lambda b, p: (0, 0))
        kernel = functools.partial(_embed_kernel_natural, n_valid=N, precision=precision)
    else:
        txt = t_norm
        txt_spec = pl.BlockSpec((N, C), lambda b, p: (0, 0))
        kernel = functools.partial(_embed_kernel_transposed_contraction,
                                   precision=precision)

    cp_kwargs = dict(dimension_semantics=("parallel", "parallel"))
    if vmem_limit is not None:
        cp_kwargs["vmem_limit_bytes"] = vmem_limit

    out3d = pl.pallas_call(
        kernel,
        out_shape=jax.ShapeDtypeStruct((B, N, P), out_dtype),
        grid_spec=pltpu.PrefetchScalarGridSpec(
            num_scalar_prefetch=0,
            grid=grid,
            in_specs=[txt_spec, img_spec],
            out_specs=pl.BlockSpec((None, N, tp), lambda b, p: (b, 0, p)),
        ),
        compiler_params=pltpu.CompilerParams(**cp_kwargs),
        cost_estimate=cost,
    )(txt, img3d)

    # (B, N, P) -> (B, N, H, W): pure reshape, no HBM transpose pass.
    return out3d.reshape(B, N, H, W)


_PROBED_CONFIG = None   # (transposed_store, buffers) resolved on first call


def optimized_embeddings_forward(image_embeddings, text_vector,
                                 precision=jax.lax.Precision.HIGHEST):
    """image_embeddings: (B, H, W, C); text_vector: (N, C)  ->  (B, N, H, W).

    precision: MXU precision for the projection.  HIGHEST matches the f32
    PyTorch reference; Precision.DEFAULT (or bf16 inputs) keeps the kernel
    purely memory-bound on v7x.
    """
    global _PROBED_CONFIG
    B, H, W, C = image_embeddings.shape
    N, C2 = text_vector.shape
    if C != C2:
        raise ValueError(f"channel dim mismatch: image C={C} vs text C={C2}")

    if _PROBED_CONFIG is None:
        # Preference order: natural-orientation kernel with triple buffering,
        # then natural with default buffering, then the previously-validated
        # transposed-contraction kernel.  The first config that compiles and
        # runs cleanly on this toolchain is cached for all subsequent calls.
        last_err = None
        for cfg in ((True, 3), (True, 2), (False, 3), (False, 2)):
            try:
                out = _forward_impl(image_embeddings, text_vector,
                                    transposed_store=cfg[0], buffers=cfg[1],
                                    precision=precision)
                out = jax.block_until_ready(out)
                _PROBED_CONFIG = cfg
                return out
            except Exception as e:   # Mosaic lowering probe
                last_err = e
        raise last_err
    ts, nb = _PROBED_CONFIG
    return _forward_impl(image_embeddings, text_vector,
                         transposed_store=ts, buffers=nb, precision=precision)


# ---------------------------------------------------------------------------
# Reference + self-test
# ---------------------------------------------------------------------------

def _reference(image_embeddings, text_vector, precision=jax.lax.Precision.HIGHEST):
    t = text_vector / jnp.linalg.norm(text_vector, axis=-1, keepdims=True)
    return jnp.einsum("bhwc,nc->bnhw", image_embeddings, t, precision=precision)


if __name__ == "__main__":
    # Small shapes consistent with the module: the PyTorch forward hardcodes
    # reshape(-1, 512), i.e. embedding_dim == channels == 512.
    B, H, Wd = 2, 16, 16
    n_classes, embedding_dim = 8, 512

    key = jax.random.PRNGKey(0)
    k_img, k_txt = jax.random.split(key)

    # Deterministic synthetic parameter (stands in for torch.manual_seed(100) randn).
    text_vector = jax.random.normal(k_txt, (n_classes, embedding_dim), jnp.float32)
    image_embeddings = jax.random.normal(k_img, (B, H, Wd, embedding_dim), jnp.float32)

    out = optimized_embeddings_forward(image_embeddings, text_vector)
    out = jax.block_until_ready(out)
    assert out.shape == (B, n_classes, H, Wd), out.shape

    # Exact-f32 reference (matches the pinned HIGHEST-precision kernel) plus a
    # bf16-rounded reference in case the toolchain resolves the f32 MXU matmul
    # to a single bf16 pass; either way a structurally wrong kernel fails both.
    ref_hi = _reference(image_embeddings, text_vector)
    t_n = text_vector / jnp.linalg.norm(text_vector, axis=-1, keepdims=True)
    ref_lo = jnp.einsum(
        "bhwc,nc->bnhw",
        image_embeddings.astype(jnp.bfloat16).astype(jnp.float32),
        t_n.astype(jnp.bfloat16).astype(jnp.float32),
        precision=jax.lax.Precision.HIGHEST,
    )
    ok_hi = bool(jnp.allclose(out, ref_hi, atol=1e-4, rtol=1e-4))
    ok_lo = bool(jnp.allclose(out, ref_lo, atol=1e-3, rtol=1e-3))
    assert ok_hi or ok_lo, (
        "mismatch vs reference: max|d_hi|=%e max|d_lo|=%e"
        % (float(jnp.max(jnp.abs(out - ref_hi))), float(jnp.max(jnp.abs(out - ref_lo))))
    )

    print("KERNEL_OK")
</pallas_src>

<mosaic_0001>
module attributes {stable_mosaic.version = 11 : i64} {
  func.func @_embed_kernel_natural(%arg0: i32, %arg1: i32, %arg2: memref<512x128xf32, #tpu.memory_space<vmem>>, %arg3: memref<1x256x512xf32, #tpu.memory_space<vmem>>, %arg4: memref<1x8x256xf32, #tpu.memory_space<vmem>>) attributes {dimension_semantics = [#tpu.dimension_semantics<parallel>, #tpu.dimension_semantics<parallel>], iteration_bounds = array<i64: 2, 1>, scalar_prefetch = 0 : i64, scratch_operands = 0 : i64, tpu.core_type = #tpu.core_type<tc>, window_params = [{pipeline_mode = #tpu.pipeline_mode<synchronous>, transform_indices = @transform_0, window_bounds = array<i64: 512, 128>}, {transform_indices = @transform_1, window_bounds = array<i64: 1, 256, 512>}, {transform_indices = @transform_2, window_bounds = array<i64: 1, 8, 256>}]} {
    %c0 = arith.constant 0 : index
    %c0_0 = arith.constant 0 : index
    %c0_1 = arith.constant 0 : index
    %0 = vector.load %arg3[%c0, %c0_0, %c0_1] : memref<1x256x512xf32, #tpu.memory_space<vmem>>, vector<1x256x512xf32>
    %1 = vector.shape_cast %0 : vector<1x256x512xf32> to vector<256x512xf32>
    %c0_2 = arith.constant 0 : index
    %c0_3 = arith.constant 0 : index
    %2 = vector.load %arg2[%c0_2, %c0_3] : memref<512x128xf32, #tpu.memory_space<vmem>>, vector<512x128xf32>
    %cst = arith.constant dense<0.000000e+00> : vector<256x128xf32>
    %3 = tpu.matmul %1, %2, %cst {dimension_numbers = #tpu.dot_dimension_numbers<[1], [0], [0], [1], [0, 0, 1, 1], [], []>, precision = #tpu.contract_precision<fp32>} : vector<256x512xf32>, vector<512x128xf32>, vector<256x128xf32> -> vector<256x128xf32>
    %4 = tpu.transpose %3, [1, 0] : vector<256x128xf32> -> vector<128x256xf32>
    %5 = vector.extract_strided_slice %4 {offsets = [0, 0], sizes = [8, 256], strides = [1, 1]} : vector<128x256xf32> to vector<8x256xf32>
    %c0_4 = arith.constant 0 : index
    %c0_5 = arith.constant 0 : index
    %c0_6 = arith.constant 0 : index
    %6 = vector.load %arg4[%c0_4, %c0_5, %c0_6] : memref<1x8x256xf32, #tpu.memory_space<vmem>>, vector<1x8x256xf32>
    %7 = vector.shape_cast %6 : vector<1x8x256xf32> to vector<8x256xf32>
    %8 = vector.shape_cast %5 : vector<8x256xf32> to vector<1x8x256xf32>
    tpu.vector_store %arg4[%c0_4, %c0_5, %c0_6], %8 {strides = array<i32>} : memref<1x8x256xf32, #tpu.memory_space<vmem>>, vector<1x8x256xf32>,
    return
  }
  func.func @transform_0(%arg0: i32, %arg1: i32) -> (i32, i32) {
    %c0_i32 = arith.constant 0 : i32
    %c0_i32_0 = arith.constant 0 : i32
    %c0_i32_1 = arith.constant 0 : i32
    return %c0_i32, %c0_i32_0 : i32, i32
  }
  func.func @transform_1(%arg0: i32, %arg1: i32) -> (i32, i32, i32) {
    %c0_i32 = arith.constant 0 : i32
    %c0_i32_0 = arith.constant 0 : i32
    return %arg0, %arg1, %c0_i32 : i32, i32, i32
  }
  func.func @transform_2(%arg0: i32, %arg1: i32) -> (i32, i32, i32) {
    %c0_i32 = arith.constant 0 : i32
    %c0_i32_0 = arith.constant 0 : i32
    return %arg0, %c0_i32, %arg1 : i32, i32, i32
  }
}

module attributes {stable_mosaic.version = 11 : i64} {
  func.func @_embed_kernel_transposed_contraction(%arg0: i32, %arg1: i32, %arg2: memref<8x512xf32, #tpu.memory_space<vmem>>, %arg3: memref<1x256x512xf32, #tpu.memory_space<vmem>>, %arg4: memref<1x8x256xf32, #tpu.memory_space<vmem>>) attributes {dimension_semantics = [#tpu.dimension_semantics<parallel>, #tpu.dimension_semantics<parallel>], iteration_bounds = array<i64: 2, 1>, scalar_prefetch = 0 : i64, scratch_operands = 0 : i64, tpu.core_type = #tpu.core_type<tc>, window_params = [{pipeline_mode = #tpu.pipeline_mode<synchronous>, transform_indices = @transform_0, window_bounds = array<i64: 8, 512>}, {transform_indices = @transform_1, window_bounds = array<i64: 1, 256, 512>}, {transform_indices = @transform_2, window_bounds = array<i64: 1, 8, 256>}]} {
    %c0 = arith.constant 0 : index
    %c0_0 = arith.constant 0 : index
    %0 = vector.load %arg2[%c0, %c0_0] : memref<8x512xf32, #tpu.memory_space<vmem>>, vector<8x512xf32>
    %c0_1 = arith.constant 0 : index
    %c0_2 = arith.constant 0 : index
    %c0_3 = arith.constant 0 : index
    %1 = vector.load %arg3[%c0_1, %c0_2, %c0_3] : memref<1x256x512xf32, #tpu.memory_space<vmem>>, vector<1x256x512xf32>
    %2 = vector.shape_cast %1 : vector<1x256x512xf32> to vector<256x512xf32>
    %cst = arith.constant dense<0.000000e+00> : vector<8x256xf32>
    %3 = tpu.matmul %0, %2, %cst {dimension_numbers = #tpu.dot_dimension_numbers<[1], [1], [0], [0], [0, 0, 1, 0], [], []>, precision = #tpu.contract_precision<fp32>} : vector<8x512xf32>, vector<256x512xf32>, vector<8x256xf32> -> vector<8x256xf32>
    %c0_4 = arith.constant 0 : index
    %c0_5 = arith.constant 0 : index
    %c0_6 = arith.constant 0 : index
    %4 = vector.load %arg4[%c0_4, %c0_5, %c0_6] : memref<1x8x256xf32, #tpu.memory_space<vmem>>, vector<1x8x256xf32>
    %5 = vector.shape_cast %4 : vector<1x8x256xf32> to vector<8x256xf32>
    %6 = vector.shape_cast %3 : vector<8x256xf32> to vector<1x8x256xf32>
    tpu.vector_store %arg4[%c0_4, %c0_5, %c0_6], %6 {strides = array<i32>} : memref<1x8x256xf32, #tpu.memory_space<vmem>>, vector<1x8x256xf32>,
    return
  }
  func.func @transform_0(%arg0: i32, %arg1: i32) -> (i32, i32) {
    %c0_i32 = arith.constant 0 : i32
    %c0_i32_0 = arith.constant 0 : i32
    %c0_i32_1 = arith.constant 0 : i32
    return %c0_i32, %c0_i32_0 : i32, i32
  }
  func.func @transform_1(%arg0: i32, %arg1: i32) -> (i32, i32, i32) {
    %c0_i32 = arith.constant 0 : i32
    %c0_i32_0 = arith.constant 0 : i32
    return %arg0, %arg1, %c0_i32 : i32, i32, i32
  }
  func.func @transform_2(%arg0: i32, %arg1: i32) -> (i32, i32, i32) {
    %c0_i32 = arith.constant 0 : i32
    %c0_i32_0 = arith.constant 0 : i32
    return %arg0, %c0_i32, %arg1 : i32, i32, i32
  }
}

</mosaic_0001>

<bundles_post_ra>
// kernel: _forward_impl.1
= control target key start
LH: loop header
LB: loop body
LE: loop exit
PB: predicated region body
PF: predicated region fallthrough
CT: control target
= control target key end

     0   :  { %7 = vsyncpa [#allocation3], 0  ;;  %s10557_s0 = inlined_call_operand.vmem [shape: f32[512,128], index: 0, kind: input, shape index: {}]   ;;  %s10558_s1 = inlined_call_operand.hbm [shape: f32[2,256,512], index: 1, kind: input, shape index: {}]   ;;  %s10559_s2 = inlined_call_operand.vmem [shape: f32[2,8,256], index: 2, kind: output, shape index: {}]  }
   0x1   :  { %9 = vsyncpa [#allocation3 + $0x1], 0  ;;  %s7164_s9 = smov 0   ;;  %s7166_s10 = smov 0  }
   0x2   :  { %s7168_s11 = smov 0   ;;  %s7170_s12 = smov 0  }
   0x3   :  { %s7172_s13 = smov 0   ;;  %s7174_s14 = smov 0  }
   0x4 LB: > { %s5742_s15 = sadd.s32 4294967295, %s7143_s14   ;;  %s27_s16 = sadd.s32 1, %s7139_s13  ;;  %s7143_s14 = sphi %s7174_s14, %s15_s14   ;;  %s7139_s13 = sphi %s7172_s13, %s12670_s13   ;;  %s7135_s12 = sphi %s7170_s12, %s12669_s12   ;;  %s7131_s11 = sphi %s7168_s11, %s12668_s11   ;;  %s7127_s10 = sphi %s7166_s10, %s12667_s10   ;;  %s7123_s9 = sphi %s7164_s9, %s12666_s9  }
   0x5   : > { %p29_p0 = scmp.ge.s32.totalorder %s27_s16, 2  ;;  %s57_s17 = sadd.s32 1, %s7131_s11 }
   0x6   : > { %p64_p1 = scmp.ne.s32.totalorder %s7131_s11, %s7127_s10  ;;  %p65_p2 = scmp.eq.s32.totalorder %s7143_s14, 0 }
   0x7   : > { %s12672_s16 = smov (%p29_p0, %s27_s16), 0  ;;  %p70_p4 = scmp.ne.s32.totalorder %s7127_s10, %s7123_s9 }
   0x8   : > { %p7200_p3 = por %p65_p2, %p64_p1  ;;  %s52_s19 = ssub.s32 %s7139_s13, %s12672_s16 }
   0x9   : > { %p71_p5 = scmp.eq.s32.totalorder %s5742_s15, 0  ;;  %p55_p6 = scmp.eq.s32.totalorder %s52_s19, 0 }
   0xa   : > { %p7011_p8 = scmp.lt.s32.totalorder %s7143_s14, 2  ;;  %s125_s22 = sand.u32 1, %s7131_s11  }
   0xb   : > { %p7207_p7 = por %p71_p5, %p70_p4  ;;  %s5755_s23 = sshll.u32 %s7139_s13, 14 }
   0xc   : > { %s7213_s21 = scalar_select %p55_p6, %s7131_s11, %s57_s17  }
   0xd   : > { %s5746_s24 = sshll.u32 %s125_s22, 10  ;;  %s7220_s27 = scalar_lea.hbm %s10558_s1, %s5755_s23 }
   0xe   : > { %s129_s28 = scalar_lea.vmem [#allocation2], %s5746_s24  ;;  %p7224_p9 = pnand %p7011_p8, %p7200_p3 }
   0xf   : > { %s139_s29 = sshll.u32 %s129_s28, 4  ;;  %s7230_s3 = scalar_lea.sflag [#allocation3], %s125_s22  ;;  %s7228_s29 = int_to_ptr.vmem [resolvable:$true] %s139_s29 }
  0x10   : > { %s7063_s4 = scalar_lea.hbm %s7220_s27, 16384  ;;  %p7065_p11 = pneg %p7224_p9 }
  0x11   : > { %p7064_p10 = scmp.ne.s32.totalorder %s7220_s27, %s7063_s4  ;;  %s7068_s7 = scalar_lea.hbm %s10558_s1, 32768 }
  0x12   : > { %p7069_p0 = scmp.lt.u32.totalorder %s7220_s27, %s10558_s1  ;;  %p7070_p1 = scmp.lt.u32.totalorder %s7068_s7, %s7063_s4 }
  0x13   : > { %p7066_p12 = pnand %p7065_p11, %p7064_p10  ;;  %p7072_p3 = scmp.lt.u32.totalorder %s7063_s4, %s7220_s27 }
  0x14   : > { %p7071_p2 = por %p7070_p1, %p7069_p0 }
  0x15   : > { %p7067_p13 = pneg %p7066_p12 }
  0x16   : > { %p7073_p4 = por %p7072_p3, %p7071_p2 }
  0x18   : > { %p7074_p5 = pnand %p7073_p4, %p7067_p13 }
  0x1a   : > { %7077 = shalt.err (!%p7074_p5)
}
  0x1b   : > { %s7078_s15 = scalar_lea.vmem %s7228_s29, 16384  ;;  %s7145_s17 = smov [#allocation2]  }
  0x1c   : > { %p7079_p6 = scmp.ne.s32.totalorder %s7228_s29, %s7078_s15  ;;  %s7083_s18 = sshll.u32 %s7145_s17, 4  ;;  %s7084_s18 = int_to_ptr.vmem [resolvable:$false] %s7083_s18 }
  0x1d   : > { %s7085_s19 = scalar_lea.vmem %s7084_s18, 32768  ;;  %p7086_p12 = scmp.lt.s32.totalorder %s7228_s29, %s7084_s18 }
  0x1e   : > { %p7081_p8 = pnand %p7079_p6, %p7065_p11  ;;  %p7087_p0 = scmp.lt.s32.totalorder %s7085_s19, %s7078_s15 }
  0x20   : > { %p7082_p10 = pneg %p7081_p8  ;;  %p7088_p1 = por %p7087_p0, %p7086_p12 }
  0x22   : > { %p7089_p2 = pnand %p7088_p1, %p7082_p10 }
  0x24   : > { %7092 = shalt.err (!%p7089_p2)
}
  0x25   : > { %s7146_s22 = smov 512   ;;  %s7147_s23 = smov 32  }
  0x26   : > { %7010 = dma.hbm_to_vmem [thread:$0]  (!%p7224_p9), %s7220_s27, 16384, %s7228_s29, %s7230_s3, %s7146_s22, %s7146_s22, %s7147_s23  }
  0x27   : > { %p5749_p11 = scmp.ge.s32.totalorder %s7143_s14, 1  ;;  %p147_p13 = scmp.lt.s32.totalorder %s7143_s14, 3 }
  0x29   : > { %p148_p3 = pnand %p5749_p11, %p147_p13 }
  0x2b   : > { %151 = sbr.rel (%p148_p3) target bundleno = 1248 (0x4e0), region = 28 }
  0x32   : > { %s153_s24 = sand.u32 1, %s7127_s10  }
  0x33   : > { %s5750_s25 = sshll.u32 %s153_s24, 10  ;;  %s154_s26 = scalar_lea.sflag [#allocation3], %s153_s24 }
  0x34   : > { %s7261_s28 = scalar_lea.vmem [#allocation2], %s5750_s25 }
  0x35   : > { %7118 = dma.done.wait (%p7207_p7), %s154_s26, 16384  }
  0x36   : > { %7120 = vsyncadd (%p7207_p7), %s154_s26, 4294950912  ;;  %v10560_v0 = vmov 0.0|0.0   ;;  %v321_v1 = vld [vmem:[%s10557_s0] sm:$0xff]  ;;  %v322_v2 = vld [vmem:[%s10557_s0 + $0x8] sm:$0xff]  ;;  %p184_p7 = scmp.lt.s32.totalorder %s7135_s12, 1 }
  0x37   : > { %5757 = vmatprep.subr.bf16.mxu1 %v10560_v0  ;;  %6045 = vmatprep.subr.bf16.mxu0 %v10560_v0  ;;  %v353_v3 = vld [vmem:[%s10557_s0 + $0x100] sm:$0xff]  ;;  %v386_v4 = vand.u32 4294901760, %v321_v1  ;;  %v389_v5 = vand.u32 4294901760, %v322_v2  ;;  %v354_v6 = vld [vmem:[%s10557_s0 + $0x108] sm:$0xff]  ;;  %v323_v8 = vld [vmem:[%s10557_s0 + $0x10] sm:$0xff] }
  0x38   : > { %v2984_v7 = vand.u32 4294901760, %v353_v3  ;;  %v324_v9 = vld [vmem:[%s10557_s0 + $0x18] sm:$0xff]  ;;  %v2987_v10 = vand.u32 4294901760, %v354_v6  ;;  %v392_v11 = vand.u32 4294901760, %v323_v8  ;;  %v355_v13 = vld [vmem:[%s10557_s0 + $0x110] sm:$0xff]  ;;  %v325_v15 = vld [vmem:[%s10557_s0 + $0x20] sm:$0xff] }
  0x39   : > { %v395_v12 = vand.u32 4294901760, %v324_v9  ;;  %v356_v14 = vld [vmem:[%s10557_s0 + $0x118] sm:$0xff]  ;;  %v7296_v16 = vpack.c.bf16 %v389_v5, %v386_v4  ;;  %v7298_v17 = vsub.f32 %v321_v1, %v386_v4  ;;  %v7300_v18 = vsub.f32 %v322_v2, %v389_v5  ;;  %v326_v20 = vld [vmem:[%s10557_s0 + $0x28] sm:$0xff]  ;;  %v357_v21 = vld [vmem:[%s10557_s0 + $0x120] sm:$0xff]  ;;  %s12674_s12 = smov (!%p184_p7, %s7135_s12), 1 }
  0x3a   : > { %v7302_v19 = vsub.f32 %v353_v3, %v2984_v7  ;;  %v358_v22 = vld [vmem:[%s10557_s0 + $0x128] sm:$0xff]  ;;  %v7313_v23 = vpack.c.bf16 %v2987_v10, %v2984_v7  ;;  %v7315_v24 = vsub.f32 %v354_v6, %v2987_v10  ;;  %v7319_v26 = vsub.f32 %v323_v8, %v392_v11  ;;  %v327_v27 = vld [vmem:[%s10557_s0 + $0x30] sm:$0xff]  ;;  %v328_v32 = vld [vmem:[%s10557_s0 + $0x38] sm:$0xff] }
  0x3b   : > { %11369 = vst [vmem:[#allocation5_spill] sm:$0xff] %v7296_v16  ;;  %11370 = vst [vmem:[#allocation6_spill] sm:$0xff] %v7298_v17  ;;  %v7317_v25 = vpack.c.bf16 %v395_v12, %v392_v11  ;;  %5759 = vmatpush1.bf16.msra.mxu1 %v7296_v16  ;;  %v7325_v28 = vsub.f32 %v324_v9, %v395_v12  ;;  %v2990_v29 = vand.u32 4294901760, %v355_v13  ;;  %v2993_v30 = vand.u32 4294901760, %v356_v14  ;;  %v359_v37 = vld [vmem:[%s10557_s0 + $0x130] sm:$0xff]  ;;  %v360_v38 = vld [vmem:[%s10557_s0 + $0x138] sm:$0xff] }
  0x3c   : > { %11371 = vst [vmem:[#allocation7_spill] sm:$0xff] %v7300_v18  ;;  %11372 = vst [vmem:[#allocation8_spill] sm:$0xff] %v7302_v19  ;;  %v398_v31 = vand.u32 4294901760, %v325_v15  ;;  %6047 = vmatpush1.bf16.msra.mxu0 %v7313_v23  ;;  %5760 = vmatprep.subr.bf16.mxu1 %v10560_v0  ;;  %v401_v33 = vand.u32 4294901760, %v326_v20  ;;  %v2996_v34 = vand.u32 4294901760, %v357_v21  ;;  %v2999_v35 = vand.u32 4294901760, %v358_v22 }
  0x3d   : > { %11373 = vst [vmem:[#allocation9_spill] sm:$0xff] %v7313_v23  ;;  %11374 = vst [vmem:[#allocation10_spill] sm:$0xff] %v7315_v24  ;;  %v404_v36 = vand.u32 4294901760, %v327_v27  ;;  %6048 = vmatprep.subr.bf16.mxu0 %v10560_v0  ;;  %v7339_v39 = vpack.c.bf16 %v2993_v30, %v2990_v29  ;;  %v7341_v40 = vsub.f32 %v355_v13, %v2990_v29  ;;  %v329_v43 = vld [vmem:[%s10557_s0 + $0x40] sm:$0xff]  ;;  %v330_v44 = vld [vmem:[%s10557_s0 + $0x48] sm:$0xff]  ;;  %v407_v52 = vand.u32 4294901760, %v328_v32 }
  0x3e   : > { %11375 = vst [vmem:[#allocation11_spill] sm:$0xff] %v7317_v25  ;;  %11376 = vst [vmem:[#allocation12_spill] sm:$0xff] %v7319_v26  ;;  %v7343_v41 = vsub.f32 %v356_v14, %v2993_v30  ;;  %v7345_v42 = vsub.f32 %v325_v15, %v398_v31  ;;  %v361_v45 = vld [vmem:[%s10557_s0 + $0x140] sm:$0xff]  ;;  %v7356_v46 = vpack.c.bf16 %v401_v33, %v398_v31  ;;  %v362_v50 = vld [vmem:[%s10557_s0 + $0x148] sm:$0xff]  ;;  %v3002_v54 = vand.u32 4294901760, %v359_v37 }
  0x3f   : > { %11377 = vst [vmem:[#allocation13_spill] sm:$0xff] %v7325_v28  ;;  %11378 = vst [vmem:[#allocation14_spill] sm:$0xff] %v7339_v39  ;;  %v7358_v47 = vsub.f32 %v326_v20, %v401_v33  ;;  %v7360_v48 = vpack.c.bf16 %v2999_v35, %v2996_v34  ;;  %v7362_v49 = vsub.f32 %v357_v21, %v2996_v34  ;;  %5762 = vmatpush1.bf16.msra.mxu1 %v7317_v25  ;;  %v331_v59 = vld [vmem:[%s10557_s0 + $0x50] sm:$0xff]  ;;  %v332_v60 = vld [vmem:[%s10557_s0 + $0x58] sm:$0xff] }
  0x40   : > { %11379 = vst [vmem:[#allocation15_spill] sm:$0xff] %v7341_v40  ;;  %11380 = vst [vmem:[#allocation16_spill] sm:$0xff] %v7356_v46  ;;  %v7368_v51 = vsub.f32 %v358_v22, %v2999_v35  ;;  %v7370_v53 = vsub.f32 %v327_v27, %v404_v36  ;;  %6050 = vmatpush1.bf16.msra.mxu0 %v7339_v39  ;;  %5763 = vmatprep.subr.bf16.mxu1 %v10560_v0  ;;  %v3005_v55 = vand.u32 4294901760, %v360_v38  ;;  %v363_v2 = vld [vmem:[%s10557_s0 + $0x150] sm:$0xff]  ;;  %v364_v3 = vld [vmem:[%s10557_s0 + $0x158] sm:$0xff] }
  0x41   : > { %11381 = vst [vmem:[#allocation17_spill] sm:$0xff] %v7360_v48  ;;  %v410_v56 = vand.u32 4294901760, %v329_v43  ;;  %v413_v57 = vand.u32 4294901760, %v330_v44  ;;  %v3008_v58 = vand.u32 4294901760, %v361_v45  ;;  %6051 = vmatprep.subr.bf16.mxu0 %v10560_v0  ;;  %v7381_v61 = vpack.c.bf16 %v407_v52, %v404_v36  ;;  %v333_v4 = vld [vmem:[%s10557_s0 + $0x60] sm:$0xff]  ;;  %v334_v9 = vld [vmem:[%s10557_s0 + $0x68] sm:$0xff] }
  0x42   : > { %v7383_v62 = vsub.f32 %v328_v32, %v407_v52  ;;  %v7385_v63 = vsub.f32 %v359_v37, %v3002_v54  ;;  %v3011_v1 = vand.u32 4294901760, %v362_v50  ;;  %v7396_v5 = vpack.c.bf16 %v3005_v55, %v3002_v54  ;;  %v365_v10 = vld [vmem:[%s10557_s0 + $0x160] sm:$0xff]  ;;  %v366_v11 = vld [vmem:[%s10557_s0 + $0x168] sm:$0xff]  ;;  %v335_v33 = vld [vmem:[%s10557_s0 + $0x70] sm:$0xff] }
  0x43   : > { %11382 = vst [vmem:[#allocation18_spill] sm:$0xff] %v7381_v61  ;;  %v7398_v6 = vsub.f32 %v360_v38, %v3005_v55  ;;  %v7400_v7 = vpack.c.bf16 %v413_v57, %v410_v56  ;;  %v7402_v8 = vsub.f32 %v329_v43, %v410_v56  ;;  %5765 = vmatpush1.bf16.msra.mxu1 %v7356_v46  ;;  %v416_v20 = vand.u32 4294901760, %v331_v59  ;;  %v336_v38 = vld [vmem:[%s10557_s0 + $0x78] sm:$0xff]  ;;  %v367_v43 = vld [vmem:[%s10557_s0 + $0x170] sm:$0xff]  ;;  %v337_v55 = vld [vmem:[%s10557_s0 + $0x80] sm:$0xff] }
  0x44   : > { %11383 = vst [vmem:[#allocation19_spill] sm:$0xff] %v7396_v5  ;;  %v7414_v12 = vsub.f32 %v330_v44, %v413_v57  ;;  %v7416_v13 = vpack.c.bf16 %v3011_v1, %v3008_v58  ;;  %v7418_v14 = vsub.f32 %v361_v45, %v3008_v58  ;;  %v7420_v15 = vsub.f32 %v362_v50, %v3011_v1  ;;  %v368_v44 = vld [vmem:[%s10557_s0 + $0x178] sm:$0xff]  ;;  %v338_v56 = vld [vmem:[%s10557_s0 + $0x88] sm:$0xff]  ;;  %v369_v57 = vld [vmem:[%s10557_s0 + $0x180] sm:$0xff] }
  0x45   : > { %11384 = vst [vmem:[#allocation20_spill] sm:$0xff] %v7400_v7  ;;  %6053 = vmatpush1.bf16.msra.mxu0 %v7360_v48  ;;  %5766 = vmatprep.subr.bf16.mxu1 %v10560_v0  ;;  %v419_v21 = vand.u32 4294901760, %v332_v60  ;;  %v3014_v22 = vand.u32 4294901760, %v363_v2  ;;  %v3017_v27 = vand.u32 4294901760, %v364_v3  ;;  %v422_v29 = vand.u32 4294901760, %v333_v4  ;;  %v373_v25 = vld [vmem:[%s10557_s0 + $0x1a0] sm:$0xff] }
  0x46   : > { %11385 = vst [vmem:[#allocation21_spill] sm:$0xff] %v7416_v13  ;;  %6054 = vmatprep.subr.bf16.mxu0 %v10560_v0  ;;  %v425_v30 = vand.u32 4294901760, %v334_v9  ;;  %v3020_v31 = vand.u32 4294901760, %v365_v10  ;;  %v3023_v32 = vand.u32 4294901760, %v366_v11  ;;  %v7430_v35 = vsub.f32 %v331_v59, %v416_v20  ;;  %v344_v23 = vld [vmem:[%s10557_s0 + $0xb8] sm:$0xff]  ;;  %v375_v16 = vld [vmem:[%s10557_s0 + $0x1b0] sm:$0xff] }
  0x47   : > { %v7428_v34 = vpack.c.bf16 %v419_v21, %v416_v20  ;;  %v7432_v36 = vsub.f32 %v332_v60, %v419_v21  ;;  %v7434_v37 = vpack.c.bf16 %v3017_v27, %v3014_v22  ;;  %5768 = vmatpush1.bf16.msra.mxu1 %v7381_v61  ;;  %v7446_v45 = vsub.f32 %v363_v2, %v3014_v22  ;;  %v370_v21 = vld [vmem:[%s10557_s0 + $0x188] sm:$0xff] }
  0x48   : > { %v7448_v50 = vsub.f32 %v364_v3, %v3017_v27  ;;  %v7450_v52 = vpack.c.bf16 %v425_v30, %v422_v29  ;;  %v7452_v54 = vsub.f32 %v333_v4, %v422_v29  ;;  %5769 = vmatprep.subr.bf16.mxu1 %v10560_v0  ;;  %v7465_v58 = vsub.f32 %v334_v9, %v425_v30 }
  0x49   : > { %11386 = vst [vmem:[#allocation22_spill] sm:$0xff] %v7428_v34  ;;  %11387 = vst [vmem:[#allocation23_spill] sm:$0xff] %v7434_v37  ;;  %6056 = vmatpush1.bf16.msra.mxu0 %v7396_v5  ;;  %v7467_v59 = vpack.c.bf16 %v3023_v32, %v3020_v31  ;;  %v7469_v60 = vsub.f32 %v365_v10, %v3020_v31  ;;  %v428_v1 = vand.u32 4294901760, %v335_v33  ;;  %v431_v3 = vand.u32 4294901760, %v336_v38  ;;  %v339_v10 = vld [vmem:[%s10557_s0 + $0x90] sm:$0xff]  ;;  %v372_v5 = vld [vmem:[%s10557_s0 + $0x198] sm:$0xff] }
  0x4a   : > { %11388 = vst [vmem:[#allocation24_spill] sm:$0xff] %v7448_v50  ;;  %11389 = vst [vmem:[#allocation25_spill] sm:$0xff] %v7450_v52  ;;  %6057 = vmatprep.subr.bf16.mxu0 %v10560_v0  ;;  %v7472_v2 = vsub.f32 %v366_v11, %v3023_v32  ;;  %v3026_v4 = vand.u32 4294901760, %v367_v43  ;;  %v3029_v20 = vand.u32 4294901760, %v368_v44  ;;  %v434_v9 = vand.u32 4294901760, %v337_v55  ;;  %v340_v11 = vld [vmem:[%s10557_s0 + $0x98] sm:$0xff] }
  0x4b   : > { %11390 = vst [vmem:[#allocation26_spill] sm:$0xff] %v7452_v54  ;;  %11391 = vst [vmem:[#allocation27_spill] sm:$0xff] %v7465_v58  ;;  %v7477_v22 = vsub.f32 %v335_v33, %v428_v1  ;;  %v437_v27 = vand.u32 4294901760, %v338_v56  ;;  %v3032_v29 = vand.u32 4294901760, %v369_v57  ;;  %5771 = vmatpush1.bf16.msra.mxu1 %v7400_v7  ;;  %v7486_v30 = vpack.c.bf16 %v431_v3, %v428_v1  ;;  %v371_v0 = vld [vmem:[%s10557_s0 + $0x190] sm:$0xff] }
  0x4c   : > { %11392 = vst [vmem:[#allocation28_spill] sm:$0xff] %v7467_v59  ;;  %11393 = vst [vmem:[#allocation29_spill] sm:$0xff] %v7469_v60  ;;  %v7488_v31 = vsub.f32 %v336_v38, %v431_v3  ;;  %v7490_v32 = vpack.c.bf16 %v3029_v20, %v3026_v4  ;;  %v7492_v33 = vsub.f32 %v367_v43, %v3026_v4  ;;  %v11400_v61 = vmov 0.0|0.0   ;;  %v341_v4 = vld [vmem:[%s10557_s0 + $0xa0] sm:$0xff] }
  0x4d   : > { %11394 = vst [vmem:[#allocation30_spill] sm:$0xff] %v7472_v2  ;;  %11395 = vst [vmem:[#allocation31_spill] sm:$0xff] %v7477_v22  ;;  %6059 = vmatpush1.bf16.msra.mxu0 %v7416_v13  ;;  %5772 = vmatprep.subr.bf16.mxu1 %v11400_v61  ;;  %v7502_v1 = vsub.f32 %v368_v44, %v3029_v20  ;;  %v7504_v38 = vpack.c.bf16 %v437_v27, %v434_v9  ;;  %v3035_v43 = vand.u32 4294901760, %v370_v21  ;;  %v342_v44 = vld [vmem:[%s10557_s0 + $0xa8] sm:$0xff] }
  0x4e   : > { %11396 = vst [vmem:[#allocation32_spill] sm:$0xff] %v7486_v30  ;;  %11397 = vst [vmem:[#allocation33_spill] sm:$0xff] %v7488_v31  ;;  %v7506_v3 = vsub.f32 %v337_v55, %v434_v9  ;;  %6060 = vmatprep.subr.bf16.mxu0 %v11400_v61  ;;  %v7512_v7 = vsub.f32 %v338_v56, %v437_v27  ;;  %v7514_v48 = vsub.f32 %v369_v57, %v3032_v29  ;;  %v374_v56 = vld [vmem:[%s10557_s0 + $0x1a8] sm:$0xff]  ;;  %v343_v57 = vld [vmem:[%s10557_s0 + $0xb0] sm:$0xff] }
  0x4f   : > { %11398 = vst [vmem:[#allocation34_spill] sm:$0xff] %v7490_v32  ;;  %11399 = vst [vmem:[#allocation35_spill] sm:$0xff] %v7492_v33  ;;  %v440_v13 = vand.u32 4294901760, %v339_v10  ;;  %v443_v46 = vand.u32 4294901760, %v340_v11  ;;  %v7519_v20 = vpack.c.bf16 %v3035_v43, %v3032_v29  ;;  %v7521_v55 = vsub.f32 %v370_v21, %v3035_v43  ;;  %5774 = vmatpush1.bf16.msra.mxu1 %v7428_v34 }
  0x50   : > { %11401 = vst [vmem:[#allocation36_spill] sm:$0xff] %v7502_v1  ;;  %11402 = vst [vmem:[#allocation37_spill] sm:$0xff] %v7504_v38  ;;  %v3038_v9 = vand.u32 4294901760, %v371_v0  ;;  %v3041_v39 = vand.u32 4294901760, %v372_v5  ;;  %v446_v43 = vand.u32 4294901760, %v341_v4  ;;  %5775 = vmatprep.subr.bf16.mxu1 %v11400_v61 }
  0x51   : > { %11403 = vst [vmem:[#allocation38_spill] sm:$0xff] %v7506_v3  ;;  %11404 = vst [vmem:[#allocation39_spill] sm:$0xff] %v7512_v7  ;;  %v7533_v27 = vpack.c.bf16 %v443_v46, %v440_v13  ;;  %v7535_v21 = vsub.f32 %v339_v10, %v440_v13  ;;  %v7537_v29 = vsub.f32 %v340_v11, %v443_v46  ;;  %6062 = vmatpush1.bf16.msra.mxu0 %v7434_v37  ;;  %v376_v37 = vld [vmem:[%s10557_s0 + $0x1b8] sm:$0xff] }
  0x52   : > { %11405 = vst [vmem:[#allocation40_spill] sm:$0xff] %v7514_v48  ;;  %11406 = vst [vmem:[#allocation41_spill] sm:$0xff] %v7519_v20  ;;  %v7547_v34 = vpack.c.bf16 %v3041_v39, %v3038_v9  ;;  %v7551_v13 = vsub.f32 %v372_v5, %v3041_v39  ;;  %v449_v46 = vand.u32 4294901760, %v342_v44  ;;  %6063 = vmatprep.subr.bf16.mxu0 %v11400_v61  ;;  %v3044_v11 = vand.u32 4294901760, %v373_v25  ;;  %v345_v48 = vld [vmem:[%s10557_s0 + $0xc0] sm:$0xff]  ;;  %v348_v7 = vld [vmem:[%s10557_s0 + $0xd8] sm:$0xff] }
  0x53   : > { %11407 = vst [vmem:[#allocation42_spill] sm:$0xff] %v7521_v55  ;;  %11408 = vst [vmem:[#allocation43_spill] sm:$0xff] %v7533_v27  ;;  %v7549_v55 = vsub.f32 %v371_v0, %v3038_v9  ;;  %v7554_v10 = vsub.f32 %v341_v4, %v446_v43  ;;  %v455_v5 = vand.u32 4294901760, %v344_v23  ;;  %v3050_v9 = vand.u32 4294901760, %v375_v16  ;;  %v346_v4 = vld [vmem:[%s10557_s0 + $0xc8] sm:$0xff]  ;;  %5777 = vmatpush1.bf16.msra.mxu1 %v7450_v52 }
  0x54   : > { %11409 = vst [vmem:[#allocation44_spill] sm:$0xff] %v7535_v21  ;;  %11410 = vst [vmem:[#allocation45_spill] sm:$0xff] %v7537_v29  ;;  %v3047_v29 = vand.u32 4294901760, %v374_v56  ;;  %v452_v21 = vand.u32 4294901760, %v343_v57  ;;  %v7562_v0 = vpack.c.bf16 %v449_v46, %v446_v43  ;;  %v7564_v39 = vsub.f32 %v342_v44, %v449_v46  ;;  %5778 = vmatprep.subr.bf16.mxu1 %v11400_v61 }
  0x55   : > { %11411 = vst [vmem:[#allocation46_spill] sm:$0xff] %v7547_v34  ;;  %11412 = vst [vmem:[#allocation47_spill] sm:$0xff] %v7549_v55  ;;  %v7578_v44 = vsub.f32 %v373_v25, %v3044_v11  ;;  %v347_v55 = vld [vmem:[%s10557_s0 + $0xd0] sm:$0xff]  ;;  %6065 = vmatpush1.bf16.msra.mxu0 %v7467_v59  ;;  %v7594_v25 = vsub.f32 %v344_v23, %v455_v5  ;;  %v467_v23 = vand.u32 4294901760, %v348_v7 }
  0x56   : > { %11413 = vst [vmem:[#allocation48_spill] sm:$0xff] %v7551_v13  ;;  %11414 = vst [vmem:[#allocation49_spill] sm:$0xff] %v7554_v10  ;;  %v377_v10 = vld [vmem:[%s10557_s0 + $0x1c0] sm:$0xff]  ;;  %v378_v13 = vld [vmem:[%s10557_s0 + $0x1c8] sm:$0xff]  ;;  %v7576_v43 = vpack.c.bf16 %v3047_v29, %v3044_v11  ;;  %v7580_v46 = vsub.f32 %v374_v56, %v3047_v29  ;;  %v7592_v52 = vpack.c.bf16 %v455_v5, %v452_v21  ;;  %v3053_v56 = vand.u32 4294901760, %v376_v37 }
  0x57   : > { %11415 = vst [vmem:[#allocation50_spill] sm:$0xff] %v7562_v0  ;;  %11416 = vst [vmem:[#allocation51_spill] sm:$0xff] %v7564_v39  ;;  %v7582_v39 = vsub.f32 %v343_v57, %v452_v21  ;;  %v7596_v29 = vsub.f32 %v375_v16, %v3050_v9  ;;  %6066 = vmatprep.subr.bf16.mxu0 %v11400_v61  ;;  %v458_v57 = vand.u32 4294901760, %v345_v48  ;;  %v461_v11 = vand.u32 4294901760, %v346_v4  ;;  %v380_v16 = vld [vmem:[%s10557_s0 + $0x1d8] sm:$0xff]  ;;  %v349_v5 = vld [vmem:[%s10557_s0 + $0xe0] sm:$0xff] }
  0x58   : > { %11417 = vst [vmem:[#allocation52_spill] sm:$0xff] %v7576_v43  ;;  %11418 = vst [vmem:[#allocation53_spill] sm:$0xff] %v7578_v44  ;;  %v379_v44 = vld [vmem:[%s10557_s0 + $0x1d0] sm:$0xff]  ;;  %v7602_v59 = vpack.c.bf16 %v3053_v56, %v3050_v9  ;;  %v7604_v3 = vsub.f32 %v376_v37, %v3053_v56  ;;  %v464_v21 = vand.u32 4294901760, %v347_v55  ;;  %5780 = vmatpush1.bf16.msra.mxu1 %v7486_v30  ;;  %v350_v56 = vld [vmem:[%s10557_s0 + $0xe8] sm:$0xff]  ;;  %v470_v33 = vand.u32 4294901760, %v349_v5 }
  0x59   : > { %11419 = vst [vmem:[#allocation54_spill] sm:$0xff] %v7580_v46  ;;  %11420 = vst [vmem:[#allocation55_spill] sm:$0xff] %v7582_v39  ;;  %v3056_v39 = vand.u32 4294901760, %v377_v10  ;;  %v3059_v46 = vand.u32 4294901760, %v378_v13  ;;  %v7617_v9 = vsub.f32 %v346_v4, %v461_v11  ;;  %v382_v30 = vld [vmem:[%s10557_s0 + $0x1e8] sm:$0xff]  ;;  %6068 = vmatpush1.bf16.msra.mxu0 %v7490_v32  ;;  %5781 = vmatprep.subr.bf16.mxu1 %v11400_v61  ;;  %v3065_v32 = vand.u32 4294901760, %v380_v16 }
  0x5a   : > { %11421 = vst [vmem:[#allocation56_spill] sm:$0xff] %v7592_v52  ;;  %11422 = vst [vmem:[#allocation57_spill] sm:$0xff] %v7594_v25  ;;  %v7615_v25 = vsub.f32 %v345_v48, %v458_v57  ;;  %6069 = vmatprep.subr.bf16.mxu0 %v11400_v61  ;;  %v7644_v1 = vsub.f32 %v348_v7, %v467_v23 }
  0x5b   : > { %11423 = vst [vmem:[#allocation58_spill] sm:$0xff] %v7596_v29  ;;  %11424 = vst [vmem:[#allocation59_spill] sm:$0xff] %v7602_v59  ;;  %v7613_v29 = vpack.c.bf16 %v461_v11, %v458_v57  ;;  %v7619_v37 = vpack.c.bf16 %v3059_v46, %v3056_v39  ;;  %v7632_v48 = vsub.f32 %v377_v10, %v3056_v39  ;;  %v3062_v11 = vand.u32 4294901760, %v379_v44 }
  0x5c   : > { %11425 = vst [vmem:[#allocation60_spill] sm:$0xff] %v7604_v3  ;;  %11427 = vst [vmem:[#allocation62_spill] sm:$0xff] %v7615_v25  ;;  %v381_v3 = vld [vmem:[%s10557_s0 + $0x1e0] sm:$0xff]  ;;  %v7634_v4 = vsub.f32 %v378_v13, %v3059_v46  ;;  %v7636_v57 = vpack.c.bf16 %v467_v23, %v464_v21  ;;  %v7642_v25 = vsub.f32 %v347_v55, %v464_v21  ;;  %v352_v13 = vld [vmem:[%s10557_s0 + $0xf8] sm:$0xff]  ;;  %v473_v39 = vand.u32 4294901760, %v350_v56 }
  0x5d   : > { %11426 = vst [vmem:[#allocation61_spill] sm:$0xff] %v7613_v29  ;;  %11428 = vst [vmem:[#allocation63_spill] sm:$0xff] %v7617_v9  ;;  %v351_v9 = vld [vmem:[%s10557_s0 + $0xf0] sm:$0xff]  ;;  %v7649_v10 = vsub.f32 %v379_v44, %v3062_v11  ;;  %v3068_v46 = vand.u32 4294901760, %v381_v3  ;;  %5783 = vmatpush1.bf16.msra.mxu1 %v7504_v38  ;;  %v7655_v7 = vpack.c.bf16 %v3065_v32, %v3062_v11  ;;  %6071 = vmatpush1.bf16.msra.mxu0 %v7519_v20 }
  0x5e   : > { %11429 = vst [vmem:[#allocation64_spill] sm:$0xff] %v7619_v37  ;;  %11430 = vst [vmem:[#allocation65_spill] sm:$0xff] %v7632_v48  ;;  %v383_v55 = vld [vmem:[%s10557_s0 + $0x1f0] sm:$0xff]  ;;  %v7657_v21 = vsub.f32 %v380_v16, %v3065_v32  ;;  %v7659_v23 = vsub.f32 %v349_v5, %v470_v33  ;;  %v476_v44 = vand.u32 4294901760, %v351_v9  ;;  %5784 = vmatprep.subr.bf16.mxu1 %v11400_v61  ;;  %v479_v32 = vand.u32 4294901760, %v352_v13  ;;  %v196_v16 = vld [vmem:[%s7261_s28 + $0x18] sm:$0xff] }
  0x5f   : > { %11431 = vst [vmem:[#allocation66_spill] sm:$0xff] %v7634_v4  ;;  %11432 = vst [vmem:[#allocation67_spill] sm:$0xff] %v7636_v57  ;;  %v3071_v4 = vand.u32 4294901760, %v382_v30  ;;  %v7669_v48 = vsub.f32 %v350_v56, %v473_v39  ;;  %v193_v5 = vld [vmem:[%s7261_s28] sm:$0xff]  ;;  %v195_v38 = vld [vmem:[%s7261_s28 + $0x10] sm:$0xff]  ;;  %6072 = vmatprep.subr.bf16.mxu0 %v11400_v61  ;;  %v3074_v20 = vand.u32 4294901760, %v383_v55 }
  0x60   : > { %11433 = vst [vmem:[#allocation68_spill] sm:$0xff] %v7642_v25  ;;  %11434 = vst [vmem:[#allocation69_spill] sm:$0xff] %v7644_v1  ;;  %v194_v1 = vld [vmem:[%s7261_s28 + $0x8] sm:$0xff]  ;;  %v7667_v25 = vpack.c.bf16 %v473_v39, %v470_v33  ;;  %v7681_v31 = vsub.f32 %v351_v9, %v476_v44  ;;  %v7683_v22 = vpack.c.bf16 %v479_v32, %v476_v44  ;;  %v7692_v2 = vand.u32 4294901760, %v196_v16 }
  0x61   : > { %11435 = vst [vmem:[#allocation70_spill] sm:$0xff] %v7649_v10  ;;  %11436 = vst [vmem:[#allocation71_spill] sm:$0xff] %v7655_v7  ;;  %v384_v10 = vld [vmem:[%s10557_s0 + $0x1f8] sm:$0xff]  ;;  %v7671_v11 = vpack.c.bf16 %v3071_v4, %v3068_v46  ;;  %v7685_v33 = vsub.f32 %v352_v13, %v479_v32  ;;  %v7687_v39 = vand.u32 4294901760, %v194_v1  ;;  %5786 = vmatpush1.bf16.msra.mxu1 %v7533_v27  ;;  %6074 = vmatpush1.bf16.msra.mxu0 %v7547_v34 }
  0x62   : > { %11437 = vst [vmem:[#allocation72_spill] sm:$0xff] %v7657_v21  ;;  %11438 = vst [vmem:[#allocation73_spill] sm:$0xff] %v7659_v23  ;;  %v7677_v23 = vsub.f32 %v381_v3, %v3068_v46  ;;  %v7679_v21 = vsub.f32 %v382_v30, %v3071_v4  ;;  %v3077_v56 = vand.u32 4294901760, %v384_v10  ;;  %v7694_v3 = vand.u32 4294901760, %v193_v5  ;;  %5787 = vmatprep.subr.bf16.mxu1 %v11400_v61  ;;  %v200_v27 = vld [vmem:[%s7261_s28 + $0x38] sm:$0xff] }
  0x63   : > { %11439 = vst [vmem:[#allocation74_spill] sm:$0xff] %v7667_v25  ;;  %11440 = vst [vmem:[#allocation75_spill] sm:$0xff] %v7669_v48  ;;  %v7690_v48 = vsub.f32 %v383_v55, %v3074_v20  ;;  %v7696_v30 = vand.u32 4294901760, %v195_v38  ;;  %v7705_v13 = vsub.f32 %v194_v1, %v7687_v39  ;;  %v10631_v46 = vand.u32 4294901760, %v7298_v17  ;;  %6075 = vmatprep.subr.bf16.mxu0 %v11400_v61 }
  0x64   : > { %11441 = vst [vmem:[#allocation76_spill] sm:$0xff] %v7671_v11  ;;  %11442 = vst [vmem:[#allocation77_spill] sm:$0xff] %v7677_v23  ;;  %v7700_v9 = vpack.c.bf16 %v3077_v56, %v3074_v20  ;;  %v7702_v4 = vsub.f32 %v384_v10, %v3077_v56  ;;  %v7710_v55 = vsub.f32 %v196_v16, %v7692_v2  ;;  %v11458_v10 = vand.u32 4294901760, %v7300_v18 }
  0x65   : > { %11443 = vst [vmem:[#allocation78_spill] sm:$0xff] %v7679_v21  ;;  %11444 = vst [vmem:[#allocation79_spill] sm:$0xff] %v7681_v31  ;;  %v7713_v44 = vsub.f32 %v193_v5, %v7694_v3  ;;  %v7716_v32 = vsub.f32 %v195_v38, %v7696_v30  ;;  %v966_v1 = vsub.f32 %v7298_v17, %v10631_v46  ;;  %5789 = vmatpush1.bf16.msra.mxu1 %v7562_v0  ;;  %v198_v46 = vld [vmem:[%s7261_s28 + $0x28] sm:$0xff] }
  0x66   : > { %11445 = vst [vmem:[#allocation80_spill] sm:$0xff] %v7683_v22  ;;  %11446 = vst [vmem:[#allocation81_spill] sm:$0xff] %v7685_v33  ;;  %v973_v34 = vsub.f32 %v7300_v18, %v11458_v10  ;;  %6077 = vmatpush1.bf16.msra.mxu0 %v7576_v43  ;;  %5790 = vmatprep.subr.bf16.mxu1 %v11400_v61  ;;  %v11459_v16 = vand.u32 4294901760, %v7705_v13  ;;  %v11460_v38 = vand.u32 4294901760, %v7302_v19  ;;  %v11461_v0 = vand.u32 4294901760, %v7315_v24 }
  0x67   : > { %11447 = vst [vmem:[#allocation82_spill] sm:$0xff] %v7687_v39  ;;  %11448 = vst [vmem:[#allocation83_spill] sm:$0xff] %v7690_v48  ;;  %v967_v56 = vand.u32 4294901760, %v966_v1  ;;  %6078 = vmatprep.subr.bf16.mxu0 %v11400_v61  ;;  %v11462_v43 = vand.u32 4294901760, %v7710_v55  ;;  %v7762_v39 = vand.u32 4294901760, %v198_v46 }
  0x68   : > { %11449 = vst [vmem:[#allocation84_spill] sm:$0xff] %v7692_v2  ;;  %11450 = vst [vmem:[#allocation85_spill] sm:$0xff] %v7694_v3  ;;  %v484_v5 = vsub.f32 %v7705_v13, %v11459_v16  ;;  %v3564_v20 = vsub.f32 %v7302_v19, %v11460_v38  ;;  %v3571_v10 = vsub.f32 %v7315_v24, %v11461_v0  ;;  %v11463_v16 = vand.u32 4294901760, %v7713_v44  ;;  %v197_v0 = vld [vmem:[%s7261_s28 + $0x20] sm:$0xff]  ;;  %v199_v24 = vld [vmem:[%s7261_s28 + $0x30] sm:$0xff] }
  0x69   : > { %11451 = vst [vmem:[#allocation86_spill] sm:$0xff] %v7696_v30  ;;  %11452 = vst [vmem:[#allocation87_spill] sm:$0xff] %v7700_v9  ;;  %v3082_v30 = vsub.f32 %v7710_v55, %v11462_v43  ;;  %v974_v3 = vand.u32 4294901760, %v973_v34  ;;  %v202_v19 = vld [vmem:[%s7261_s28 + $0x48] sm:$0xff]  ;;  %v204_v43 = vld [vmem:[%s7261_s28 + $0x58] sm:$0xff]  ;;  %5792 = vmatpush1.bf16.msra.mxu1 %v7592_v52  ;;  %v7781_v52 = vand.u32 4294901760, %v197_v0 }
  0x6a   : > { %11453 = vst [vmem:[#allocation88_spill] sm:$0xff] %v7702_v4  ;;  %11454 = vst [vmem:[#allocation89_spill] sm:$0xff] %v7705_v13  ;;  %v7752_v1 = vsub.f32 %v7713_v44, %v11463_v16  ;;  %v11464_v13 = vand.u32 4294901760, %v7716_v32  ;;  %v485_v2 = vand.u32 4294901760, %v484_v5  ;;  %v3565_v18 = vand.u32 4294901760, %v3564_v20  ;;  %v203_v34 = vld [vmem:[%s7261_s28 + $0x50] sm:$0xff]  ;;  %6080 = vmatpush1.bf16.msra.mxu0 %v7602_v59  ;;  %5793 = vmatprep.subr.bf16.mxu1 %v11400_v61 }
  0x6b   : > { %11455 = vst [vmem:[#allocation90_spill] sm:$0xff] %v7710_v55  ;;  %11456 = vst [vmem:[#allocation91_spill] sm:$0xff] %v7713_v44  ;;  %v3572_v17 = vand.u32 4294901760, %v3571_v10  ;;  %v201_v55 = vld [vmem:[%s7261_s28 + $0x40] sm:$0xff]  ;;  %v3083_v16 = vand.u32 4294901760, %v3082_v30  ;;  %v7777_v5 = vsub.f32 %v198_v46, %v7762_v39  ;;  %v7779_v10 = vand.u32 4294901760, %v200_v27  ;;  %6081 = vmatprep.subr.bf16.mxu0 %v11400_v61 }
  0x6c   : > { %11457 = vst [vmem:[#allocation92_spill] sm:$0xff] %v7716_v32  ;;  %v7757_v38 = vsub.f32 %v7716_v32, %v11464_v13  ;;  %11465 = vst [vmem:[#allocation93_spill] sm:$0xff] %v7762_v39  ;;  %v7769_v32 = vpack.c.bf16 %v974_v3, %v967_v56  ;;  %486 = vmatprep.mubr.f32.mxu1 %v485_v2  ;;  %v7784_v30 = vand.u32 4294901760, %v199_v24  ;;  %v7786_v3 = vand.u32 4294901760, %v202_v19 }
  0x6d   : > { %v7774_v20 = vpack.c.bf16 %v3572_v17, %v3565_v18  ;;  %11466 = vst [vmem:[#allocation94_spill] sm:$0xff] %v7777_v5  ;;  %11467 = vst [vmem:[#allocation95_spill] sm:$0xff] %v7779_v10  ;;  %v7788_v56 = vand.u32 4294901760, %v204_v43  ;;  %v7790_v13 = vand.u32 4294901760, %v201_v55  ;;  %3084 = vmatprep.mubr.f32.mxu0 %v3083_v16  ;;  %v7794_v18 = vsub.f32 %v200_v27, %v7779_v10  ;;  %v212_v10 = vld [vmem:[%s7261_s28 + $0x98] sm:$0xff] }
  0x6e   : > { %11468 = vst [vmem:[#allocation96_spill] sm:$0xff] %v7781_v52  ;;  %11469 = vst [vmem:[#allocation97_spill] sm:$0xff] %v7784_v30  ;;  %v7797_v46 = vsub.f32 %v197_v0, %v7781_v52  ;;  %v7799_v44 = vand.u32 4294901760, %v203_v34  ;;  %5795 = vmatpush1.bf16.msra.mxu1 %v7613_v29  ;;  %v7803_v2 = vsub.f32 %v199_v24, %v7784_v30  ;;  %6083 = vmatpush1.bf16.msra.mxu0 %v7619_v37 }
  0x6f   : > { %11470 = vst [vmem:[#allocation98_spill] sm:$0xff] %v7786_v3  ;;  %11471 = vst [vmem:[#allocation99_spill] sm:$0xff] %v7788_v56  ;;  %v7806_v59 = vsub.f32 %v202_v19, %v7786_v3  ;;  %v7809_v16 = vsub.f32 %v204_v43, %v7788_v56  ;;  %v7812_v17 = vsub.f32 %v201_v55, %v7790_v13  ;;  %5796 = vmatprep.subr.bf16.mxu1 %v11400_v61 }
  0x70   : > { %11472 = vst [vmem:[#allocation100_spill] sm:$0xff] %v7790_v13  ;;  %11473 = vst [vmem:[#allocation101_spill] sm:$0xff] %v7794_v18  ;;  %v11480_v27 = vand.u32 4294901760, %v7777_v5  ;;  %v10672_v24 = vand.u32 4294901760, %v7794_v18  ;;  %v7824_v29 = vsub.f32 %v203_v34, %v7799_v44  ;;  %6084 = vmatprep.subr.bf16.mxu0 %v11400_v61  ;;  %v11482_v34 = vand.u32 4294901760, %v7797_v46 }
  0x71   : > { %11474 = vst [vmem:[#allocation102_spill] sm:$0xff] %v7797_v46  ;;  %11475 = vst [vmem:[#allocation103_spill] sm:$0xff] %v7799_v44  ;;  %v11483_v13 = vand.u32 4294901760, %v7803_v2  ;;  %v11484_v37 = vand.u32 4294901760, %v7806_v59  ;;  %v10708_v44 = vand.u32 4294901760, %v7325_v28  ;;  %v11493_v30 = vand.u32 4294901760, %v7343_v41 }
  0x72   : > { %11476 = vst [vmem:[#allocation104_spill] sm:$0xff] %v7803_v2  ;;  %11477 = vst [vmem:[#allocation105_spill] sm:$0xff] %v7806_v59  ;;  %v7819_v0 = vsub.f32 %v7777_v5, %v11480_v27  ;;  %v7835_v19 = vsub.f32 %v7794_v18, %v10672_v24  ;;  %v7840_v55 = vsub.f32 %v7797_v46, %v11482_v34  ;;  %5798 = vmatpush1.bf16.msra.mxu1 %v7636_v57  ;;  %v205_v46 = vld [vmem:[%s7261_s28 + $0x60] sm:$0xff] }
  0x73   : > { %11478 = vst [vmem:[#allocation106_spill] sm:$0xff] %v7809_v16  ;;  %11479 = vst [vmem:[#allocation107_spill] sm:$0xff] %v7812_v17  ;;  %v7847_v27 = vsub.f32 %v7803_v2, %v11483_v13  ;;  %v7852_v24 = vsub.f32 %v7806_v59, %v11484_v37  ;;  %v11485_v18 = vand.u32 4294901760, %v7809_v16  ;;  %v11486_v34 = vand.u32 4294901760, %v7812_v17  ;;  %6086 = vmatpush1.bf16.msra.mxu0 %v7655_v7  ;;  %v208_v2 = vld [vmem:[%s7261_s28 + $0x78] sm:$0xff] }
  0x74   : > { %11481 = vst [vmem:[#allocation108_spill] sm:$0xff] %v7824_v29  ;;  %5799 = vmatprep.subr.bf16.mxu1 %v11400_v61  ;;  %v11487_v57 = vand.u32 4294901760, %v7824_v29  ;;  %6087 = vmatprep.subr.bf16.mxu0 %v11400_v61  ;;  %v7893_v13 = vand.u32 4294901760, %v208_v2  ;;  %v7895_v37 = vand.u32 4294901760, %v205_v46  ;;  %v987_v56 = vsub.f32 %v7325_v28, %v10708_v44 }
  0x75   : > { %v7857_v5 = vsub.f32 %v7809_v16, %v11485_v18  ;;  %v7862_v43 = vsub.f32 %v7812_v17, %v11486_v34  ;;  %v10697_v18 = vand.u32 4294901760, %v7319_v26  ;;  %v206_v16 = vld [vmem:[%s7261_s28 + $0x68] sm:$0xff]  ;;  %v207_v17 = vld [vmem:[%s7261_s28 + $0x70] sm:$0xff] }
  0x76   : > { %v7871_v59 = vsub.f32 %v7824_v29, %v11487_v57  ;;  %5801 = vmatpush1.bf16.msra.mxu1 %v7667_v25  ;;  %v7891_v7 = vand.u32 4294901760, %v206_v16  ;;  %11489 = vst [vmem:[#allocation110_spill] sm:$0xff] %v7893_v13  ;;  %11490 = vst [vmem:[#allocation111_spill] sm:$0xff] %v7895_v37  ;;  %v210_v57 = vld [vmem:[%s7261_s28 + $0x88] sm:$0xff]  ;;  %v11491_v25 = vand.u32 4294901760, %v7341_v40  ;;  %v7906_v3 = vand.u32 4294901760, %v207_v17 }
  0x77   : > { %v980_v29 = vsub.f32 %v7319_v26, %v10697_v18  ;;  %6089 = vmatpush1.bf16.msra.mxu0 %v7671_v11  ;;  %5802 = vmatprep.subr.bf16.mxu1 %v11400_v61  ;;  %v3585_v11 = vsub.f32 %v7343_v41, %v11493_v30  ;;  %v7919_v44 = vsub.f32 %v205_v46, %v7895_v37  ;;  %v7925_v26 = vand.u32 4294901760, %v210_v57  ;;  %v209_v46 = vld [vmem:[%s7261_s28 + $0x80] sm:$0xff] }
  0x78   : > { %11488 = vst [vmem:[#allocation109_spill] sm:$0xff] %v7891_v7  ;;  %v3578_v34 = vsub.f32 %v7341_v40, %v11491_v25  ;;  %11492 = vst [vmem:[#allocation112_spill] sm:$0xff] %v7906_v3  ;;  %6090 = vmatprep.subr.bf16.mxu0 %v11400_v61  ;;  %v7913_v52 = vsub.f32 %v206_v16, %v7891_v7  ;;  %v988_v25 = vand.u32 4294901760, %v987_v56 }
  0x79   : > { %v981_v18 = vand.u32 4294901760, %v980_v29  ;;  %v7916_v29 = vsub.f32 %v208_v2, %v7893_v13  ;;  %11496 = vst [vmem:[#allocation115_spill] sm:$0xff] %v7919_v44  ;;  %v7923_v28 = vsub.f32 %v207_v17, %v7906_v3  ;;  %11498 = vst [vmem:[#allocation117_spill] sm:$0xff] %v7925_v26  ;;  %v3586_v30 = vand.u32 4294901760, %v3585_v11  ;;  %v211_v11 = vld [vmem:[%s7261_s28 + $0x90] sm:$0xff] }
  0x7a   : > { %11494 = vst [vmem:[#allocation113_spill] sm:$0xff] %v7913_v52  ;;  %v3579_v40 = vand.u32 4294901760, %v3578_v34  ;;  %5804 = vmatpush1.bf16.msra.mxu1 %v7683_v22  ;;  %v7936_v34 = vsub.f32 %v210_v57, %v7925_v26  ;;  %v7938_v3 = vand.u32 4294901760, %v212_v10  ;;  %v11501_v2 = vand.u32 4294901760, %v7913_v52 }
  0x7b   : > { %11495 = vst [vmem:[#allocation114_spill] sm:$0xff] %v7916_v29  ;;  %11497 = vst [vmem:[#allocation116_spill] sm:$0xff] %v7923_v28  ;;  %6092 = vmatpush1.bf16.msra.mxu0 %v7700_v9  ;;  %5805 = vmatprep.subr.bf16.mxu1 %v11400_v61  ;;  %v5809_v56 = vpack.c.bf16 %v988_v25, %v981_v18  ;;  %v11502_v9 = vand.u32 4294901760, %v7916_v29  ;;  %v11503_v25 = vand.u32 4294901760, %v7919_v44  ;;  %v11504_v17 = vand.u32 4294901760, %v7752_v1 }
  0x7c   : > { %11499 = vst [vmem:[#allocation118_spill] sm:$0xff] %v7936_v34  ;;  %11500 = vst [vmem:[#allocation119_spill] sm:$0xff] %v7938_v3  ;;  %6093 = vmatprep.subr.bf16.mxu0 %v11400_v61  ;;  %v6097_v16 = vpack.c.bf16 %v3586_v30, %v3579_v40  ;;  %v7945_v13 = vsub.f32 %v7913_v52, %v11501_v2  ;;  %v11505_v40 = vand.u32 4294901760, %v7923_v28  ;;  %v214_v2 = vld [vmem:[%s7261_s28 + $0xa8] sm:$0xff] }
  0x7d   : > { %v7950_v18 = vsub.f32 %v7916_v29, %v11502_v9  ;;  %v7955_v57 = vsub.f32 %v7919_v44, %v11503_v25  ;;  %492 = vmatmul.mubr.f32.vlgmr.msra.gmra.mrb[0].mxu1 %v11504_v17  ;;  %v7966_v22 = vsub.f32 %v212_v10, %v7938_v3  ;;  %v7968_v9 = vand.u32 4294901760, %v209_v46 }
  0x7e   : > { %v7962_v30 = vsub.f32 %v7923_v28, %v11505_v40  ;;  %v11508_v29 = vand.u32 4294901760, %v7757_v38  ;;  %5807 = vmatpush1.bf16.msra.mxu1 %v7769_v32  ;;  %v530_v1 = vand.u32 4294901760, %v7945_v13  ;;  %v7976_v40 = vand.u32 4294901760, %v211_v11 }
  0x7f   : > { %11506 = vst [vmem:[#allocation120_spill] sm:$0xff] %v7966_v22  ;;  %11507 = vst [vmem:[#allocation121_spill] sm:$0xff] %v7968_v9  ;;  %v3128_v17 = vand.u32 4294901760, %v7950_v18  ;;  %v11510_v10 = vand.u32 4294901760, %v7819_v0  ;;  %v11511_v38 = vand.u32 4294901760, %v7936_v34  ;;  %v10727_v13 = vand.u32 4294901760, %v7966_v22  ;;  %5808 = vmatprep.subr.bf16.mxu1 %v11400_v61 }
  0x80   : > { %3090 = vmatmul.mubr.f32.vlgmr.msra.gmra.mrb[0].mxu0 %v11508_v29  ;;  %11509 = vst [vmem:[#allocation122_spill] sm:$0xff] %v7976_v40  ;;  %v7989_v29 = vsub.f32 %v209_v46, %v7968_v9  ;;  %v11513_v18 = vand.u32 4294901760, %v7835_v19  ;;  %v10728_v0 = vand.u32 4294901760, %v7345_v42  ;;  %v11515_v25 = vand.u32 4294901760, %v7840_v55  ;;  %v217_v9 = vld [vmem:[%s7261_s28 + $0xc0] sm:$0xff] }
  0x81   : > { %6095 = vmatpush1.bf16.msra.mxu0 %v7774_v20  ;;  %501 = vmatprep.mubr.f32.mxu1 %v11510_v10  ;;  %v7985_v32 = vsub.f32 %v7936_v34, %v11511_v38  ;;  %v7995_v20 = vsub.f32 %v211_v11, %v7976_v40  ;;  %v10731_v10 = vand.u32 4294901760, %v7358_v47  ;;  %v3142_v46 = vsub.f32 %v7966_v22, %v10727_v13  ;;  %v213_v34 = vld [vmem:[%s7261_s28 + $0xa0] sm:$0xff]  ;;  %v220_v40 = vld [vmem:[%s7261_s28 + $0xd8] sm:$0xff] }
  0x82   : > { %11512 = vst [vmem:[#allocation123_spill] sm:$0xff] %v7989_v29  ;;  %3099 = vmatprep.mubr.f32.mxu0 %v11513_v18  ;;  %507 = vmatmul.mubr.f32.gmra.mrb[2].mxu1 %v11515_v25  ;;  %v11516_v38 = vand.u32 4294901760, %v7847_v27  ;;  %v11517_v55 = vand.u32 4294901760, %v7852_v24  ;;  %v11518_v11 = vand.u32 4294901760, %v7362_v49  ;;  %v216_v27 = vld [vmem:[%s7261_s28 + $0xb8] sm:$0xff] }
  0x83   : > { %11514 = vst [vmem:[#allocation124_spill] sm:$0xff] %v7995_v20  ;;  %6096 = vmatprep.subr.bf16.mxu0 %v11400_v61  ;;  %v545_v19 = vand.u32 4294901760, %v7985_v32  ;;  %v994_v32 = vsub.f32 %v7345_v42, %v10728_v0  ;;  %v1001_v13 = vsub.f32 %v7358_v47, %v10731_v10  ;;  %5810 = vmatpush1.bf16.msra.mxu1 %v5809_v56  ;;  %v3143_v24 = vand.u32 4294901760, %v3142_v46 }
  0x84   : > { %3105 = vmatmul.mubr.f32.gmra.mrb[2].mxu0 %v11516_v38  ;;  %516 = vmatprep.mubr.f32.mxu1 %v11517_v55  ;;  %v3592_v18 = vsub.f32 %v7362_v49, %v11518_v11  ;;  %v11519_v38 = vand.u32 4294901760, %v7857_v5  ;;  %v11520_v55 = vand.u32 4294901760, %v7989_v29  ;;  %v11521_v0 = vand.u32 4294901760, %v7368_v51  ;;  %v215_v11 = vld [vmem:[%s7261_s28 + $0xb0] sm:$0xff] }
  0x85   : > { %v8033_v10 = vand.u32 4294901760, %v214_v2  ;;  %6098 = vmatpush1.bf16.msra.mxu0 %v6097_v16  ;;  %5811 = vmatprep.subr.bf16.mxu1 %v11400_v61  ;;  %v11523_v5 = vand.u32 4294901760, %v7995_v20  ;;  %v995_v46 = vand.u32 4294901760, %v994_v32  ;;  %v8048_v52 = vand.u32 4294901760, %v216_v27 }
  0x86   : > { %3114 = vmatprep.mubr.f32.mxu0 %v11519_v38  ;;  %v550_v25 = vsub.f32 %v7989_v29, %v11520_v55  ;;  %v3599_v22 = vsub.f32 %v7368_v51, %v11521_v0  ;;  %v1002_v38 = vand.u32 4294901760, %v1001_v13  ;;  %v3593_v55 = vand.u32 4294901760, %v3592_v18  ;;  %v218_v29 = vld [vmem:[%s7261_s28 + $0xc8] sm:$0xff]  ;;  %6099 = vmatprep.subr.bf16.mxu0 %v11400_v61 }
  0x87   : > { %11522 = vst [vmem:[#allocation125_spill] sm:$0xff] %v8033_v10  ;;  %v3148_v56 = vsub.f32 %v7995_v20, %v11523_v5  ;;  %v11524_v0 = vand.u32 4294901760, %v7862_v43  ;;  %v8046_v16 = vsub.f32 %v214_v2, %v8033_v10  ;;  %11526 = vst [vmem:[#allocation127_spill] sm:$0xff] %v8048_v52  ;;  %v11527_v32 = vand.u32 4294901760, %v7871_v59 }
  0x88   : > { %v551_v28 = vand.u32 4294901760, %v550_v25  ;;  %v3600_v44 = vand.u32 4294901760, %v3599_v22  ;;  %v5812_v18 = vpack.c.bf16 %v1002_v38, %v995_v46  ;;  %v8054_v5 = vand.u32 4294901760, %v213_v34  ;;  %v219_v25 = vld [vmem:[%s7261_s28 + $0xd0] sm:$0xff] }
  0x89   : > { %522 = vmatmul.mubr.f32.gmra.mrb[4].mxu1 %v11524_v0  ;;  %11525 = vst [vmem:[#allocation126_spill] sm:$0xff] %v8046_v16  ;;  %3120 = vmatmul.mubr.f32.gmra.mrb[4].mxu0 %v11527_v32  ;;  %v3149_v13 = vand.u32 4294901760, %v3148_v56  ;;  %v8056_v43 = vand.u32 4294901760, %v215_v11  ;;  %v10752_v2 = vand.u32 4294901760, %v8046_v16  ;;  %v8061_v0 = vsub.f32 %v216_v27, %v8048_v52 }
  0x8a   : > { %531 = vmatprep.mubr.f32.mxu1 %v530_v1  ;;  %11528 = vst [vmem:[#allocation128_spill] sm:$0xff] %v8054_v5  ;;  %3129 = vmatprep.mubr.f32.mxu0 %v3128_v17  ;;  %v6100_v22 = vpack.c.bf16 %v3600_v44, %v3593_v55  ;;  %v8063_v20 = vand.u32 4294901760, %v218_v29  ;;  %v8066_v59 = vsub.f32 %v213_v34, %v8054_v5  ;;  %v8071_v56 = vand.u32 4294901760, %v220_v40 }
  0x8b   : > { %11529 = vst [vmem:[#allocation129_spill] sm:$0xff] %v8056_v43  ;;  %11530 = vst [vmem:[#allocation130_spill] sm:$0xff] %v8061_v0  ;;  %5813 = vmatpush1.bf16.msra.mxu1 %v5812_v18  ;;  %v8069_v1 = vsub.f32 %v215_v11, %v8056_v43  ;;  %v8073_v46 = vand.u32 4294901760, %v217_v9  ;;  %v11536_v44 = vand.u32 4294901760, %v7955_v57  ;;  %v559_v17 = vsub.f32 %v8046_v16, %v10752_v2 }
  0x8c   : > { %11531 = vst [vmem:[#allocation131_spill] sm:$0xff] %v8063_v20  ;;  %11532 = vst [vmem:[#allocation132_spill] sm:$0xff] %v8066_v59  ;;  %6101 = vmatpush1.bf16.msra.mxu0 %v6100_v22  ;;  %v10750_v27 = vand.u32 4294901760, %v8061_v0  ;;  %v8082_v34 = vsub.f32 %v218_v29, %v8063_v20  ;;  %v8084_v38 = vand.u32 4294901760, %v219_v25  ;;  %v11539_v11 = vand.u32 4294901760, %v7962_v30  ;;  %5814 = vmatprep.subr.bf16.mxu1 %v11400_v61 }
  0x8d   : > { %11533 = vst [vmem:[#allocation133_spill] sm:$0xff] %v8069_v1  ;;  %11534 = vst [vmem:[#allocation134_spill] sm:$0xff] %v8071_v56  ;;  %537 = vmatmul.mubr.f32.gmra.mrb[6].mxu1 %v11536_v44  ;;  %v10748_v55 = vand.u32 4294901760, %v8066_v59  ;;  %v10749_v57 = vand.u32 4294901760, %v8069_v1  ;;  %v8091_v32 = vsub.f32 %v220_v40, %v8071_v56  ;;  %v8094_v18 = vsub.f32 %v217_v9, %v8073_v46 }
  0x8e   : > { %11535 = vst [vmem:[#allocation135_spill] sm:$0xff] %v8073_v46  ;;  %11537 = vst [vmem:[#allocation136_spill] sm:$0xff] %v8082_v34  ;;  %3135 = vmatmul.mubr.f32.gmra.mrb[6].mxu0 %v11539_v11  ;;  %546 = vmatprep.mubr.f32.mxu1 %v545_v19  ;;  %v560_v22 = vand.u32 4294901760, %v559_v17  ;;  %v3157_v29 = vsub.f32 %v8061_v0, %v10750_v27  ;;  %v10751_v30 = vand.u32 4294901760, %v8082_v34  ;;  %v227_v46 = vld [vmem:[%s7261_s28 + $0x110] sm:$0xff] }
  0x8f   : > { %11538 = vst [vmem:[#allocation137_spill] sm:$0xff] %v8084_v38  ;;  %11540 = vst [vmem:[#allocation138_spill] sm:$0xff] %v8091_v32  ;;  %3144 = vmatprep.mubr.f32.mxu0 %v3143_v24  ;;  %v8102_v19 = vsub.f32 %v219_v25, %v8084_v38  ;;  %v565_v40 = vsub.f32 %v8066_v59, %v10748_v55  ;;  %v3163_v9 = vsub.f32 %v8069_v1, %v10749_v57  ;;  %v228_v59 = vld [vmem:[%s7261_s28 + $0x118] sm:$0xff]  ;;  %v225_v38 = vld [vmem:[%s7261_s28 + $0x100] sm:$0xff] }
  0x90   : > { %11541 = vst [vmem:[#allocation139_spill] sm:$0xff] %v8094_v18  ;;  %v10755_v24 = vand.u32 4294901760, %v8091_v32  ;;  %v10760_v44 = vand.u32 4294901760, %v8094_v18  ;;  %6102 = vmatprep.subr.bf16.mxu0 %v11400_v61  ;;  %v3158_v17 = vand.u32 4294901760, %v3157_v29  ;;  %v574_v25 = vsub.f32 %v8082_v34, %v10751_v30  ;;  %v222_v30 = vld [vmem:[%s7261_s28 + $0xe8] sm:$0xff]  ;;  %v221_v34 = vld [vmem:[%s7261_s28 + $0xe0] sm:$0xff] }
  0x91   : > { %11542 = vst [vmem:[#allocation140_spill] sm:$0xff] %v8102_v19  ;;  %552 = vmatmul.mubr.f32.gmra.mrb[8].mxu1 %v551_v28  ;;  %v10763_v11 = vand.u32 4294901760, %v8102_v19  ;;  %v10764_v55 = vand.u32 4294901760, %v7370_v53  ;;  %v566_v57 = vand.u32 4294901760, %v565_v40  ;;  %v3164_v27 = vand.u32 4294901760, %v3163_v9  ;;  %v224_v9 = vld [vmem:[%s7261_s28 + $0xf8] sm:$0xff] }
  0x92   : > { %3150 = vmatmul.mubr.f32.gmra.mrb[8].mxu0 %v3149_v13  ;;  %561 = vmatprep.mubr.f32.mxu1 %v560_v22  ;;  %v3172_v28 = vsub.f32 %v8091_v32, %v10755_v24  ;;  %v580_v29 = vsub.f32 %v8094_v18, %v10760_v44  ;;  %v575_v2 = vand.u32 4294901760, %v574_v25  ;;  %v10767_v40 = vand.u32 4294901760, %v7383_v62  ;;  %v226_v25 = vld [vmem:[%s7261_s28 + $0x108] sm:$0xff] }
  0x93   : > { %3159 = vmatprep.mubr.f32.mxu0 %v3158_v17  ;;  %v3178_v13 = vsub.f32 %v8102_v19, %v10763_v11  ;;  %v1008_v22 = vsub.f32 %v7370_v53, %v10764_v55  ;;  %v10770_v1 = vand.u32 4294901760, %v7385_v63  ;;  %v10775_v44 = vand.u32 4294901760, %v7398_v6  ;;  %v223_v17 = vld [vmem:[%s7261_s28 + $0xf0] sm:$0xff] }
  0x94   : > { %v3173_v24 = vand.u32 4294901760, %v3172_v28  ;;  %v581_v32 = vand.u32 4294901760, %v580_v29  ;;  %v1015_v55 = vsub.f32 %v7383_v62, %v10767_v40  ;;  %v8141_v19 = vand.u32 4294901760, %v222_v30 }
  0x95   : > { %567 = vmatmul.mubr.f32.gmra.mrb[10].mxu1 %v566_v57  ;;  %v3179_v18 = vand.u32 4294901760, %v3178_v13  ;;  %v1009_v11 = vand.u32 4294901760, %v1008_v22  ;;  %v3606_v28 = vsub.f32 %v7385_v63, %v10770_v1  ;;  %v3613_v57 = vsub.f32 %v7398_v6, %v10775_v44 }
  0x96   : > { %11543 = vst [vmem:[#allocation141_spill] sm:$0xff] %v8141_v19  ;;  %3165 = vmatmul.mubr.f32.gmra.mrb[10].mxu0 %v3164_v27  ;;  %576 = vmatprep.mubr.f32.mxu1 %v575_v2  ;;  %v8149_v29 = vand.u32 4294901760, %v224_v9  ;;  %v8151_v13 = vand.u32 4294901760, %v221_v34  ;;  %v1016_v22 = vand.u32 4294901760, %v1015_v55  ;;  %v8154_v40 = vsub.f32 %v222_v30, %v8141_v19 }
  0x97   : > { %3174 = vmatprep.mubr.f32.mxu0 %v3173_v24  ;;  %v8156_v27 = vand.u32 4294901760, %v223_v17  ;;  %v8158_v2 = vand.u32 4294901760, %v226_v25  ;;  %v3607_v1 = vand.u32 4294901760, %v3606_v28  ;;  %v3614_v0 = vand.u32 4294901760, %v3613_v57 }
  0x98   : > { %11544 = vst [vmem:[#allocation142_spill] sm:$0xff] %v8149_v29  ;;  %11545 = vst [vmem:[#allocation143_spill] sm:$0xff] %v8151_v13  ;;  %v8162_v16 = vsub.f32 %v224_v9, %v8149_v29  ;;  %v8165_v44 = vsub.f32 %v221_v34, %v8151_v13  ;;  %v5815_v24 = vpack.c.bf16 %v1016_v22, %v1009_v11  ;;  %v10783_v55 = vand.u32 4294901760, %v8154_v40 }
  0x99   : > { %11546 = vst [vmem:[#allocation144_spill] sm:$0xff] %v8154_v40  ;;  %11547 = vst [vmem:[#allocation145_spill] sm:$0xff] %v8156_v27  ;;  %582 = vmatmul.mubr.f32.gmra.mrb[12].mxu1 %v581_v32  ;;  %v8170_v30 = vsub.f32 %v223_v17, %v8156_v27  ;;  %v8173_v19 = vsub.f32 %v226_v25, %v8158_v2  ;;  %v6103_v28 = vpack.c.bf16 %v3614_v0, %v3607_v1 }
  0x9a   : > { %11548 = vst [vmem:[#allocation146_spill] sm:$0xff] %v8158_v2  ;;  %11549 = vst [vmem:[#allocation147_spill] sm:$0xff] %v8162_v16  ;;  %3180 = vmatmul.mubr.f32.gmra.mrb[12].mxu0 %v3179_v18  ;;  %v10782_v9 = vand.u32 4294901760, %v8162_v16  ;;  %v10784_v57 = vand.u32 4294901760, %v8165_v44  ;;  %v8178_v34 = vand.u32 4294901760, %v228_v59  ;;  %5816 = vmatpush1.bf16.msra.mxu1 %v5815_v24  ;;  %v589_v32 = vsub.f32 %v8154_v40, %v10783_v55 }
  0x9b   : > { %11550 = vst [vmem:[#allocation148_spill] sm:$0xff] %v8165_v44  ;;  %11551 = vst [vmem:[#allocation149_spill] sm:$0xff] %v8170_v30  ;;  %v10791_v11 = vand.u32 4294901760, %v8170_v30  ;;  %v10794_v17 = vand.u32 4294901760, %v8173_v19  ;;  %v8185_v25 = vand.u32 4294901760, %v225_v38  ;;  %6104 = vmatpush1.bf16.msra.mxu0 %v6103_v28  ;;  %5817 = vmatprep.subr.bf16.mxu1 %v11400_v61  ;;  %v8197_v22 = vand.u32 4294901760, %v227_v46 }
  0x9c   : > { %11552 = vst [vmem:[#allocation150_spill] sm:$0xff] %v8173_v19  ;;  %11553 = vst [vmem:[#allocation151_spill] sm:$0xff] %v8178_v34  ;;  %v3187_v0 = vsub.f32 %v8162_v16, %v10782_v9  ;;  %v595_v1 = vsub.f32 %v8165_v44, %v10784_v57  ;;  %v8194_v18 = vsub.f32 %v228_v59, %v8178_v34  ;;  %v590_v24 = vand.u32 4294901760, %v589_v32  ;;  %v230_v32 = vld [vmem:[%s7261_s28 + $0x128] sm:$0xff] }
  0x9d   : > { %11554 = vst [vmem:[#allocation152_spill] sm:$0xff] %v8185_v25  ;;  %11556 = vst [vmem:[#allocation154_spill] sm:$0xff] %v8197_v22  ;;  %v3193_v28 = vsub.f32 %v8170_v30, %v10791_v11  ;;  %v604_v9 = vsub.f32 %v8173_v19, %v10794_v17  ;;  %v8206_v55 = vsub.f32 %v225_v38, %v8185_v25  ;;  %6105 = vmatprep.subr.bf16.mxu0 %v11400_v61 }
  0x9e   : > { %11555 = vst [vmem:[#allocation153_spill] sm:$0xff] %v8194_v18  ;;  %v3188_v59 = vand.u32 4294901760, %v3187_v0  ;;  %v596_v57 = vand.u32 4294901760, %v595_v1  ;;  %v10795_v44 = vand.u32 4294901760, %v8194_v18  ;;  %v8211_v16 = vsub.f32 %v227_v46, %v8197_v22  ;;  %591 = vmatprep.mubr.f32.mxu1 %v590_v24 }
  0x9f   : > { %11557 = vst [vmem:[#allocation155_spill] sm:$0xff] %v8206_v55  ;;  %v3194_v40 = vand.u32 4294901760, %v3193_v28  ;;  %v605_v11 = vand.u32 4294901760, %v604_v9  ;;  %v10796_v30 = vand.u32 4294901760, %v8206_v55  ;;  %v10799_v17 = vand.u32 4294901760, %v7402_v8 }
  0xa0   : > { %11558 = vst [vmem:[#allocation156_spill] sm:$0xff] %v8211_v16  ;;  %3189 = vmatprep.mubr.f32.mxu0 %v3188_v59  ;;  %597 = vmatmul.mubr.f32.gmra.mrb[14].mxu1 %v596_v57  ;;  %v3202_v38 = vsub.f32 %v8194_v18, %v10795_v44  ;;  %v10806_v46 = vand.u32 4294901760, %v8211_v16  ;;  %v10809_v0 = vand.u32 4294901760, %v7414_v12  ;;  %v10814_v1 = vand.u32 4294901760, %v7418_v14  ;;  %v232_v59 = vld [vmem:[%s7261_s28 + $0x138] sm:$0xff] }
  0xa1   : > { %3195 = vmatmul.mubr.f32.gmra.mrb[14].mxu0 %v3194_v40  ;;  %606 = vmatprep.mubr.f32.mxu1 %v605_v11  ;;  %v610_v9 = vsub.f32 %v8206_v55, %v10796_v30  ;;  %v1022_v57 = vsub.f32 %v7402_v8, %v10799_v17  ;;  %v8229_v28 = vand.u32 4294901760, %v230_v32  ;;  %v229_v55 = vld [vmem:[%s7261_s28 + $0x120] sm:$0xff]  ;;  %v231_v17 = vld [vmem:[%s7261_s28 + $0x130] sm:$0xff]  ;;  %v11560_v19 = vand.u32 4294901760, %v7420_v15 }
  0xa2   : > { %v3203_v44 = vand.u32 4294901760, %v3202_v38  ;;  %v3208_v40 = vsub.f32 %v8211_v16, %v10806_v46  ;;  %v1029_v11 = vsub.f32 %v7414_v12, %v10809_v0  ;;  %v3620_v30 = vsub.f32 %v7418_v14, %v10814_v1  ;;  %v234_v46 = vld [vmem:[%s7261_s28 + $0x148] sm:$0xff]  ;;  %v236_v16 = vld [vmem:[%s7261_s28 + $0x158] sm:$0xff] }
  0xa3   : > { %11559 = vst [vmem:[#allocation157_spill] sm:$0xff] %v8229_v28  ;;  %v611_v18 = vand.u32 4294901760, %v610_v9  ;;  %v1023_v24 = vand.u32 4294901760, %v1022_v57  ;;  %v3627_v38 = vsub.f32 %v7420_v15, %v11560_v19  ;;  %v8247_v22 = vsub.f32 %v230_v32, %v8229_v28  ;;  %v233_v19 = vld [vmem:[%s7261_s28 + $0x140] sm:$0xff] }
  0xa4   : > { %3204 = vmatprep.mubr.f32.mxu0 %v3203_v44  ;;  %v3209_v0 = vand.u32 4294901760, %v3208_v40  ;;  %v1030_v25 = vand.u32 4294901760, %v1029_v11  ;;  %v3621_v34 = vand.u32 4294901760, %v3620_v30  ;;  %v8251_v1 = vand.u32 4294901760, %v232_v59  ;;  %v235_v30 = vld [vmem:[%s7261_s28 + $0x150] sm:$0xff] }
  0xa5   : > { %11561 = vst [vmem:[#allocation158_spill] sm:$0xff] %v8247_v22  ;;  %612 = vmatmul.mubr.f32.gmra.mrb[16].mxu1 %v611_v18  ;;  %v3628_v9 = vand.u32 4294901760, %v3627_v38  ;;  %v10824_v57 = vand.u32 4294901760, %v8247_v22  ;;  %v8254_v2 = vand.u32 4294901760, %v229_v55  ;;  %v8256_v27 = vand.u32 4294901760, %v231_v17 }
  0xa6   : > { %11562 = vst [vmem:[#allocation159_spill] sm:$0xff] %v8251_v1  ;;  %3210 = vmatmul.mubr.f32.gmra.mrb[16].mxu0 %v3209_v0  ;;  %v5818_v32 = vpack.c.bf16 %v1030_v25, %v1023_v24  ;;  %v8260_v28 = vsub.f32 %v232_v59, %v8251_v1  ;;  %v8262_v44 = vand.u32 4294901760, %v234_v46  ;;  %v8264_v40 = vand.u32 4294901760, %v236_v16 }
  0xa7   : > { %11563 = vst [vmem:[#allocation160_spill] sm:$0xff] %v8254_v2  ;;  %11564 = vst [vmem:[#allocation161_spill] sm:$0xff] %v8256_v27  ;;  %v6106_v11 = vpack.c.bf16 %v3628_v9, %v3621_v34  ;;  %v619_v18 = vsub.f32 %v8247_v22, %v10824_v57  ;;  %v8271_v38 = vsub.f32 %v229_v55, %v8254_v2  ;;  %v8283_v34 = vand.u32 4294901760, %v233_v19 }
  0xa8   : > { %11565 = vst [vmem:[#allocation162_spill] sm:$0xff] %v8260_v28  ;;  %11566 = vst [vmem:[#allocation163_spill] sm:$0xff] %v8262_v44  ;;  %v8274_v13 = vsub.f32 %v231_v17, %v8256_v27  ;;  %5819 = vmatpush1.bf16.msra.mxu1 %v5818_v32  ;;  %v10823_v25 = vand.u32 4294901760, %v8260_v28  ;;  %v8278_v0 = vsub.f32 %v234_v46, %v8262_v44  ;;  %v8288_v17 = vand.u32 4294901760, %v235_v30 }
  0xa9   : > { %11567 = vst [vmem:[#allocation164_spill] sm:$0xff] %v8264_v40  ;;  %11568 = vst [vmem:[#allocation165_spill] sm:$0xff] %v8271_v38  ;;  %v8281_v24 = vsub.f32 %v236_v16, %v8264_v40  ;;  %6107 = vmatpush1.bf16.msra.mxu0 %v6106_v11  ;;  %v620_v59 = vand.u32 4294901760, %v619_v18  ;;  %v10829_v9 = vand.u32 4294901760, %v8271_v38  ;;  %5820 = vmatprep.subr.bf16.mxu1 %v11400_v61  ;;  %v10842_v16 = vand.u32 4294901760, %v7430_v35 }
  0xaa   : > { %11569 = vst [vmem:[#allocation166_spill] sm:$0xff] %v8274_v13  ;;  %11570 = vst [vmem:[#allocation167_spill] sm:$0xff] %v8278_v0  ;;  %v10834_v55 = vand.u32 4294901760, %v8274_v13  ;;  %v3217_v46 = vsub.f32 %v8260_v28, %v10823_v25  ;;  %v10839_v32 = vand.u32 4294901760, %v8278_v0  ;;  %v8296_v11 = vsub.f32 %v233_v19, %v8283_v34  ;;  %6108 = vmatprep.subr.bf16.mxu0 %v11400_v61 }
  0xab   : > { %11571 = vst [vmem:[#allocation168_spill] sm:$0xff] %v8281_v24  ;;  %11572 = vst [vmem:[#allocation169_spill] sm:$0xff] %v8283_v34  ;;  %621 = vmatprep.mubr.f32.mxu1 %v620_v59  ;;  %v625_v18 = vsub.f32 %v8271_v38, %v10829_v9  ;;  %v8306_v57 = vsub.f32 %v235_v30, %v8288_v17  ;;  %v11576_v59 = vand.u32 4294901760, %v8281_v24 }
  0xac   : > { %11573 = vst [vmem:[#allocation170_spill] sm:$0xff] %v8288_v17  ;;  %11574 = vst [vmem:[#allocation171_spill] sm:$0xff] %v8296_v11  ;;  %v3223_v25 = vsub.f32 %v8274_v13, %v10834_v55  ;;  %v3218_v19 = vand.u32 4294901760, %v3217_v46  ;;  %v634_v28 = vsub.f32 %v8278_v0, %v10839_v32  ;;  %v10845_v9 = vand.u32 4294901760, %v8296_v11  ;;  %v238_v46 = vld [vmem:[%s7261_s28 + $0x168] sm:$0xff]  ;;  %v240_v13 = vld [vmem:[%s7261_s28 + $0x178] sm:$0xff] }
  0xad   : > { %11575 = vst [vmem:[#allocation172_spill] sm:$0xff] %v8306_v57  ;;  %v3232_v22 = vsub.f32 %v8281_v24, %v11576_v59  ;;  %v626_v38 = vand.u32 4294901760, %v625_v18  ;;  %v10848_v55 = vand.u32 4294901760, %v8306_v57  ;;  %v1036_v30 = vsub.f32 %v7430_v35, %v10842_v16 }
  0xae   : > { %v3224_v34 = vand.u32 4294901760, %v3223_v25  ;;  %3219 = vmatprep.mubr.f32.mxu0 %v3218_v19  ;;  %v635_v17 = vand.u32 4294901760, %v634_v28  ;;  %v640_v59 = vsub.f32 %v8296_v11, %v10845_v9  ;;  %v10849_v18 = vand.u32 4294901760, %v7432_v36  ;;  %v237_v25 = vld [vmem:[%s7261_s28 + $0x160] sm:$0xff]  ;;  %v242_v11 = vld [vmem:[%s7261_s28 + $0x188] sm:$0xff] }
  0xaf   : > { %v3233_v32 = vand.u32 4294901760, %v3232_v22  ;;  %627 = vmatmul.mubr.f32.gmra.mrb[18].mxu1 %v626_v38  ;;  %v3238_v24 = vsub.f32 %v8306_v57, %v10848_v55  ;;  %v1037_v16 = vand.u32 4294901760, %v1036_v30  ;;  %v10854_v0 = vand.u32 4294901760, %v7446_v45  ;;  %v239_v22 = vld [vmem:[%s7261_s28 + $0x170] sm:$0xff] }
  0xb0   : > { %3225 = vmatmul.mubr.f32.gmra.mrb[18].mxu0 %v3224_v34  ;;  %v10859_v28 = vand.u32 4294901760, %v7448_v50  ;;  %636 = vmatprep.mubr.f32.mxu1 %v635_v17  ;;  %v641_v19 = vand.u32 4294901760, %v640_v59  ;;  %v1043_v9 = vsub.f32 %v7432_v36, %v10849_v18  ;;  %v8336_v38 = vand.u32 4294901760, %v238_v46 }
  0xb1   : > { %3234 = vmatprep.mubr.f32.mxu0 %v3233_v32  ;;  %v8338_v34 = vand.u32 4294901760, %v240_v13  ;;  %v3239_v30 = vand.u32 4294901760, %v3238_v24  ;;  %v3634_v55 = vsub.f32 %v7446_v45, %v10854_v0  ;;  %v8347_v32 = vand.u32 4294901760, %v237_v25  ;;  %v244_v24 = vld [vmem:[%s7261_s28 + $0x198] sm:$0xff] }
  0xb2   : > { %11577 = vst [vmem:[#allocation173_spill] sm:$0xff] %v8336_v38  ;;  %v3641_v17 = vsub.f32 %v7448_v50, %v10859_v28  ;;  %v1044_v59 = vand.u32 4294901760, %v1043_v9  ;;  %v8350_v18 = vsub.f32 %v238_v46, %v8336_v38  ;;  %v8355_v40 = vand.u32 4294901760, %v239_v22  ;;  %v241_v9 = vld [vmem:[%s7261_s28 + $0x180] sm:$0xff] }
  0xb3   : > { %11578 = vst [vmem:[#allocation174_spill] sm:$0xff] %v8338_v34  ;;  %11579 = vst [vmem:[#allocation175_spill] sm:$0xff] %v8347_v32  ;;  %v8353_v57 = vsub.f32 %v240_v13, %v8338_v34  ;;  %642 = vmatmul.mubr.f32.gmra.mrb[20].mxu1 %v641_v19  ;;  %v3635_v0 = vand.u32 4294901760, %v3634_v55  ;;  %v8359_v27 = vsub.f32 %v237_v25, %v8347_v32  ;;  %v8361_v28 = vand.u32 4294901760, %v242_v11  ;;  %v243_v34 = vld [vmem:[%s7261_s28 + $0x190] sm:$0xff] }
  0xb4   : > { %11580 = vst [vmem:[#allocation176_spill] sm:$0xff] %v8350_v18  ;;  %11582 = vst [vmem:[#allocation178_spill] sm:$0xff] %v8355_v40  ;;  %3240 = vmatmul.mubr.f32.gmra.mrb[20].mxu0 %v3239_v30  ;;  %v3642_v44 = vand.u32 4294901760, %v3641_v17  ;;  %v5821_v2 = vpack.c.bf16 %v1044_v59, %v1037_v16  ;;  %v10869_v46 = vand.u32 4294901760, %v8350_v18  ;;  %v8367_v13 = vsub.f32 %v239_v22, %v8355_v40  ;;  %v249_v40 = vld [vmem:[%s7261_s28 + $0x1c0] sm:$0xff] }
  0xb5   : > { %11581 = vst [vmem:[#allocation177_spill] sm:$0xff] %v8353_v57  ;;  %11583 = vst [vmem:[#allocation179_spill] sm:$0xff] %v8359_v27  ;;  %v10868_v38 = vand.u32 4294901760, %v8353_v57  ;;  %v10870_v19 = vand.u32 4294901760, %v8359_v27  ;;  %v8372_v55 = vsub.f32 %v242_v11, %v8361_v28  ;;  %v8374_v25 = vand.u32 4294901760, %v244_v24 }
  0xb6   : > { %11584 = vst [vmem:[#allocation180_spill] sm:$0xff] %v8361_v28  ;;  %11585 = vst [vmem:[#allocation181_spill] sm:$0xff] %v8367_v13  ;;  %v6109_v1 = vpack.c.bf16 %v3642_v44, %v3635_v0  ;;  %5822 = vmatpush1.bf16.msra.mxu1 %v5821_v2  ;;  %v649_v16 = vsub.f32 %v8350_v18, %v10869_v46  ;;  %v10875_v22 = vand.u32 4294901760, %v8367_v13  ;;  %v8383_v17 = vand.u32 4294901760, %v241_v9  ;;  %v247_v18 = vld [vmem:[%s7261_s28 + $0x1b0] sm:$0xff] }
  0xb7   : > { %11586 = vst [vmem:[#allocation182_spill] sm:$0xff] %v8372_v55  ;;  %11587 = vst [vmem:[#allocation183_spill] sm:$0xff] %v8374_v25  ;;  %v3247_v30 = vsub.f32 %v8353_v57, %v10868_v38  ;;  %v655_v44 = vsub.f32 %v8359_v27, %v10870_v19  ;;  %v10879_v0 = vand.u32 4294901760, %v8372_v55  ;;  %v8390_v2 = vsub.f32 %v244_v24, %v8374_v25  ;;  %v252_v25 = vld [vmem:[%s7261_s28 + $0x1d8] sm:$0xff] }
  0xb8   : > { %11588 = vst [vmem:[#allocation184_spill] sm:$0xff] %v8383_v17  ;;  %6110 = vmatpush1.bf16.msra.mxu0 %v6109_v1  ;;  %5823 = vmatprep.subr.bf16.mxu1 %v11400_v61  ;;  %v8393_v11 = vand.u32 4294901760, %v243_v34  ;;  %v650_v59 = vand.u32 4294901760, %v649_v16  ;;  %v3253_v1 = vsub.f32 %v8367_v13, %v10875_v22  ;;  %v8399_v46 = vsub.f32 %v241_v9, %v8383_v17 }
  0xb9   : > { %11589 = vst [vmem:[#allocation185_spill] sm:$0xff] %v8390_v2  ;;  %v3248_v38 = vand.u32 4294901760, %v3247_v30  ;;  %6111 = vmatprep.subr.bf16.mxu0 %v11400_v61  ;;  %v656_v19 = vand.u32 4294901760, %v655_v44  ;;  %v664_v24 = vsub.f32 %v8372_v55, %v10879_v0  ;;  %v10878_v27 = vand.u32 4294901760, %v8390_v2  ;;  %v246_v44 = vld [vmem:[%s7261_s28 + $0x1a8] sm:$0xff]  ;;  %v245_v55 = vld [vmem:[%s7261_s28 + $0x1a0] sm:$0xff] }
  0xba   : > { %11590 = vst [vmem:[#allocation186_spill] sm:$0xff] %v8393_v11  ;;  %11591 = vst [vmem:[#allocation187_spill] sm:$0xff] %v8399_v46  ;;  %v8407_v57 = vsub.f32 %v243_v34, %v8393_v11  ;;  %651 = vmatprep.mubr.f32.mxu1 %v650_v59  ;;  %v3254_v16 = vand.u32 4294901760, %v3253_v1  ;;  %v10882_v30 = vand.u32 4294901760, %v8399_v46  ;;  %v10885_v9 = vand.u32 4294901760, %v7452_v54  ;;  %v248_v59 = vld [vmem:[%s7261_s28 + $0x1b8] sm:$0xff] }
  0xbb   : > { %3249 = vmatprep.mubr.f32.mxu0 %v3248_v38  ;;  %v10892_v22 = vand.u32 4294901760, %v7465_v58  ;;  %657 = vmatmul.mubr.f32.gmra.mrb[22].mxu1 %v656_v19  ;;  %v665_v13 = vand.u32 4294901760, %v664_v24  ;;  %v3262_v34 = vsub.f32 %v8390_v2, %v10878_v27  ;;  %v11593_v27 = vld [vmem:[#allocation30_spill] sm:$0xff]  ;;  %v8452_v32 = vand.u32 4294901760, %v247_v18 }
  0xbc   : > { %11592 = vst [vmem:[#allocation188_spill] sm:$0xff] %v8407_v57  ;;  %3255 = vmatmul.mubr.f32.gmra.mrb[22].mxu0 %v3254_v16  ;;  %v670_v1 = vsub.f32 %v8399_v46, %v10882_v30  ;;  %v1050_v19 = vsub.f32 %v7452_v54, %v10885_v9  ;;  %v10905_v0 = vand.u32 4294901760, %v11593_v27  ;;  %v11594_v16 = vand.u32 4294901760, %v8407_v57 }
  0xbd   : > { %v1057_v24 = vsub.f32 %v7465_v58, %v10892_v22  ;;  %666 = vmatprep.mubr.f32.mxu1 %v665_v13  ;;  %v3263_v38 = vand.u32 4294901760, %v3262_v34  ;;  %v11595_v30 = vand.u32 4294901760, %v7469_v60  ;;  %v8435_v9 = vand.u32 4294901760, %v246_v44  ;;  %v250_v34 = vld [vmem:[%s7261_s28 + $0x1c8] sm:$0xff]  ;;  %11600 = vst [vmem:[#allocation193_spill] sm:$0xff] %v8452_v32 }
  0xbe   : > { %v3268_v2 = vsub.f32 %v8407_v57, %v11594_v16  ;;  %v671_v11 = vand.u32 4294901760, %v670_v1  ;;  %v1051_v22 = vand.u32 4294901760, %v1050_v19  ;;  %v3655_v13 = vsub.f32 %v11593_v27, %v10905_v0 }
  0xbf   : > { %v3648_v46 = vsub.f32 %v7469_v60, %v11595_v30  ;;  %11596 = vst [vmem:[#allocation189_spill] sm:$0xff] %v8435_v9  ;;  %v1058_v17 = vand.u32 4294901760, %v1057_v24  ;;  %3264 = vmatprep.mubr.f32.mxu0 %v3263_v38  ;;  %v8445_v28 = vsub.f32 %v246_v44, %v8435_v9  ;;  %v8447_v30 = vand.u32 4294901760, %v248_v59  ;;  %v251_v44 = vld [vmem:[%s7261_s28 + $0x1d0] sm:$0xff]  ;;  %v297_v60 = vld [vmem:[%s7261_s28 + $0x340] sm:$0xff] }
  0xc0   : > { %v3269_v16 = vand.u32 4294901760, %v3268_v2  ;;  %672 = vmatmul.mubr.f32.gmra.mrb[24].mxu1 %v671_v11  ;;  %v3656_v19 = vand.u32 4294901760, %v3655_v13  ;;  %v8450_v24 = vand.u32 4294901760, %v245_v55  ;;  %v8460_v2 = vand.u32 4294901760, %v252_v25 }
  0xc1   : > { %v3649_v57 = vand.u32 4294901760, %v3648_v46  ;;  %11597 = vst [vmem:[#allocation190_spill] sm:$0xff] %v8445_v28  ;;  %11598 = vst [vmem:[#allocation191_spill] sm:$0xff] %v8447_v30  ;;  %v5824_v1 = vpack.c.bf16 %v1058_v17, %v1051_v22  ;;  %v10908_v0 = vand.u32 4294901760, %v8445_v28  ;;  %v8456_v38 = vsub.f32 %v248_v59, %v8447_v30 }
  0xc2   : > { %11599 = vst [vmem:[#allocation192_spill] sm:$0xff] %v8450_v24  ;;  %3270 = vmatmul.mubr.f32.gmra.mrb[24].mxu0 %v3269_v16  ;;  %v8458_v46 = vand.u32 4294901760, %v250_v34  ;;  %11603 = vst [vmem:[#allocation196_spill] sm:$0xff] %v8460_v2  ;;  %v8464_v22 = vsub.f32 %v245_v55, %v8450_v24  ;;  %v8467_v17 = vsub.f32 %v247_v18, %v8452_v32  ;;  %v8469_v11 = vand.u32 4294901760, %v249_v40 }
  0xc3   : > { %11601 = vst [vmem:[#allocation194_spill] sm:$0xff] %v8456_v38  ;;  %5825 = vmatpush1.bf16.msra.mxu1 %v5824_v1  ;;  %v6112_v9 = vpack.c.bf16 %v3656_v19, %v3649_v57  ;;  %v679_v59 = vsub.f32 %v8445_v28, %v10908_v0  ;;  %v10911_v13 = vand.u32 4294901760, %v8456_v38  ;;  %v8479_v1 = vsub.f32 %v252_v25, %v8460_v2 }
  0xc4   : > { %11602 = vst [vmem:[#allocation195_spill] sm:$0xff] %v8458_v46  ;;  %11604 = vst [vmem:[#allocation197_spill] sm:$0xff] %v8464_v22  ;;  %v8476_v16 = vsub.f32 %v250_v34, %v8458_v46  ;;  %5826 = vmatprep.subr.bf16.mxu1 %v11400_v61  ;;  %v10916_v57 = vand.u32 4294901760, %v8464_v22  ;;  %v10923_v18 = vand.u32 4294901760, %v8467_v17  ;;  %v8485_v55 = vsub.f32 %v249_v40, %v8469_v11 }
  0xc5   : > { %11605 = vst [vmem:[#allocation198_spill] sm:$0xff] %v8467_v17  ;;  %11606 = vst [vmem:[#allocation199_spill] sm:$0xff] %v8469_v11  ;;  %6113 = vmatpush1.bf16.msra.mxu0 %v6112_v9  ;;  %v8487_v19 = vand.u32 4294901760, %v251_v44  ;;  %v680_v0 = vand.u32 4294901760, %v679_v59  ;;  %v3277_v34 = vsub.f32 %v8456_v38, %v10911_v13  ;;  %v11613_v11 = vand.u32 4294901760, %v8479_v1 }
  0xc6   : > { %11607 = vst [vmem:[#allocation200_spill] sm:$0xff] %v8476_v16  ;;  %11608 = vst [vmem:[#allocation201_spill] sm:$0xff] %v8479_v1  ;;  %6114 = vmatprep.subr.bf16.mxu0 %v11400_v61  ;;  %v685_v40 = vsub.f32 %v8464_v22, %v10916_v57  ;;  %v3283_v9 = vsub.f32 %v8467_v17, %v10923_v18  ;;  %v10932_v59 = vand.u32 4294901760, %v8485_v55  ;;  %v11612_v28 = vand.u32 4294901760, %v8476_v16  ;;  %v11614_v22 = vld [vmem:[#allocation31_spill] sm:$0xff]  ;;  %v256_v17 = vld [vmem:[%s7261_s28 + $0x1f8] sm:$0xff] }
  0xc7   : > { %11609 = vst [vmem:[#allocation202_spill] sm:$0xff] %v8485_v55  ;;  %11610 = vst [vmem:[#allocation203_spill] sm:$0xff] %v8487_v19  ;;  %v8503_v13 = vsub.f32 %v251_v44, %v8487_v19  ;;  %681 = vmatprep.mubr.f32.mxu1 %v680_v0  ;;  %v3278_v25 = vand.u32 4294901760, %v3277_v34  ;;  %v3292_v57 = vsub.f32 %v8479_v1, %v11613_v11  ;;  %v10937_v2 = vand.u32 4294901760, %v11614_v22  ;;  %v254_v34 = vld [vmem:[%s7261_s28 + $0x1e8] sm:$0xff]  ;;  %v11615_v1 = vld [vmem:[#allocation33_spill] sm:$0xff] }
  0xc8   : > { %v694_v38 = vsub.f32 %v8476_v16, %v11612_v28  ;;  %v686_v46 = vand.u32 4294901760, %v685_v40  ;;  %v3284_v18 = vand.u32 4294901760, %v3283_v9  ;;  %v700_v44 = vsub.f32 %v8485_v55, %v10932_v59  ;;  %v253_v9 = vld [vmem:[%s7261_s28 + $0x1e0] sm:$0xff]  ;;  %v11616_v55 = vld [vmem:[#allocation35_spill] sm:$0xff] }
  0xc9   : > { %11611 = vst [vmem:[#allocation204_spill] sm:$0xff] %v8503_v13  ;;  %v10940_v0 = vand.u32 4294901760, %v8503_v13  ;;  %3279 = vmatprep.mubr.f32.mxu0 %v3278_v25  ;;  %v3293_v28 = vand.u32 4294901760, %v3292_v57  ;;  %v1064_v11 = vsub.f32 %v11614_v22, %v10937_v2  ;;  %v10943_v40 = vand.u32 4294901760, %v11615_v1  ;;  %v11617_v25 = vld [vmem:[#allocation36_spill] sm:$0xff]  ;;  %v255_v57 = vld [vmem:[%s7261_s28 + $0x1f0] sm:$0xff] }
  0xca   : > { %v695_v19 = vand.u32 4294901760, %v694_v38  ;;  %687 = vmatmul.mubr.f32.gmra.mrb[26].mxu1 %v686_v46  ;;  %3285 = vmatmul.mubr.f32.gmra.mrb[26].mxu0 %v3284_v18  ;;  %v701_v16 = vand.u32 4294901760, %v700_v44  ;;  %v10947_v32 = vand.u32 4294901760, %v11616_v55  ;;  %v8532_v46 = vand.u32 4294901760, %v254_v34  ;;  %v258_v44 = vld [vmem:[%s7261_s28 + $0x208] sm:$0xff] }
  0xcb   : > { %v3298_v59 = vsub.f32 %v8503_v13, %v10940_v0  ;;  %3294 = vmatprep.mubr.f32.mxu0 %v3293_v28  ;;  %v1065_v2 = vand.u32 4294901760, %v1064_v11  ;;  %v1071_v24 = vsub.f32 %v11615_v1, %v10943_v40  ;;  %v8534_v18 = vand.u32 4294901760, %v256_v17 }
  0xcc   : > { %696 = vmatprep.mubr.f32.mxu1 %v695_v19  ;;  %11618 = vst [vmem:[#allocation205_spill] sm:$0xff] %v8532_v46  ;;  %v3662_v38 = vsub.f32 %v11616_v55, %v10947_v32  ;;  %v11620_v13 = vand.u32 4294901760, %v11617_v25  ;;  %v8543_v28 = vand.u32 4294901760, %v253_v9  ;;  %v8546_v40 = vsub.f32 %v254_v34, %v8532_v46 }
  0xcd   : > { %11619 = vst [vmem:[#allocation206_spill] sm:$0xff] %v8534_v18  ;;  %v3299_v0 = vand.u32 4294901760, %v3298_v59  ;;  %v1072_v11 = vand.u32 4294901760, %v1071_v24  ;;  %v8549_v30 = vsub.f32 %v256_v17, %v8534_v18  ;;  %v8551_v1 = vand.u32 4294901760, %v255_v57  ;;  %v260_v59 = vld [vmem:[%s7261_s28 + $0x218] sm:$0xff]  ;;  %v257_v24 = vld [vmem:[%s7261_s28 + $0x200] sm:$0xff] }
  0xce   : > { %v3669_v19 = vsub.f32 %v11617_v25, %v11620_v13  ;;  %11621 = vst [vmem:[#allocation207_spill] sm:$0xff] %v8543_v28  ;;  %11622 = vst [vmem:[#allocation208_spill] sm:$0xff] %v8546_v40  ;;  %702 = vmatmul.mubr.f32.gmra.mrb[28].mxu1 %v701_v16  ;;  %v3663_v32 = vand.u32 4294901760, %v3662_v38  ;;  %v8555_v22 = vsub.f32 %v253_v9, %v8543_v28  ;;  %v8557_v13 = vand.u32 4294901760, %v258_v44  ;;  %v259_v18 = vld [vmem:[%s7261_s28 + $0x210] sm:$0xff]  ;;  %v268_v28 = vld [vmem:[%s7261_s28 + $0x258] sm:$0xff] }
  0xcf   : > { %11623 = vst [vmem:[#allocation209_spill] sm:$0xff] %v8549_v30  ;;  %11624 = vst [vmem:[#allocation210_spill] sm:$0xff] %v8551_v1  ;;  %3300 = vmatmul.mubr.f32.gmra.mrb[28].mxu0 %v3299_v0  ;;  %v5827_v25 = vpack.c.bf16 %v1072_v11, %v1065_v2  ;;  %v10958_v34 = vand.u32 4294901760, %v8546_v40  ;;  %v10957_v46 = vand.u32 4294901760, %v8549_v30  ;;  %v8563_v17 = vsub.f32 %v255_v57, %v8551_v1 }
  0xd0   : > { %v3670_v55 = vand.u32 4294901760, %v3669_v19  ;;  %11625 = vst [vmem:[#allocation211_spill] sm:$0xff] %v8555_v22  ;;  %11626 = vst [vmem:[#allocation212_spill] sm:$0xff] %v8557_v13  ;;  %v10959_v16 = vand.u32 4294901760, %v8555_v22  ;;  %v8568_v0 = vsub.f32 %v258_v44, %v8557_v13  ;;  %v8570_v9 = vand.u32 4294901760, %v260_v59 }
  0xd1   : > { %11627 = vst [vmem:[#allocation213_spill] sm:$0xff] %v8563_v17  ;;  %5828 = vmatpush1.bf16.msra.mxu1 %v5827_v25  ;;  %v709_v2 = vsub.f32 %v8546_v40, %v10958_v34  ;;  %v3307_v38 = vsub.f32 %v8549_v30, %v10957_v46  ;;  %v10964_v57 = vand.u32 4294901760, %v8563_v17  ;;  %v8579_v19 = vand.u32 4294901760, %v257_v24 }
  0xd2   : > { %v6115_v29 = vpack.c.bf16 %v3670_v55, %v3663_v32  ;;  %11628 = vst [vmem:[#allocation214_spill] sm:$0xff] %v8568_v0  ;;  %11629 = vst [vmem:[#allocation215_spill] sm:$0xff] %v8570_v9  ;;  %v715_v32 = vsub.f32 %v8555_v22, %v10959_v16  ;;  %v10971_v55 = vand.u32 4294901760, %v8568_v0  ;;  %v8586_v25 = vsub.f32 %v260_v59, %v8570_v9  ;;  %v263_v9 = vld [vmem:[%s7261_s28 + $0x230] sm:$0xff] }
  0xd3   : > { %11630 = vst [vmem:[#allocation216_spill] sm:$0xff] %v8579_v19  ;;  %5829 = vmatprep.subr.bf16.mxu1 %v11400_v61  ;;  %v8589_v44 = vand.u32 4294901760, %v259_v18  ;;  %v710_v11 = vand.u32 4294901760, %v709_v2  ;;  %v3308_v46 = vand.u32 4294901760, %v3307_v38  ;;  %v8595_v34 = vsub.f32 %v257_v24, %v8579_v19  ;;  %v11635_v24 = vld [vmem:[#allocation38_spill] sm:$0xff] }
  0xd4   : > { %6116 = vmatpush1.bf16.msra.mxu0 %v6115_v29  ;;  %11631 = vst [vmem:[#allocation217_spill] sm:$0xff] %v8586_v25  ;;  %v3313_v29 = vsub.f32 %v8563_v17, %v10964_v57  ;;  %v716_v16 = vand.u32 4294901760, %v715_v32  ;;  %v724_v59 = vsub.f32 %v8568_v0, %v10971_v55  ;;  %v10972_v22 = vand.u32 4294901760, %v8586_v25  ;;  %v11636_v17 = vld [vmem:[#allocation39_spill] sm:$0xff]  ;;  %v262_v32 = vld [vmem:[%s7261_s28 + $0x228] sm:$0xff] }
  0xd5   : > { %11632 = vst [vmem:[#allocation218_spill] sm:$0xff] %v8589_v44  ;;  %11633 = vst [vmem:[#allocation219_spill] sm:$0xff] %v8595_v34  ;;  %6117 = vmatprep.subr.bf16.mxu0 %v11400_v61  ;;  %v8603_v30 = vsub.f32 %v259_v18, %v8589_v44  ;;  %711 = vmatprep.mubr.f32.mxu1 %v710_v11  ;;  %v10977_v38 = vand.u32 4294901760, %v8595_v34  ;;  %v10980_v57 = vand.u32 4294901760, %v11635_v24  ;;  %v10987_v40 = vand.u32 4294901760, %v11636_v17  ;;  %v264_v11 = vld [vmem:[%s7261_s28 + $0x238] sm:$0xff] }
  0xd6   : > { %3309 = vmatprep.mubr.f32.mxu0 %v3308_v46  ;;  %v3314_v2 = vand.u32 4294901760, %v3313_v29  ;;  %717 = vmatmul.mubr.f32.gmra.mrb[30].mxu1 %v716_v16  ;;  %v725_v19 = vand.u32 4294901760, %v724_v59  ;;  %v3322_v18 = vsub.f32 %v8586_v25, %v10972_v22  ;;  %v11637_v46 = vld [vmem:[#allocation40_spill] sm:$0xff]  ;;  %v11638_v22 = vld [vmem:[#allocation42_spill] sm:$0xff]  ;;  %v261_v44 = vld [vmem:[%s7261_s28 + $0x220] sm:$0xff] }
  0xd7   : > { %11634 = vst [vmem:[#allocation220_spill] sm:$0xff] %v8603_v30  ;;  %v730_v29 = vsub.f32 %v8595_v34, %v10977_v38  ;;  %v1078_v16 = vsub.f32 %v11635_v24, %v10980_v57  ;;  %v1085_v59 = vsub.f32 %v11636_v17, %v10987_v40  ;;  %v10997_v25 = vand.u32 4294901760, %v11638_v22 }
  0xd8   : > { %3315 = vmatmul.mubr.f32.gmra.mrb[30].mxu0 %v3314_v2  ;;  %726 = vmatprep.mubr.f32.mxu1 %v725_v19  ;;  %v3323_v55 = vand.u32 4294901760, %v3322_v18  ;;  %v11639_v2 = vand.u32 4294901760, %v8603_v30  ;;  %v11640_v38 = vand.u32 4294901760, %v11637_v46  ;;  %v8631_v57 = vand.u32 4294901760, %v262_v32  ;;  %v266_v18 = vld [vmem:[%s7261_s28 + $0x248] sm:$0xff] }
  0xd9   : > { %v731_v13 = vand.u32 4294901760, %v730_v29  ;;  %v1079_v40 = vand.u32 4294901760, %v1078_v16  ;;  %v1086_v1 = vand.u32 4294901760, %v1085_v59  ;;  %v3683_v19 = vsub.f32 %v11638_v22, %v10997_v25 }
  0xda   : > { %v3328_v0 = vsub.f32 %v8603_v30, %v11639_v2  ;;  %v3676_v34 = vsub.f32 %v11637_v46, %v11640_v38  ;;  %11641 = vst [vmem:[#allocation221_spill] sm:$0xff] %v8631_v57  ;;  %3324 = vmatprep.mubr.f32.mxu0 %v3323_v55  ;;  %v8641_v17 = vsub.f32 %v262_v32, %v8631_v57  ;;  %v8643_v38 = vand.u32 4294901760, %v264_v11  ;;  %v265_v46 = vld [vmem:[%s7261_s28 + $0x240] sm:$0xff]  ;;  %v267_v32 = vld [vmem:[%s7261_s28 + $0x250] sm:$0xff] }
  0xdb   : > { %732 = vmatmul.mubr.f32.gmra.mrb[32].mxu1 %v731_v13  ;;  %v5830_v29 = vpack.c.bf16 %v1086_v1, %v1079_v40  ;;  %v3684_v16 = vand.u32 4294901760, %v3683_v19  ;;  %v8646_v59 = vand.u32 4294901760, %v261_v44  ;;  %v8648_v24 = vand.u32 4294901760, %v263_v9 }
  0xdc   : > { %v3329_v2 = vand.u32 4294901760, %v3328_v0  ;;  %v3677_v30 = vand.u32 4294901760, %v3676_v34  ;;  %11642 = vst [vmem:[#allocation222_spill] sm:$0xff] %v8641_v17  ;;  %11643 = vst [vmem:[#allocation223_spill] sm:$0xff] %v8643_v38  ;;  %v11000_v25 = vand.u32 4294901760, %v8641_v17  ;;  %v8652_v55 = vsub.f32 %v264_v11, %v8643_v38 }
  0xdd   : > { %11644 = vst [vmem:[#allocation224_spill] sm:$0xff] %v8646_v59  ;;  %11645 = vst [vmem:[#allocation225_spill] sm:$0xff] %v8648_v24  ;;  %v8654_v34 = vand.u32 4294901760, %v266_v18  ;;  %v8656_v0 = vand.u32 4294901760, %v268_v28  ;;  %5831 = vmatpush1.bf16.msra.mxu1 %v5830_v29  ;;  %v8660_v1 = vsub.f32 %v261_v44, %v8646_v59  ;;  %v8663_v40 = vsub.f32 %v263_v9, %v8648_v24 }
  0xde   : > { %3330 = vmatmul.mubr.f32.gmra.mrb[32].mxu0 %v3329_v2  ;;  %11646 = vst [vmem:[#allocation226_spill] sm:$0xff] %v8652_v55  ;;  %v6118_v57 = vpack.c.bf16 %v3684_v16, %v3677_v30  ;;  %v8665_v13 = vand.u32 4294901760, %v265_v46  ;;  %v739_v11 = vsub.f32 %v8641_v17, %v11000_v25  ;;  %v11003_v19 = vand.u32 4294901760, %v8652_v55  ;;  %5832 = vmatprep.subr.bf16.mxu1 %v11400_v61 }
  0xdf   : > { %11647 = vst [vmem:[#allocation227_spill] sm:$0xff] %v8654_v34  ;;  %11648 = vst [vmem:[#allocation228_spill] sm:$0xff] %v8656_v0  ;;  %v8672_v2 = vsub.f32 %v266_v18, %v8654_v34  ;;  %v8675_v29 = vsub.f32 %v268_v28, %v8656_v0  ;;  %v11008_v30 = vand.u32 4294901760, %v8660_v1  ;;  %v11015_v9 = vand.u32 4294901760, %v8663_v40 }
  0xe0   : > { %11649 = vst [vmem:[#allocation229_spill] sm:$0xff] %v8660_v1  ;;  %11650 = vst [vmem:[#allocation230_spill] sm:$0xff] %v8663_v40  ;;  %6119 = vmatpush1.bf16.msra.mxu0 %v6118_v57  ;;  %v8681_v44 = vsub.f32 %v265_v46, %v8665_v13  ;;  %v8683_v16 = vand.u32 4294901760, %v267_v32  ;;  %v740_v25 = vand.u32 4294901760, %v739_v11  ;;  %v3337_v18 = vsub.f32 %v8652_v55, %v11003_v19 }
  0xe1   : > { %11651 = vst [vmem:[#allocation231_spill] sm:$0xff] %v8665_v13  ;;  %11652 = vst [vmem:[#allocation232_spill] sm:$0xff] %v8672_v2  ;;  %6120 = vmatprep.subr.bf16.mxu0 %v11400_v61  ;;  %v745_v57 = vsub.f32 %v8660_v1, %v11008_v30  ;;  %v3343_v46 = vsub.f32 %v8663_v40, %v11015_v9  ;;  %v11657_v17 = vand.u32 4294901760, %v8672_v2  ;;  %v11658_v13 = vand.u32 4294901760, %v8675_v29  ;;  %v11659_v1 = vld [vmem:[#allocation44_spill] sm:$0xff] }
  0xe2   : > { %11653 = vst [vmem:[#allocation233_spill] sm:$0xff] %v8675_v29  ;;  %11654 = vst [vmem:[#allocation234_spill] sm:$0xff] %v8681_v44  ;;  %v11024_v11 = vand.u32 4294901760, %v8681_v44  ;;  %v8699_v19 = vsub.f32 %v267_v32, %v8683_v16  ;;  %741 = vmatprep.mubr.f32.mxu1 %v740_v25  ;;  %v3338_v28 = vand.u32 4294901760, %v3337_v18  ;;  %v11029_v0 = vand.u32 4294901760, %v11659_v1  ;;  %v270_v18 = vld [vmem:[%s7261_s28 + $0x268] sm:$0xff] }
  0xe3   : > { %11655 = vst [vmem:[#allocation235_spill] sm:$0xff] %v8683_v16  ;;  %v754_v55 = vsub.f32 %v8672_v2, %v11657_v17  ;;  %v3352_v30 = vsub.f32 %v8675_v29, %v11658_v13  ;;  %v746_v34 = vand.u32 4294901760, %v745_v57  ;;  %v3344_v9 = vand.u32 4294901760, %v3343_v46  ;;  %v272_v40 = vld [vmem:[%s7261_s28 + $0x278] sm:$0xff]  ;;  %v11660_v29 = vld [vmem:[#allocation45_spill] sm:$0xff] }
  0xe4   : > { %11656 = vst [vmem:[#allocation236_spill] sm:$0xff] %v8699_v19  ;;  %v760_v32 = vsub.f32 %v8681_v44, %v11024_v11  ;;  %v11032_v25 = vand.u32 4294901760, %v8699_v19  ;;  %3339 = vmatprep.mubr.f32.mxu0 %v3338_v28  ;;  %v1092_v13 = vsub.f32 %v11659_v1, %v11029_v0  ;;  %v11035_v57 = vand.u32 4294901760, %v11660_v29  ;;  %v269_v46 = vld [vmem:[%s7261_s28 + $0x260] sm:$0xff]  ;;  %v11661_v44 = vld [vmem:[#allocation47_spill] sm:$0xff]  ;;  %v11662_v28 = vld [vmem:[#allocation48_spill] sm:$0xff] }
  0xe5   : > { %v755_v16 = vand.u32 4294901760, %v754_v55  ;;  %v3353_v17 = vand.u32 4294901760, %v3352_v30  ;;  %747 = vmatmul.mubr.f32.gmra.mrb[34].mxu1 %v746_v34  ;;  %3345 = vmatmul.mubr.f32.gmra.mrb[34].mxu0 %v3344_v9  ;;  %v11039_v24 = vand.u32 4294901760, %v11661_v44  ;;  %v271_v30 = vld [vmem:[%s7261_s28 + $0x270] sm:$0xff]  ;;  %v8728_v34 = vand.u32 4294901760, %v270_v18 }
  0xe6   : > { %v761_v2 = vand.u32 4294901760, %v760_v32  ;;  %v3358_v11 = vsub.f32 %v8699_v19, %v11032_v25  ;;  %v1093_v0 = vand.u32 4294901760, %v1092_v13  ;;  %v1099_v59 = vsub.f32 %v11660_v29, %v11035_v57  ;;  %v274_v32 = vld [vmem:[%s7261_s28 + $0x288] sm:$0xff] }
  0xe7   : > { %756 = vmatprep.mubr.f32.mxu1 %v755_v16  ;;  %3354 = vmatprep.mubr.f32.mxu0 %v3353_v17  ;;  %11663 = vst [vmem:[#allocation237_spill] sm:$0xff] %v8728_v34  ;;  %v8730_v9 = vand.u32 4294901760, %v272_v40  ;;  %v3690_v55 = vsub.f32 %v11661_v44, %v11039_v24  ;;  %v11665_v19 = vand.u32 4294901760, %v11662_v28  ;;  %v8739_v17 = vand.u32 4294901760, %v269_v46 }
  0xe8   : > { %v3359_v25 = vand.u32 4294901760, %v3358_v11  ;;  %v1100_v13 = vand.u32 4294901760, %v1099_v59  ;;  %v8742_v57 = vsub.f32 %v270_v18, %v8728_v34  ;;  %v8747_v29 = vand.u32 4294901760, %v271_v30  ;;  %v276_v11 = vld [vmem:[%s7261_s28 + $0x298] sm:$0xff]  ;;  %v273_v59 = vld [vmem:[%s7261_s28 + $0x280] sm:$0xff] }
  0xe9   : > { %11664 = vst [vmem:[#allocation238_spill] sm:$0xff] %v8730_v9  ;;  %v3697_v16 = vsub.f32 %v11662_v28, %v11665_v19  ;;  %11666 = vst [vmem:[#allocation239_spill] sm:$0xff] %v8739_v17  ;;  %v8745_v38 = vsub.f32 %v272_v40, %v8730_v9  ;;  %762 = vmatmul.mubr.f32.gmra.mrb[36].mxu1 %v761_v2  ;;  %v3691_v24 = vand.u32 4294901760, %v3690_v55  ;;  %v8753_v19 = vand.u32 4294901760, %v274_v32  ;;  %v275_v9 = vld [vmem:[%s7261_s28 + $0x290] sm:$0xff] }
  0xea   : > { %11667 = vst [vmem:[#allocation240_spill] sm:$0xff] %v8742_v57  ;;  %11669 = vst [vmem:[#allocation242_spill] sm:$0xff] %v8747_v29  ;;  %3360 = vmatmul.mubr.f32.gmra.mrb[36].mxu0 %v3359_v25  ;;  %v8751_v1 = vsub.f32 %v269_v46, %v8739_v17  ;;  %v5833_v28 = vpack.c.bf16 %v1100_v13, %v1093_v0  ;;  %v11049_v18 = vand.u32 4294901760, %v8742_v57  ;;  %v8766_v46 = vand.u32 4294901760, %v276_v11  ;;  %v284_v17 = vld [vmem:[%s7261_s28 + $0x2d8] sm:$0xff] }
  0xeb   : > { %11668 = vst [vmem:[#allocation241_spill] sm:$0xff] %v8745_v38  ;;  %v3698_v44 = vand.u32 4294901760, %v3697_v16  ;;  %11671 = vst [vmem:[#allocation244_spill] sm:$0xff] %v8753_v19  ;;  %v11048_v34 = vand.u32 4294901760, %v8745_v38  ;;  %v8759_v40 = vsub.f32 %v271_v30, %v8747_v29  ;;  %v8764_v25 = vsub.f32 %v274_v32, %v8753_v19 }
  0xec   : > { %11670 = vst [vmem:[#allocation243_spill] sm:$0xff] %v8751_v1  ;;  %v11050_v2 = vand.u32 4294901760, %v8751_v1  ;;  %11674 = vst [vmem:[#allocation247_spill] sm:$0xff] %v8766_v46  ;;  %5834 = vmatpush1.bf16.msra.mxu1 %v5833_v28  ;;  %v769_v0 = vsub.f32 %v8742_v57, %v11049_v18  ;;  %v8775_v16 = vand.u32 4294901760, %v273_v59  ;;  %v8782_v28 = vsub.f32 %v276_v11, %v8766_v46  ;;  %v279_v46 = vld [vmem:[%s7261_s28 + $0x2b0] sm:$0xff] }
  0xed   : > { %11672 = vst [vmem:[#allocation245_spill] sm:$0xff] %v8759_v40  ;;  %v6121_v22 = vpack.c.bf16 %v3698_v44, %v3691_v24  ;;  %11673 = vst [vmem:[#allocation246_spill] sm:$0xff] %v8764_v25  ;;  %v3367_v55 = vsub.f32 %v8745_v38, %v11048_v34  ;;  %v11055_v30 = vand.u32 4294901760, %v8759_v40  ;;  %v11062_v44 = vand.u32 4294901760, %v8764_v25  ;;  %5835 = vmatprep.subr.bf16.mxu1 %v11400_v61 }
  0xee   : > { %11675 = vst [vmem:[#allocation248_spill] sm:$0xff] %v8775_v16  ;;  %v775_v24 = vsub.f32 %v8751_v1, %v11050_v2  ;;  %11676 = vst [vmem:[#allocation249_spill] sm:$0xff] %v8782_v28  ;;  %v8785_v32 = vand.u32 4294901760, %v275_v9  ;;  %v770_v13 = vand.u32 4294901760, %v769_v0  ;;  %v8791_v18 = vsub.f32 %v273_v59, %v8775_v16  ;;  %v11680_v59 = vld [vmem:[#allocation49_spill] sm:$0xff] }
  0xef   : > { %6122 = vmatpush1.bf16.msra.mxu0 %v6121_v22  ;;  %v3368_v34 = vand.u32 4294901760, %v3367_v55  ;;  %v3373_v22 = vsub.f32 %v8759_v40, %v11055_v30  ;;  %v784_v11 = vsub.f32 %v8764_v25, %v11062_v44  ;;  %v11063_v1 = vand.u32 4294901760, %v8782_v28  ;;  %v11681_v40 = vld [vmem:[#allocation51_spill] sm:$0xff] }
  0xf0   : > { %11677 = vst [vmem:[#allocation250_spill] sm:$0xff] %v8785_v32  ;;  %11678 = vst [vmem:[#allocation251_spill] sm:$0xff] %v8791_v18  ;;  %6123 = vmatprep.subr.bf16.mxu0 %v11400_v61  ;;  %v776_v2 = vand.u32 4294901760, %v775_v24  ;;  %v8799_v38 = vsub.f32 %v275_v9, %v8785_v32  ;;  %771 = vmatprep.mubr.f32.mxu1 %v770_v13  ;;  %v11068_v55 = vand.u32 4294901760, %v8791_v18  ;;  %v11071_v30 = vand.u32 4294901760, %v11680_v59  ;;  %v278_v24 = vld [vmem:[%s7261_s28 + $0x2a8] sm:$0xff] }
  0xf1   : > { %3369 = vmatprep.mubr.f32.mxu0 %v3368_v34  ;;  %v3374_v0 = vand.u32 4294901760, %v3373_v22  ;;  %v11078_v57 = vand.u32 4294901760, %v11681_v40  ;;  %v785_v16 = vand.u32 4294901760, %v784_v11  ;;  %v3382_v9 = vsub.f32 %v8782_v28, %v11063_v1  ;;  %v11682_v34 = vld [vmem:[#allocation53_spill] sm:$0xff]  ;;  %v11683_v1 = vld [vmem:[#allocation54_spill] sm:$0xff]  ;;  %v280_v13 = vld [vmem:[%s7261_s28 + $0x2b8] sm:$0xff] }
  0xf2   : > { %11679 = vst [vmem:[#allocation252_spill] sm:$0xff] %v8799_v38  ;;  %777 = vmatmul.mubr.f32.gmra.mrb[38].mxu1 %v776_v2  ;;  %v790_v22 = vsub.f32 %v8791_v18, %v11068_v55  ;;  %v1106_v2 = vsub.f32 %v11680_v59, %v11071_v30  ;;  %v11088_v28 = vand.u32 4294901760, %v11683_v1  ;;  %v11685_v55 = vand.u32 4294901760, %v11682_v34  ;;  %v277_v32 = vld [vmem:[%s7261_s28 + $0x2a0] sm:$0xff] }
  0xf3   : > { %3375 = vmatmul.mubr.f32.gmra.mrb[38].mxu0 %v3374_v0  ;;  %v1113_v11 = vsub.f32 %v11681_v40, %v11078_v57  ;;  %786 = vmatprep.mubr.f32.mxu1 %v785_v16  ;;  %v3383_v44 = vand.u32 4294901760, %v3382_v9  ;;  %v11684_v0 = vand.u32 4294901760, %v8799_v38  ;;  %v8827_v30 = vand.u32 4294901760, %v278_v24  ;;  %v282_v9 = vld [vmem:[%s7261_s28 + $0x2c8] sm:$0xff] }
  0xf4   : > { %v3704_v18 = vsub.f32 %v11682_v34, %v11685_v55  ;;  %v791_v19 = vand.u32 4294901760, %v790_v22  ;;  %v1107_v57 = vand.u32 4294901760, %v1106_v2  ;;  %v3711_v16 = vsub.f32 %v11683_v1, %v11088_v28  ;;  %v281_v34 = vld [vmem:[%s7261_s28 + $0x2c0] sm:$0xff] }
  0xf5   : > { %v3388_v25 = vsub.f32 %v8799_v38, %v11684_v0  ;;  %11686 = vst [vmem:[#allocation253_spill] sm:$0xff] %v8827_v30  ;;  %v1114_v29 = vand.u32 4294901760, %v1113_v11  ;;  %3384 = vmatprep.mubr.f32.mxu0 %v3383_v44  ;;  %v8837_v40 = vsub.f32 %v278_v24, %v8827_v30  ;;  %v8839_v55 = vand.u32 4294901760, %v280_v13  ;;  %v283_v24 = vld [vmem:[%s7261_s28 + $0x2d0] sm:$0xff] }
  0xf6   : > { %v3705_v38 = vand.u32 4294901760, %v3704_v18  ;;  %792 = vmatmul.mubr.f32.gmra.mrb[40].mxu1 %v791_v19  ;;  %v3712_v2 = vand.u32 4294901760, %v3711_v16  ;;  %v8842_v11 = vand.u32 4294901760, %v277_v32  ;;  %v8844_v59 = vand.u32 4294901760, %v279_v46 }
  0xf7   : > { %v3389_v0 = vand.u32 4294901760, %v3388_v25  ;;  %11687 = vst [vmem:[#allocation254_spill] sm:$0xff] %v8837_v40  ;;  %11688 = vst [vmem:[#allocation255_spill] sm:$0xff] %v8839_v55  ;;  %v5836_v22 = vpack.c.bf16 %v1114_v29, %v1107_v57  ;;  %v11091_v28 = vand.u32 4294901760, %v8837_v40  ;;  %v8848_v44 = vsub.f32 %v280_v13, %v8839_v55 }
  0xf8   : > { %11689 = vst [vmem:[#allocation256_spill] sm:$0xff] %v8842_v11  ;;  %11690 = vst [vmem:[#allocation257_spill] sm:$0xff] %v8844_v59  ;;  %v8850_v18 = vand.u32 4294901760, %v282_v9  ;;  %v8852_v25 = vand.u32 4294901760, %v284_v17  ;;  %v6124_v30 = vpack.c.bf16 %v3712_v2, %v3705_v38  ;;  %v8856_v29 = vsub.f32 %v277_v32, %v8842_v11 }
  0xf9   : > { %3390 = vmatmul.mubr.f32.gmra.mrb[40].mxu0 %v3389_v0  ;;  %11691 = vst [vmem:[#allocation258_spill] sm:$0xff] %v8848_v44  ;;  %5837 = vmatpush1.bf16.msra.mxu1 %v5836_v22  ;;  %v8859_v57 = vsub.f32 %v279_v46, %v8844_v59  ;;  %v8861_v19 = vand.u32 4294901760, %v281_v34  ;;  %v799_v13 = vsub.f32 %v8837_v40, %v11091_v28  ;;  %v11094_v16 = vand.u32 4294901760, %v8848_v44 }
  0xfa   : > { %11692 = vst [vmem:[#allocation259_spill] sm:$0xff] %v8850_v18  ;;  %11693 = vst [vmem:[#allocation260_spill] sm:$0xff] %v8852_v25  ;;  %v8868_v0 = vsub.f32 %v282_v9, %v8850_v18  ;;  %v8871_v22 = vsub.f32 %v284_v17, %v8852_v25  ;;  %5838 = vmatprep.subr.bf16.mxu1 %v11400_v61  ;;  %6125 = vmatpush1.bf16.msra.mxu0 %v6124_v30  ;;  %v11099_v38 = vand.u32 4294901760, %v8856_v29 }
  0xfb   : > { %11694 = vst [vmem:[#allocation261_spill] sm:$0xff] %v8856_v29  ;;  %11695 = vst [vmem:[#allocation262_spill] sm:$0xff] %v8859_v57  ;;  %v11106_v46 = vand.u32 4294901760, %v8859_v57  ;;  %v8877_v32 = vsub.f32 %v281_v34, %v8861_v19  ;;  %v8879_v2 = vand.u32 4294901760, %v283_v24  ;;  %v800_v28 = vand.u32 4294901760, %v799_v13  ;;  %6126 = vmatprep.subr.bf16.mxu0 %v11400_v61 }
  0xfc   : > { %11696 = vst [vmem:[#allocation263_spill] sm:$0xff] %v8861_v19  ;;  %11697 = vst [vmem:[#allocation264_spill] sm:$0xff] %v8868_v0  ;;  %v3397_v9 = vsub.f32 %v8848_v44, %v11094_v16  ;;  %v805_v30 = vsub.f32 %v8856_v29, %v11099_v38  ;;  %v11702_v40 = vand.u32 4294901760, %v8868_v0  ;;  %v11703_v19 = vand.u32 4294901760, %v8871_v22  ;;  %v11704_v29 = vld [vmem:[#allocation55_spill] sm:$0xff] }
  0xfd   : > { %11698 = vst [vmem:[#allocation265_spill] sm:$0xff] %v8871_v22  ;;  %11699 = vst [vmem:[#allocation266_spill] sm:$0xff] %v8877_v32  ;;  %v3403_v34 = vsub.f32 %v8859_v57, %v11106_v46  ;;  %v11115_v13 = vand.u32 4294901760, %v8877_v32  ;;  %v8895_v16 = vsub.f32 %v283_v24, %v8879_v2  ;;  %801 = vmatprep.mubr.f32.mxu1 %v800_v28  ;;  %v11120_v25 = vand.u32 4294901760, %v11704_v29  ;;  %v288_v57 = vld [vmem:[%s7261_s28 + $0x2f8] sm:$0xff] }
  0xfe   : > { %11700 = vst [vmem:[#allocation267_spill] sm:$0xff] %v8879_v2  ;;  %v3398_v17 = vand.u32 4294901760, %v3397_v9  ;;  %v814_v44 = vsub.f32 %v8868_v0, %v11702_v40  ;;  %v3412_v38 = vsub.f32 %v8871_v22, %v11703_v19  ;;  %v806_v18 = vand.u32 4294901760, %v805_v30  ;;  %v286_v9 = vld [vmem:[%s7261_s28 + $0x2e8] sm:$0xff]  ;;  %v11705_v22 = vld [vmem:[#allocation57_spill] sm:$0xff] }
  0xff   : > { %11701 = vst [vmem:[#allocation268_spill] sm:$0xff] %v8895_v16  ;;  %v3404_v46 = vand.u32 4294901760, %v3403_v34  ;;  %v820_v24 = vsub.f32 %v8877_v32, %v11115_v13  ;;  %v11123_v28 = vand.u32 4294901760, %v8895_v16  ;;  %v1120_v19 = vsub.f32 %v11704_v29, %v11120_v25  ;;  %v285_v34 = vld [vmem:[%s7261_s28 + $0x2e0] sm:$0xff]  ;;  %v11706_v32 = vld [vmem:[#allocation58_spill] sm:$0xff] }
 0x100   : > { %3399 = vmatprep.mubr.f32.mxu0 %v3398_v17  ;;  %v815_v2 = vand.u32 4294901760, %v814_v44  ;;  %v3413_v40 = vand.u32 4294901760, %v3412_v38  ;;  %v11126_v30 = vand.u32 4294901760, %v11705_v22  ;;  %807 = vmatmul.mubr.f32.gmra.mrb[42].mxu1 %v806_v18  ;;  %v11130_v59 = vand.u32 4294901760, %v11706_v32  ;;  %v11707_v17 = vld [vmem:[#allocation60_spill] sm:$0xff]  ;;  %v287_v38 = vld [vmem:[%s7261_s28 + $0x2f0] sm:$0xff] }
 0x101   : > { %3405 = vmatmul.mubr.f32.gmra.mrb[42].mxu0 %v3404_v46  ;;  %v821_v0 = vand.u32 4294901760, %v820_v24  ;;  %v3418_v13 = vsub.f32 %v8895_v16, %v11123_v28  ;;  %v1121_v25 = vand.u32 4294901760, %v1120_v19  ;;  %v8924_v18 = vand.u32 4294901760, %v286_v9  ;;  %v290_v24 = vld [vmem:[%s7261_s28 + $0x308] sm:$0xff] }
 0x102   : > { %816 = vmatprep.mubr.f32.mxu1 %v815_v2  ;;  %3414 = vmatprep.mubr.f32.mxu0 %v3413_v40  ;;  %v1127_v11 = vsub.f32 %v11705_v22, %v11126_v30  ;;  %v8926_v46 = vand.u32 4294901760, %v288_v57  ;;  %v3718_v44 = vsub.f32 %v11706_v32, %v11130_v59  ;;  %v11710_v16 = vand.u32 4294901760, %v11707_v17 }
 0x103   : > { %11708 = vst [vmem:[#allocation269_spill] sm:$0xff] %v8924_v18  ;;  %v3419_v28 = vand.u32 4294901760, %v3418_v13  ;;  %v8935_v40 = vand.u32 4294901760, %v285_v34  ;;  %v8938_v30 = vsub.f32 %v286_v9, %v8924_v18  ;;  %v8943_v22 = vand.u32 4294901760, %v287_v38  ;;  %v292_v13 = vld [vmem:[%s7261_s28 + $0x318] sm:$0xff] }
 0x104   : > { %11709 = vst [vmem:[#allocation270_spill] sm:$0xff] %v8926_v46  ;;  %v3725_v2 = vsub.f32 %v11707_v17, %v11710_v16  ;;  %v1128_v19 = vand.u32 4294901760, %v1127_v11  ;;  %v8941_v55 = vsub.f32 %v288_v57, %v8926_v46  ;;  %822 = vmatmul.mubr.f32.gmra.mrb[44].mxu1 %v821_v0  ;;  %v3719_v59 = vand.u32 4294901760, %v3718_v44  ;;  %v289_v11 = vld [vmem:[%s7261_s28 + $0x300] sm:$0xff]  ;;  %v291_v46 = vld [vmem:[%s7261_s28 + $0x310] sm:$0xff] }
 0x105   : > { %11711 = vst [vmem:[#allocation271_spill] sm:$0xff] %v8935_v40  ;;  %11712 = vst [vmem:[#allocation272_spill] sm:$0xff] %v8938_v30  ;;  %3420 = vmatmul.mubr.f32.gmra.mrb[44].mxu0 %v3419_v28  ;;  %v8947_v29 = vsub.f32 %v285_v34, %v8935_v40  ;;  %v8949_v16 = vand.u32 4294901760, %v290_v24  ;;  %v11140_v9 = vand.u32 4294901760, %v8938_v30  ;;  %v8955_v57 = vsub.f32 %v287_v38, %v8943_v22  ;;  %v300_v40 = vld [vmem:[%s7261_s28 + $0x358] sm:$0xff] }
 0x106   : > { %11713 = vst [vmem:[#allocation273_spill] sm:$0xff] %v8941_v55  ;;  %11714 = vst [vmem:[#allocation274_spill] sm:$0xff] %v8943_v22  ;;  %v3726_v32 = vand.u32 4294901760, %v3725_v2  ;;  %v5839_v17 = vpack.c.bf16 %v1128_v19, %v1121_v25  ;;  %v11139_v18 = vand.u32 4294901760, %v8941_v55  ;;  %v8962_v34 = vand.u32 4294901760, %v292_v13 }
 0x107   : > { %11715 = vst [vmem:[#allocation275_spill] sm:$0xff] %v8947_v29  ;;  %11716 = vst [vmem:[#allocation276_spill] sm:$0xff] %v8949_v16  ;;  %v11141_v0 = vand.u32 4294901760, %v8947_v29  ;;  %v8960_v28 = vsub.f32 %v290_v24, %v8949_v16  ;;  %v829_v25 = vsub.f32 %v8938_v30, %v11140_v9  ;;  %v11146_v38 = vand.u32 4294901760, %v8955_v57 }
 0x108   : > { %11717 = vst [vmem:[#allocation277_spill] sm:$0xff] %v8955_v57  ;;  %v6127_v1 = vpack.c.bf16 %v3726_v32, %v3719_v59  ;;  %11719 = vst [vmem:[#allocation279_spill] sm:$0xff] %v8962_v34  ;;  %5840 = vmatpush1.bf16.msra.mxu1 %v5839_v17  ;;  %v3427_v44 = vsub.f32 %v8941_v55, %v11139_v18  ;;  %v8971_v2 = vand.u32 4294901760, %v289_v11  ;;  %v8981_v24 = vand.u32 4294901760, %v291_v46 }
 0x109   : > { %11718 = vst [vmem:[#allocation278_spill] sm:$0xff] %v8960_v28  ;;  %v835_v59 = vsub.f32 %v8947_v29, %v11141_v0  ;;  %v11153_v32 = vand.u32 4294901760, %v8960_v28  ;;  %v8978_v17 = vsub.f32 %v292_v13, %v8962_v34  ;;  %5841 = vmatprep.subr.bf16.mxu1 %v11400_v61  ;;  %v830_v19 = vand.u32 4294901760, %v829_v25  ;;  %v295_v34 = vld [vmem:[%s7261_s28 + $0x330] sm:$0xff] }
 0x10a   : > { %11720 = vst [vmem:[#allocation280_spill] sm:$0xff] %v8971_v2  ;;  %6128 = vmatpush1.bf16.msra.mxu0 %v6127_v1  ;;  %11722 = vst [vmem:[#allocation282_spill] sm:$0xff] %v8981_v24  ;;  %v3428_v18 = vand.u32 4294901760, %v3427_v44  ;;  %v3433_v1 = vsub.f32 %v8955_v57, %v11146_v38  ;;  %v8987_v9 = vsub.f32 %v289_v11, %v8971_v2  ;;  %v11725_v11 = vld [vmem:[#allocation62_spill] sm:$0xff]  ;;  %v11726_v57 = vld [vmem:[#allocation63_spill] sm:$0xff]  ;;  %v9040_v58 = vand.u32 4294901760, %v295_v34 }
 0x10b   : > { %11721 = vst [vmem:[#allocation281_spill] sm:$0xff] %v8978_v17  ;;  %6129 = vmatprep.subr.bf16.mxu0 %v11400_v61  ;;  %v836_v0 = vand.u32 4294901760, %v835_v59  ;;  %v844_v13 = vsub.f32 %v8960_v28, %v11153_v32  ;;  %v11154_v29 = vand.u32 4294901760, %v8978_v17  ;;  %v8995_v55 = vsub.f32 %v291_v46, %v8981_v24  ;;  %831 = vmatprep.mubr.f32.mxu1 %v830_v19  ;;  %v294_v59 = vld [vmem:[%s7261_s28 + $0x328] sm:$0xff]  ;;  %v296_v19 = vld [vmem:[%s7261_s28 + $0x338] sm:$0xff]  ;;  %v293_v24 = vld [vmem:[%s7261_s28 + $0x320] sm:$0xff] }
 0x10c   : > { %11723 = vst [vmem:[#allocation283_spill] sm:$0xff] %v8987_v9  ;;  %3429 = vmatprep.mubr.f32.mxu0 %v3428_v18  ;;  %v3434_v25 = vand.u32 4294901760, %v3433_v1  ;;  %v11159_v44 = vand.u32 4294901760, %v8987_v9  ;;  %v11162_v38 = vand.u32 4294901760, %v11725_v11  ;;  %v11169_v30 = vand.u32 4294901760, %v11726_v57  ;;  %v11727_v18 = vld [vmem:[#allocation65_spill] sm:$0xff] }
 0x10d   : > { %11724 = vst [vmem:[#allocation284_spill] sm:$0xff] %v8995_v55  ;;  %837 = vmatmul.mubr.f32.gmra.mrb[46].mxu1 %v836_v0  ;;  %v845_v2 = vand.u32 4294901760, %v844_v13  ;;  %v3442_v46 = vsub.f32 %v8978_v17, %v11154_v29  ;;  %v11728_v29 = vld [vmem:[#allocation66_spill] sm:$0xff]  ;;  %11735 = vst [vmem:[#allocation289_spill] sm:$0xff] %v9040_v58 }
 0x10e   : > { %3435 = vmatmul.mubr.f32.gmra.mrb[46].mxu0 %v3434_v25  ;;  %v850_v1 = vsub.f32 %v8987_v9, %v11159_v44  ;;  %v1134_v0 = vsub.f32 %v11725_v11, %v11162_v38  ;;  %v1141_v13 = vsub.f32 %v11726_v57, %v11169_v30  ;;  %v11181_v17 = vand.u32 4294901760, %v11728_v29 }
 0x10f   : > { %846 = vmatprep.mubr.f32.mxu1 %v845_v2  ;;  %v3443_v32 = vand.u32 4294901760, %v3442_v46  ;;  %v11729_v25 = vand.u32 4294901760, %v8995_v55  ;;  %v11730_v44 = vand.u32 4294901760, %v11727_v18  ;;  %v9023_v38 = vand.u32 4294901760, %v294_v59  ;;  %v298_v46 = vld [vmem:[%s7261_s28 + $0x348] sm:$0xff] }
 0x110   : > { %v851_v16 = vand.u32 4294901760, %v850_v1  ;;  %v1135_v30 = vand.u32 4294901760, %v1134_v0  ;;  %v1142_v22 = vand.u32 4294901760, %v1141_v13  ;;  %v3739_v2 = vsub.f32 %v11728_v29, %v11181_v17 }
 0x111   : > { %v3448_v28 = vsub.f32 %v8995_v55, %v11729_v25  ;;  %v3732_v9 = vsub.f32 %v11727_v18, %v11730_v44  ;;  %11731 = vst [vmem:[#allocation285_spill] sm:$0xff] %v9023_v38  ;;  %3444 = vmatprep.mubr.f32.mxu0 %v3443_v32  ;;  %v9033_v27 = vsub.f32 %v294_v59, %v9023_v38  ;;  %v9035_v44 = vand.u32 4294901760, %v296_v19  ;;  %v299_v59 = vld [vmem:[%s7261_s28 + $0x350] sm:$0xff] }
 0x112   : > { %852 = vmatmul.mubr.f32.gmra.mrb[48].mxu1 %v851_v16  ;;  %v5842_v1 = vpack.c.bf16 %v1142_v22, %v1135_v30  ;;  %v3740_v0 = vand.u32 4294901760, %v3739_v2  ;;  %v9038_v13 = vand.u32 4294901760, %v293_v24  ;;  %v9055_v30 = vsub.f32 %v295_v34, %v9040_v58 }
 0x113   : > { %v3449_v25 = vand.u32 4294901760, %v3448_v28  ;;  %v3733_v55 = vand.u32 4294901760, %v3732_v9  ;;  %11732 = vst [vmem:[#allocation286_spill] sm:$0xff] %v9033_v27  ;;  %11733 = vst [vmem:[#allocation287_spill] sm:$0xff] %v9035_v44  ;;  %v11184_v17 = vand.u32 4294901760, %v9033_v27  ;;  %v9044_v32 = vsub.f32 %v296_v19, %v9035_v44 }
 0x114   : > { %11734 = vst [vmem:[#allocation288_spill] sm:$0xff] %v9038_v13  ;;  %v9046_v9 = vand.u32 4294901760, %v298_v46  ;;  %v9048_v28 = vand.u32 4294901760, %v300_v40  ;;  %5843 = vmatpush1.bf16.msra.mxu1 %v5842_v1  ;;  %v9052_v22 = vsub.f32 %v293_v24, %v9038_v13  ;;  %11740 = vst [vmem:[#allocation294_spill] sm:$0xff] %v9055_v30  ;;  %v9057_v16 = vand.u32 4294901760, %v297_v60 }
 0x115   : > { %3450 = vmatmul.mubr.f32.gmra.mrb[48].mxu0 %v3449_v25  ;;  %11736 = vst [vmem:[#allocation290_spill] sm:$0xff] %v9044_v32  ;;  %v6130_v38 = vpack.c.bf16 %v3740_v0, %v3733_v55  ;;  %v859_v19 = vsub.f32 %v9033_v27, %v11184_v17  ;;  %v11187_v2 = vand.u32 4294901760, %v9044_v32  ;;  %5844 = vmatprep.subr.bf16.mxu1 %v11400_v61  ;;  %v11199_v34 = vand.u32 4294901760, %v9055_v30 }
 0x116   : > { %11737 = vst [vmem:[#allocation291_spill] sm:$0xff] %v9046_v9  ;;  %11738 = vst [vmem:[#allocation292_spill] sm:$0xff] %v9048_v28  ;;  %v9064_v25 = vsub.f32 %v298_v46, %v9046_v9  ;;  %v9067_v1 = vsub.f32 %v300_v40, %v9048_v28  ;;  %v11192_v55 = vand.u32 4294901760, %v9052_v22  ;;  %v9073_v24 = vsub.f32 %v297_v60, %v9057_v16 }
 0x117   : > { %11739 = vst [vmem:[#allocation293_spill] sm:$0xff] %v9052_v22  ;;  %11741 = vst [vmem:[#allocation295_spill] sm:$0xff] %v9057_v16  ;;  %6131 = vmatpush1.bf16.msra.mxu0 %v6130_v38  ;;  %v9075_v0 = vand.u32 4294901760, %v299_v59  ;;  %v860_v17 = vand.u32 4294901760, %v859_v19  ;;  %v3457_v46 = vsub.f32 %v9044_v32, %v11187_v2  ;;  %v3463_v38 = vsub.f32 %v9055_v30, %v11199_v34  ;;  %v304_v30 = vld [vmem:[%s7261_s28 + $0x378] sm:$0xff] }
 0x118   : > { %11742 = vst [vmem:[#allocation296_spill] sm:$0xff] %v9064_v25  ;;  %11743 = vst [vmem:[#allocation297_spill] sm:$0xff] %v9067_v1  ;;  %6132 = vmatprep.subr.bf16.mxu0 %v11400_v61  ;;  %v865_v60 = vsub.f32 %v9052_v22, %v11192_v55  ;;  %v11208_v19 = vand.u32 4294901760, %v9073_v24  ;;  %v11747_v27 = vand.u32 4294901760, %v9064_v25  ;;  %v11748_v16 = vand.u32 4294901760, %v9067_v1  ;;  %v11749_v22 = vld [vmem:[#allocation68_spill] sm:$0xff] }
 0x119   : > { %11744 = vst [vmem:[#allocation298_spill] sm:$0xff] %v9073_v24  ;;  %11745 = vst [vmem:[#allocation299_spill] sm:$0xff] %v9075_v0  ;;  %v9091_v2 = vsub.f32 %v299_v59, %v9075_v0  ;;  %861 = vmatprep.mubr.f32.mxu1 %v860_v17  ;;  %v3458_v40 = vand.u32 4294901760, %v3457_v46  ;;  %v11213_v28 = vand.u32 4294901760, %v11749_v22  ;;  %v3464_v34 = vand.u32 4294901760, %v3463_v38  ;;  %v302_v46 = vld [vmem:[%s7261_s28 + $0x368] sm:$0xff] }
 0x11a   : > { %v874_v32 = vsub.f32 %v9064_v25, %v11747_v27  ;;  %v3472_v55 = vsub.f32 %v9067_v1, %v11748_v16  ;;  %v866_v9 = vand.u32 4294901760, %v865_v60  ;;  %v880_v59 = vsub.f32 %v9073_v24, %v11208_v19  ;;  %v11750_v1 = vld [vmem:[#allocation69_spill] sm:$0xff]  ;;  %v11751_v24 = vld [vmem:[#allocation70_spill] sm:$0xff] }
 0x11b   : > { %11746 = vst [vmem:[#allocation300_spill] sm:$0xff] %v9091_v2  ;;  %v11216_v17 = vand.u32 4294901760, %v9091_v2  ;;  %3459 = vmatprep.mubr.f32.mxu0 %v3458_v40  ;;  %v1148_v16 = vsub.f32 %v11749_v22, %v11213_v28  ;;  %v11219_v60 = vand.u32 4294901760, %v11750_v1  ;;  %v301_v38 = vld [vmem:[%s7261_s28 + $0x360] sm:$0xff]  ;;  %v11224_v58 = vand.u32 4294901760, %v11751_v24  ;;  %v11752_v40 = vld [vmem:[#allocation72_spill] sm:$0xff] }
 0x11c   : > { %v875_v0 = vand.u32 4294901760, %v874_v32  ;;  %v3473_v27 = vand.u32 4294901760, %v3472_v55  ;;  %867 = vmatmul.mubr.f32.gmra.mrb[50].mxu1 %v866_v9  ;;  %3465 = vmatmul.mubr.f32.gmra.mrb[50].mxu0 %v3464_v34  ;;  %v881_v25 = vand.u32 4294901760, %v880_v59  ;;  %v303_v55 = vld [vmem:[%s7261_s28 + $0x370] sm:$0xff]  ;;  %v9120_v9 = vand.u32 4294901760, %v302_v46  ;;  %v306_v59 = vld [vmem:[%s7261_s28 + $0x388] sm:$0xff] }
 0x11d   : > { %v3478_v19 = vsub.f32 %v9091_v2, %v11216_v17  ;;  %v1149_v28 = vand.u32 4294901760, %v1148_v16  ;;  %v1155_v13 = vsub.f32 %v11750_v1, %v11219_v60  ;;  %v9122_v34 = vand.u32 4294901760, %v304_v30 }
 0x11e   : > { %876 = vmatprep.mubr.f32.mxu1 %v875_v0  ;;  %3474 = vmatprep.mubr.f32.mxu0 %v3473_v27  ;;  %11753 = vst [vmem:[#allocation301_spill] sm:$0xff] %v9120_v9  ;;  %v3746_v32 = vsub.f32 %v11751_v24, %v11224_v58  ;;  %v11755_v2 = vand.u32 4294901760, %v11752_v40  ;;  %v9131_v27 = vand.u32 4294901760, %v301_v38  ;;  %v9134_v60 = vsub.f32 %v302_v46, %v9120_v9 }
 0x11f   : > { %11754 = vst [vmem:[#allocation302_spill] sm:$0xff] %v9122_v34  ;;  %v3479_v17 = vand.u32 4294901760, %v3478_v19  ;;  %v1156_v16 = vand.u32 4294901760, %v1155_v13  ;;  %v9137_v44 = vsub.f32 %v304_v30, %v9122_v34  ;;  %v9139_v54 = vand.u32 4294901760, %v303_v55  ;;  %v308_v19 = vld [vmem:[%s7261_s28 + $0x398] sm:$0xff]  ;;  %v305_v13 = vld [vmem:[%s7261_s28 + $0x380] sm:$0xff] }
 0x120   : > { %v3753_v0 = vsub.f32 %v11752_v40, %v11755_v2  ;;  %11756 = vst [vmem:[#allocation303_spill] sm:$0xff] %v9131_v27  ;;  %11757 = vst [vmem:[#allocation304_spill] sm:$0xff] %v9134_v60  ;;  %882 = vmatmul.mubr.f32.gmra.mrb[52].mxu1 %v881_v25  ;;  %v3747_v58 = vand.u32 4294901760, %v3746_v32  ;;  %v9143_v20 = vsub.f32 %v301_v38, %v9131_v27  ;;  %v9145_v2 = vand.u32 4294901760, %v306_v59  ;;  %v307_v34 = vld [vmem:[%s7261_s28 + $0x390] sm:$0xff]  ;;  %v313_v27 = vld [vmem:[%s7261_s28 + $0x3c0] sm:$0xff] }
 0x121   : > { %11758 = vst [vmem:[#allocation305_spill] sm:$0xff] %v9137_v44  ;;  %11759 = vst [vmem:[#allocation306_spill] sm:$0xff] %v9139_v54  ;;  %3480 = vmatmul.mubr.f32.gmra.mrb[52].mxu0 %v3479_v17  ;;  %v5845_v43 = vpack.c.bf16 %v1156_v16, %v1149_v28  ;;  %v11238_v46 = vand.u32 4294901760, %v9134_v60  ;;  %v11237_v9 = vand.u32 4294901760, %v9137_v44  ;;  %v9151_v30 = vsub.f32 %v303_v55, %v9139_v54 }
 0x122   : > { %v3754_v56 = vand.u32 4294901760, %v3753_v0  ;;  %11760 = vst [vmem:[#allocation307_spill] sm:$0xff] %v9143_v20  ;;  %11761 = vst [vmem:[#allocation308_spill] sm:$0xff] %v9145_v2  ;;  %v11239_v25 = vand.u32 4294901760, %v9143_v20  ;;  %v9156_v17 = vsub.f32 %v306_v59, %v9145_v2  ;;  %v9158_v38 = vand.u32 4294901760, %v308_v19  ;;  %v316_v2 = vld [vmem:[%s7261_s28 + $0x3d8] sm:$0xff] }
 0x123   : > { %11762 = vst [vmem:[#allocation309_spill] sm:$0xff] %v9151_v30  ;;  %5846 = vmatpush1.bf16.msra.mxu1 %v5845_v43  ;;  %v889_v28 = vsub.f32 %v9134_v60, %v11238_v46  ;;  %v3487_v32 = vsub.f32 %v9137_v44, %v11237_v9  ;;  %v11244_v55 = vand.u32 4294901760, %v9151_v30  ;;  %v9167_v0 = vand.u32 4294901760, %v305_v13 }
 0x124   : > { %v6133_v5 = vpack.c.bf16 %v3754_v56, %v3747_v58  ;;  %11763 = vst [vmem:[#allocation310_spill] sm:$0xff] %v9156_v17  ;;  %11764 = vst [vmem:[#allocation311_spill] sm:$0xff] %v9158_v38  ;;  %v895_v58 = vsub.f32 %v9143_v20, %v11239_v25  ;;  %v11252_v56 = vand.u32 4294901760, %v9156_v17  ;;  %v9174_v43 = vsub.f32 %v308_v19, %v9158_v38 }
 0x125   : > { %11765 = vst [vmem:[#allocation312_spill] sm:$0xff] %v9167_v0  ;;  %5847 = vmatprep.subr.bf16.mxu1 %v11400_v61  ;;  %v9177_v59 = vand.u32 4294901760, %v307_v34  ;;  %v890_v16 = vand.u32 4294901760, %v889_v28  ;;  %v3488_v9 = vand.u32 4294901760, %v3487_v32  ;;  %v9183_v46 = vsub.f32 %v305_v13, %v9167_v0  ;;  %v11770_v13 = vld [vmem:[#allocation73_spill] sm:$0xff] }
 0x126   : > { %6134 = vmatpush1.bf16.msra.mxu0 %v6133_v5  ;;  %11766 = vst [vmem:[#allocation313_spill] sm:$0xff] %v9174_v43  ;;  %v3493_v5 = vsub.f32 %v9151_v30, %v11244_v55  ;;  %v896_v25 = vand.u32 4294901760, %v895_v58  ;;  %v904_v19 = vsub.f32 %v9156_v17, %v11252_v56  ;;  %v11251_v20 = vand.u32 4294901760, %v9174_v43  ;;  %v11771_v30 = vld [vmem:[#allocation75_spill] sm:$0xff]  ;;  %v310_v58 = vld [vmem:[%s7261_s28 + $0x3a8] sm:$0xff]  ;;  %v312_v56 = vld [vmem:[%s7261_s28 + $0x3b8] sm:$0xff] }
 0x127   : > { %11767 = vst [vmem:[#allocation314_spill] sm:$0xff] %v9177_v59  ;;  %11768 = vst [vmem:[#allocation315_spill] sm:$0xff] %v9183_v46  ;;  %6135 = vmatprep.subr.bf16.mxu0 %v11400_v61  ;;  %v9191_v44 = vsub.f32 %v307_v34, %v9177_v59  ;;  %891 = vmatprep.mubr.f32.mxu1 %v890_v16  ;;  %v11253_v32 = vand.u32 4294901760, %v9183_v46  ;;  %v11256_v55 = vand.u32 4294901760, %v11770_v13  ;;  %v11263_v60 = vand.u32 4294901760, %v11771_v30  ;;  %v311_v17 = vld [vmem:[%s7261_s28 + $0x3b0] sm:$0xff] }
 0x128   : > { %3489 = vmatprep.mubr.f32.mxu0 %v3488_v9  ;;  %v3494_v28 = vand.u32 4294901760, %v3493_v5  ;;  %897 = vmatmul.mubr.f32.gmra.mrb[54].mxu1 %v896_v25  ;;  %v905_v0 = vand.u32 4294901760, %v904_v19  ;;  %v3502_v34 = vsub.f32 %v9174_v43, %v11251_v20  ;;  %v11277_v20 = vand.u32 4294901760, %v7679_v21  ;;  %v309_v43 = vld [vmem:[%s7261_s28 + $0x3a0] sm:$0xff] }
 0x129   : > { %11769 = vst [vmem:[#allocation316_spill] sm:$0xff] %v9191_v44  ;;  %v11268_v16 = vand.u32 4294901760, %v9191_v44  ;;  %v910_v5 = vsub.f32 %v9183_v46, %v11253_v32  ;;  %v1162_v25 = vsub.f32 %v11770_v13, %v11256_v55  ;;  %v1169_v19 = vsub.f32 %v11771_v30, %v11263_v60 }
 0x12a   : > { %3495 = vmatmul.mubr.f32.gmra.mrb[54].mxu0 %v3494_v28  ;;  %906 = vmatprep.mubr.f32.mxu1 %v905_v0  ;;  %v3503_v9 = vand.u32 4294901760, %v3502_v34  ;;  %v11772_v32 = vand.u32 4294901760, %v7677_v23  ;;  %v9219_v55 = vand.u32 4294901760, %v310_v58  ;;  %v3767_v0 = vsub.f32 %v7679_v21, %v11277_v20  ;;  %v314_v34 = vld [vmem:[%s7261_s28 + $0x3c8] sm:$0xff] }
 0x12b   : > { %v3508_v28 = vsub.f32 %v9191_v44, %v11268_v16  ;;  %v911_v59 = vand.u32 4294901760, %v910_v5  ;;  %v1163_v60 = vand.u32 4294901760, %v1162_v25  ;;  %v1170_v38 = vand.u32 4294901760, %v1169_v19 }
 0x12c   : > { %v3760_v46 = vsub.f32 %v7677_v23, %v11772_v32  ;;  %11773 = vst [vmem:[#allocation317_spill] sm:$0xff] %v9219_v55  ;;  %3504 = vmatprep.mubr.f32.mxu0 %v3503_v9  ;;  %v9229_v54 = vsub.f32 %v310_v58, %v9219_v55  ;;  %v9231_v32 = vand.u32 4294901760, %v312_v56  ;;  %v3768_v25 = vand.u32 4294901760, %v3767_v0 }
 0x12d   : > { %v3509_v16 = vand.u32 4294901760, %v3508_v28  ;;  %912 = vmatmul.mubr.f32.gmra.mrb[56].mxu1 %v911_v59  ;;  %v5848_v5 = vpack.c.bf16 %v1170_v38, %v1163_v60  ;;  %v9234_v19 = vand.u32 4294901760, %v309_v43  ;;  %v9236_v50 = vand.u32 4294901760, %v311_v17  ;;  %v315_v28 = vld [vmem:[%s7261_s28 + $0x3d0] sm:$0xff] }
 0x12e   : > { %v3761_v44 = vand.u32 4294901760, %v3760_v46  ;;  %11774 = vst [vmem:[#allocation318_spill] sm:$0xff] %v9229_v54  ;;  %11775 = vst [vmem:[#allocation319_spill] sm:$0xff] %v9231_v32  ;;  %v11280_v20 = vand.u32 4294901760, %v9229_v54  ;;  %v9240_v9 = vsub.f32 %v312_v56, %v9231_v32  ;;  %v9242_v46 = vand.u32 4294901760, %v314_v34 }
 0x12f   : > { %11776 = vst [vmem:[#allocation320_spill] sm:$0xff] %v9234_v19  ;;  %11777 = vst [vmem:[#allocation321_spill] sm:$0xff] %v9236_v50  ;;  %3510 = vmatmul.mubr.f32.gmra.mrb[56].mxu0 %v3509_v16  ;;  %v9244_v58 = vand.u32 4294901760, %v316_v2  ;;  %5849 = vmatpush1.bf16.msra.mxu1 %v5848_v5  ;;  %v9248_v60 = vsub.f32 %v309_v43, %v9234_v19  ;;  %v9251_v38 = vsub.f32 %v311_v17, %v9236_v50 }
 0x130   : > { %11778 = vst [vmem:[#allocation322_spill] sm:$0xff] %v9240_v9  ;;  %11779 = vst [vmem:[#allocation323_spill] sm:$0xff] %v9242_v46  ;;  %v6136_v55 = vpack.c.bf16 %v3768_v25, %v3761_v44  ;;  %v9253_v59 = vand.u32 4294901760, %v313_v27  ;;  %v919_v56 = vsub.f32 %v9229_v54, %v11280_v20  ;;  %v11283_v16 = vand.u32 4294901760, %v9240_v9  ;;  %5850 = vmatprep.subr.bf16.mxu1 %v11400_v61 }
 0x131   : > { %11780 = vst [vmem:[#allocation324_spill] sm:$0xff] %v9244_v58  ;;  %11781 = vst [vmem:[#allocation325_spill] sm:$0xff] %v9248_v60  ;;  %v9260_v0 = vsub.f32 %v314_v34, %v9242_v46  ;;  %v9263_v5 = vsub.f32 %v316_v2, %v9244_v58  ;;  %v11288_v44 = vand.u32 4294901760, %v9248_v60  ;;  %v11293_v17 = vand.u32 4294901760, %v9251_v38 }
 0x132   : > { %11782 = vst [vmem:[#allocation326_spill] sm:$0xff] %v9251_v38  ;;  %11783 = vst [vmem:[#allocation327_spill] sm:$0xff] %v9253_v59  ;;  %6137 = vmatpush1.bf16.msra.mxu0 %v6136_v55  ;;  %v9269_v43 = vsub.f32 %v313_v27, %v9253_v59  ;;  %v9271_v25 = vand.u32 4294901760, %v315_v28  ;;  %v920_v20 = vand.u32 4294901760, %v919_v56  ;;  %v3517_v34 = vsub.f32 %v9240_v9, %v11283_v16 }
 0x133   : > { %11784 = vst [vmem:[#allocation328_spill] sm:$0xff] %v9260_v0  ;;  %11785 = vst [vmem:[#allocation329_spill] sm:$0xff] %v9263_v5  ;;  %6138 = vmatprep.subr.bf16.mxu0 %v11400_v61  ;;  %v925_v27 = vsub.f32 %v9248_v60, %v11288_v44  ;;  %v3523_v55 = vsub.f32 %v9251_v38, %v11293_v17  ;;  %v11789_v54 = vand.u32 4294901760, %v9260_v0  ;;  %v11790_v59 = vand.u32 4294901760, %v9263_v5  ;;  %v320_v38 = vld [vmem:[%s7261_s28 + $0x3f8] sm:$0xff] }
 0x134   : > { %11786 = vst [vmem:[#allocation330_spill] sm:$0xff] %v9269_v43  ;;  %11787 = vst [vmem:[#allocation331_spill] sm:$0xff] %v9271_v25  ;;  %v11300_v56 = vand.u32 4294901760, %v9269_v43  ;;  %v9287_v16 = vsub.f32 %v315_v28, %v9271_v25  ;;  %921 = vmatprep.mubr.f32.mxu1 %v920_v20  ;;  %v3518_v2 = vand.u32 4294901760, %v3517_v34  ;;  %v11303_v60 = vand.u32 4294901760, %v7681_v31  ;;  %v318_v34 = vld [vmem:[%s7261_s28 + $0x3e8] sm:$0xff] }
 0x135   : > { %v934_v9 = vsub.f32 %v9260_v0, %v11789_v54  ;;  %v3532_v44 = vsub.f32 %v9263_v5, %v11790_v59  ;;  %v926_v58 = vand.u32 4294901760, %v925_v27  ;;  %v3524_v17 = vand.u32 4294901760, %v3523_v55  ;;  %v317_v27 = vld [vmem:[%s7261_s28 + $0x3e0] sm:$0xff] }
 0x136   : > { %11788 = vst [vmem:[#allocation332_spill] sm:$0xff] %v9287_v16  ;;  %v940_v28 = vsub.f32 %v9269_v43, %v11300_v56  ;;  %v11306_v20 = vand.u32 4294901760, %v9287_v16  ;;  %3519 = vmatprep.mubr.f32.mxu0 %v3518_v2  ;;  %v1176_v59 = vsub.f32 %v7681_v31, %v11303_v60  ;;  %v11307_v5 = vand.u32 4294901760, %v7685_v33 }
 0x137   : > { %v935_v25 = vand.u32 4294901760, %v934_v9  ;;  %v3533_v54 = vand.u32 4294901760, %v3532_v44  ;;  %927 = vmatmul.mubr.f32.gmra.mrb[58].mxu1 %v926_v58  ;;  %3525 = vmatmul.mubr.f32.gmra.mrb[58].mxu0 %v3524_v17  ;;  %v11312_v43 = vand.u32 4294901760, %v7690_v48  ;;  %v11315_v2 = vand.u32 4294901760, %v7702_v4  ;;  %v319_v9 = vld [vmem:[%s7261_s28 + $0x3f0] sm:$0xff]  ;;  %s5756_s28 = sshll.u32 %s12674_s12, 4 }
 0x138   : > { %v941_v55 = vand.u32 4294901760, %v940_v28  ;;  %v3538_v56 = vsub.f32 %v9287_v16, %v11306_v20  ;;  %v1177_v44 = vand.u32 4294901760, %v1176_v59  ;;  %v1183_v60 = vsub.f32 %v7685_v33, %v11307_v5  ;;  %s191_s9 = scalar_lea.vmem %s10559_s2, %s5756_s28 }
 0x139   : > { %936 = vmatprep.mubr.f32.mxu1 %v935_v25  ;;  %3534 = vmatprep.mubr.f32.mxu0 %v3533_v54  ;;  %v9316_v0 = vand.u32 4294901760, %v318_v34  ;;  %v9318_v58 = vand.u32 4294901760, %v320_v38  ;;  %v3774_v28 = vsub.f32 %v7690_v48, %v11312_v43  ;;  %v3781_v20 = vsub.f32 %v7702_v4, %v11315_v2 }
 0x13a   : > { %v3539_v17 = vand.u32 4294901760, %v3538_v56  ;;  %v9326_v25 = vand.u32 4294901760, %v317_v27  ;;  %v1184_v54 = vand.u32 4294901760, %v1183_v60  ;;  %v9334_v16 = vand.u32 4294901760, %v319_v9 }
 0x13b   : > { %11791 = vst [vmem:[#allocation333_spill] sm:$0xff] %v9316_v0  ;;  %11792 = vst [vmem:[#allocation334_spill] sm:$0xff] %v9318_v58  ;;  %v9329_v59 = vsub.f32 %v318_v34, %v9316_v0  ;;  %v9332_v5 = vsub.f32 %v320_v38, %v9318_v58  ;;  %942 = vmatmul.mubr.f32.gmra.mrb[60].mxu1 %v941_v55  ;;  %v3775_v56 = vand.u32 4294901760, %v3774_v28  ;;  %v3782_v46 = vand.u32 4294901760, %v3781_v20 }
 0x13c   : > { %11793 = vst [vmem:[#allocation335_spill] sm:$0xff] %v9326_v25  ;;  %11796 = vst [vmem:[#allocation338_spill] sm:$0xff] %v9334_v16  ;;  %3540 = vmatmul.mubr.f32.gmra.mrb[60].mxu0 %v3539_v17  ;;  %v9337_v43 = vsub.f32 %v317_v27, %v9326_v25  ;;  %v5851_v50 = vpack.c.bf16 %v1184_v54, %v1177_v44  ;;  %v9342_v34 = vsub.f32 %v319_v9, %v9334_v16  ;;  %v11800_v54 = vld [vmem:[#allocation6_spill] sm:$0xff] }
 0x13d   : > { %11794 = vst [vmem:[#allocation336_spill] sm:$0xff] %v9329_v59  ;;  %11795 = vst [vmem:[#allocation337_spill] sm:$0xff] %v9332_v5  ;;  %v11320_v2 = vand.u32 4294901760, %v9329_v59  ;;  %v11319_v60 = vand.u32 4294901760, %v9332_v5  ;;  %v6139_v0 = vpack.c.bf16 %v3782_v46, %v3775_v56  ;;  %v11801_v56 = vld [vmem:[#allocation7_spill] sm:$0xff] }
 0x13e   : > { %11797 = vst [vmem:[#allocation339_spill] sm:$0xff] %v9337_v43  ;;  %11798 = vst [vmem:[#allocation340_spill] sm:$0xff] %v9342_v34  ;;  %v11318_v38 = vand.u32 4294901760, %v9337_v43  ;;  %5852 = vmatpush1.bf16.msra.mxu1 %v5851_v50  ;;  %v11321_v27 = vand.u32 4294901760, %v9342_v34 }
 0x13f   : > { %v949_v55 = vsub.f32 %v9329_v59, %v11320_v2  ;;  %v3547_v20 = vsub.f32 %v9332_v5, %v11319_v60  ;;  %6140 = vmatpush1.bf16.msra.mxu0 %v6139_v0  ;;  %5853 = vmatprep.subr.bf16.mxu1 %v11400_v61  ;;  %v11799_v0 = vld [vmem:[#allocation82_spill] sm:$0xff]  ;;  %v11802_v60 = vld [vmem:[#allocation84_spill] sm:$0xff] }
 0x140   : > { %v955_v9 = vsub.f32 %v9337_v43, %v11318_v38  ;;  %v3553_v50 = vsub.f32 %v9342_v34, %v11321_v27  ;;  %6141 = vmatprep.subr.bf16.mxu0 %v11400_v61  ;;  %v5854_v38 = vpack.c.bf16 %v11801_v56, %v11800_v54  ;;  %v11811_v27 = vld [vmem:[#allocation96_spill] sm:$0xff] }
 0x141   : > { %v950_v46 = vand.u32 4294901760, %v949_v55  ;;  %v3548_v44 = vand.u32 4294901760, %v3547_v20  ;;  %v11803_v55 = vld [vmem:[#allocation8_spill] sm:$0xff]  ;;  %v11804_v20 = vld [vmem:[#allocation10_spill] sm:$0xff] }
 0x142   : > { %v956_v17 = vand.u32 4294901760, %v955_v9  ;;  %v3554_v28 = vand.u32 4294901760, %v3553_v50  ;;  %v6142_v2 = vpack.c.bf16 %v11804_v20, %v11803_v55  ;;  %v11805_v50 = vld [vmem:[#allocation85_spill] sm:$0xff] }
 0x143   : > { %951 = vmatprep.mubr.f32.mxu1 %v950_v46  ;;  %3549 = vmatprep.mubr.f32.mxu0 %v3548_v44  ;;  %v11807_v44 = vld [vmem:[#allocation12_spill] sm:$0xff]  ;;  %v11808_v46 = vld [vmem:[#allocation13_spill] sm:$0xff] }
 0x144   : > { %957 = vmatmul.mubr.f32.gmra.mrb[62].mxu1 %v956_v17  ;;  %3555 = vmatmul.mubr.f32.gmra.mrb[62].mxu0 %v3554_v28  ;;  %v11810_v28 = vld [vmem:[#allocation15_spill] sm:$0xff]  ;;  %v11812_v9 = vld [vmem:[#allocation97_spill] sm:$0xff] }
 0x145   : > { %1187 = vmatprep.mubr.f32.mxu1 %v11799_v0  ;;  %3785 = vmatprep.mubr.f32.mxu0 %v11802_v60  ;;  %v11806_v60 = vld [vmem:[#allocation86_spill] sm:$0xff]  ;;  %v11809_v0 = vld [vmem:[#allocation95_spill] sm:$0xff]  ;;  %v6145_v17 = vpack.c.bf16 %v7343_v41, %v11810_v28 }
 0x148   : > { %1189 = vmatmul.mubr.f32.vlgmr.msra.gmra.mrb[0].mxu1 %v11805_v50  ;;  %3787 = vmatmul.mubr.f32.vlgmr.msra.gmra.mrb[0].mxu0 %v11806_v60  ;;  %v5857_v50 = vpack.c.bf16 %v11808_v46, %v11807_v44  ;;  %v11815_v60 = vld [vmem:[#allocation100_spill] sm:$0xff] }
 0x149   : > { %5855 = vmatpush1.bf16.msra.mxu1 %v5854_v38  ;;  %6143 = vmatpush1.bf16.msra.mxu0 %v6142_v2  ;;  %v11813_v38 = vld [vmem:[#allocation98_spill] sm:$0xff]  ;;  %v11814_v2 = vld [vmem:[#allocation99_spill] sm:$0xff] }
 0x14a   : > { %1194 = vmatprep.mubr.f32.mxu1 %v7762_v39  ;;  %3792 = vmatprep.mubr.f32.mxu0 %v11809_v0  ;;  %v5860_v39 = vpack.c.bf16 %v7358_v47, %v7345_v42  ;;  %v6148_v0 = vpack.c.bf16 %v7368_v51, %v7362_v49 }
 0x14b   : > { %5856 = vmatprep.subr.bf16.mxu1 %v11400_v61  ;;  %6144 = vmatprep.subr.bf16.mxu0 %v11400_v61 }
 0x14c   : > { %1196 = vmatmul.mubr.f32.gmra.mrb[2].mxu1 %v11811_v27  ;;  %3794 = vmatmul.mubr.f32.gmra.mrb[2].mxu0 %v11812_v9  ;;  %v11816_v27 = vld [vmem:[#allocation103_spill] sm:$0xff] }
 0x14d   : > { %1201 = vmatprep.mubr.f32.mxu1 %v11813_v38  ;;  %3799 = vmatprep.mubr.f32.mxu0 %v11814_v2  ;;  %v11817_v38 = vld [vmem:[#allocation110_spill] sm:$0xff]  ;;  %v11830_v2 = vld [vmem:[#allocation135_spill] sm:$0xff] }
 0x14e   : > { %5858 = vmatpush1.bf16.msra.mxu1 %v5857_v50  ;;  %6146 = vmatpush1.bf16.msra.mxu0 %v6145_v17  ;;  %v5863_v50 = vpack.c.bf16 %v7383_v62, %v7370_v53  ;;  %v6151_v17 = vpack.c.bf16 %v7398_v6, %v7385_v63 }
 0x14f   : > { %5859 = vmatprep.subr.bf16.mxu1 %v11400_v61  ;;  %6147 = vmatprep.subr.bf16.mxu0 %v11400_v61 }
 0x150   : > { %1203 = vmatmul.mubr.f32.gmra.mrb[4].mxu1 %v11815_v60  ;;  %3801 = vmatmul.mubr.f32.gmra.mrb[4].mxu0 %v11816_v27  ;;  %v11818_v60 = vld [vmem:[#allocation112_spill] sm:$0xff] }
 0x151   : > { %1208 = vmatprep.mubr.f32.mxu1 %v7891_v7  ;;  %3806 = vmatprep.mubr.f32.mxu0 %v11817_v38  ;;  %v11819_v38 = vld [vmem:[#allocation121_spill] sm:$0xff]  ;;  %v11829_v7 = vld [vmem:[#allocation30_spill] sm:$0xff] }
 0x152   : > { %5861 = vmatpush1.bf16.msra.mxu1 %v5860_v39  ;;  %6149 = vmatpush1.bf16.msra.mxu0 %v6148_v0  ;;  %v5866_v39 = vpack.c.bf16 %v7414_v12, %v7402_v8  ;;  %v6154_v0 = vpack.c.bf16 %v7420_v15, %v7418_v14 }
 0x153   : > { %5862 = vmatprep.subr.bf16.mxu1 %v11400_v61  ;;  %6150 = vmatprep.subr.bf16.mxu0 %v11400_v61 }
 0x154   : > { %1210 = vmatmul.mubr.f32.gmra.mrb[6].mxu1 %v7895_v37  ;;  %3808 = vmatmul.mubr.f32.gmra.mrb[6].mxu0 %v11818_v60  ;;  %v11820_v37 = vld [vmem:[#allocation122_spill] sm:$0xff] }
 0x155   : > { %1215 = vmatprep.mubr.f32.mxu1 %v7925_v26  ;;  %3813 = vmatprep.mubr.f32.mxu0 %v7938_v3  ;;  %v11822_v26 = vld [vmem:[#allocation128_spill] sm:$0xff] }
 0x156   : > { %5864 = vmatpush1.bf16.msra.mxu1 %v5863_v50  ;;  %6152 = vmatpush1.bf16.msra.mxu0 %v6151_v17  ;;  %v5869_v50 = vpack.c.bf16 %v7432_v36, %v7430_v35  ;;  %v11821_v17 = vld [vmem:[#allocation24_spill] sm:$0xff] }
 0x157   : > { %5865 = vmatprep.subr.bf16.mxu1 %v11400_v61  ;;  %6153 = vmatprep.subr.bf16.mxu0 %v11400_v61  ;;  %v6157_v3 = vpack.c.bf16 %v11821_v17, %v7446_v45 }
 0x158   : > { %1217 = vmatmul.mubr.f32.gmra.mrb[8].mxu1 %v11819_v38  ;;  %3815 = vmatmul.mubr.f32.gmra.mrb[8].mxu0 %v11820_v37  ;;  %v11823_v38 = vld [vmem:[#allocation129_spill] sm:$0xff]  ;;  %v11824_v37 = vld [vmem:[#allocation131_spill] sm:$0xff] }
 0x159   : > { %1222 = vmatprep.mubr.f32.mxu1 %v8033_v10  ;;  %3820 = vmatprep.mubr.f32.mxu0 %v8048_v52  ;;  %v11825_v10 = vld [vmem:[#allocation134_spill] sm:$0xff]  ;;  %v11827_v52 = vld [vmem:[#allocation27_spill] sm:$0xff] }
 0x15a   : > { %5867 = vmatpush1.bf16.msra.mxu1 %v5866_v39  ;;  %6155 = vmatpush1.bf16.msra.mxu0 %v6154_v0  ;;  %v11826_v39 = vld [vmem:[#allocation26_spill] sm:$0xff]  ;;  %v11828_v0 = vld [vmem:[#allocation29_spill] sm:$0xff] }
 0x15b   : > { %5868 = vmatprep.subr.bf16.mxu1 %v11400_v61  ;;  %6156 = vmatprep.subr.bf16.mxu0 %v11400_v61  ;;  %v5872_v60 = vpack.c.bf16 %v11827_v52, %v11826_v39  ;;  %v6160_v27 = vpack.c.bf16 %v11829_v7, %v11828_v0  ;;  %v11837_v52 = vld [vmem:[#allocation36_spill] sm:$0xff]  ;;  %v11838_v0 = vld [vmem:[#allocation143_spill] sm:$0xff]  ;;  %v12002_v39 = vld [vmem:[#allocation153_spill] sm:$0xff] }
 0x15c   : > { %1224 = vmatmul.mubr.f32.gmra.mrb[10].mxu1 %v11822_v26  ;;  %3822 = vmatmul.mubr.f32.gmra.mrb[10].mxu0 %v11823_v38  ;;  %v11831_v26 = vld [vmem:[#allocation137_spill] sm:$0xff] }
 0x15d   : > { %1229 = vmatprep.mubr.f32.mxu1 %v11824_v37  ;;  %3827 = vmatprep.mubr.f32.mxu0 %v11825_v10  ;;  %v11832_v38 = vld [vmem:[#allocation141_spill] sm:$0xff]  ;;  %v11833_v37 = vld [vmem:[#allocation142_spill] sm:$0xff] }
 0x15e   : > { %5870 = vmatpush1.bf16.msra.mxu1 %v5869_v50  ;;  %6158 = vmatpush1.bf16.msra.mxu0 %v6157_v3  ;;  %v11834_v50 = vld [vmem:[#allocation31_spill] sm:$0xff]  ;;  %v11835_v10 = vld [vmem:[#allocation33_spill] sm:$0xff] }
 0x15f   : > { %5871 = vmatprep.subr.bf16.mxu1 %v11400_v61  ;;  %6159 = vmatprep.subr.bf16.mxu0 %v11400_v61  ;;  %v5875_v9 = vpack.c.bf16 %v11835_v10, %v11834_v50  ;;  %v11836_v3 = vld [vmem:[#allocation35_spill] sm:$0xff]  ;;  %v11845_v50 = vld [vmem:[#allocation42_spill] sm:$0xff] }
 0x160   : > { %1231 = vmatmul.mubr.f32.gmra.mrb[12].mxu1 %v11830_v2  ;;  %3829 = vmatmul.mubr.f32.gmra.mrb[12].mxu0 %v11831_v26  ;;  %v6163_v7 = vpack.c.bf16 %v11837_v52, %v11836_v3  ;;  %v11839_v2 = vld [vmem:[#allocation145_spill] sm:$0xff]  ;;  %v11840_v26 = vld [vmem:[#allocation146_spill] sm:$0xff]  ;;  %v11846_v3 = vld [vmem:[#allocation152_spill] sm:$0xff] }
 0x161   : > { %1236 = vmatprep.mubr.f32.mxu1 %v11832_v38  ;;  %3834 = vmatprep.mubr.f32.mxu0 %v11833_v37  ;;  %v11841_v38 = vld [vmem:[#allocation151_spill] sm:$0xff] }
 0x162   : > { %5873 = vmatpush1.bf16.msra.mxu1 %v5872_v60  ;;  %6161 = vmatpush1.bf16.msra.mxu0 %v6160_v27  ;;  %v11842_v60 = vld [vmem:[#allocation38_spill] sm:$0xff]  ;;  %v11843_v37 = vld [vmem:[#allocation39_spill] sm:$0xff]  ;;  %v11844_v27 = vld [vmem:[#allocation40_spill] sm:$0xff] }
 0x163   : > { %5874 = vmatprep.subr.bf16.mxu1 %v11400_v61  ;;  %6162 = vmatprep.subr.bf16.mxu0 %v11400_v61  ;;  %v5878_v10 = vpack.c.bf16 %v11843_v37, %v11842_v60  ;;  %v6166_v52 = vpack.c.bf16 %v11845_v50, %v11844_v27  ;;  %v11853_v60 = vld [vmem:[#allocation48_spill] sm:$0xff] }
 0x164   : > { %1238 = vmatmul.mubr.f32.gmra.mrb[14].mxu1 %v11838_v0  ;;  %3836 = vmatmul.mubr.f32.gmra.mrb[14].mxu0 %v11839_v2  ;;  %v11847_v0 = vld [vmem:[#allocation154_spill] sm:$0xff]  ;;  %v11848_v2 = vld [vmem:[#allocation157_spill] sm:$0xff]  ;;  %v11854_v27 = vld [vmem:[#allocation160_spill] sm:$0xff] }
 0x165   : > { %1243 = vmatprep.mubr.f32.mxu1 %v11840_v26  ;;  %3841 = vmatprep.mubr.f32.mxu0 %v11841_v38  ;;  %v11849_v26 = vld [vmem:[#allocation159_spill] sm:$0xff]  ;;  %v11851_v38 = vld [vmem:[#allocation45_spill] sm:$0xff] }
 0x166   : > { %5876 = vmatpush1.bf16.msra.mxu1 %v5875_v9  ;;  %6164 = vmatpush1.bf16.msra.mxu0 %v6163_v7  ;;  %v11850_v9 = vld [vmem:[#allocation44_spill] sm:$0xff]  ;;  %v11852_v7 = vld [vmem:[#allocation47_spill] sm:$0xff] }
 0x167   : > { %5877 = vmatprep.subr.bf16.mxu1 %v11400_v61  ;;  %6165 = vmatprep.subr.bf16.mxu0 %v11400_v61  ;;  %v5881_v37 = vpack.c.bf16 %v11851_v38, %v11850_v9  ;;  %v6169_v50 = vpack.c.bf16 %v11853_v60, %v11852_v7  ;;  %v11861_v9 = vld [vmem:[#allocation54_spill] sm:$0xff]  ;;  %v11862_v7 = vld [vmem:[#allocation169_spill] sm:$0xff] }
 0x168   : > { %1245 = vmatmul.mubr.f32.gmra.mrb[16].mxu1 %v11846_v3  ;;  %3843 = vmatmul.mubr.f32.gmra.mrb[16].mxu0 %v11847_v0  ;;  %v11855_v3 = vld [vmem:[#allocation161_spill] sm:$0xff]  ;;  %v11856_v0 = vld [vmem:[#allocation163_spill] sm:$0xff] }
 0x169   : > { %1250 = vmatprep.mubr.f32.mxu1 %v11848_v2  ;;  %3848 = vmatprep.mubr.f32.mxu0 %v11849_v26  ;;  %v11857_v2 = vld [vmem:[#allocation164_spill] sm:$0xff]  ;;  %v11859_v26 = vld [vmem:[#allocation51_spill] sm:$0xff] }
 0x16a   : > { %5879 = vmatpush1.bf16.msra.mxu1 %v5878_v10  ;;  %6167 = vmatpush1.bf16.msra.mxu0 %v6166_v52  ;;  %v11858_v10 = vld [vmem:[#allocation49_spill] sm:$0xff] }
 0x16b   : > { %5880 = vmatprep.subr.bf16.mxu1 %v11400_v61  ;;  %6168 = vmatprep.subr.bf16.mxu0 %v11400_v61  ;;  %v5884_v38 = vpack.c.bf16 %v11859_v26, %v11858_v10  ;;  %v11860_v52 = vld [vmem:[#allocation53_spill] sm:$0xff]  ;;  %v11869_v10 = vld [vmem:[#allocation60_spill] sm:$0xff] }
 0x16c   : > { %1252 = vmatmul.mubr.f32.gmra.mrb[18].mxu1 %v11854_v27  ;;  %3850 = vmatmul.mubr.f32.gmra.mrb[18].mxu0 %v11855_v3  ;;  %v6172_v60 = vpack.c.bf16 %v11861_v9, %v11860_v52  ;;  %v11863_v27 = vld [vmem:[#allocation170_spill] sm:$0xff]  ;;  %v11864_v3 = vld [vmem:[#allocation173_spill] sm:$0xff]  ;;  %v11870_v52 = vld [vmem:[#allocation175_spill] sm:$0xff] }
 0x16d   : > { %1257 = vmatprep.mubr.f32.mxu1 %v11856_v0  ;;  %3855 = vmatprep.mubr.f32.mxu0 %v11857_v2  ;;  %v11865_v0 = vld [vmem:[#allocation174_spill] sm:$0xff]  ;;  %v11867_v2 = vld [vmem:[#allocation57_spill] sm:$0xff] }
 0x16e   : > { %5882 = vmatpush1.bf16.msra.mxu1 %v5881_v37  ;;  %6170 = vmatpush1.bf16.msra.mxu0 %v6169_v50  ;;  %v11866_v37 = vld [vmem:[#allocation55_spill] sm:$0xff]  ;;  %v11868_v50 = vld [vmem:[#allocation58_spill] sm:$0xff] }
 0x16f   : > { %5883 = vmatprep.subr.bf16.mxu1 %v11400_v61  ;;  %6171 = vmatprep.subr.bf16.mxu0 %v11400_v61  ;;  %v5887_v26 = vpack.c.bf16 %v11867_v2, %v11866_v37  ;;  %v6175_v9 = vpack.c.bf16 %v11869_v10, %v11868_v50  ;;  %v11995_v10 = vld [vmem:[#allocation144_spill] sm:$0xff]  ;;  %v11996_v50 = vld [vmem:[#allocation147_spill] sm:$0xff]  ;;  %v11997_v2 = vld [vmem:[#allocation25_spill] sm:$0xff] }
 0x170   : > { %1259 = vmatmul.mubr.f32.gmra.mrb[20].mxu1 %v11862_v7  ;;  %3857 = vmatmul.mubr.f32.gmra.mrb[20].mxu0 %v11863_v27  ;;  %v11871_v7 = vld [vmem:[#allocation178_spill] sm:$0xff]  ;;  %v11872_v27 = vld [vmem:[#allocation180_spill] sm:$0xff] }
 0x171   : > { %1264 = vmatprep.mubr.f32.mxu1 %v11864_v3  ;;  %3862 = vmatprep.mubr.f32.mxu0 %v11865_v0  ;;  %v11873_v3 = vld [vmem:[#allocation183_spill] sm:$0xff]  ;;  %v11876_v0 = vld [vmem:[#allocation189_spill] sm:$0xff]  ;;  %v11998_v37 = vld [vmem:[#allocation28_spill] sm:$0xff] }
 0x172   : > { %5885 = vmatpush1.bf16.msra.mxu1 %v5884_v38  ;;  %6173 = vmatpush1.bf16.msra.mxu0 %v6172_v60  ;;  %v11874_v38 = vld [vmem:[#allocation184_spill] sm:$0xff]  ;;  %v11875_v60 = vld [vmem:[#allocation186_spill] sm:$0xff] }
 0x173   : > { %5886 = vmatprep.subr.bf16.mxu1 %v11400_v61  ;;  %6174 = vmatprep.subr.bf16.mxu0 %v11400_v61 }
 0x174   : > { %1266 = vmatmul.mubr.f32.gmra.mrb[22].mxu1 %v11870_v52  ;;  %3864 = vmatmul.mubr.f32.gmra.mrb[22].mxu0 %v11871_v7  ;;  %v11877_v52 = vld [vmem:[#allocation191_spill] sm:$0xff]  ;;  %v11878_v7 = vpack.c.bf16 %v11726_v57, %v11725_v11  ;;  %v11991_v57 = vld [vmem:[#allocation22_spill] sm:$0xff] }
 0x175   : > { %1271 = vmatprep.mubr.f32.mxu1 %v11872_v27  ;;  %3869 = vmatprep.mubr.f32.mxu0 %v11873_v3  ;;  %v11903_v3 = vld [vmem:[#allocation225_spill] sm:$0xff]  ;;  %v11905_v27 = vld [vmem:[#allocation228_spill] sm:$0xff]  ;;  %v11992_v11 = vld [vmem:[#allocation23_spill] sm:$0xff] }
 0x176   : > { %5888 = vmatpush1.bf16.msra.mxu1 %v5887_v26  ;;  %6176 = vmatpush1.bf16.msra.mxu0 %v6175_v9  ;;  %v11879_v26 = vpack.c.bf16 %v11728_v29, %v11727_v18  ;;  %v11880_v9 = vld [vmem:[#allocation192_spill] sm:$0xff]  ;;  %v11990_v18 = vld [vmem:[#allocation138_spill] sm:$0xff] }
 0x177   : > { %5889 = vmatprep.subr.bf16.mxu1 %v11400_v61  ;;  %6177 = vmatprep.subr.bf16.mxu0 %v11400_v61  ;;  %v11989_v29 = vld [vmem:[#allocation136_spill] sm:$0xff] }
 0x178   : > { %1273 = vmatmul.mubr.f32.gmra.mrb[24].mxu1 %v11874_v38  ;;  %3871 = vmatmul.mubr.f32.gmra.mrb[24].mxu0 %v11875_v60  ;;  %v11881_v38 = vld [vmem:[#allocation193_spill] sm:$0xff]  ;;  %v11882_v60 = vld [vmem:[#allocation195_spill] sm:$0xff] }
 0x179   : > { %1278 = vmatprep.mubr.f32.mxu1 %v11876_v0  ;;  %3876 = vmatprep.mubr.f32.mxu0 %v11877_v52  ;;  %v11883_v0 = vld [vmem:[#allocation196_spill] sm:$0xff]  ;;  %v11884_v52 = vpack.c.bf16 %v11750_v1, %v11749_v22  ;;  %v11986_v22 = vld [vmem:[#allocation21_spill] sm:$0xff] }
 0x17a   : > { %5891 = vmatpush1.bf16.msra.mxu1 %v11878_v7  ;;  %6179 = vmatpush1.bf16.msra.mxu0 %v11879_v26  ;;  %v11885_v7 = vpack.c.bf16 %v11752_v40, %v11751_v24  ;;  %v11886_v26 = vld [vmem:[#allocation199_spill] sm:$0xff]  ;;  %v11983_v40 = vld [vmem:[#allocation126_spill] sm:$0xff]  ;;  %v11985_v1 = vld [vmem:[#allocation20_spill] sm:$0xff] }
 0x17b   : > { %5892 = vmatprep.subr.bf16.mxu1 %v11400_v61  ;;  %6180 = vmatprep.subr.bf16.mxu0 %v11400_v61  ;;  %v11984_v24 = vld [vmem:[#allocation130_spill] sm:$0xff] }
 0x17c   : > { %1280 = vmatmul.mubr.f32.gmra.mrb[26].mxu1 %v11880_v9  ;;  %3878 = vmatmul.mubr.f32.gmra.mrb[26].mxu0 %v11881_v38  ;;  %v11887_v9 = vld [vmem:[#allocation203_spill] sm:$0xff]  ;;  %v11888_v38 = vld [vmem:[#allocation205_spill] sm:$0xff] }
 0x17d   : > { %1285 = vmatprep.mubr.f32.mxu1 %v11882_v60  ;;  %3883 = vmatprep.mubr.f32.mxu0 %v11883_v0  ;;  %v11889_v60 = vld [vmem:[#allocation206_spill] sm:$0xff]  ;;  %v11890_v0 = vpack.c.bf16 %v11771_v30, %v11770_v13  ;;  %v11980_v13 = vld [vmem:[#allocation19_spill] sm:$0xff] }
 0x17e   : > { %5894 = vmatpush1.bf16.msra.mxu1 %v11884_v52  ;;  %6182 = vmatpush1.bf16.msra.mxu0 %v11885_v7  ;;  %v11891_v52 = vpack.c.bf16 %v7679_v21, %v7677_v23  ;;  %v11892_v7 = vld [vmem:[#allocation207_spill] sm:$0xff]  ;;  %v11977_v21 = vld [vmem:[#allocation118_spill] sm:$0xff]  ;;  %v11978_v23 = vld [vmem:[#allocation120_spill] sm:$0xff] }
 0x17f   : > { %5895 = vmatprep.subr.bf16.mxu1 %v11400_v61  ;;  %6183 = vmatprep.subr.bf16.mxu0 %v11400_v61  ;;  %v11979_v30 = vld [vmem:[#allocation18_spill] sm:$0xff] }
 0x180   : > { %1287 = vmatmul.mubr.f32.gmra.mrb[28].mxu1 %v11886_v26  ;;  %3885 = vmatmul.mubr.f32.gmra.mrb[28].mxu0 %v11887_v9  ;;  %v11893_v26 = vld [vmem:[#allocation210_spill] sm:$0xff]  ;;  %v11894_v9 = vld [vmem:[#allocation212_spill] sm:$0xff] }
 0x181   : > { %1292 = vmatprep.mubr.f32.mxu1 %v11888_v38  ;;  %3890 = vmatprep.mubr.f32.mxu0 %v11889_v60  ;;  %v11895_v38 = vld [vmem:[#allocation215_spill] sm:$0xff]  ;;  %v11896_v60 = vpack.c.bf16 %v7685_v33, %v7681_v31  ;;  %v11973_v33 = vld [vmem:[#allocation16_spill] sm:$0xff]  ;;  %v11974_v31 = vld [vmem:[#allocation17_spill] sm:$0xff] }
 0x182   : > { %5897 = vmatpush1.bf16.msra.mxu1 %v11890_v0  ;;  %6185 = vmatpush1.bf16.msra.mxu0 %v11891_v52  ;;  %v11897_v0 = vpack.c.bf16 %v7702_v4, %v7690_v48  ;;  %v11898_v52 = vld [vmem:[#allocation216_spill] sm:$0xff]  ;;  %v11907_v4 = vld [vmem:[#allocation235_spill] sm:$0xff]  ;;  %v11909_v48 = vld [vmem:[#allocation238_spill] sm:$0xff] }
 0x183   : > { %5898 = vmatprep.subr.bf16.mxu1 %v11400_v61  ;;  %6186 = vmatprep.subr.bf16.mxu0 %v11400_v61 }
 0x184   : > { %1294 = vmatmul.mubr.f32.gmra.mrb[30].mxu1 %v11892_v7  ;;  %3892 = vmatmul.mubr.f32.gmra.mrb[30].mxu0 %v11893_v26  ;;  %v11899_v7 = vld [vmem:[#allocation218_spill] sm:$0xff]  ;;  %v11900_v26 = vld [vmem:[#allocation221_spill] sm:$0xff] }
 0x185   : > { %1299 = vmatprep.mubr.f32.mxu1 %v11894_v9  ;;  %3897 = vmatprep.mubr.f32.mxu0 %v11895_v38  ;;  %v11901_v9 = vld [vmem:[#allocation223_spill] sm:$0xff]  ;;  %v11902_v38 = vld [vmem:[#allocation224_spill] sm:$0xff] }
 0x186   : > { %5900 = vmatpush1.bf16.msra.mxu1 %v11896_v60  ;;  %6188 = vmatpush1.bf16.msra.mxu0 %v11897_v0  ;;  %v11904_v60 = vld [vmem:[#allocation227_spill] sm:$0xff] }
 0x187   : > { %5901 = vmatprep.subr.bf16.mxu1 %v11400_v61  ;;  %6189 = vmatprep.subr.bf16.mxu0 %v11400_v61  ;;  %v11906_v0 = vld [vmem:[#allocation231_spill] sm:$0xff] }
 0x188   : > { %1301 = vmatmul.mubr.f32.gmra.mrb[32].mxu1 %v11898_v52  ;;  %3899 = vmatmul.mubr.f32.gmra.mrb[32].mxu0 %v11899_v7  ;;  %v11908_v52 = vld [vmem:[#allocation237_spill] sm:$0xff]  ;;  %v11910_v7 = vld [vmem:[#allocation239_spill] sm:$0xff] }
 0x189   : > { %1306 = vmatprep.mubr.f32.mxu1 %v11900_v26  ;;  %3904 = vmatprep.mubr.f32.mxu0 %v11901_v9  ;;  %v11911_v26 = vld [vmem:[#allocation242_spill] sm:$0xff]  ;;  %v11912_v9 = vld [vmem:[#allocation244_spill] sm:$0xff] }
 0x18c   : > { %1308 = vmatmul.mubr.f32.gmra.mrb[34].mxu1 %v11902_v38  ;;  %3906 = vmatmul.mubr.f32.gmra.mrb[34].mxu0 %v11903_v3  ;;  %v11913_v38 = vld [vmem:[#allocation247_spill] sm:$0xff]  ;;  %v11914_v3 = vld [vmem:[#allocation248_spill] sm:$0xff] }
 0x18d   : > { %1313 = vmatprep.mubr.f32.mxu1 %v11904_v60  ;;  %3911 = vmatprep.mubr.f32.mxu0 %v11905_v27  ;;  %v11915_v60 = vld [vmem:[#allocation250_spill] sm:$0xff]  ;;  %v11916_v27 = vld [vmem:[#allocation253_spill] sm:$0xff] }
 0x190   : > { %1315 = vmatmul.mubr.f32.gmra.mrb[36].mxu1 %v11906_v0  ;;  %3913 = vmatmul.mubr.f32.gmra.mrb[36].mxu0 %v11907_v4  ;;  %v11917_v0 = vld [vmem:[#allocation255_spill] sm:$0xff]  ;;  %v11918_v4 = vld [vmem:[#allocation256_spill] sm:$0xff] }
 0x191   : > { %1320 = vmatprep.mubr.f32.mxu1 %v11908_v52  ;;  %3918 = vmatprep.mubr.f32.mxu0 %v11909_v48  ;;  %v11919_v52 = vld [vmem:[#allocation257_spill] sm:$0xff]  ;;  %v11920_v48 = vld [vmem:[#allocation259_spill] sm:$0xff] }
 0x194   : > { %1322 = vmatmul.mubr.f32.gmra.mrb[38].mxu1 %v11910_v7  ;;  %3920 = vmatmul.mubr.f32.gmra.mrb[38].mxu0 %v11911_v26  ;;  %v11921_v7 = vld [vmem:[#allocation260_spill] sm:$0xff]  ;;  %v11922_v26 = vld [vmem:[#allocation263_spill] sm:$0xff] }
 0x195   : > { %1327 = vmatprep.mubr.f32.mxu1 %v11912_v9  ;;  %3925 = vmatprep.mubr.f32.mxu0 %v11913_v38  ;;  %v11923_v9 = vld [vmem:[#allocation267_spill] sm:$0xff]  ;;  %v11924_v38 = vld [vmem:[#allocation269_spill] sm:$0xff] }
 0x198   : > { %1329 = vmatmul.mubr.f32.gmra.mrb[40].mxu1 %v11914_v3  ;;  %3927 = vmatmul.mubr.f32.gmra.mrb[40].mxu0 %v11915_v60  ;;  %v11925_v3 = vld [vmem:[#allocation270_spill] sm:$0xff]  ;;  %v11926_v60 = vld [vmem:[#allocation271_spill] sm:$0xff] }
 0x199   : > { %1334 = vmatprep.mubr.f32.mxu1 %v11916_v27  ;;  %3932 = vmatprep.mubr.f32.mxu0 %v11917_v0  ;;  %v11927_v27 = vld [vmem:[#allocation274_spill] sm:$0xff]  ;;  %v11928_v0 = vld [vmem:[#allocation276_spill] sm:$0xff] }
 0x19c   : > { %1336 = vmatmul.mubr.f32.gmra.mrb[42].mxu1 %v11918_v4  ;;  %3934 = vmatmul.mubr.f32.gmra.mrb[42].mxu0 %v11919_v52  ;;  %v11929_v4 = vld [vmem:[#allocation279_spill] sm:$0xff]  ;;  %v11930_v52 = vld [vmem:[#allocation280_spill] sm:$0xff] }
 0x19d   : > { %1341 = vmatprep.mubr.f32.mxu1 %v11920_v48  ;;  %3939 = vmatprep.mubr.f32.mxu0 %v11921_v7  ;;  %v11931_v48 = vld [vmem:[#allocation282_spill] sm:$0xff]  ;;  %v11932_v7 = vld [vmem:[#allocation285_spill] sm:$0xff] }
 0x1a0   : > { %1343 = vmatmul.mubr.f32.gmra.mrb[44].mxu1 %v11922_v26  ;;  %3941 = vmatmul.mubr.f32.gmra.mrb[44].mxu0 %v11923_v9  ;;  %v11933_v26 = vld [vmem:[#allocation287_spill] sm:$0xff]  ;;  %v11934_v9 = vld [vmem:[#allocation288_spill] sm:$0xff] }
 0x1a1   : > { %1348 = vmatprep.mubr.f32.mxu1 %v11924_v38  ;;  %3946 = vmatprep.mubr.f32.mxu0 %v11925_v3  ;;  %v11935_v38 = vld [vmem:[#allocation289_spill] sm:$0xff]  ;;  %v11936_v3 = vld [vmem:[#allocation291_spill] sm:$0xff] }
 0x1a4   : > { %1350 = vmatmul.mubr.f32.gmra.mrb[46].mxu1 %v11926_v60  ;;  %3948 = vmatmul.mubr.f32.gmra.mrb[46].mxu0 %v11927_v27  ;;  %v11937_v60 = vld [vmem:[#allocation292_spill] sm:$0xff]  ;;  %v11938_v27 = vld [vmem:[#allocation295_spill] sm:$0xff] }
 0x1a5   : > { %1355 = vmatprep.mubr.f32.mxu1 %v11928_v0  ;;  %3953 = vmatprep.mubr.f32.mxu0 %v11929_v4  ;;  %v11939_v0 = vld [vmem:[#allocation299_spill] sm:$0xff]  ;;  %v11940_v4 = vld [vmem:[#allocation301_spill] sm:$0xff] }
 0x1a8   : > { %1357 = vmatmul.mubr.f32.gmra.mrb[48].mxu1 %v11930_v52  ;;  %3955 = vmatmul.mubr.f32.gmra.mrb[48].mxu0 %v11931_v48  ;;  %v11941_v52 = vld [vmem:[#allocation302_spill] sm:$0xff]  ;;  %v11942_v48 = vld [vmem:[#allocation303_spill] sm:$0xff] }
 0x1a9   : > { %1362 = vmatprep.mubr.f32.mxu1 %v11932_v7  ;;  %3960 = vmatprep.mubr.f32.mxu0 %v11933_v26  ;;  %v11943_v7 = vld [vmem:[#allocation306_spill] sm:$0xff]  ;;  %v11944_v26 = vld [vmem:[#allocation308_spill] sm:$0xff] }
 0x1ac   : > { %1364 = vmatmul.mubr.f32.gmra.mrb[50].mxu1 %v11934_v9  ;;  %3962 = vmatmul.mubr.f32.gmra.mrb[50].mxu0 %v11935_v38  ;;  %v11945_v9 = vld [vmem:[#allocation311_spill] sm:$0xff]  ;;  %v11946_v38 = vld [vmem:[#allocation312_spill] sm:$0xff] }
 0x1ad   : > { %1369 = vmatprep.mubr.f32.mxu1 %v11936_v3  ;;  %3967 = vmatprep.mubr.f32.mxu0 %v11937_v60  ;;  %v11947_v3 = vld [vmem:[#allocation314_spill] sm:$0xff]  ;;  %v11948_v60 = vld [vmem:[#allocation317_spill] sm:$0xff] }
 0x1b0   : > { %1371 = vmatmul.mubr.f32.gmra.mrb[52].mxu1 %v11938_v27  ;;  %3969 = vmatmul.mubr.f32.gmra.mrb[52].mxu0 %v11939_v0  ;;  %v11969_v0 = vld [vmem:[#allocation107_spill] sm:$0xff]  ;;  %v11970_v27 = vld [vmem:[#allocation108_spill] sm:$0xff] }
 0x1b1   : > { %1376 = vmatprep.mubr.f32.mxu1 %v11940_v4  ;;  %3974 = vmatprep.mubr.f32.mxu0 %v11941_v52  ;;  %v11949_v4 = vld [vmem:[#allocation321_spill] sm:$0xff]  ;;  %v11950_v52 = vld [vmem:[#allocation323_spill] sm:$0xff] }
 0x1b4   : > { %1378 = vmatmul.mubr.f32.gmra.mrb[54].mxu1 %v11942_v48  ;;  %3976 = vmatmul.mubr.f32.gmra.mrb[54].mxu0 %v11943_v7  ;;  %v11951_v48 = vld [vmem:[#allocation324_spill] sm:$0xff]  ;;  %v11952_v7 = vld [vmem:[#allocation327_spill] sm:$0xff] }
 0x1b5   : > { %1383 = vmatprep.mubr.f32.mxu1 %v11944_v26  ;;  %3981 = vmatprep.mubr.f32.mxu0 %v11945_v9  ;;  %v11953_v26 = vld [vmem:[#allocation331_spill] sm:$0xff]  ;;  %v11954_v9 = vld [vmem:[#allocation333_spill] sm:$0xff] }
 0x1b8   : > { %1385 = vmatmul.mubr.f32.gmra.mrb[56].mxu1 %v11946_v38  ;;  %3983 = vmatmul.mubr.f32.gmra.mrb[56].mxu0 %v11947_v3  ;;  %v11967_v3 = vld [vmem:[#allocation11_spill] sm:$0xff]  ;;  %v11968_v38 = vld [vmem:[#allocation14_spill] sm:$0xff] }
 0x1b9   : > { %1390 = vmatprep.mubr.f32.mxu1 %v11948_v60  ;;  %3988 = vmatprep.mubr.f32.mxu0 %v9231_v32  ;;  %v11955_v32 = vld [vmem:[#allocation89_spill] sm:$0xff]  ;;  %v11966_v60 = vld [vmem:[#allocation106_spill] sm:$0xff] }
 0x1bc   : > { %1392 = vmatmul.mubr.f32.gmra.mrb[58].mxu1 %v9234_v19  ;;  %3990 = vmatmul.mubr.f32.gmra.mrb[58].mxu0 %v11949_v4  ;;  %v11956_v19 = vld [vmem:[#allocation90_spill] sm:$0xff]  ;;  %v11957_v4 = vld [vmem:[#allocation91_spill] sm:$0xff] }
 0x1bd   : > { %1397 = vmatprep.mubr.f32.mxu1 %v11950_v52  ;;  %3995 = vmatprep.mubr.f32.mxu0 %v11951_v48  ;;  %v11958_v52 = vld [vmem:[#allocation92_spill] sm:$0xff]  ;;  %v11959_v48 = vld [vmem:[#allocation5_spill] sm:$0xff] }
 0x1c0   : > { %1399 = vmatmul.mubr.f32.gmra.mrb[60].mxu1 %v11952_v7  ;;  %3997 = vmatmul.mubr.f32.gmra.mrb[60].mxu0 %v11953_v26  ;;  %v11960_v7 = vld [vmem:[#allocation9_spill] sm:$0xff]  ;;  %v11961_v26 = vld [vmem:[#allocation94_spill] sm:$0xff] }
 0x1c1   : > { %1404 = vmatprep.mubr.f32.mxu1 %v11954_v9  ;;  %4002 = vmatprep.mubr.f32.mxu0 %v9318_v58  ;;  %v11962_v9 = vld [vmem:[#allocation101_spill] sm:$0xff] }
 0x1c2   : > { %v11965_v58 = vld [vmem:[#allocation105_spill] sm:$0xff] }
 0x1c4   : > { %1406 = vmatmul.mubr.f32.gmra.mrb[62].mxu1 %v9326_v25  ;;  %4004 = vmatmul.mubr.f32.gmra.mrb[62].mxu0 %v9334_v16  ;;  %v11963_v25 = vld [vmem:[#allocation102_spill] sm:$0xff]  ;;  %v11964_v16 = vld [vmem:[#allocation104_spill] sm:$0xff] }
 0x1c5   : > { %1541 = vmatprep.mubr.f32.mxu1 %v11955_v32  ;;  %4139 = vmatprep.mubr.f32.mxu0 %v11956_v19 }
 0x1c8   : > { %1544 = vmatmul.mubr.f32.vlgmr.msra.gmra.mrb[0].mxu1 %v11957_v4  ;;  %4142 = vmatmul.mubr.f32.vlgmr.msra.gmra.mrb[0].mxu0 %v11958_v52 }
 0x1c9   : > { %5903 = vmatpush1.bf16.msra.mxu1 %v11959_v48  ;;  %6191 = vmatpush1.bf16.msra.mxu0 %v11960_v7  ;;  %v11971_v7 = vld [vmem:[#allocation113_spill] sm:$0xff]  ;;  %v11972_v48 = vld [vmem:[#allocation114_spill] sm:$0xff] }
 0x1ca   : > { %1550 = vmatprep.mubr.f32.mxu1 %v11961_v26  ;;  %4148 = vmatprep.mubr.f32.mxu0 %v11962_v9 }
 0x1cb   : > { %5904 = vmatprep.subr.bf16.mxu1 %v11400_v61  ;;  %6192 = vmatprep.subr.bf16.mxu0 %v11400_v61 }
 0x1cc   : > { %1553 = vmatmul.mubr.f32.gmra.mrb[2].mxu1 %v11963_v25  ;;  %4151 = vmatmul.mubr.f32.gmra.mrb[2].mxu0 %v11964_v16 }
 0x1cd   : > { %1559 = vmatprep.mubr.f32.mxu1 %v11965_v58  ;;  %4157 = vmatprep.mubr.f32.mxu0 %v11966_v60 }
 0x1ce   : > { %5906 = vmatpush1.bf16.msra.mxu1 %v11967_v3  ;;  %6194 = vmatpush1.bf16.msra.mxu0 %v11968_v38  ;;  %v11975_v3 = vld [vmem:[#allocation115_spill] sm:$0xff]  ;;  %v11976_v38 = vld [vmem:[#allocation116_spill] sm:$0xff] }
 0x1cf   : > { %5907 = vmatprep.subr.bf16.mxu1 %v11400_v61  ;;  %6195 = vmatprep.subr.bf16.mxu0 %v11400_v61 }
 0x1d0   : > { %1562 = vmatmul.mubr.f32.gmra.mrb[4].mxu1 %v11969_v0  ;;  %4160 = vmatmul.mubr.f32.gmra.mrb[4].mxu0 %v11970_v27 }
 0x1d1   : > { %1568 = vmatprep.mubr.f32.mxu1 %v11971_v7  ;;  %4166 = vmatprep.mubr.f32.mxu0 %v11972_v48 }
 0x1d2   : > { %5909 = vmatpush1.bf16.msra.mxu1 %v11973_v33  ;;  %6197 = vmatpush1.bf16.msra.mxu0 %v11974_v31  ;;  %v11981_v33 = vld [vmem:[#allocation123_spill] sm:$0xff]  ;;  %v11982_v31 = vld [vmem:[#allocation124_spill] sm:$0xff] }
 0x1d3   : > { %5910 = vmatprep.subr.bf16.mxu1 %v11400_v61  ;;  %6198 = vmatprep.subr.bf16.mxu0 %v11400_v61 }
 0x1d4   : > { %1571 = vmatmul.mubr.f32.gmra.mrb[6].mxu1 %v11975_v3  ;;  %4169 = vmatmul.mubr.f32.gmra.mrb[6].mxu0 %v11976_v38 }
 0x1d5   : > { %1577 = vmatprep.mubr.f32.mxu1 %v11977_v21  ;;  %4175 = vmatprep.mubr.f32.mxu0 %v11978_v23 }
 0x1d6   : > { %5912 = vmatpush1.bf16.msra.mxu1 %v11979_v30  ;;  %6200 = vmatpush1.bf16.msra.mxu0 %v11980_v13  ;;  %v11987_v30 = vld [vmem:[#allocation132_spill] sm:$0xff]  ;;  %v11988_v13 = vld [vmem:[#allocation133_spill] sm:$0xff] }
 0x1d7   : > { %5913 = vmatprep.subr.bf16.mxu1 %v11400_v61  ;;  %6201 = vmatprep.subr.bf16.mxu0 %v11400_v61 }
 0x1d8   : > { %1580 = vmatmul.mubr.f32.gmra.mrb[8].mxu1 %v11981_v33  ;;  %4178 = vmatmul.mubr.f32.gmra.mrb[8].mxu0 %v11982_v31 }
 0x1d9   : > { %1586 = vmatprep.mubr.f32.mxu1 %v11983_v40  ;;  %4184 = vmatprep.mubr.f32.mxu0 %v11984_v24 }
 0x1da   : > { %5915 = vmatpush1.bf16.msra.mxu1 %v11985_v1  ;;  %6203 = vmatpush1.bf16.msra.mxu0 %v11986_v22  ;;  %v11993_v1 = vld [vmem:[#allocation139_spill] sm:$0xff]  ;;  %v11994_v22 = vld [vmem:[#allocation140_spill] sm:$0xff] }
 0x1db   : > { %5916 = vmatprep.subr.bf16.mxu1 %v11400_v61  ;;  %6204 = vmatprep.subr.bf16.mxu0 %v11400_v61 }
 0x1dc   : > { %1589 = vmatmul.mubr.f32.gmra.mrb[10].mxu1 %v11987_v30  ;;  %4187 = vmatmul.mubr.f32.gmra.mrb[10].mxu0 %v11988_v13 }
 0x1dd   : > { %1595 = vmatprep.mubr.f32.mxu1 %v11989_v29  ;;  %4193 = vmatprep.mubr.f32.mxu0 %v11990_v18  ;;  %v12062_v18 = vld [vmem:[#allocation236_spill] sm:$0xff]  ;;  %v12064_v29 = vld [vmem:[#allocation241_spill] sm:$0xff] }
 0x1de   : > { %5918 = vmatpush1.bf16.msra.mxu1 %v11991_v57  ;;  %6206 = vmatpush1.bf16.msra.mxu0 %v11992_v11  ;;  %v11999_v57 = vld [vmem:[#allocation148_spill] sm:$0xff]  ;;  %v12000_v11 = vld [vmem:[#allocation149_spill] sm:$0xff] }
 0x1df   : > { %5919 = vmatprep.subr.bf16.mxu1 %v11400_v61  ;;  %6207 = vmatprep.subr.bf16.mxu0 %v11400_v61 }
 0x1e0   : > { %1598 = vmatmul.mubr.f32.gmra.mrb[12].mxu1 %v11993_v1  ;;  %4196 = vmatmul.mubr.f32.gmra.mrb[12].mxu0 %v11994_v22  ;;  %v12001_v1 = vld [vmem:[#allocation150_spill] sm:$0xff]  ;;  %v12003_v22 = vld [vmem:[#allocation32_spill] sm:$0xff] }
 0x1e1   : > { %1604 = vmatprep.mubr.f32.mxu1 %v11995_v10  ;;  %4202 = vmatprep.mubr.f32.mxu0 %v11996_v50  ;;  %v12004_v10 = vld [vmem:[#allocation34_spill] sm:$0xff] }
 0x1e2   : > { %5921 = vmatpush1.bf16.msra.mxu1 %v11997_v2  ;;  %6209 = vmatpush1.bf16.msra.mxu0 %v11998_v37  ;;  %v12005_v2 = vld [vmem:[#allocation155_spill] sm:$0xff]  ;;  %v12006_v37 = vld [vmem:[#allocation156_spill] sm:$0xff]  ;;  %v12008_v50 = vld [vmem:[#allocation162_spill] sm:$0xff] }
 0x1e3   : > { %5922 = vmatprep.subr.bf16.mxu1 %v11400_v61  ;;  %6210 = vmatprep.subr.bf16.mxu0 %v11400_v61 }
 0x1e4   : > { %1607 = vmatmul.mubr.f32.gmra.mrb[14].mxu1 %v11999_v57  ;;  %4205 = vmatmul.mubr.f32.gmra.mrb[14].mxu0 %v12000_v11  ;;  %v12007_v57 = vld [vmem:[#allocation158_spill] sm:$0xff]  ;;  %v12009_v11 = vld [vmem:[#allocation37_spill] sm:$0xff] }
 0x1e5   : > { %1613 = vmatprep.mubr.f32.mxu1 %v12001_v1  ;;  %4211 = vmatprep.mubr.f32.mxu0 %v12002_v39  ;;  %v12010_v1 = vld [vmem:[#allocation41_spill] sm:$0xff]  ;;  %v12014_v39 = vld [vmem:[#allocation168_spill] sm:$0xff] }
 0x1e6   : > { %5924 = vmatpush1.bf16.msra.mxu1 %v12003_v22  ;;  %6212 = vmatpush1.bf16.msra.mxu0 %v12004_v10  ;;  %v12011_v22 = vld [vmem:[#allocation165_spill] sm:$0xff]  ;;  %v12012_v10 = vld [vmem:[#allocation166_spill] sm:$0xff] }
 0x1e7   : > { %5925 = vmatprep.subr.bf16.mxu1 %v11400_v61  ;;  %6213 = vmatprep.subr.bf16.mxu0 %v11400_v61 }
 0x1e8   : > { %1616 = vmatmul.mubr.f32.gmra.mrb[16].mxu1 %v12005_v2  ;;  %4214 = vmatmul.mubr.f32.gmra.mrb[16].mxu0 %v12006_v37  ;;  %v12013_v2 = vld [vmem:[#allocation167_spill] sm:$0xff] }
 0x1e9   : > { %1622 = vmatprep.mubr.f32.mxu1 %v12007_v57  ;;  %4220 = vmatprep.mubr.f32.mxu0 %v12008_v50  ;;  %v12015_v37 = vld [vmem:[#allocation43_spill] sm:$0xff]  ;;  %v12016_v57 = vld [vmem:[#allocation46_spill] sm:$0xff]  ;;  %v12020_v50 = vld [vmem:[#allocation177_spill] sm:$0xff] }
 0x1ea   : > { %5927 = vmatpush1.bf16.msra.mxu1 %v12009_v11  ;;  %6215 = vmatpush1.bf16.msra.mxu0 %v12010_v1  ;;  %v12017_v11 = vld [vmem:[#allocation171_spill] sm:$0xff]  ;;  %v12018_v1 = vld [vmem:[#allocation172_spill] sm:$0xff] }
 0x1eb   : > { %5928 = vmatprep.subr.bf16.mxu1 %v11400_v61  ;;  %6216 = vmatprep.subr.bf16.mxu0 %v11400_v61 }
 0x1ec   : > { %1625 = vmatmul.mubr.f32.gmra.mrb[18].mxu1 %v12011_v22  ;;  %4223 = vmatmul.mubr.f32.gmra.mrb[18].mxu0 %v12012_v10  ;;  %v12019_v22 = vld [vmem:[#allocation176_spill] sm:$0xff]  ;;  %v12021_v10 = vld [vmem:[#allocation50_spill] sm:$0xff] }
 0x1ed   : > { %1631 = vmatprep.mubr.f32.mxu1 %v12013_v2  ;;  %4229 = vmatprep.mubr.f32.mxu0 %v12014_v39  ;;  %v12022_v2 = vld [vmem:[#allocation52_spill] sm:$0xff]  ;;  %v12026_v39 = vld [vmem:[#allocation185_spill] sm:$0xff] }
 0x1ee   : > { %5930 = vmatpush1.bf16.msra.mxu1 %v12015_v37  ;;  %6218 = vmatpush1.bf16.msra.mxu0 %v12016_v57  ;;  %v12023_v37 = vld [vmem:[#allocation179_spill] sm:$0xff]  ;;  %v12024_v57 = vld [vmem:[#allocation181_spill] sm:$0xff] }
 0x1ef   : > { %5931 = vmatprep.subr.bf16.mxu1 %v11400_v61  ;;  %6219 = vmatprep.subr.bf16.mxu0 %v11400_v61 }
 0x1f0   : > { %1634 = vmatmul.mubr.f32.gmra.mrb[20].mxu1 %v12017_v11  ;;  %4232 = vmatmul.mubr.f32.gmra.mrb[20].mxu0 %v12018_v1  ;;  %v12025_v11 = vld [vmem:[#allocation182_spill] sm:$0xff]  ;;  %v12027_v1 = vld [vmem:[#allocation56_spill] sm:$0xff] }
 0x1f1   : > { %1640 = vmatprep.mubr.f32.mxu1 %v12019_v22  ;;  %4238 = vmatprep.mubr.f32.mxu0 %v12020_v50  ;;  %v12028_v22 = vld [vmem:[#allocation59_spill] sm:$0xff]  ;;  %v12032_v50 = vld [vmem:[#allocation194_spill] sm:$0xff] }
 0x1f2   : > { %5933 = vmatpush1.bf16.msra.mxu1 %v12021_v10  ;;  %6221 = vmatpush1.bf16.msra.mxu0 %v12022_v2  ;;  %v12029_v10 = vld [vmem:[#allocation187_spill] sm:$0xff]  ;;  %v12030_v2 = vld [vmem:[#allocation188_spill] sm:$0xff] }
 0x1f3   : > { %5934 = vmatprep.subr.bf16.mxu1 %v11400_v61  ;;  %6222 = vmatprep.subr.bf16.mxu0 %v11400_v61 }
 0x1f4   : > { %1643 = vmatmul.mubr.f32.gmra.mrb[22].mxu1 %v12023_v37  ;;  %4241 = vmatmul.mubr.f32.gmra.mrb[22].mxu0 %v12024_v57  ;;  %v12031_v37 = vld [vmem:[#allocation190_spill] sm:$0xff]  ;;  %v12033_v57 = vld [vmem:[#allocation61_spill] sm:$0xff] }
 0x1f5   : > { %1649 = vmatprep.mubr.f32.mxu1 %v12025_v11  ;;  %4247 = vmatprep.mubr.f32.mxu0 %v12026_v39  ;;  %v12034_v11 = vld [vmem:[#allocation64_spill] sm:$0xff]  ;;  %v12038_v39 = vld [vmem:[#allocation201_spill] sm:$0xff] }
 0x1f6   : > { %5936 = vmatpush1.bf16.msra.mxu1 %v12027_v1  ;;  %6224 = vmatpush1.bf16.msra.mxu0 %v12028_v22  ;;  %v12035_v1 = vld [vmem:[#allocation197_spill] sm:$0xff]  ;;  %v12036_v22 = vld [vmem:[#allocation198_spill] sm:$0xff] }
 0x1f7   : > { %5937 = vmatprep.subr.bf16.mxu1 %v11400_v61  ;;  %6225 = vmatprep.subr.bf16.mxu0 %v11400_v61 }
 0x1f8   : > { %1652 = vmatmul.mubr.f32.gmra.mrb[24].mxu1 %v12029_v10  ;;  %4250 = vmatmul.mubr.f32.gmra.mrb[24].mxu0 %v12030_v2  ;;  %v12037_v10 = vld [vmem:[#allocation200_spill] sm:$0xff]  ;;  %v12039_v2 = vld [vmem:[#allocation67_spill] sm:$0xff] }
 0x1f9   : > { %1658 = vmatprep.mubr.f32.mxu1 %v12031_v37  ;;  %4256 = vmatprep.mubr.f32.mxu0 %v12032_v50  ;;  %v12040_v37 = vld [vmem:[#allocation71_spill] sm:$0xff]  ;;  %v12044_v50 = vld [vmem:[#allocation209_spill] sm:$0xff] }
 0x1fa   : > { %5939 = vmatpush1.bf16.msra.mxu1 %v12033_v57  ;;  %6227 = vmatpush1.bf16.msra.mxu0 %v12034_v11  ;;  %v12041_v57 = vld [vmem:[#allocation202_spill] sm:$0xff]  ;;  %v12042_v11 = vld [vmem:[#allocation204_spill] sm:$0xff] }
 0x1fb   : > { %5940 = vmatprep.subr.bf16.mxu1 %v11400_v61  ;;  %6228 = vmatprep.subr.bf16.mxu0 %v11400_v61 }
 0x1fc   : > { %1661 = vmatmul.mubr.f32.gmra.mrb[26].mxu1 %v12035_v1  ;;  %4259 = vmatmul.mubr.f32.gmra.mrb[26].mxu0 %v12036_v22  ;;  %v12043_v1 = vld [vmem:[#allocation208_spill] sm:$0xff]  ;;  %v12045_v22 = vld [vmem:[#allocation74_spill] sm:$0xff] }
 0x1fd   : > { %1667 = vmatprep.mubr.f32.mxu1 %v12037_v10  ;;  %4265 = vmatprep.mubr.f32.mxu0 %v12038_v39  ;;  %v12046_v10 = vld [vmem:[#allocation76_spill] sm:$0xff]  ;;  %v12050_v39 = vld [vmem:[#allocation217_spill] sm:$0xff] }
 0x1fe   : > { %5942 = vmatpush1.bf16.msra.mxu1 %v12039_v2  ;;  %6230 = vmatpush1.bf16.msra.mxu0 %v12040_v37  ;;  %v12047_v2 = vld [vmem:[#allocation211_spill] sm:$0xff]  ;;  %v12048_v37 = vld [vmem:[#allocation213_spill] sm:$0xff] }
 0x1ff   : > { %5943 = vmatprep.subr.bf16.mxu1 %v11400_v61  ;;  %6231 = vmatprep.subr.bf16.mxu0 %v11400_v61 }
 0x200   : > { %1670 = vmatmul.mubr.f32.gmra.mrb[28].mxu1 %v12041_v57  ;;  %4268 = vmatmul.mubr.f32.gmra.mrb[28].mxu0 %v12042_v11  ;;  %v12049_v57 = vld [vmem:[#allocation214_spill] sm:$0xff]  ;;  %v12051_v11 = vld [vmem:[#allocation80_spill] sm:$0xff] }
 0x201   : > { %1676 = vmatprep.mubr.f32.mxu1 %v12043_v1  ;;  %4274 = vmatprep.mubr.f32.mxu0 %v12044_v50  ;;  %v12052_v1 = vld [vmem:[#allocation87_spill] sm:$0xff]  ;;  %v12056_v50 = vld [vmem:[#allocation226_spill] sm:$0xff] }
 0x202   : > { %5945 = vmatpush1.bf16.msra.mxu1 %v12045_v22  ;;  %6233 = vmatpush1.bf16.msra.mxu0 %v12046_v10  ;;  %v12053_v22 = vld [vmem:[#allocation219_spill] sm:$0xff]  ;;  %v12054_v10 = vld [vmem:[#allocation220_spill] sm:$0xff] }
 0x203   : > { %5946 = vmatprep.subr.bf16.mxu1 %v11400_v61  ;;  %6234 = vmatprep.subr.bf16.mxu0 %v11400_v61 }
 0x204   : > { %1679 = vmatmul.mubr.f32.gmra.mrb[30].mxu1 %v12047_v2  ;;  %4277 = vmatmul.mubr.f32.gmra.mrb[30].mxu0 %v12048_v37  ;;  %v12055_v2 = vld [vmem:[#allocation222_spill] sm:$0xff]  ;;  %v12057_v37 = vld [vmem:[#allocation229_spill] sm:$0xff] }
 0x205   : > { %1685 = vmatprep.mubr.f32.mxu1 %v12049_v57  ;;  %4283 = vmatprep.mubr.f32.mxu0 %v12050_v39  ;;  %v12058_v57 = vld [vmem:[#allocation230_spill] sm:$0xff]  ;;  %v12059_v39 = vld [vmem:[#allocation232_spill] sm:$0xff] }
 0x206   : > { %5948 = vmatpush1.bf16.msra.mxu1 %v12051_v11  ;;  %6236 = vmatpush1.bf16.msra.mxu0 %v12052_v1  ;;  %v12060_v11 = vld [vmem:[#allocation233_spill] sm:$0xff]  ;;  %v12061_v1 = vld [vmem:[#allocation234_spill] sm:$0xff] }
 0x207   : > { %5949 = vmatprep.subr.bf16.mxu1 %v11400_v61  ;;  %6237 = vmatprep.subr.bf16.mxu0 %v11400_v61 }
 0x208   : > { %1688 = vmatmul.mubr.f32.gmra.mrb[32].mxu1 %v12053_v22  ;;  %4286 = vmatmul.mubr.f32.gmra.mrb[32].mxu0 %v12054_v10  ;;  %v12063_v22 = vld [vmem:[#allocation240_spill] sm:$0xff]  ;;  %v12065_v10 = vld [vmem:[#allocation243_spill] sm:$0xff] }
 0x209   : > { %1694 = vmatprep.mubr.f32.mxu1 %v12055_v2  ;;  %4292 = vmatprep.mubr.f32.mxu0 %v12056_v50  ;;  %v12066_v2 = vld [vmem:[#allocation245_spill] sm:$0xff]  ;;  %v12067_v50 = vld [vmem:[#allocation246_spill] sm:$0xff] }
 0x20c   : > { %1697 = vmatmul.mubr.f32.gmra.mrb[34].mxu1 %v12057_v37  ;;  %4295 = vmatmul.mubr.f32.gmra.mrb[34].mxu0 %v12058_v57  ;;  %v12068_v37 = vld [vmem:[#allocation249_spill] sm:$0xff]  ;;  %v12069_v57 = vld [vmem:[#allocation251_spill] sm:$0xff] }
 0x20d   : > { %1703 = vmatprep.mubr.f32.mxu1 %v12059_v39  ;;  %4301 = vmatprep.mubr.f32.mxu0 %v12060_v11  ;;  %v12070_v39 = vld [vmem:[#allocation252_spill] sm:$0xff]  ;;  %v12071_v11 = vld [vmem:[#allocation254_spill] sm:$0xff] }
 0x210   : > { %1706 = vmatmul.mubr.f32.gmra.mrb[36].mxu1 %v12061_v1  ;;  %4304 = vmatmul.mubr.f32.gmra.mrb[36].mxu0 %v12062_v18  ;;  %v12072_v1 = vld [vmem:[#allocation258_spill] sm:$0xff]  ;;  %v12073_v18 = vld [vmem:[#allocation261_spill] sm:$0xff] }
 0x211   : > { %1712 = vmatprep.mubr.f32.mxu1 %v12063_v22  ;;  %4310 = vmatprep.mubr.f32.mxu0 %v12064_v29  ;;  %v12074_v22 = vld [vmem:[#allocation262_spill] sm:$0xff]  ;;  %v12075_v29 = vld [vmem:[#allocation264_spill] sm:$0xff] }
 0x214   : > { %1715 = vmatmul.mubr.f32.gmra.mrb[38].mxu1 %v12065_v10  ;;  %4313 = vmatmul.mubr.f32.gmra.mrb[38].mxu0 %v12066_v2  ;;  %v12076_v10 = vld [vmem:[#allocation265_spill] sm:$0xff]  ;;  %v12077_v2 = vld [vmem:[#allocation266_spill] sm:$0xff] }
 0x215   : > { %1721 = vmatprep.mubr.f32.mxu1 %v12067_v50  ;;  %4319 = vmatprep.mubr.f32.mxu0 %v12068_v37  ;;  %v12078_v50 = vld [vmem:[#allocation268_spill] sm:$0xff] }
 0x216   : > { %v12079_v37 = vld [vmem:[#allocation272_spill] sm:$0xff] }
 0x218   : > { %1724 = vmatmul.mubr.f32.gmra.mrb[40].mxu1 %v12069_v57  ;;  %4322 = vmatmul.mubr.f32.gmra.mrb[40].mxu0 %v12070_v39  ;;  %v12080_v57 = vld [vmem:[#allocation273_spill] sm:$0xff]  ;;  %v12081_v39 = vld [vmem:[#allocation275_spill] sm:$0xff] }
 0x219   : > { %1730 = vmatprep.mubr.f32.mxu1 %v12071_v11  ;;  %4328 = vmatprep.mubr.f32.mxu0 %v12072_v1  ;;  %v12082_v11 = vld [vmem:[#allocation277_spill] sm:$0xff]  ;;  %v12083_v1 = vld [vmem:[#allocation278_spill] sm:$0xff] }
 0x21c   : > { %1733 = vmatmul.mubr.f32.gmra.mrb[42].mxu1 %v12073_v18  ;;  %4331 = vmatmul.mubr.f32.gmra.mrb[42].mxu0 %v12074_v22  ;;  %v12084_v18 = vld [vmem:[#allocation281_spill] sm:$0xff]  ;;  %v12085_v22 = vld [vmem:[#allocation283_spill] sm:$0xff] }
 0x21d   : > { %1739 = vmatprep.mubr.f32.mxu1 %v12075_v29  ;;  %4337 = vmatprep.mubr.f32.mxu0 %v12076_v10  ;;  %v12086_v29 = vld [vmem:[#allocation284_spill] sm:$0xff]  ;;  %v12087_v10 = vld [vmem:[#allocation286_spill] sm:$0xff] }
 0x220   : > { %1742 = vmatmul.mubr.f32.gmra.mrb[44].mxu1 %v12077_v2  ;;  %4340 = vmatmul.mubr.f32.gmra.mrb[44].mxu0 %v12078_v50  ;;  %v12088_v2 = vld [vmem:[#allocation290_spill] sm:$0xff]  ;;  %v12089_v50 = vld [vmem:[#allocation293_spill] sm:$0xff] }
 0x221   : > { %1748 = vmatprep.mubr.f32.mxu1 %v12079_v37  ;;  %4346 = vmatprep.mubr.f32.mxu0 %v12080_v57  ;;  %v12090_v37 = vld [vmem:[#allocation294_spill] sm:$0xff]  ;;  %v12091_v57 = vld [vmem:[#allocation296_spill] sm:$0xff] }
 0x224   : > { %1751 = vmatmul.mubr.f32.gmra.mrb[46].mxu1 %v12081_v39  ;;  %4349 = vmatmul.mubr.f32.gmra.mrb[46].mxu0 %v12082_v11  ;;  %v12092_v39 = vld [vmem:[#allocation297_spill] sm:$0xff]  ;;  %v12093_v11 = vld [vmem:[#allocation298_spill] sm:$0xff] }
 0x225   : > { %1757 = vmatprep.mubr.f32.mxu1 %v12083_v1  ;;  %4355 = vmatprep.mubr.f32.mxu0 %v12084_v18  ;;  %v12094_v1 = vld [vmem:[#allocation300_spill] sm:$0xff] }
 0x226   : > { %v12095_v18 = vld [vmem:[#allocation304_spill] sm:$0xff] }
 0x228   : > { %1760 = vmatmul.mubr.f32.gmra.mrb[48].mxu1 %v12085_v22  ;;  %4358 = vmatmul.mubr.f32.gmra.mrb[48].mxu0 %v12086_v29  ;;  %v12096_v22 = vld [vmem:[#allocation305_spill] sm:$0xff]  ;;  %v12097_v29 = vld [vmem:[#allocation307_spill] sm:$0xff] }
 0x229   : > { %1766 = vmatprep.mubr.f32.mxu1 %v12087_v10  ;;  %4364 = vmatprep.mubr.f32.mxu0 %v12088_v2  ;;  %v12098_v10 = vld [vmem:[#allocation309_spill] sm:$0xff]  ;;  %v12099_v2 = vld [vmem:[#allocation310_spill] sm:$0xff] }
 0x22c   : > { %1769 = vmatmul.mubr.f32.gmra.mrb[50].mxu1 %v12089_v50  ;;  %4367 = vmatmul.mubr.f32.gmra.mrb[50].mxu0 %v12090_v37  ;;  %v12100_v50 = vld [vmem:[#allocation313_spill] sm:$0xff]  ;;  %v12101_v37 = vld [vmem:[#allocation315_spill] sm:$0xff] }
 0x22d   : > { %1775 = vmatprep.mubr.f32.mxu1 %v12091_v57  ;;  %4373 = vmatprep.mubr.f32.mxu0 %v12092_v39  ;;  %v12102_v57 = vld [vmem:[#allocation316_spill] sm:$0xff]  ;;  %v12103_v39 = vld [vmem:[#allocation318_spill] sm:$0xff] }
 0x230   : > { %1778 = vmatmul.mubr.f32.gmra.mrb[52].mxu1 %v12093_v11  ;;  %4376 = vmatmul.mubr.f32.gmra.mrb[52].mxu0 %v12094_v1  ;;  %v12104_v11 = vld [vmem:[#allocation322_spill] sm:$0xff]  ;;  %v12105_v1 = vld [vmem:[#allocation325_spill] sm:$0xff] }
 0x231   : > { %1784 = vmatprep.mubr.f32.mxu1 %v12095_v18  ;;  %4382 = vmatprep.mubr.f32.mxu0 %v12096_v22  ;;  %v12106_v18 = vld [vmem:[#allocation326_spill] sm:$0xff]  ;;  %v12107_v22 = vld [vmem:[#allocation328_spill] sm:$0xff] }
 0x234   : > { %1787 = vmatmul.mubr.f32.gmra.mrb[54].mxu1 %v12097_v29  ;;  %4385 = vmatmul.mubr.f32.gmra.mrb[54].mxu0 %v12098_v10  ;;  %v12108_v29 = vld [vmem:[#allocation329_spill] sm:$0xff]  ;;  %v12109_v10 = vld [vmem:[#allocation330_spill] sm:$0xff] }
 0x235   : > { %1793 = vmatprep.mubr.f32.mxu1 %v12099_v2  ;;  %4391 = vmatprep.mubr.f32.mxu0 %v12100_v50  ;;  %v12110_v2 = vld [vmem:[#allocation332_spill] sm:$0xff] }
 0x238   : > { %1796 = vmatmul.mubr.f32.gmra.mrb[56].mxu1 %v12101_v37  ;;  %4394 = vmatmul.mubr.f32.gmra.mrb[56].mxu0 %v12102_v57 }
 0x239   : > { %1802 = vmatprep.mubr.f32.mxu1 %v12103_v39  ;;  %4400 = vmatprep.mubr.f32.mxu0 %v12104_v11 }
 0x23c   : > { %1805 = vmatmul.mubr.f32.gmra.mrb[58].mxu1 %v12105_v1  ;;  %4403 = vmatmul.mubr.f32.gmra.mrb[58].mxu0 %v12106_v18  ;;  %v12111_v1 = vand.u32 4294901760, %v11955_v32  ;;  %v12112_v18 = vand.u32 4294901760, %v11800_v54  ;;  %v12128_v54 = vand.u32 4294901760, %v11966_v60 }
 0x23d   : > { %1811 = vmatprep.mubr.f32.mxu1 %v12107_v22  ;;  %4409 = vmatprep.mubr.f32.mxu0 %v12108_v29  ;;  %v12113_v22 = vand.u32 4294901760, %v11801_v56  ;;  %v12129_v56 = vand.u32 4294901760, %v7345_v42  ;;  %v12135_v42 = vand.u32 4294901760, %v11971_v7 }
 0x23f   : > { %v5950_v29 = vpack.c.bf16 %v12113_v22, %v12112_v18  ;;  %v12120_v18 = vand.u32 4294901760, %v11807_v44  ;;  %v12121_v22 = vand.u32 4294901760, %v11808_v46  ;;  %v12134_v46 = vand.u32 4294901760, %v11970_v27 }
 0x240   : > { %1814 = vmatmul.mubr.f32.gmra.mrb[60].mxu1 %v12109_v10  ;;  %4412 = vmatmul.mubr.f32.gmra.mrb[60].mxu0 %v12110_v2  ;;  %v12114_v10 = vand.u32 4294901760, %v11956_v19  ;;  %v12115_v2 = vand.u32 4294901760, %v11803_v55  ;;  %v12122_v19 = vand.u32 4294901760, %v11962_v9 }
 0x241   : > { %1820 = vmatprep.mubr.f32.mxu1 %v9329_v59  ;;  %4418 = vmatprep.mubr.f32.mxu0 %v9332_v5  ;;  %v12116_v59 = vand.u32 4294901760, %v11804_v20  ;;  %v5953_v32 = vpack.c.bf16 %v12121_v22, %v12120_v18  ;;  %v12165_v18 = vld [vmem:[#allocation27_spill] sm:$0xff] }
 0x243   : > { %v6238_v5 = vpack.c.bf16 %v12116_v59, %v12115_v2  ;;  %v12140_v2 = vand.u32 4294901760, %v7398_v6  ;;  %v12146_v6 = vand.u32 4294901760, %v7414_v12  ;;  %v12152_v12 = vand.u32 4294901760, %v11984_v24 }
 0x244   : > { %1823 = vmatmul.mubr.f32.gmra.mrb[62].mxu1 %v9337_v43  ;;  %4421 = vmatmul.mubr.f32.gmra.mrb[62].mxu0 %v9342_v34  ;;  %v12117_v43 = vand.u32 4294901760, %v11957_v4  ;;  %v12118_v34 = vand.u32 4294901760, %v11958_v52  ;;  %v12123_v4 = vand.u32 4294901760, %v11810_v28  ;;  %v12139_v28 = vand.u32 4294901760, %v7385_v63 }
 0x245   : > { %1927 = vmatprep.mubr.f32.mxu1 %v12111_v1  ;;  %4525 = vmatprep.mubr.f32.mxu0 %v12114_v10  ;;  %v12119_v1 = vand.u32 4294901760, %v11961_v26  ;;  %v12141_v10 = vand.u32 4294901760, %v11975_v3  ;;  %v12145_v63 = vand.u32 4294901760, %v7402_v8  ;;  %v12147_v3 = vand.u32 4294901760, %v7418_v14 }
 0x246   : > { %v6247_v27 = vpack.c.bf16 %v12140_v2, %v12139_v28  ;;  %v12151_v8 = vand.u32 4294901760, %v11983_v40  ;;  %v12153_v14 = vand.u32 4294901760, %v7430_v35  ;;  %v12157_v40 = vand.u32 4294901760, %v11987_v30  ;;  %v12159_v35 = vld [vmem:[#allocation136_spill] sm:$0xff]  ;;  %v12167_v30 = vld [vmem:[#allocation29_spill] sm:$0xff] }
 0x247   : > { %v5962_v9 = vpack.c.bf16 %v12146_v6, %v12145_v63  ;;  %v12158_v24 = vand.u32 4294901760, %v11988_v13  ;;  %v12160_v60 = vand.u32 4294901760, %v12159_v35  ;;  %v12189_v2 = vld [vmem:[#allocation149_spill] sm:$0xff]  ;;  %v12195_v63 = vld [vmem:[#allocation38_spill] sm:$0xff]  ;;  %v12211_v35 = vld [vmem:[#allocation44_spill] sm:$0xff] }
 0x248   : > { %1931 = vmatmul.mubr.f32.vlgmr.msra.gmra.mrb[0].mxu1 %v12117_v43  ;;  %4529 = vmatmul.mubr.f32.vlgmr.msra.gmra.mrb[0].mxu0 %v12118_v34  ;;  %v12124_v43 = vand.u32 4294901760, %v7343_v41  ;;  %v12127_v34 = vand.u32 4294901760, %v11965_v58  ;;  %v12130_v41 = vand.u32 4294901760, %v7358_v47  ;;  %v12133_v58 = vand.u32 4294901760, %v11969_v0 }
 0x249   : > { %5951 = vmatpush1.bf16.msra.mxu1 %v5950_v29  ;;  %6239 = vmatpush1.bf16.msra.mxu0 %v6238_v5  ;;  %v12125_v29 = vand.u32 4294901760, %v11963_v25  ;;  %v12126_v5 = vand.u32 4294901760, %v11964_v16  ;;  %v12131_v25 = vand.u32 4294901760, %v7362_v49  ;;  %v12132_v16 = vand.u32 4294901760, %v7368_v51 }
 0x24a   : > { %1938 = vmatprep.mubr.f32.mxu1 %v12119_v1  ;;  %4536 = vmatprep.mubr.f32.mxu0 %v12122_v19  ;;  %v6241_v59 = vpack.c.bf16 %v12124_v43, %v12123_v4  ;;  %v5956_v55 = vpack.c.bf16 %v12130_v41, %v12129_v56  ;;  %v12136_v47 = vand.u32 4294901760, %v11972_v48  ;;  %v12137_v49 = vand.u32 4294901760, %v7370_v53  ;;  %v12163_v1 = vld [vmem:[#allocation26_spill] sm:$0xff]  ;;  %v12171_v43 = vld [vmem:[#allocation139_spill] sm:$0xff] }
 0x24b   : > { %5952 = vmatprep.subr.bf16.mxu1 %v11400_v61  ;;  %6240 = vmatprep.subr.bf16.mxu0 %v11400_v61  ;;  %v6244_v20 = vpack.c.bf16 %v12132_v16, %v12131_v25  ;;  %v12138_v51 = vand.u32 4294901760, %v7383_v62  ;;  %v12142_v48 = vand.u32 4294901760, %v11976_v38  ;;  %v12143_v53 = vand.u32 4294901760, %v11977_v21  ;;  %v12169_v19 = vld [vmem:[#allocation30_spill] sm:$0xff]  ;;  %v12177_v56 = vld [vmem:[#allocation147_spill] sm:$0xff]  ;;  %v12181_v16 = vld [vmem:[#allocation33_spill] sm:$0xff] }
 0x24c   : > { %1942 = vmatmul.mubr.f32.gmra.mrb[2].mxu1 %v12125_v29  ;;  %4540 = vmatmul.mubr.f32.gmra.mrb[2].mxu0 %v12126_v5  ;;  %v12144_v62 = vand.u32 4294901760, %v11978_v23  ;;  %v12148_v38 = vand.u32 4294901760, %v7420_v15  ;;  %v12149_v21 = vand.u32 4294901760, %v11981_v33  ;;  %v12150_v23 = vand.u32 4294901760, %v11982_v31  ;;  %v12173_v29 = vld [vmem:[#allocation140_spill] sm:$0xff] }
 0x24d   : > { %1949 = vmatprep.mubr.f32.mxu1 %v12127_v34  ;;  %4547 = vmatprep.mubr.f32.mxu0 %v12128_v54  ;;  %v5959_v44 = vpack.c.bf16 %v12138_v51, %v12137_v49  ;;  %v12154_v15 = vand.u32 4294901760, %v7432_v36  ;;  %v12155_v33 = vand.u32 4294901760, %v7446_v45  ;;  %v12156_v31 = vand.u32 4294901760, %v11821_v17  ;;  %v12161_v36 = vld [vmem:[#allocation138_spill] sm:$0xff]  ;;  %v12175_v34 = vld [vmem:[#allocation144_spill] sm:$0xff] }
 0x24e   : > { %5954 = vmatpush1.bf16.msra.mxu1 %v5953_v32  ;;  %6242 = vmatpush1.bf16.msra.mxu0 %v6241_v59  ;;  %v6250_v26 = vpack.c.bf16 %v12148_v38, %v12147_v3  ;;  %v12162_v0 = vand.u32 4294901760, %v12161_v36  ;;  %v12164_v45 = vand.u32 4294901760, %v12163_v1  ;;  %v12166_v17 = vand.u32 4294901760, %v12165_v18  ;;  %v12213_v36 = vld [vmem:[#allocation45_spill] sm:$0xff] }
 0x24f   : > { %5955 = vmatprep.subr.bf16.mxu1 %v11400_v61  ;;  %6243 = vmatprep.subr.bf16.mxu0 %v11400_v61  ;;  %v5965_v7 = vpack.c.bf16 %v12154_v15, %v12153_v14  ;;  %v6253_v52 = vpack.c.bf16 %v12156_v31, %v12155_v33  ;;  %v12168_v32 = vand.u32 4294901760, %v12167_v30  ;;  %v12170_v13 = vand.u32 4294901760, %v12169_v19  ;;  %v12203_v14 = vld [vmem:[#allocation155_spill] sm:$0xff]  ;;  %v12207_v31 = vld [vmem:[#allocation158_spill] sm:$0xff] }
 0x250   : > { %1953 = vmatmul.mubr.f32.gmra.mrb[4].mxu1 %v12133_v58  ;;  %4551 = vmatmul.mubr.f32.gmra.mrb[4].mxu0 %v12134_v46  ;;  %v5968_v22 = vpack.c.bf16 %v12166_v17, %v12164_v45  ;;  %v12172_v59 = vand.u32 4294901760, %v12171_v43  ;;  %v12174_v5 = vand.u32 4294901760, %v12173_v29  ;;  %v12176_v54 = vand.u32 4294901760, %v12175_v34  ;;  %v12183_v46 = vld [vmem:[#allocation35_spill] sm:$0xff]  ;;  %v12217_v17 = vld [vmem:[#allocation48_spill] sm:$0xff]  ;;  %v12227_v34 = vld [vmem:[#allocation49_spill] sm:$0xff] }
 0x251   : > { %1960 = vmatprep.mubr.f32.mxu1 %v12135_v42  ;;  %4558 = vmatprep.mubr.f32.mxu0 %v12136_v47  ;;  %v6256_v4 = vpack.c.bf16 %v12170_v13, %v12168_v32  ;;  %v12178_v41 = vand.u32 4294901760, %v12177_v56  ;;  %v12184_v42 = vand.u32 4294901760, %v12183_v46  ;;  %v12185_v47 = vld [vmem:[#allocation36_spill] sm:$0xff]  ;;  %v12196_v6 = vand.u32 4294901760, %v12195_v63  ;;  %v12215_v45 = vld [vmem:[#allocation47_spill] sm:$0xff]  ;;  %v12219_v32 = vld [vmem:[#allocation165_spill] sm:$0xff] }
 0x252   : > { %5957 = vmatpush1.bf16.msra.mxu1 %v5956_v55  ;;  %6245 = vmatpush1.bf16.msra.mxu0 %v6244_v20  ;;  %v12179_v55 = vld [vmem:[#allocation31_spill] sm:$0xff]  ;;  %v12182_v20 = vand.u32 4294901760, %v12181_v16  ;;  %v12186_v49 = vand.u32 4294901760, %v12185_v47  ;;  %v12204_v15 = vand.u32 4294901760, %v12203_v14  ;;  %v12216_v18 = vand.u32 4294901760, %v12215_v45  ;;  %v12221_v13 = vld [vmem:[#allocation166_spill] sm:$0xff] }
 0x253   : > { %5958 = vmatprep.subr.bf16.mxu1 %v11400_v61  ;;  %6246 = vmatprep.subr.bf16.mxu0 %v11400_v61  ;;  %v12180_v25 = vand.u32 4294901760, %v12179_v55  ;;  %v12220_v19 = vand.u32 4294901760, %v12219_v32  ;;  %v12223_v43 = vld [vmem:[#allocation167_spill] sm:$0xff]  ;;  %v12225_v29 = vld [vmem:[#allocation168_spill] sm:$0xff]  ;;  %v12255_v14 = vld [vmem:[#allocation182_spill] sm:$0xff] }
 0x254   : > { %1964 = vmatmul.mubr.f32.gmra.mrb[6].mxu1 %v12141_v10  ;;  %4562 = vmatmul.mubr.f32.gmra.mrb[6].mxu0 %v12142_v48  ;;  %v6259_v51 = vpack.c.bf16 %v12186_v49, %v12184_v42  ;;  %v12191_v10 = vld [vmem:[#allocation150_spill] sm:$0xff]  ;;  %v12229_v56 = vld [vmem:[#allocation51_spill] sm:$0xff]  ;;  %v12237_v49 = vld [vmem:[#allocation172_spill] sm:$0xff] }
 0x255   : > { %1971 = vmatprep.mubr.f32.mxu1 %v12143_v53  ;;  %4569 = vmatprep.mubr.f32.mxu0 %v12144_v62  ;;  %v5971_v58 = vpack.c.bf16 %v12182_v20, %v12180_v25  ;;  %v12192_v48 = vand.u32 4294901760, %v12191_v10  ;;  %v12193_v53 = vld [vmem:[#allocation153_spill] sm:$0xff]  ;;  %v12233_v20 = vld [vmem:[#allocation54_spill] sm:$0xff]  ;;  %v12235_v42 = vld [vmem:[#allocation171_spill] sm:$0xff] }
 0x256   : > { %5960 = vmatpush1.bf16.msra.mxu1 %v5959_v44  ;;  %6248 = vmatpush1.bf16.msra.mxu0 %v6247_v27  ;;  %v12187_v44 = vld [vmem:[#allocation148_spill] sm:$0xff]  ;;  %v12190_v27 = vand.u32 4294901760, %v12189_v2  ;;  %v12194_v62 = vand.u32 4294901760, %v12193_v53  ;;  %v12231_v25 = vld [vmem:[#allocation53_spill] sm:$0xff]  ;;  %v12236_v47 = vand.u32 4294901760, %v12235_v42  ;;  %v12243_v10 = vld [vmem:[#allocation55_spill] sm:$0xff] }
 0x257   : > { %5961 = vmatprep.subr.bf16.mxu1 %v11400_v61  ;;  %6249 = vmatprep.subr.bf16.mxu0 %v11400_v61  ;;  %v12188_v28 = vand.u32 4294901760, %v12187_v44  ;;  %v12232_v16 = vand.u32 4294901760, %v12231_v25  ;;  %v12239_v44 = vld [vmem:[#allocation176_spill] sm:$0xff]  ;;  %v12241_v2 = vld [vmem:[#allocation177_spill] sm:$0xff]  ;;  %v12271_v32 = vld [vmem:[#allocation190_spill] sm:$0xff] }
 0x258   : > { %1975 = vmatmul.mubr.f32.gmra.mrb[8].mxu1 %v12149_v21  ;;  %4573 = vmatmul.mubr.f32.gmra.mrb[8].mxu0 %v12150_v23  ;;  %v12201_v23 = vld [vmem:[#allocation42_spill] sm:$0xff]  ;;  %v12245_v53 = vld [vmem:[#allocation57_spill] sm:$0xff]  ;;  %v12287_v42 = vld [vmem:[#allocation200_spill] sm:$0xff] }
 0x259   : > { %1982 = vmatprep.mubr.f32.mxu1 %v12151_v8  ;;  %4580 = vmatprep.mubr.f32.mxu0 %v12152_v12  ;;  %v12202_v8 = vand.u32 4294901760, %v12201_v23 }
 0x25a   : > { %5963 = vmatpush1.bf16.msra.mxu1 %v5962_v9  ;;  %6251 = vmatpush1.bf16.msra.mxu0 %v6250_v26  ;;  %v12197_v9 = vld [vmem:[#allocation39_spill] sm:$0xff]  ;;  %v12199_v26 = vld [vmem:[#allocation40_spill] sm:$0xff] }
 0x25b   : > { %5964 = vmatprep.subr.bf16.mxu1 %v11400_v61  ;;  %6252 = vmatprep.subr.bf16.mxu0 %v11400_v61  ;;  %v12198_v3 = vand.u32 4294901760, %v12197_v9  ;;  %v12200_v21 = vand.u32 4294901760, %v12199_v26 }
 0x25c   : > { %1986 = vmatmul.mubr.f32.gmra.mrb[10].mxu1 %v12157_v40  ;;  %4584 = vmatmul.mubr.f32.gmra.mrb[10].mxu0 %v12158_v24  ;;  %v12209_v40 = vld [vmem:[#allocation162_spill] sm:$0xff] }
 0x25d   : > { %1993 = vmatprep.mubr.f32.mxu1 %v12160_v60  ;;  %4591 = vmatprep.mubr.f32.mxu0 %v12162_v0  ;;  %v5974_v38 = vpack.c.bf16 %v12198_v3, %v12196_v6  ;;  %v6262_v12 = vpack.c.bf16 %v12202_v8, %v12200_v21  ;;  %v12210_v24 = vand.u32 4294901760, %v12209_v40  ;;  %v12212_v60 = vand.u32 4294901760, %v12211_v35  ;;  %v12247_v6 = vld [vmem:[#allocation58_spill] sm:$0xff]  ;;  %v12249_v3 = vld [vmem:[#allocation60_spill] sm:$0xff]  ;;  %v12251_v21 = vld [vmem:[#allocation179_spill] sm:$0xff] }
 0x25e   : > { %5966 = vmatpush1.bf16.msra.mxu1 %v5965_v7  ;;  %6254 = vmatpush1.bf16.msra.mxu0 %v6253_v52  ;;  %v12205_v7 = vld [vmem:[#allocation156_spill] sm:$0xff]  ;;  %v12208_v52 = vand.u32 4294901760, %v12207_v31  ;;  %v12214_v0 = vand.u32 4294901760, %v12213_v36  ;;  %v12248_v9 = vand.u32 4294901760, %v12247_v6  ;;  %v12252_v23 = vand.u32 4294901760, %v12251_v21  ;;  %v12253_v8 = vld [vmem:[#allocation181_spill] sm:$0xff] }
 0x25f   : > { %5967 = vmatprep.subr.bf16.mxu1 %v11400_v61  ;;  %6255 = vmatprep.subr.bf16.mxu0 %v11400_v61  ;;  %v12206_v33 = vand.u32 4294901760, %v12205_v7  ;;  %v12257_v7 = vld [vmem:[#allocation185_spill] sm:$0xff]  ;;  %v12259_v31 = vld [vmem:[#allocation62_spill] sm:$0xff]  ;;  %v12261_v40 = vld [vmem:[#allocation63_spill] sm:$0xff] }
 0x260   : > { %1997 = vmatmul.mubr.f32.gmra.mrb[12].mxu1 %v12172_v59  ;;  %4595 = vmatmul.mubr.f32.gmra.mrb[12].mxu0 %v12174_v5  ;;  %v5977_v1 = vpack.c.bf16 %v12214_v0, %v12212_v60  ;;  %v12224_v59 = vand.u32 4294901760, %v12223_v43  ;;  %v12226_v5 = vand.u32 4294901760, %v12225_v29  ;;  %v12263_v60 = vld [vmem:[#allocation65_spill] sm:$0xff]  ;;  %v12265_v0 = vld [vmem:[#allocation66_spill] sm:$0xff]  ;;  %v12275_v43 = vld [vmem:[#allocation68_spill] sm:$0xff] }
 0x261   : > { %2004 = vmatprep.mubr.f32.mxu1 %v12176_v54  ;;  %4602 = vmatprep.mubr.f32.mxu0 %v12178_v41  ;;  %v12228_v54 = vand.u32 4294901760, %v12227_v34  ;;  %v12230_v41 = vand.u32 4294901760, %v12229_v56  ;;  %v12264_v36 = vand.u32 4294901760, %v12263_v60  ;;  %v12277_v29 = vld [vmem:[#allocation69_spill] sm:$0xff]  ;;  %v12303_v21 = vld [vmem:[#allocation208_spill] sm:$0xff] }
 0x262   : > { %5969 = vmatpush1.bf16.msra.mxu1 %v5968_v22  ;;  %6257 = vmatpush1.bf16.msra.mxu0 %v6256_v4  ;;  %v12218_v22 = vand.u32 4294901760, %v12217_v17  ;;  %v12222_v4 = vand.u32 4294901760, %v12221_v13  ;;  %v12273_v13 = vld [vmem:[#allocation194_spill] sm:$0xff] }
 0x263   : > { %5970 = vmatprep.subr.bf16.mxu1 %v11400_v61  ;;  %6258 = vmatprep.subr.bf16.mxu0 %v11400_v61  ;;  %v5980_v55 = vpack.c.bf16 %v12230_v41, %v12228_v54  ;;  %v12279_v54 = vld [vmem:[#allocation70_spill] sm:$0xff]  ;;  %v12281_v41 = vld [vmem:[#allocation72_spill] sm:$0xff] }
 0x264   : > { %2008 = vmatmul.mubr.f32.gmra.mrb[14].mxu1 %v12188_v28  ;;  %4606 = vmatmul.mubr.f32.gmra.mrb[14].mxu0 %v12190_v27  ;;  %v6265_v30 = vpack.c.bf16 %v12218_v22, %v12216_v18  ;;  %v12240_v28 = vand.u32 4294901760, %v12239_v44  ;;  %v12242_v27 = vand.u32 4294901760, %v12241_v2  ;;  %v12267_v18 = vld [vmem:[#allocation187_spill] sm:$0xff]  ;;  %v12269_v22 = vld [vmem:[#allocation188_spill] sm:$0xff]  ;;  %v12280_v56 = vand.u32 4294901760, %v12279_v54  ;;  %v12291_v44 = vld [vmem:[#allocation73_spill] sm:$0xff] }
 0x265   : > { %2015 = vmatprep.mubr.f32.mxu1 %v12192_v48  ;;  %4613 = vmatprep.mubr.f32.mxu0 %v12194_v62  ;;  %v12244_v48 = vand.u32 4294901760, %v12243_v10  ;;  %v12246_v62 = vand.u32 4294901760, %v12245_v53  ;;  %v12268_v17 = vand.u32 4294901760, %v12267_v18  ;;  %v12293_v2 = vld [vmem:[#allocation75_spill] sm:$0xff]  ;;  %v12319_v18 = vld [vmem:[#allocation214_spill] sm:$0xff] }
 0x266   : > { %5972 = vmatpush1.bf16.msra.mxu1 %v5971_v58  ;;  %6260 = vmatpush1.bf16.msra.mxu0 %v6259_v51  ;;  %v12234_v58 = vand.u32 4294901760, %v12233_v20  ;;  %v12238_v51 = vand.u32 4294901760, %v12237_v49  ;;  %v12289_v49 = vld [vmem:[#allocation201_spill] sm:$0xff] }
 0x267   : > { %5973 = vmatprep.subr.bf16.mxu1 %v11400_v61  ;;  %6261 = vmatprep.subr.bf16.mxu0 %v11400_v61  ;;  %v5983_v63 = vpack.c.bf16 %v12246_v62, %v12244_v48  ;;  %v12295_v48 = vld [vmem:[#allocation77_spill] sm:$0xff]  ;;  %v12297_v62 = vld [vmem:[#allocation78_spill] sm:$0xff] }
 0x268   : > { %2019 = vmatmul.mubr.f32.gmra.mrb[16].mxu1 %v12204_v15  ;;  %4617 = vmatmul.mubr.f32.gmra.mrb[16].mxu0 %v12206_v33  ;;  %v6268_v46 = vpack.c.bf16 %v12234_v58, %v12232_v16  ;;  %v12256_v15 = vand.u32 4294901760, %v12255_v14  ;;  %v12258_v33 = vand.u32 4294901760, %v12257_v7  ;;  %v12283_v16 = vld [vmem:[#allocation197_spill] sm:$0xff]  ;;  %v12285_v58 = vld [vmem:[#allocation198_spill] sm:$0xff]  ;;  %v12296_v53 = vand.u32 4294901760, %v12295_v48  ;;  %v12307_v14 = vld [vmem:[#allocation79_spill] sm:$0xff] }
 0x269   : > { %2026 = vmatprep.mubr.f32.mxu1 %v12208_v52  ;;  %4624 = vmatprep.mubr.f32.mxu0 %v12210_v24  ;;  %v12260_v52 = vand.u32 4294901760, %v12259_v31  ;;  %v12262_v24 = vand.u32 4294901760, %v12261_v40  ;;  %v12284_v20 = vand.u32 4294901760, %v12283_v16  ;;  %v12309_v7 = vld [vmem:[#allocation81_spill] sm:$0xff] }
 0x26a   : > { %5975 = vmatpush1.bf16.msra.mxu1 %v5974_v38  ;;  %6263 = vmatpush1.bf16.msra.mxu0 %v6262_v12  ;;  %v12250_v38 = vand.u32 4294901760, %v12249_v3  ;;  %v12254_v12 = vand.u32 4294901760, %v12253_v8  ;;  %v12305_v8 = vld [vmem:[#allocation209_spill] sm:$0xff] }
 0x26b   : > { %5976 = vmatprep.subr.bf16.mxu1 %v11400_v61  ;;  %6264 = vmatprep.subr.bf16.mxu0 %v11400_v61  ;;  %v5986_v35 = vpack.c.bf16 %v12262_v24, %v12260_v52  ;;  %v12311_v52 = vld [vmem:[#allocation83_spill] sm:$0xff]  ;;  %v12313_v24 = vld [vmem:[#allocation88_spill] sm:$0xff]  ;;  %v12337_v16 = vld [vmem:[#allocation233_spill] sm:$0xff] }
 0x26c   : > { %2030 = vmatmul.mubr.f32.gmra.mrb[18].mxu1 %v12220_v19  ;;  %4628 = vmatmul.mubr.f32.gmra.mrb[18].mxu0 %v12222_v4  ;;  %v6271_v26 = vpack.c.bf16 %v12250_v38, %v12248_v9  ;;  %v12272_v19 = vand.u32 4294901760, %v12271_v32  ;;  %v12274_v4 = vand.u32 4294901760, %v12273_v13  ;;  %v12299_v9 = vld [vmem:[#allocation202_spill] sm:$0xff]  ;;  %v12301_v38 = vld [vmem:[#allocation204_spill] sm:$0xff]  ;;  %v12312_v40 = vand.u32 4294901760, %v12311_v52  ;;  %v12323_v32 = vld [vmem:[#allocation219_spill] sm:$0xff] }
 0x26d   : > { %2037 = vmatprep.mubr.f32.mxu1 %v12224_v59  ;;  %4635 = vmatprep.mubr.f32.mxu0 %v12226_v5  ;;  %v12276_v59 = vand.u32 4294901760, %v12275_v43  ;;  %v12278_v5 = vand.u32 4294901760, %v12277_v29  ;;  %v12300_v3 = vand.u32 4294901760, %v12299_v9  ;;  %v12325_v13 = vld [vmem:[#allocation220_spill] sm:$0xff]  ;;  %v12327_v43 = vld [vmem:[#allocation222_spill] sm:$0xff]  ;;  %v12355_v9 = vld [vmem:[#allocation251_spill] sm:$0xff] }
 0x26e   : > { %5978 = vmatpush1.bf16.msra.mxu1 %v5977_v1  ;;  %6266 = vmatpush1.bf16.msra.mxu0 %v6265_v30  ;;  %v12266_v1 = vand.u32 4294901760, %v12265_v0  ;;  %v12270_v30 = vand.u32 4294901760, %v12269_v22  ;;  %v12321_v22 = vld [vmem:[#allocation217_spill] sm:$0xff]  ;;  %v12329_v29 = vld [vmem:[#allocation226_spill] sm:$0xff] }
 0x26f   : > { %5979 = vmatprep.subr.bf16.mxu1 %v11400_v61  ;;  %6267 = vmatprep.subr.bf16.mxu0 %v11400_v61  ;;  %v5989_v34 = vpack.c.bf16 %v12278_v5, %v12276_v59  ;;  %v12328_v59 = vand.u32 4294901760, %v12327_v43  ;;  %v12330_v5 = vand.u32 4294901760, %v12329_v29  ;;  %v12385_v43 = vld [vmem:[#allocation281_spill] sm:$0xff]  ;;  %v12387_v29 = vld [vmem:[#allocation283_spill] sm:$0xff] }
 0x270   : > { %2041 = vmatmul.mubr.f32.gmra.mrb[20].mxu1 %v12236_v47  ;;  %4639 = vmatmul.mubr.f32.gmra.mrb[20].mxu0 %v12238_v51  ;;  %v6274_v45 = vpack.c.bf16 %v12266_v1, %v12264_v36  ;;  %v12288_v47 = vand.u32 4294901760, %v12287_v42  ;;  %v12290_v51 = vand.u32 4294901760, %v12289_v49  ;;  %v12315_v36 = vld [vmem:[#allocation211_spill] sm:$0xff]  ;;  %v12317_v1 = vld [vmem:[#allocation213_spill] sm:$0xff]  ;;  %v12341_v42 = vld [vmem:[#allocation236_spill] sm:$0xff] }
 0x271   : > { %2048 = vmatprep.mubr.f32.mxu1 %v12240_v28  ;;  %4646 = vmatprep.mubr.f32.mxu0 %v12242_v27  ;;  %v12292_v28 = vand.u32 4294901760, %v12291_v44  ;;  %v12294_v27 = vand.u32 4294901760, %v12293_v2  ;;  %v12316_v0 = vand.u32 4294901760, %v12315_v36  ;;  %v12343_v49 = vld [vmem:[#allocation240_spill] sm:$0xff]  ;;  %v12345_v44 = vld [vmem:[#allocation241_spill] sm:$0xff]  ;;  %v12347_v2 = vld [vmem:[#allocation243_spill] sm:$0xff] }
 0x272   : > { %5981 = vmatpush1.bf16.msra.mxu1 %v5980_v55  ;;  %6269 = vmatpush1.bf16.msra.mxu0 %v6268_v46  ;;  %v12282_v55 = vand.u32 4294901760, %v12281_v41  ;;  %v12286_v46 = vand.u32 4294901760, %v12285_v58  ;;  %v12339_v58 = vld [vmem:[#allocation234_spill] sm:$0xff]  ;;  %v12373_v36 = vld [vmem:[#allocation268_spill] sm:$0xff] }
 0x273   : > { %5982 = vmatprep.subr.bf16.mxu1 %v11400_v61  ;;  %6270 = vmatprep.subr.bf16.mxu0 %v11400_v61  ;;  %v5992_v10 = vpack.c.bf16 %v12294_v27, %v12292_v28  ;;  %v12346_v28 = vand.u32 4294901760, %v12345_v44  ;;  %v12348_v27 = vand.u32 4294901760, %v12347_v2  ;;  %v12403_v44 = vld [vmem:[#allocation298_spill] sm:$0xff]  ;;  %v12405_v2 = vld [vmem:[#allocation300_spill] sm:$0xff] }
 0x274   : > { %2052 = vmatmul.mubr.f32.gmra.mrb[22].mxu1 %v12252_v23  ;;  %4650 = vmatmul.mubr.f32.gmra.mrb[22].mxu0 %v12254_v12  ;;  %v6277_v25 = vpack.c.bf16 %v12282_v55, %v12280_v56  ;;  %v12304_v23 = vand.u32 4294901760, %v12303_v21  ;;  %v12306_v12 = vand.u32 4294901760, %v12305_v8  ;;  %v12333_v56 = vld [vmem:[#allocation230_spill] sm:$0xff]  ;;  %v12335_v55 = vld [vmem:[#allocation232_spill] sm:$0xff] }
 0x275   : > { %2059 = vmatprep.mubr.f32.mxu1 %v12256_v15  ;;  %4657 = vmatprep.mubr.f32.mxu0 %v12258_v33  ;;  %v12308_v15 = vand.u32 4294901760, %v12307_v14  ;;  %v12310_v33 = vand.u32 4294901760, %v12309_v7  ;;  %v12334_v41 = vand.u32 4294901760, %v12333_v56  ;;  %v12359_v21 = vld [vmem:[#allocation254_spill] sm:$0xff]  ;;  %v12363_v14 = vld [vmem:[#allocation261_spill] sm:$0xff] }
 0x276   : > { %5984 = vmatpush1.bf16.msra.mxu1 %v5983_v63  ;;  %6272 = vmatpush1.bf16.msra.mxu0 %v6271_v26  ;;  %v12298_v63 = vand.u32 4294901760, %v12297_v62  ;;  %v12302_v26 = vand.u32 4294901760, %v12301_v38  ;;  %v12357_v38 = vld [vmem:[#allocation252_spill] sm:$0xff]  ;;  %v12361_v8 = vld [vmem:[#allocation258_spill] sm:$0xff] }
 0x277   : > { %5985 = vmatprep.subr.bf16.mxu1 %v11400_v61  ;;  %6273 = vmatprep.subr.bf16.mxu0 %v11400_v61  ;;  %v5995_v31 = vpack.c.bf16 %v12310_v33, %v12308_v15  ;;  %v12364_v15 = vand.u32 4294901760, %v12363_v14  ;;  %v12365_v7 = vld [vmem:[#allocation262_spill] sm:$0xff]  ;;  %v12421_v14 = vand.u32 4294901760, %v12104_v11  ;;  %v12434_v11 = vld [vmem:[#allocation336_spill] sm:$0xff] }
 0x278   : > { %2063 = vmatmul.mubr.f32.gmra.mrb[24].mxu1 %v12268_v17  ;;  %4661 = vmatmul.mubr.f32.gmra.mrb[24].mxu0 %v12270_v30  ;;  %v6280_v6 = vpack.c.bf16 %v12298_v63, %v12296_v53  ;;  %v12320_v17 = vand.u32 4294901760, %v12319_v18  ;;  %v12322_v30 = vand.u32 4294901760, %v12321_v22  ;;  %v12351_v53 = vld [vmem:[#allocation246_spill] sm:$0xff]  ;;  %v12353_v63 = vld [vmem:[#allocation249_spill] sm:$0xff]  ;;  %v12366_v33 = vand.u32 4294901760, %v12365_v7  ;;  %v12379_v22 = vld [vmem:[#allocation275_spill] sm:$0xff] }
 0x279   : > { %2070 = vmatprep.mubr.f32.mxu1 %v12272_v19  ;;  %4668 = vmatprep.mubr.f32.mxu0 %v12274_v4  ;;  %v12324_v19 = vand.u32 4294901760, %v12323_v32  ;;  %v12326_v4 = vand.u32 4294901760, %v12325_v13  ;;  %v12352_v62 = vand.u32 4294901760, %v12351_v53  ;;  %v12377_v18 = vld [vmem:[#allocation273_spill] sm:$0xff]  ;;  %v12383_v13 = vld [vmem:[#allocation278_spill] sm:$0xff] }
 0x27a   : > { %5987 = vmatpush1.bf16.msra.mxu1 %v5986_v35  ;;  %6275 = vmatpush1.bf16.msra.mxu0 %v6274_v45  ;;  %v12314_v35 = vand.u32 4294901760, %v12313_v24  ;;  %v12318_v45 = vand.u32 4294901760, %v12317_v1  ;;  %v12375_v1 = vld [vmem:[#allocation272_spill] sm:$0xff]  ;;  %v12381_v32 = vld [vmem:[#allocation277_spill] sm:$0xff]  ;;  %v12391_v56 = vld [vmem:[#allocation286_spill] sm:$0xff] }
 0x27b   : > { %5988 = vmatprep.subr.bf16.mxu1 %v11400_v61  ;;  %6276 = vmatprep.subr.bf16.mxu0 %v11400_v61  ;;  %v12409_v53 = vld [vmem:[#allocation305_spill] sm:$0xff] }
 0x27c   : > { %2074 = vmatmul.mubr.f32.gmra.mrb[26].mxu1 %v12284_v20  ;;  %4672 = vmatmul.mubr.f32.gmra.mrb[26].mxu0 %v12286_v46  ;;  %v6283_v60 = vpack.c.bf16 %v12314_v35, %v12312_v40  ;;  %v12338_v20 = vand.u32 4294901760, %v12337_v16  ;;  %v12340_v46 = vand.u32 4294901760, %v12339_v58  ;;  %v12369_v40 = vld [vmem:[#allocation265_spill] sm:$0xff]  ;;  %v12371_v35 = vld [vmem:[#allocation266_spill] sm:$0xff] }
 0x27d   : > { %2081 = vmatprep.mubr.f32.mxu1 %v12288_v47  ;;  %4679 = vmatprep.mubr.f32.mxu0 %v12290_v51  ;;  %v12342_v47 = vand.u32 4294901760, %v12341_v42  ;;  %v12344_v51 = vand.u32 4294901760, %v12343_v49  ;;  %v12370_v24 = vand.u32 4294901760, %v12369_v40  ;;  %v12395_v16 = vld [vmem:[#allocation293_spill] sm:$0xff]  ;;  %v12397_v58 = vld [vmem:[#allocation294_spill] sm:$0xff]  ;;  %v12399_v42 = vld [vmem:[#allocation296_spill] sm:$0xff] }
 0x27e   : > { %5990 = vmatpush1.bf16.msra.mxu1 %v5989_v34  ;;  %6278 = vmatpush1.bf16.msra.mxu0 %v6277_v25  ;;  %v12331_v34 = vld [vmem:[#allocation229_spill] sm:$0xff]  ;;  %v12336_v25 = vand.u32 4294901760, %v12335_v55  ;;  %v12393_v55 = vld [vmem:[#allocation290_spill] sm:$0xff] }
 0x27f   : > { %5991 = vmatprep.subr.bf16.mxu1 %v11400_v61  ;;  %6279 = vmatprep.subr.bf16.mxu0 %v11400_v61  ;;  %v12332_v54 = vand.u32 4294901760, %v12331_v34  ;;  %v12389_v34 = vld [vmem:[#allocation284_spill] sm:$0xff]  ;;  %v12401_v49 = vld [vmem:[#allocation297_spill] sm:$0xff] }
 0x280   : > { %2085 = vmatmul.mubr.f32.gmra.mrb[28].mxu1 %v12300_v3  ;;  %4683 = vmatmul.mubr.f32.gmra.mrb[28].mxu0 %v12302_v26  ;;  %v12356_v3 = vand.u32 4294901760, %v12355_v9  ;;  %v12358_v26 = vand.u32 4294901760, %v12357_v38  ;;  %v12413_v9 = vld [vmem:[#allocation309_spill] sm:$0xff]  ;;  %v12415_v38 = vld [vmem:[#allocation310_spill] sm:$0xff] }
 0x281   : > { %2092 = vmatprep.mubr.f32.mxu1 %v12304_v23  ;;  %4690 = vmatprep.mubr.f32.mxu0 %v12306_v12  ;;  %v12360_v23 = vand.u32 4294901760, %v12359_v21  ;;  %v12362_v12 = vand.u32 4294901760, %v12361_v8  ;;  %v12417_v21 = vand.u32 4294901760, %v12100_v50  ;;  %v12419_v8 = vand.u32 4294901760, %v12102_v57  ;;  %v12426_v50 = vld [vmem:[#allocation328_spill] sm:$0xff]  ;;  %v12430_v57 = vld [vmem:[#allocation330_spill] sm:$0xff] }
 0x282   : > { %5993 = vmatpush1.bf16.msra.mxu1 %v5992_v10  ;;  %6281 = vmatpush1.bf16.msra.mxu0 %v6280_v6  ;;  %v12349_v10 = vld [vmem:[#allocation245_spill] sm:$0xff]  ;;  %v12354_v6 = vand.u32 4294901760, %v12353_v63  ;;  %v12411_v63 = vld [vmem:[#allocation307_spill] sm:$0xff] }
 0x283   : > { %5994 = vmatprep.subr.bf16.mxu1 %v11400_v61  ;;  %6282 = vmatprep.subr.bf16.mxu0 %v11400_v61  ;;  %v12350_v48 = vand.u32 4294901760, %v12349_v10  ;;  %v12407_v10 = vld [vmem:[#allocation304_spill] sm:$0xff] }
 0x284   : > { %2096 = vmatmul.mubr.f32.gmra.mrb[30].mxu1 %v12316_v0  ;;  %4694 = vmatmul.mubr.f32.gmra.mrb[30].mxu0 %v12318_v45  ;;  %v12374_v0 = vand.u32 4294901760, %v12373_v36  ;;  %v12376_v45 = vand.u32 4294901760, %v12375_v1  ;;  %v12436_v36 = vld [vmem:[#allocation337_spill] sm:$0xff]  ;;  %v12438_v1 = vld [vmem:[#allocation339_spill] sm:$0xff] }
 0x285   : > { %2103 = vmatprep.mubr.f32.mxu1 %v12320_v17  ;;  %4701 = vmatprep.mubr.f32.mxu0 %v12322_v30  ;;  %v12378_v17 = vand.u32 4294901760, %v12377_v18  ;;  %v12380_v30 = vand.u32 4294901760, %v12379_v22  ;;  %v12440_v18 = vld [vmem:[#allocation340_spill] sm:$0xff]  ;;  %v12442_v22 = vld [vmem:[#allocation82_spill] sm:$0xff] }
 0x286   : > { %5996 = vmatpush1.bf16.msra.mxu1 %v5995_v31  ;;  %6284 = vmatpush1.bf16.msra.mxu0 %v6283_v60  ;;  %v12367_v31 = vld [vmem:[#allocation264_spill] sm:$0xff]  ;;  %v12372_v60 = vand.u32 4294901760, %v12371_v35 }
 0x287   : > { %5997 = vmatprep.subr.bf16.mxu1 %v11400_v61  ;;  %6285 = vmatprep.subr.bf16.mxu0 %v11400_v61  ;;  %v12368_v52 = vand.u32 4294901760, %v12367_v31 }
 0x288   : > { %2107 = vmatmul.mubr.f32.gmra.mrb[32].mxu1 %v12324_v19  ;;  %4705 = vmatmul.mubr.f32.gmra.mrb[32].mxu0 %v12326_v4  ;;  %v12382_v19 = vand.u32 4294901760, %v12381_v32  ;;  %v12384_v4 = vand.u32 4294901760, %v12383_v13  ;;  %v12444_v32 = vld [vmem:[#allocation85_spill] sm:$0xff] }
 0x289   : > { %2114 = vmatprep.mubr.f32.mxu1 %v12328_v59  ;;  %4712 = vmatprep.mubr.f32.mxu0 %v12330_v5  ;;  %v12386_v59 = vand.u32 4294901760, %v12385_v43  ;;  %v12388_v5 = vand.u32 4294901760, %v12387_v29  ;;  %v12446_v13 = vld [vmem:[#allocation5_spill] sm:$0xff]  ;;  %v12450_v29 = vld [vmem:[#allocation96_spill] sm:$0xff] }
 0x28a   : > { %v12448_v43 = vld [vmem:[#allocation93_spill] sm:$0xff] }
 0x28c   : > { %2118 = vmatmul.mubr.f32.gmra.mrb[34].mxu1 %v12332_v54  ;;  %4716 = vmatmul.mubr.f32.gmra.mrb[34].mxu0 %v12334_v41  ;;  %v12390_v54 = vand.u32 4294901760, %v12389_v34  ;;  %v12392_v41 = vand.u32 4294901760, %v12391_v56  ;;  %v12452_v34 = vld [vmem:[#allocation98_spill] sm:$0xff]  ;;  %v12454_v56 = vld [vmem:[#allocation11_spill] sm:$0xff] }
 0x28d   : > { %2125 = vmatprep.mubr.f32.mxu1 %v12336_v25  ;;  %4723 = vmatprep.mubr.f32.mxu0 %v12338_v20  ;;  %v12394_v25 = vand.u32 4294901760, %v12393_v55  ;;  %v12396_v20 = vand.u32 4294901760, %v12395_v16  ;;  %v12456_v55 = vld [vmem:[#allocation100_spill] sm:$0xff]  ;;  %v12458_v16 = vld [vmem:[#allocation109_spill] sm:$0xff] }
 0x290   : > { %2129 = vmatmul.mubr.f32.gmra.mrb[36].mxu1 %v12340_v46  ;;  %4727 = vmatmul.mubr.f32.gmra.mrb[36].mxu0 %v12342_v47  ;;  %v12398_v46 = vand.u32 4294901760, %v12397_v58  ;;  %v12400_v47 = vand.u32 4294901760, %v12399_v42  ;;  %v12460_v58 = vld [vmem:[#allocation16_spill] sm:$0xff]  ;;  %v12462_v42 = vld [vmem:[#allocation111_spill] sm:$0xff] }
 0x291   : > { %2136 = vmatprep.mubr.f32.mxu1 %v12344_v51  ;;  %4734 = vmatprep.mubr.f32.mxu0 %v12346_v28  ;;  %v12402_v51 = vand.u32 4294901760, %v12401_v49  ;;  %v12404_v28 = vand.u32 4294901760, %v12403_v44  ;;  %v12464_v49 = vld [vmem:[#allocation117_spill] sm:$0xff]  ;;  %v12466_v44 = vld [vmem:[#allocation18_spill] sm:$0xff] }
 0x294   : > { %2140 = vmatmul.mubr.f32.gmra.mrb[38].mxu1 %v12348_v27  ;;  %4738 = vmatmul.mubr.f32.gmra.mrb[38].mxu0 %v12350_v48  ;;  %v12406_v27 = vand.u32 4294901760, %v12405_v2  ;;  %v12408_v48 = vand.u32 4294901760, %v12407_v10  ;;  %v12468_v2 = vld [vmem:[#allocation121_spill] sm:$0xff] }
 0x295   : > { %2147 = vmatprep.mubr.f32.mxu1 %v12352_v62  ;;  %4745 = vmatprep.mubr.f32.mxu0 %v12354_v6  ;;  %v12410_v62 = vand.u32 4294901760, %v12409_v53  ;;  %v12412_v6 = vand.u32 4294901760, %v12411_v63  ;;  %v12470_v10 = vld [vmem:[#allocation125_spill] sm:$0xff]  ;;  %v12472_v53 = vld [vmem:[#allocation20_spill] sm:$0xff] }
 0x296   : > { %v12474_v63 = vld [vmem:[#allocation128_spill] sm:$0xff] }
 0x298   : > { %2151 = vmatmul.mubr.f32.gmra.mrb[40].mxu1 %v12356_v3  ;;  %4749 = vmatmul.mubr.f32.gmra.mrb[40].mxu0 %v12358_v26  ;;  %v12414_v3 = vand.u32 4294901760, %v12413_v9  ;;  %v12416_v26 = vand.u32 4294901760, %v12415_v38  ;;  %v12476_v9 = vld [vmem:[#allocation131_spill] sm:$0xff]  ;;  %v12478_v38 = vld [vmem:[#allocation22_spill] sm:$0xff] }
 0x299   : > { %2158 = vmatprep.mubr.f32.mxu1 %v12360_v23  ;;  %4756 = vmatprep.mubr.f32.mxu0 %v12362_v12  ;;  %v12418_v23 = vand.u32 4294901760, %v12101_v37  ;;  %v12420_v12 = vand.u32 4294901760, %v12103_v39  ;;  %v12428_v37 = vld [vmem:[#allocation329_spill] sm:$0xff]  ;;  %v12432_v39 = vld [vmem:[#allocation332_spill] sm:$0xff] }
 0x29a   : > { %v12429_v40 = vand.u32 4294901760, %v12428_v37  ;;  %v12433_v35 = vand.u32 4294901760, %v12432_v39  ;;  %v12491_v37 = vld [vmem:[#allocation34_spill] sm:$0xff]  ;;  %v12495_v39 = vld [vmem:[#allocation159_spill] sm:$0xff] }
 0x29c   : > { %2162 = vmatmul.mubr.f32.gmra.mrb[42].mxu1 %v12364_v15  ;;  %4760 = vmatmul.mubr.f32.gmra.mrb[42].mxu0 %v12366_v33  ;;  %v12422_v15 = vld [vmem:[#allocation325_spill] sm:$0xff]  ;;  %v12424_v33 = vld [vmem:[#allocation326_spill] sm:$0xff] }
 0x29d   : > { %2169 = vmatprep.mubr.f32.mxu1 %v12368_v52  ;;  %4767 = vmatprep.mubr.f32.mxu0 %v12370_v24  ;;  %v12423_v7 = vand.u32 4294901760, %v12422_v15  ;;  %v12425_v31 = vand.u32 4294901760, %v12424_v33  ;;  %v12427_v52 = vand.u32 4294901760, %v12426_v50  ;;  %v12431_v24 = vand.u32 4294901760, %v12430_v57  ;;  %v12485_v15 = vld [vmem:[#allocation28_spill] sm:$0xff]  ;;  %v12487_v33 = vld [vmem:[#allocation145_spill] sm:$0xff] }
 0x29e   : > { %v12489_v50 = vld [vmem:[#allocation151_spill] sm:$0xff]  ;;  %v12493_v57 = vld [vmem:[#allocation154_spill] sm:$0xff] }
 0x2a0   : > { %2173 = vmatmul.mubr.f32.gmra.mrb[44].mxu1 %v12372_v60  ;;  %4771 = vmatmul.mubr.f32.gmra.mrb[44].mxu0 %v12374_v0  ;;  %v12435_v60 = vand.u32 4294901760, %v12434_v11  ;;  %v12437_v0 = vand.u32 4294901760, %v12436_v36  ;;  %v12497_v11 = vld [vmem:[#allocation41_spill] sm:$0xff] }
 0x2a1   : > { %2180 = vmatprep.mubr.f32.mxu1 %v12376_v45  ;;  %4778 = vmatprep.mubr.f32.mxu0 %v12378_v17  ;;  %v12439_v45 = vand.u32 4294901760, %v12438_v1  ;;  %v12441_v17 = vand.u32 4294901760, %v12440_v18  ;;  %v12499_v36 = vld [vmem:[#allocation161_spill] sm:$0xff]  ;;  %v12501_v1 = vld [vmem:[#allocation164_spill] sm:$0xff]  ;;  %v12503_v18 = vld [vmem:[#allocation46_spill] sm:$0xff] }
 0x2a4   : > { %2184 = vmatmul.mubr.f32.gmra.mrb[46].mxu1 %v12380_v30  ;;  %4782 = vmatmul.mubr.f32.gmra.mrb[46].mxu0 %v12382_v19  ;;  %v12443_v30 = vld [vmem:[#allocation84_spill] sm:$0xff]  ;;  %v12445_v19 = vld [vmem:[#allocation86_spill] sm:$0xff] }
 0x2a5   : > { %2191 = vmatprep.mubr.f32.mxu1 %v12384_v4  ;;  %4789 = vmatprep.mubr.f32.mxu0 %v12386_v59  ;;  %v12447_v4 = vld [vmem:[#allocation9_spill] sm:$0xff]  ;;  %v12449_v59 = vld [vmem:[#allocation95_spill] sm:$0xff] }
 0x2a8   : > { %2195 = vmatmul.mubr.f32.gmra.mrb[48].mxu1 %v12388_v5  ;;  %4793 = vmatmul.mubr.f32.gmra.mrb[48].mxu0 %v12390_v54  ;;  %v12451_v5 = vld [vmem:[#allocation97_spill] sm:$0xff]  ;;  %v12453_v54 = vld [vmem:[#allocation99_spill] sm:$0xff] }
 0x2a9   : > { %2202 = vmatprep.mubr.f32.mxu1 %v12392_v41  ;;  %4800 = vmatprep.mubr.f32.mxu0 %v12394_v25  ;;  %v12455_v41 = vld [vmem:[#allocation14_spill] sm:$0xff]  ;;  %v12457_v25 = vld [vmem:[#allocation103_spill] sm:$0xff] }
 0x2ac   : > { %2206 = vmatmul.mubr.f32.gmra.mrb[50].mxu1 %v12396_v20  ;;  %4804 = vmatmul.mubr.f32.gmra.mrb[50].mxu0 %v12398_v46  ;;  %v12459_v20 = vld [vmem:[#allocation110_spill] sm:$0xff]  ;;  %v12461_v46 = vld [vmem:[#allocation17_spill] sm:$0xff] }
 0x2ad   : > { %2213 = vmatprep.mubr.f32.mxu1 %v12400_v47  ;;  %4811 = vmatprep.mubr.f32.mxu0 %v12402_v51  ;;  %v12463_v47 = vld [vmem:[#allocation112_spill] sm:$0xff]  ;;  %v12465_v51 = vld [vmem:[#allocation119_spill] sm:$0xff] }
 0x2b0   : > { %2217 = vmatmul.mubr.f32.gmra.mrb[52].mxu1 %v12404_v28  ;;  %4815 = vmatmul.mubr.f32.gmra.mrb[52].mxu0 %v12406_v27  ;;  %v12467_v28 = vld [vmem:[#allocation19_spill] sm:$0xff]  ;;  %v12469_v27 = vld [vmem:[#allocation122_spill] sm:$0xff] }
 0x2b1   : > { %2224 = vmatprep.mubr.f32.mxu1 %v12408_v48  ;;  %4822 = vmatprep.mubr.f32.mxu0 %v12410_v62  ;;  %v12471_v48 = vld [vmem:[#allocation127_spill] sm:$0xff]  ;;  %v12473_v62 = vld [vmem:[#allocation21_spill] sm:$0xff] }
 0x2b4   : > { %2228 = vmatmul.mubr.f32.gmra.mrb[54].mxu1 %v12412_v6  ;;  %4826 = vmatmul.mubr.f32.gmra.mrb[54].mxu0 %v12414_v3  ;;  %v12475_v6 = vld [vmem:[#allocation129_spill] sm:$0xff]  ;;  %v12477_v3 = vld [vmem:[#allocation134_spill] sm:$0xff] }
 0x2b5   : > { %2235 = vmatprep.mubr.f32.mxu1 %v12416_v26  ;;  %4833 = vmatprep.mubr.f32.mxu0 %v12417_v21  ;;  %v12479_v26 = vld [vmem:[#allocation23_spill] sm:$0xff] }
 0x2b6   : > { %v12480_v21 = vld [vmem:[#allocation135_spill] sm:$0xff] }
 0x2b8   : > { %2239 = vmatmul.mubr.f32.gmra.mrb[56].mxu1 %v12418_v23  ;;  %4837 = vmatmul.mubr.f32.gmra.mrb[56].mxu0 %v12419_v8  ;;  %v12481_v23 = vld [vmem:[#allocation137_spill] sm:$0xff] }
 0x2b9   : > { %2246 = vmatprep.mubr.f32.mxu1 %v12420_v12  ;;  %4844 = vmatprep.mubr.f32.mxu0 %v12421_v14  ;;  %v12482_v8 = vld [vmem:[#allocation141_spill] sm:$0xff]  ;;  %v12483_v12 = vld [vmem:[#allocation142_spill] sm:$0xff] }
 0x2ba   : > { %v12484_v14 = vld [vmem:[#allocation25_spill] sm:$0xff] }
 0x2bc   : > { %2250 = vmatmul.mubr.f32.gmra.mrb[58].mxu1 %v12423_v7  ;;  %4848 = vmatmul.mubr.f32.gmra.mrb[58].mxu0 %v12425_v31  ;;  %v12486_v7 = vld [vmem:[#allocation143_spill] sm:$0xff]  ;;  %v12488_v31 = vld [vmem:[#allocation146_spill] sm:$0xff] }
 0x2bd   : > { %2257 = vmatprep.mubr.f32.mxu1 %v12427_v52  ;;  %4855 = vmatprep.mubr.f32.mxu0 %v12429_v40  ;;  %v12490_v52 = vld [vmem:[#allocation32_spill] sm:$0xff] }
 0x2be   : > { %v12492_v40 = vld [vmem:[#allocation152_spill] sm:$0xff] }
 0x2c0   : > { %2261 = vmatmul.mubr.f32.gmra.mrb[60].mxu1 %v12431_v24  ;;  %4859 = vmatmul.mubr.f32.gmra.mrb[60].mxu0 %v12433_v35  ;;  %v12494_v24 = vld [vmem:[#allocation157_spill] sm:$0xff] }
 0x2c1   : > { %2268 = vmatprep.mubr.f32.mxu1 %v12435_v60  ;;  %4866 = vmatprep.mubr.f32.mxu0 %v12437_v0  ;;  %v12496_v35 = vld [vmem:[#allocation37_spill] sm:$0xff]  ;;  %v12498_v60 = vld [vmem:[#allocation160_spill] sm:$0xff]  ;;  %v12500_v0 = vld [vmem:[#allocation163_spill] sm:$0xff] }
 0x2c4   : > { %2272 = vmatmul.mubr.f32.gmra.mrb[62].mxu1 %v12439_v45  ;;  %4870 = vmatmul.mubr.f32.gmra.mrb[62].mxu0 %v12441_v17  ;;  %v12502_v45 = vld [vmem:[#allocation43_spill] sm:$0xff]  ;;  %v12504_v17 = vld [vmem:[#allocation169_spill] sm:$0xff] }
 0x2c5   : > { %2438 = vmatprep.mubr.f32.mxu1 %v12442_v22  ;;  %5036 = vmatprep.mubr.f32.mxu0 %v12443_v30 }
 0x2c8   : > { %2440 = vmatmul.mubr.f32.vlgmr.msra.gmra.mrb[0].mxu1 %v12444_v32  ;;  %5038 = vmatmul.mubr.f32.vlgmr.msra.gmra.mrb[0].mxu0 %v12445_v19 }
 0x2c9   : > { %5999 = vmatpush1.bf16.msra.mxu1 %v12446_v13  ;;  %6287 = vmatpush1.bf16.msra.mxu0 %v12447_v4  ;;  %v12505_v13 = vld [vmem:[#allocation170_spill] sm:$0xff]  ;;  %v12506_v4 = vld [vmem:[#allocation173_spill] sm:$0xff] }
 0x2ca   : > { %2445 = vmatprep.mubr.f32.mxu1 %v12448_v43  ;;  %5043 = vmatprep.mubr.f32.mxu0 %v12449_v59 }
 0x2cb   : > { %6000 = vmatprep.subr.bf16.mxu1 %v11400_v61  ;;  %6288 = vmatprep.subr.bf16.mxu0 %v11400_v61 }
 0x2cc   : > { %2447 = vmatmul.mubr.f32.gmra.mrb[2].mxu1 %v12450_v29  ;;  %5045 = vmatmul.mubr.f32.gmra.mrb[2].mxu0 %v12451_v5 }
 0x2cd   : > { %2452 = vmatprep.mubr.f32.mxu1 %v12452_v34  ;;  %5050 = vmatprep.mubr.f32.mxu0 %v12453_v54 }
 0x2ce   : > { %6002 = vmatpush1.bf16.msra.mxu1 %v12454_v56  ;;  %6290 = vmatpush1.bf16.msra.mxu0 %v12455_v41  ;;  %v12507_v56 = vld [vmem:[#allocation174_spill] sm:$0xff] }
 0x2cf   : > { %6003 = vmatprep.subr.bf16.mxu1 %v11400_v61  ;;  %6291 = vmatprep.subr.bf16.mxu0 %v11400_v61  ;;  %v12508_v41 = vld [vmem:[#allocation50_spill] sm:$0xff] }
 0x2d0   : > { %2454 = vmatmul.mubr.f32.gmra.mrb[4].mxu1 %v12456_v55  ;;  %5052 = vmatmul.mubr.f32.gmra.mrb[4].mxu0 %v12457_v25 }
 0x2d1   : > { %2459 = vmatprep.mubr.f32.mxu1 %v12458_v16  ;;  %5057 = vmatprep.mubr.f32.mxu0 %v12459_v20 }
 0x2d2   : > { %6005 = vmatpush1.bf16.msra.mxu1 %v12460_v58  ;;  %6293 = vmatpush1.bf16.msra.mxu0 %v12461_v46  ;;  %v12509_v58 = vld [vmem:[#allocation52_spill] sm:$0xff]  ;;  %v12510_v46 = vld [vmem:[#allocation175_spill] sm:$0xff] }
 0x2d3   : > { %6006 = vmatprep.subr.bf16.mxu1 %v11400_v61  ;;  %6294 = vmatprep.subr.bf16.mxu0 %v11400_v61 }
 0x2d4   : > { %2461 = vmatmul.mubr.f32.gmra.mrb[6].mxu1 %v12462_v42  ;;  %5059 = vmatmul.mubr.f32.gmra.mrb[6].mxu0 %v12463_v47 }
 0x2d5   : > { %2466 = vmatprep.mubr.f32.mxu1 %v12464_v49  ;;  %5064 = vmatprep.mubr.f32.mxu0 %v12465_v51 }
 0x2d6   : > { %6008 = vmatpush1.bf16.msra.mxu1 %v12466_v44  ;;  %6296 = vmatpush1.bf16.msra.mxu0 %v12467_v28  ;;  %v12511_v44 = vld [vmem:[#allocation178_spill] sm:$0xff]  ;;  %v12512_v28 = vld [vmem:[#allocation180_spill] sm:$0xff] }
 0x2d7   : > { %6009 = vmatprep.subr.bf16.mxu1 %v11400_v61  ;;  %6297 = vmatprep.subr.bf16.mxu0 %v11400_v61 }
 0x2d8   : > { %2468 = vmatmul.mubr.f32.gmra.mrb[8].mxu1 %v12468_v2  ;;  %5066 = vmatmul.mubr.f32.gmra.mrb[8].mxu0 %v12469_v27 }
 0x2d9   : > { %2473 = vmatprep.mubr.f32.mxu1 %v12470_v10  ;;  %5071 = vmatprep.mubr.f32.mxu0 %v12471_v48 }
 0x2da   : > { %6011 = vmatpush1.bf16.msra.mxu1 %v12472_v53  ;;  %6299 = vmatpush1.bf16.msra.mxu0 %v12473_v62  ;;  %v12513_v53 = vld [vmem:[#allocation183_spill] sm:$0xff]  ;;  %v12514_v62 = vld [vmem:[#allocation56_spill] sm:$0xff] }
 0x2db   : > { %6012 = vmatprep.subr.bf16.mxu1 %v11400_v61  ;;  %6300 = vmatprep.subr.bf16.mxu0 %v11400_v61 }
 0x2dc   : > { %2475 = vmatmul.mubr.f32.gmra.mrb[10].mxu1 %v12474_v63  ;;  %5073 = vmatmul.mubr.f32.gmra.mrb[10].mxu0 %v12475_v6 }
 0x2dd   : > { %2480 = vmatprep.mubr.f32.mxu1 %v12476_v9  ;;  %5078 = vmatprep.mubr.f32.mxu0 %v12477_v3 }
 0x2de   : > { %6014 = vmatpush1.bf16.msra.mxu1 %v12478_v38  ;;  %6302 = vmatpush1.bf16.msra.mxu0 %v12479_v26  ;;  %v12515_v38 = vld [vmem:[#allocation59_spill] sm:$0xff]  ;;  %v12516_v26 = vld [vmem:[#allocation184_spill] sm:$0xff] }
 0x2df   : > { %6015 = vmatprep.subr.bf16.mxu1 %v11400_v61  ;;  %6303 = vmatprep.subr.bf16.mxu0 %v11400_v61 }
 0x2e0   : > { %2482 = vmatmul.mubr.f32.gmra.mrb[12].mxu1 %v12480_v21  ;;  %5080 = vmatmul.mubr.f32.gmra.mrb[12].mxu0 %v12481_v23 }
 0x2e1   : > { %2487 = vmatprep.mubr.f32.mxu1 %v12482_v8  ;;  %5085 = vmatprep.mubr.f32.mxu0 %v12483_v12 }
 0x2e2   : > { %6017 = vmatpush1.bf16.msra.mxu1 %v12484_v14  ;;  %6305 = vmatpush1.bf16.msra.mxu0 %v12485_v15  ;;  %v12517_v14 = vld [vmem:[#allocation186_spill] sm:$0xff]  ;;  %v12518_v15 = vld [vmem:[#allocation189_spill] sm:$0xff] }
 0x2e3   : > { %6018 = vmatprep.subr.bf16.mxu1 %v11400_v61  ;;  %6306 = vmatprep.subr.bf16.mxu0 %v11400_v61 }
 0x2e4   : > { %2489 = vmatmul.mubr.f32.gmra.mrb[14].mxu1 %v12486_v7  ;;  %5087 = vmatmul.mubr.f32.gmra.mrb[14].mxu0 %v12487_v33 }
 0x2e5   : > { %2494 = vmatprep.mubr.f32.mxu1 %v12488_v31  ;;  %5092 = vmatprep.mubr.f32.mxu0 %v12489_v50 }
 0x2e6   : > { %6020 = vmatpush1.bf16.msra.mxu1 %v12490_v52  ;;  %6308 = vmatpush1.bf16.msra.mxu0 %v12491_v37  ;;  %v12519_v52 = vld [vmem:[#allocation191_spill] sm:$0xff]  ;;  %v12520_v37 = vld [vmem:[#allocation61_spill] sm:$0xff] }
 0x2e7   : > { %6021 = vmatprep.subr.bf16.mxu1 %v11400_v61  ;;  %6309 = vmatprep.subr.bf16.mxu0 %v11400_v61 }
 0x2e8   : > { %2496 = vmatmul.mubr.f32.gmra.mrb[16].mxu1 %v12492_v40  ;;  %5094 = vmatmul.mubr.f32.gmra.mrb[16].mxu0 %v12493_v57 }
 0x2e9   : > { %2501 = vmatprep.mubr.f32.mxu1 %v12494_v24  ;;  %5099 = vmatprep.mubr.f32.mxu0 %v12495_v39 }
 0x2ea   : > { %6023 = vmatpush1.bf16.msra.mxu1 %v12496_v35  ;;  %6311 = vmatpush1.bf16.msra.mxu0 %v12497_v11  ;;  %v12521_v35 = vld [vmem:[#allocation64_spill] sm:$0xff] }
 0x2eb   : > { %6024 = vmatprep.subr.bf16.mxu1 %v11400_v61  ;;  %6312 = vmatprep.subr.bf16.mxu0 %v11400_v61  ;;  %v12522_v11 = vld [vmem:[#allocation192_spill] sm:$0xff] }
 0x2ec   : > { %2503 = vmatmul.mubr.f32.gmra.mrb[18].mxu1 %v12498_v60  ;;  %5101 = vmatmul.mubr.f32.gmra.mrb[18].mxu0 %v12499_v36 }
 0x2ed   : > { %2508 = vmatprep.mubr.f32.mxu1 %v12500_v0  ;;  %5106 = vmatprep.mubr.f32.mxu0 %v12501_v1 }
 0x2ee   : > { %6026 = vmatpush1.bf16.msra.mxu1 %v12502_v45  ;;  %6314 = vmatpush1.bf16.msra.mxu0 %v12503_v18  ;;  %v12523_v45 = vld [vmem:[#allocation193_spill] sm:$0xff]  ;;  %v12524_v18 = vld [vmem:[#allocation195_spill] sm:$0xff] }
 0x2ef   : > { %6027 = vmatprep.subr.bf16.mxu1 %v11400_v61  ;;  %6315 = vmatprep.subr.bf16.mxu0 %v11400_v61 }
 0x2f0   : > { %2510 = vmatmul.mubr.f32.gmra.mrb[20].mxu1 %v12504_v17  ;;  %5108 = vmatmul.mubr.f32.gmra.mrb[20].mxu0 %v12505_v13 }
 0x2f1   : > { %2515 = vmatprep.mubr.f32.mxu1 %v12506_v4  ;;  %5113 = vmatprep.mubr.f32.mxu0 %v12507_v56 }
 0x2f2   : > { %6029 = vmatpush1.bf16.msra.mxu1 %v12508_v41  ;;  %6317 = vmatpush1.bf16.msra.mxu0 %v12509_v58  ;;  %v12525_v41 = vld [vmem:[#allocation196_spill] sm:$0xff]  ;;  %v12526_v58 = vld [vmem:[#allocation67_spill] sm:$0xff] }
 0x2f3   : > { %6030 = vmatprep.subr.bf16.mxu1 %v11400_v61  ;;  %6318 = vmatprep.subr.bf16.mxu0 %v11400_v61 }
 0x2f4   : > { %2517 = vmatmul.mubr.f32.gmra.mrb[22].mxu1 %v12510_v46  ;;  %5115 = vmatmul.mubr.f32.gmra.mrb[22].mxu0 %v12511_v44 }
 0x2f5   : > { %2522 = vmatprep.mubr.f32.mxu1 %v12512_v28  ;;  %5120 = vmatprep.mubr.f32.mxu0 %v12513_v53 }
 0x2f6   : > { %6032 = vmatpush1.bf16.msra.mxu1 %v12514_v62  ;;  %6320 = vmatpush1.bf16.msra.mxu0 %v12515_v38  ;;  %v12527_v62 = vld [vmem:[#allocation71_spill] sm:$0xff] }
 0x2f7   : > { %6033 = vmatprep.subr.bf16.mxu1 %v11400_v61  ;;  %6321 = vmatprep.subr.bf16.mxu0 %v11400_v61  ;;  %v12528_v38 = vld [vmem:[#allocation199_spill] sm:$0xff] }
 0x2f8   : > { %2524 = vmatmul.mubr.f32.gmra.mrb[24].mxu1 %v12516_v26  ;;  %5122 = vmatmul.mubr.f32.gmra.mrb[24].mxu0 %v12517_v14 }
 0x2f9   : > { %2529 = vmatprep.mubr.f32.mxu1 %v12518_v15  ;;  %5127 = vmatprep.mubr.f32.mxu0 %v12519_v52  ;;  %v12543_v52 = vld [vmem:[#allocation223_spill] sm:$0xff] }
 0x2fa   : > { %6035 = vmatpush1.bf16.msra.mxu1 %v12520_v37  ;;  %6323 = vmatpush1.bf16.msra.mxu0 %v12521_v35  ;;  %v12529_v37 = vld [vmem:[#allocation203_spill] sm:$0xff]  ;;  %v12530_v35 = vld [vmem:[#allocation205_spill] sm:$0xff] }
 0x2fb   : > { %6036 = vmatprep.subr.bf16.mxu1 %v11400_v61  ;;  %6324 = vmatprep.subr.bf16.mxu0 %v11400_v61 }
 0x2fc   : > { %2531 = vmatmul.mubr.f32.gmra.mrb[26].mxu1 %v12522_v11  ;;  %5129 = vmatmul.mubr.f32.gmra.mrb[26].mxu0 %v12523_v45  ;;  %v12531_v11 = vld [vmem:[#allocation206_spill] sm:$0xff] }
 0x2fd   : > { %2536 = vmatprep.mubr.f32.mxu1 %v12524_v18  ;;  %5134 = vmatprep.mubr.f32.mxu0 %v12525_v41  ;;  %v12532_v45 = vld [vmem:[#allocation74_spill] sm:$0xff]  ;;  %v12533_v18 = vld [vmem:[#allocation76_spill] sm:$0xff]  ;;  %v12537_v41 = vld [vmem:[#allocation215_spill] sm:$0xff] }
 0x2fe   : > { %6038 = vmatpush1.bf16.msra.mxu1 %v12526_v58  ;;  %6326 = vmatpush1.bf16.msra.mxu0 %v12527_v62  ;;  %v12534_v58 = vld [vmem:[#allocation207_spill] sm:$0xff]  ;;  %v12535_v62 = vld [vmem:[#allocation210_spill] sm:$0xff] }
 0x2ff   : > { %6039 = vmatprep.subr.bf16.mxu1 %v11400_v61  ;;  %6327 = vmatprep.subr.bf16.mxu0 %v11400_v61 }
 0x300   : > { %2538 = vmatmul.mubr.f32.gmra.mrb[28].mxu1 %v12528_v38  ;;  %5136 = vmatmul.mubr.f32.gmra.mrb[28].mxu0 %v12529_v37  ;;  %v12536_v38 = vld [vmem:[#allocation212_spill] sm:$0xff] }
 0x301   : > { %2543 = vmatprep.mubr.f32.mxu1 %v12530_v35  ;;  %5141 = vmatprep.mubr.f32.mxu0 %v12531_v11  ;;  %v12538_v37 = vld [vmem:[#allocation80_spill] sm:$0xff]  ;;  %v12539_v35 = vld [vmem:[#allocation87_spill] sm:$0xff] }
 0x302   : > { %6041 = vmatpush1.bf16.msra.mxu1 %v12532_v45  ;;  %6329 = vmatpush1.bf16.msra.mxu0 %v12533_v18  ;;  %v12540_v11 = vld [vmem:[#allocation216_spill] sm:$0xff]  ;;  %v12541_v45 = vld [vmem:[#allocation218_spill] sm:$0xff]  ;;  %v12542_v18 = vld [vmem:[#allocation221_spill] sm:$0xff] }
 0x303   : > { %6042 = vmatprep.subr.bf16.mxu1 %v11400_v61  ;;  %6330 = vmatprep.subr.bf16.mxu0 %v11400_v61  ;;  %v12545_v61 = vld [vmem:[#allocation225_spill] sm:$0xff] }
 0x304   : > { %2545 = vmatmul.mubr.f32.gmra.mrb[30].mxu1 %v12534_v58  ;;  %5143 = vmatmul.mubr.f32.gmra.mrb[30].mxu0 %v12535_v62  ;;  %v12544_v58 = vld [vmem:[#allocation224_spill] sm:$0xff]  ;;  %v12546_v62 = vld [vmem:[#allocation227_spill] sm:$0xff] }
 0x305   : > { %2550 = vmatprep.mubr.f32.mxu1 %v12536_v38  ;;  %5148 = vmatprep.mubr.f32.mxu0 %v12537_v41  ;;  %v12547_v38 = vld [vmem:[#allocation228_spill] sm:$0xff]  ;;  %v12548_v41 = vld [vmem:[#allocation231_spill] sm:$0xff] }
 0x306   : > { %6044 = vmatpush1.bf16.msra.mxu1 %v12538_v37  ;;  %6332 = vmatpush1.bf16.msra.mxu0 %v12539_v35  ;;  %v12549_v37 = vld [vmem:[#allocation235_spill] sm:$0xff]  ;;  %v12550_v35 = vld [vmem:[#allocation237_spill] sm:$0xff] }
 0x308   : > { %2552 = vmatmul.mubr.f32.gmra.mrb[32].mxu1 %v12540_v11  ;;  %5150 = vmatmul.mubr.f32.gmra.mrb[32].mxu0 %v12541_v45  ;;  %v12551_v11 = vld [vmem:[#allocation238_spill] sm:$0xff]  ;;  %v12552_v45 = vld [vmem:[#allocation239_spill] sm:$0xff] }
 0x309   : > { %2557 = vmatprep.mubr.f32.mxu1 %v12542_v18  ;;  %5155 = vmatprep.mubr.f32.mxu0 %v12543_v52  ;;  %v12553_v18 = vld [vmem:[#allocation242_spill] sm:$0xff]  ;;  %v12554_v52 = vld [vmem:[#allocation244_spill] sm:$0xff] }
 0x30c   : > { %2559 = vmatmul.mubr.f32.gmra.mrb[34].mxu1 %v12544_v58  ;;  %5157 = vmatmul.mubr.f32.gmra.mrb[34].mxu0 %v12545_v61  ;;  %v12555_v58 = vld [vmem:[#allocation247_spill] sm:$0xff]  ;;  %v12556_v61 = vld [vmem:[#allocation248_spill] sm:$0xff] }
 0x30d   : > { %2564 = vmatprep.mubr.f32.mxu1 %v12546_v62  ;;  %5162 = vmatprep.mubr.f32.mxu0 %v12547_v38  ;;  %v12557_v62 = vld [vmem:[#allocation250_spill] sm:$0xff]  ;;  %v12558_v38 = vld [vmem:[#allocation253_spill] sm:$0xff] }
 0x310   : > { %2566 = vmatmul.mubr.f32.gmra.mrb[36].mxu1 %v12548_v41  ;;  %5164 = vmatmul.mubr.f32.gmra.mrb[36].mxu0 %v12549_v37  ;;  %v12559_v41 = vld [vmem:[#allocation255_spill] sm:$0xff]  ;;  %v12560_v37 = vld [vmem:[#allocation256_spill] sm:$0xff] }
 0x311   : > { %2571 = vmatprep.mubr.f32.mxu1 %v12550_v35  ;;  %5169 = vmatprep.mubr.f32.mxu0 %v12551_v11  ;;  %v12561_v35 = vld [vmem:[#allocation257_spill] sm:$0xff]  ;;  %v12562_v11 = vld [vmem:[#allocation259_spill] sm:$0xff] }
 0x314   : > { %2573 = vmatmul.mubr.f32.gmra.mrb[38].mxu1 %v12552_v45  ;;  %5171 = vmatmul.mubr.f32.gmra.mrb[38].mxu0 %v12553_v18  ;;  %v12563_v45 = vld [vmem:[#allocation260_spill] sm:$0xff]  ;;  %v12564_v18 = vld [vmem:[#allocation263_spill] sm:$0xff] }
 0x315   : > { %2578 = vmatprep.mubr.f32.mxu1 %v12554_v52  ;;  %5176 = vmatprep.mubr.f32.mxu0 %v12555_v58  ;;  %v12565_v52 = vld [vmem:[#allocation267_spill] sm:$0xff]  ;;  %v12566_v58 = vld [vmem:[#allocation269_spill] sm:$0xff] }
 0x318   : > { %2580 = vmatmul.mubr.f32.gmra.mrb[40].mxu1 %v12556_v61  ;;  %5178 = vmatmul.mubr.f32.gmra.mrb[40].mxu0 %v12557_v62  ;;  %v12567_v61 = vld [vmem:[#allocation270_spill] sm:$0xff]  ;;  %v12568_v62 = vld [vmem:[#allocation271_spill] sm:$0xff] }
 0x319   : > { %2585 = vmatprep.mubr.f32.mxu1 %v12558_v38  ;;  %5183 = vmatprep.mubr.f32.mxu0 %v12559_v41  ;;  %v12569_v38 = vld [vmem:[#allocation274_spill] sm:$0xff]  ;;  %v12570_v41 = vld [vmem:[#allocation276_spill] sm:$0xff] }
 0x31c   : > { %2587 = vmatmul.mubr.f32.gmra.mrb[42].mxu1 %v12560_v37  ;;  %5185 = vmatmul.mubr.f32.gmra.mrb[42].mxu0 %v12561_v35  ;;  %v12571_v37 = vld [vmem:[#allocation279_spill] sm:$0xff]  ;;  %v12572_v35 = vld [vmem:[#allocation280_spill] sm:$0xff] }
 0x31d   : > { %2592 = vmatprep.mubr.f32.mxu1 %v12562_v11  ;;  %5190 = vmatprep.mubr.f32.mxu0 %v12563_v45  ;;  %v12573_v11 = vld [vmem:[#allocation282_spill] sm:$0xff]  ;;  %v12574_v45 = vld [vmem:[#allocation285_spill] sm:$0xff] }
 0x320   : > { %2594 = vmatmul.mubr.f32.gmra.mrb[44].mxu1 %v12564_v18  ;;  %5192 = vmatmul.mubr.f32.gmra.mrb[44].mxu0 %v12565_v52  ;;  %v12575_v18 = vld [vmem:[#allocation287_spill] sm:$0xff]  ;;  %v12576_v52 = vld [vmem:[#allocation288_spill] sm:$0xff] }
 0x321   : > { %2599 = vmatprep.mubr.f32.mxu1 %v12566_v58  ;;  %5197 = vmatprep.mubr.f32.mxu0 %v12567_v61  ;;  %v12577_v58 = vld [vmem:[#allocation289_spill] sm:$0xff]  ;;  %v12578_v61 = vld [vmem:[#allocation291_spill] sm:$0xff] }
 0x324   : > { %2601 = vmatmul.mubr.f32.gmra.mrb[46].mxu1 %v12568_v62  ;;  %5199 = vmatmul.mubr.f32.gmra.mrb[46].mxu0 %v12569_v38  ;;  %v12579_v62 = vld [vmem:[#allocation292_spill] sm:$0xff]  ;;  %v12580_v38 = vld [vmem:[#allocation295_spill] sm:$0xff] }
 0x325   : > { %2606 = vmatprep.mubr.f32.mxu1 %v12570_v41  ;;  %5204 = vmatprep.mubr.f32.mxu0 %v12571_v37  ;;  %v12581_v41 = vld [vmem:[#allocation299_spill] sm:$0xff]  ;;  %v12582_v37 = vld [vmem:[#allocation301_spill] sm:$0xff] }
 0x328   : > { %2608 = vmatmul.mubr.f32.gmra.mrb[48].mxu1 %v12572_v35  ;;  %5206 = vmatmul.mubr.f32.gmra.mrb[48].mxu0 %v12573_v11  ;;  %v12583_v35 = vld [vmem:[#allocation302_spill] sm:$0xff]  ;;  %v12584_v11 = vld [vmem:[#allocation303_spill] sm:$0xff] }
 0x329   : > { %2613 = vmatprep.mubr.f32.mxu1 %v12574_v45  ;;  %5211 = vmatprep.mubr.f32.mxu0 %v12575_v18  ;;  %v12585_v45 = vld [vmem:[#allocation306_spill] sm:$0xff]  ;;  %v12586_v18 = vld [vmem:[#allocation308_spill] sm:$0xff] }
 0x32c   : > { %2615 = vmatmul.mubr.f32.gmra.mrb[50].mxu1 %v12576_v52  ;;  %5213 = vmatmul.mubr.f32.gmra.mrb[50].mxu0 %v12577_v58  ;;  %v12587_v52 = vld [vmem:[#allocation311_spill] sm:$0xff]  ;;  %v12588_v58 = vld [vmem:[#allocation312_spill] sm:$0xff] }
 0x32d   : > { %2620 = vmatprep.mubr.f32.mxu1 %v12578_v61  ;;  %5218 = vmatprep.mubr.f32.mxu0 %v12579_v62  ;;  %v12589_v61 = vld [vmem:[#allocation314_spill] sm:$0xff]  ;;  %v12590_v62 = vld [vmem:[#allocation317_spill] sm:$0xff] }
 0x330   : > { %2622 = vmatmul.mubr.f32.gmra.mrb[52].mxu1 %v12580_v38  ;;  %5220 = vmatmul.mubr.f32.gmra.mrb[52].mxu0 %v12581_v41  ;;  %v12591_v38 = vld [vmem:[#allocation319_spill] sm:$0xff]  ;;  %v12592_v41 = vld [vmem:[#allocation320_spill] sm:$0xff] }
 0x331   : > { %2627 = vmatprep.mubr.f32.mxu1 %v12582_v37  ;;  %5225 = vmatprep.mubr.f32.mxu0 %v12583_v35  ;;  %v12593_v37 = vld [vmem:[#allocation321_spill] sm:$0xff]  ;;  %v12594_v35 = vld [vmem:[#allocation323_spill] sm:$0xff] }
 0x334   : > { %2629 = vmatmul.mubr.f32.gmra.mrb[54].mxu1 %v12584_v11  ;;  %5227 = vmatmul.mubr.f32.gmra.mrb[54].mxu0 %v12585_v45  ;;  %v12595_v11 = vld [vmem:[#allocation324_spill] sm:$0xff]  ;;  %v12596_v45 = vld [vmem:[#allocation327_spill] sm:$0xff] }
 0x335   : > { %2634 = vmatprep.mubr.f32.mxu1 %v12586_v18  ;;  %5232 = vmatprep.mubr.f32.mxu0 %v12587_v52  ;;  %v12597_v18 = vld [vmem:[#allocation331_spill] sm:$0xff]  ;;  %v12598_v52 = vld [vmem:[#allocation333_spill] sm:$0xff] }
 0x338   : > { %2636 = vmatmul.mubr.f32.gmra.mrb[56].mxu1 %v12588_v58  ;;  %5234 = vmatmul.mubr.f32.gmra.mrb[56].mxu0 %v12589_v61  ;;  %v12599_v58 = vld [vmem:[#allocation334_spill] sm:$0xff]  ;;  %v12600_v61 = vld [vmem:[#allocation335_spill] sm:$0xff] }
 0x339   : > { %2641 = vmatprep.mubr.f32.mxu1 %v12590_v62  ;;  %5239 = vmatprep.mubr.f32.mxu0 %v12591_v38  ;;  %v12601_v62 = vld [vmem:[#allocation338_spill] sm:$0xff] }
 0x33c   : > { %2643 = vmatmul.mubr.f32.gmra.mrb[58].mxu1 %v12592_v41  ;;  %5241 = vmatmul.mubr.f32.gmra.mrb[58].mxu0 %v12593_v37 }
 0x33d   : > { %2648 = vmatprep.mubr.f32.mxu1 %v12594_v35  ;;  %5246 = vmatprep.mubr.f32.mxu0 %v12595_v11 }
 0x340   : > { %2650 = vmatmul.mubr.f32.gmra.mrb[60].mxu1 %v12596_v45  ;;  %5248 = vmatmul.mubr.f32.gmra.mrb[60].mxu0 %v12597_v18 }
 0x341   : > { %2655 = vmatprep.mubr.f32.mxu1 %v12598_v52  ;;  %5253 = vmatprep.mubr.f32.mxu0 %v12599_v58 }
 0x344   : > { %2657 = vmatmul.mubr.f32.gmra.mrb[62].mxu1 %v12600_v61  ;;  %5255 = vmatmul.mubr.f32.gmra.mrb[62].mxu0 %v12601_v62 }
 0x345   : > { %2759 = vmatprep.mubr.f32.mxu1 %v12442_v22  ;;  %5357 = vmatprep.mubr.f32.mxu0 %v12443_v30  ;;  %v12602_v22 = vld [vmem:[#allocation191_spill] sm:$0xff]  ;;  %v12603_v30 = vld [vmem:[#allocation192_spill] sm:$0xff] }
 0x348   : > { %2761 = vmatmul.mubr.f32.vlgmr.msra.gmra.mrb[0].mxu1 %v12444_v32  ;;  %5359 = vmatmul.mubr.f32.vlgmr.msra.gmra.mrb[0].mxu0 %v12445_v19  ;;  %v12604_v32 = vld [vmem:[#allocation193_spill] sm:$0xff]  ;;  %v12605_v19 = vld [vmem:[#allocation195_spill] sm:$0xff] }
 0x349   : > { %2766 = vmatprep.mubr.f32.mxu1 %v12448_v43  ;;  %5364 = vmatprep.mubr.f32.mxu0 %v12449_v59  ;;  %v12606_v43 = vld [vmem:[#allocation196_spill] sm:$0xff]  ;;  %v12607_v59 = vld [vmem:[#allocation199_spill] sm:$0xff] }
 0x34c   : > { %2768 = vmatmul.mubr.f32.gmra.mrb[2].mxu1 %v12450_v29  ;;  %5366 = vmatmul.mubr.f32.gmra.mrb[2].mxu0 %v12451_v5  ;;  %v12608_v29 = vld [vmem:[#allocation203_spill] sm:$0xff]  ;;  %v12609_v5 = vld [vmem:[#allocation205_spill] sm:$0xff] }
 0x34d   : > { %2773 = vmatprep.mubr.f32.mxu1 %v12452_v34  ;;  %5371 = vmatprep.mubr.f32.mxu0 %v12453_v54  ;;  %v12610_v34 = vld [vmem:[#allocation206_spill] sm:$0xff]  ;;  %v12611_v54 = vld [vmem:[#allocation207_spill] sm:$0xff] }
 0x350   : > { %2775 = vmatmul.mubr.f32.gmra.mrb[4].mxu1 %v12456_v55  ;;  %5373 = vmatmul.mubr.f32.gmra.mrb[4].mxu0 %v12457_v25  ;;  %v12612_v55 = vld [vmem:[#allocation210_spill] sm:$0xff]  ;;  %v12613_v25 = vld [vmem:[#allocation212_spill] sm:$0xff] }
 0x351   : > { %2780 = vmatprep.mubr.f32.mxu1 %v12458_v16  ;;  %5378 = vmatprep.mubr.f32.mxu0 %v12459_v20  ;;  %v12614_v16 = vld [vmem:[#allocation215_spill] sm:$0xff]  ;;  %v12615_v20 = vld [vmem:[#allocation216_spill] sm:$0xff] }
 0x354   : > { %2782 = vmatmul.mubr.f32.gmra.mrb[6].mxu1 %v12462_v42  ;;  %5380 = vmatmul.mubr.f32.gmra.mrb[6].mxu0 %v12463_v47  ;;  %v12616_v42 = vld [vmem:[#allocation218_spill] sm:$0xff]  ;;  %v12617_v47 = vld [vmem:[#allocation221_spill] sm:$0xff] }
 0x355   : > { %2787 = vmatprep.mubr.f32.mxu1 %v12464_v49  ;;  %5385 = vmatprep.mubr.f32.mxu0 %v12465_v51  ;;  %v12618_v49 = vld [vmem:[#allocation223_spill] sm:$0xff]  ;;  %v12619_v51 = vld [vmem:[#allocation224_spill] sm:$0xff] }
 0x358   : > { %2789 = vmatmul.mubr.f32.gmra.mrb[8].mxu1 %v12468_v2  ;;  %5387 = vmatmul.mubr.f32.gmra.mrb[8].mxu0 %v12469_v27  ;;  %v12620_v2 = vld [vmem:[#allocation225_spill] sm:$0xff]  ;;  %v12621_v27 = vld [vmem:[#allocation227_spill] sm:$0xff] }
 0x359   : > { %2794 = vmatprep.mubr.f32.mxu1 %v12470_v10  ;;  %5392 = vmatprep.mubr.f32.mxu0 %v12471_v48  ;;  %v12622_v10 = vld [vmem:[#allocation228_spill] sm:$0xff]  ;;  %v12623_v48 = vld [vmem:[#allocation231_spill] sm:$0xff] }
 0x35c   : > { %2796 = vmatmul.mubr.f32.gmra.mrb[10].mxu1 %v12474_v63  ;;  %5394 = vmatmul.mubr.f32.gmra.mrb[10].mxu0 %v12475_v6  ;;  %v12624_v63 = vld [vmem:[#allocation235_spill] sm:$0xff]  ;;  %v12625_v6 = vld [vmem:[#allocation237_spill] sm:$0xff] }
 0x35d   : > { %2801 = vmatprep.mubr.f32.mxu1 %v12476_v9  ;;  %5399 = vmatprep.mubr.f32.mxu0 %v12477_v3  ;;  %v12626_v9 = vld [vmem:[#allocation238_spill] sm:$0xff]  ;;  %v12627_v3 = vld [vmem:[#allocation239_spill] sm:$0xff] }
 0x360   : > { %2803 = vmatmul.mubr.f32.gmra.mrb[12].mxu1 %v12480_v21  ;;  %5401 = vmatmul.mubr.f32.gmra.mrb[12].mxu0 %v12481_v23  ;;  %v12628_v21 = vld [vmem:[#allocation242_spill] sm:$0xff]  ;;  %v12629_v23 = vld [vmem:[#allocation244_spill] sm:$0xff] }
 0x361   : > { %2808 = vmatprep.mubr.f32.mxu1 %v12482_v8  ;;  %5406 = vmatprep.mubr.f32.mxu0 %v12483_v12  ;;  %v12630_v8 = vld [vmem:[#allocation247_spill] sm:$0xff]  ;;  %v12631_v12 = vld [vmem:[#allocation248_spill] sm:$0xff] }
 0x364   : > { %2810 = vmatmul.mubr.f32.gmra.mrb[14].mxu1 %v12486_v7  ;;  %5408 = vmatmul.mubr.f32.gmra.mrb[14].mxu0 %v12487_v33  ;;  %v12632_v7 = vld [vmem:[#allocation250_spill] sm:$0xff]  ;;  %v12633_v33 = vld [vmem:[#allocation253_spill] sm:$0xff] }
 0x365   : > { %2815 = vmatprep.mubr.f32.mxu1 %v12488_v31  ;;  %5413 = vmatprep.mubr.f32.mxu0 %v12489_v50  ;;  %v12634_v31 = vld [vmem:[#allocation255_spill] sm:$0xff]  ;;  %v12635_v50 = vld [vmem:[#allocation256_spill] sm:$0xff] }
 0x368   : > { %2817 = vmatmul.mubr.f32.gmra.mrb[16].mxu1 %v12492_v40  ;;  %5415 = vmatmul.mubr.f32.gmra.mrb[16].mxu0 %v12493_v57  ;;  %v12636_v40 = vld [vmem:[#allocation257_spill] sm:$0xff]  ;;  %v12637_v57 = vld [vmem:[#allocation259_spill] sm:$0xff] }
 0x369   : > { %2822 = vmatprep.mubr.f32.mxu1 %v12494_v24  ;;  %5420 = vmatprep.mubr.f32.mxu0 %v12495_v39  ;;  %v12638_v24 = vld [vmem:[#allocation260_spill] sm:$0xff]  ;;  %v12639_v39 = vld [vmem:[#allocation263_spill] sm:$0xff] }
 0x36c   : > { %2824 = vmatmul.mubr.f32.gmra.mrb[18].mxu1 %v12498_v60  ;;  %5422 = vmatmul.mubr.f32.gmra.mrb[18].mxu0 %v12499_v36  ;;  %v12640_v60 = vld [vmem:[#allocation267_spill] sm:$0xff]  ;;  %v12641_v36 = vld [vmem:[#allocation269_spill] sm:$0xff] }
 0x36d   : > { %2829 = vmatprep.mubr.f32.mxu1 %v12500_v0  ;;  %5427 = vmatprep.mubr.f32.mxu0 %v12501_v1  ;;  %v12642_v0 = vld [vmem:[#allocation270_spill] sm:$0xff]  ;;  %v12643_v1 = vld [vmem:[#allocation271_spill] sm:$0xff] }
 0x370   : > { %2831 = vmatmul.mubr.f32.gmra.mrb[20].mxu1 %v12504_v17  ;;  %5429 = vmatmul.mubr.f32.gmra.mrb[20].mxu0 %v12505_v13  ;;  %v12644_v17 = vld [vmem:[#allocation274_spill] sm:$0xff]  ;;  %v12645_v13 = vld [vmem:[#allocation276_spill] sm:$0xff] }
 0x371   : > { %2836 = vmatprep.mubr.f32.mxu1 %v12506_v4  ;;  %5434 = vmatprep.mubr.f32.mxu0 %v12507_v56  ;;  %v12646_v4 = vld [vmem:[#allocation279_spill] sm:$0xff]  ;;  %v12647_v56 = vld [vmem:[#allocation280_spill] sm:$0xff] }
 0x374   : > { %2838 = vmatmul.mubr.f32.gmra.mrb[22].mxu1 %v12510_v46  ;;  %5436 = vmatmul.mubr.f32.gmra.mrb[22].mxu0 %v12511_v44  ;;  %v12648_v46 = vld [vmem:[#allocation282_spill] sm:$0xff]  ;;  %v12649_v44 = vld [vmem:[#allocation285_spill] sm:$0xff] }
 0x375   : > { %2843 = vmatprep.mubr.f32.mxu1 %v12512_v28  ;;  %5441 = vmatprep.mubr.f32.mxu0 %v12513_v53  ;;  %v12650_v28 = vld [vmem:[#allocation287_spill] sm:$0xff]  ;;  %v12651_v53 = vld [vmem:[#allocation288_spill] sm:$0xff] }
 0x378   : > { %2845 = vmatmul.mubr.f32.gmra.mrb[24].mxu1 %v12516_v26  ;;  %5443 = vmatmul.mubr.f32.gmra.mrb[24].mxu0 %v12517_v14  ;;  %v12652_v26 = vld [vmem:[#allocation289_spill] sm:$0xff]  ;;  %v12653_v14 = vld [vmem:[#allocation291_spill] sm:$0xff] }
 0x379   : > { %2850 = vmatprep.mubr.f32.mxu1 %v12518_v15  ;;  %5448 = vmatprep.mubr.f32.mxu0 %v12602_v22  ;;  %v12654_v15 = vld [vmem:[#allocation292_spill] sm:$0xff]  ;;  %v12655_v22 = vld [vmem:[#allocation295_spill] sm:$0xff] }
 0x37c   : > { %2852 = vmatmul.mubr.f32.gmra.mrb[26].mxu1 %v12603_v30  ;;  %5450 = vmatmul.mubr.f32.gmra.mrb[26].mxu0 %v12604_v32  ;;  %v12656_v30 = vld [vmem:[#allocation299_spill] sm:$0xff]  ;;  %v12657_v32 = vld [vmem:[#allocation301_spill] sm:$0xff] }
 0x37d   : > { %2857 = vmatprep.mubr.f32.mxu1 %v12605_v19  ;;  %5455 = vmatprep.mubr.f32.mxu0 %v12606_v43  ;;  %v12658_v19 = vld [vmem:[#allocation302_spill] sm:$0xff]  ;;  %v12659_v43 = vld [vmem:[#allocation303_spill] sm:$0xff] }
 0x380   : > { %2859 = vmatmul.mubr.f32.gmra.mrb[28].mxu1 %v12607_v59  ;;  %5457 = vmatmul.mubr.f32.gmra.mrb[28].mxu0 %v12608_v29  ;;  %v12660_v59 = vld [vmem:[#allocation306_spill] sm:$0xff]  ;;  %v12661_v29 = vld [vmem:[#allocation308_spill] sm:$0xff] }
 0x381   : > { %2864 = vmatprep.mubr.f32.mxu1 %v12609_v5  ;;  %5462 = vmatprep.mubr.f32.mxu0 %v12610_v34  ;;  %v12662_v5 = vld [vmem:[#allocation311_spill] sm:$0xff]  ;;  %v12663_v34 = vld [vmem:[#allocation312_spill] sm:$0xff] }
 0x384   : > { %2866 = vmatmul.mubr.f32.gmra.mrb[30].mxu1 %v12611_v54  ;;  %5464 = vmatmul.mubr.f32.gmra.mrb[30].mxu0 %v12612_v55  ;;  %v12664_v54 = vld [vmem:[#allocation314_spill] sm:$0xff]  ;;  %v12665_v55 = vld [vmem:[#allocation317_spill] sm:$0xff] }
 0x385   : > { %2871 = vmatprep.mubr.f32.mxu1 %v12613_v25  ;;  %5469 = vmatprep.mubr.f32.mxu0 %v12614_v16 }
 0x388   : > { %2873 = vmatmul.mubr.f32.gmra.mrb[32].mxu1 %v12615_v20  ;;  %5471 = vmatmul.mubr.f32.gmra.mrb[32].mxu0 %v12616_v42 }
 0x389   : > { %2878 = vmatprep.mubr.f32.mxu1 %v12617_v47  ;;  %5476 = vmatprep.mubr.f32.mxu0 %v12618_v49 }
 0x38c   : > { %2880 = vmatmul.mubr.f32.gmra.mrb[34].mxu1 %v12619_v51  ;;  %5478 = vmatmul.mubr.f32.gmra.mrb[34].mxu0 %v12620_v2 }
 0x38d   : > { %2885 = vmatprep.mubr.f32.mxu1 %v12621_v27  ;;  %5483 = vmatprep.mubr.f32.mxu0 %v12622_v10 }
 0x390   : > { %2887 = vmatmul.mubr.f32.gmra.mrb[36].mxu1 %v12623_v48  ;;  %5485 = vmatmul.mubr.f32.gmra.mrb[36].mxu0 %v12624_v63 }
 0x391   : > { %2892 = vmatprep.mubr.f32.mxu1 %v12625_v6  ;;  %5490 = vmatprep.mubr.f32.mxu0 %v12626_v9 }
 0x394   : > { %2894 = vmatmul.mubr.f32.gmra.mrb[38].mxu1 %v12627_v3  ;;  %5492 = vmatmul.mubr.f32.gmra.mrb[38].mxu0 %v12628_v21 }
 0x395   : > { %2899 = vmatprep.mubr.f32.mxu1 %v12629_v23  ;;  %5497 = vmatprep.mubr.f32.mxu0 %v12630_v8 }
 0x398   : > { %2901 = vmatmul.mubr.f32.gmra.mrb[40].mxu1 %v12631_v12  ;;  %5499 = vmatmul.mubr.f32.gmra.mrb[40].mxu0 %v12632_v7 }
 0x399   : > { %2906 = vmatprep.mubr.f32.mxu1 %v12633_v33  ;;  %5504 = vmatprep.mubr.f32.mxu0 %v12634_v31 }
 0x39c   : > { %2908 = vmatmul.mubr.f32.gmra.mrb[42].mxu1 %v12635_v50  ;;  %5506 = vmatmul.mubr.f32.gmra.mrb[42].mxu0 %v12636_v40 }
 0x39d   : > { %2913 = vmatprep.mubr.f32.mxu1 %v12637_v57  ;;  %5511 = vmatprep.mubr.f32.mxu0 %v12638_v24 }
 0x3a0   : > { %2915 = vmatmul.mubr.f32.gmra.mrb[44].mxu1 %v12639_v39  ;;  %5513 = vmatmul.mubr.f32.gmra.mrb[44].mxu0 %v12640_v60 }
 0x3a1   : > { %2920 = vmatprep.mubr.f32.mxu1 %v12641_v36  ;;  %5518 = vmatprep.mubr.f32.mxu0 %v12642_v0 }
 0x3a4   : > { %2922 = vmatmul.mubr.f32.gmra.mrb[46].mxu1 %v12643_v1  ;;  %5520 = vmatmul.mubr.f32.gmra.mrb[46].mxu0 %v12644_v17 }
 0x3a5   : > { %2927 = vmatprep.mubr.f32.mxu1 %v12645_v13  ;;  %5525 = vmatprep.mubr.f32.mxu0 %v12646_v4 }
 0x3a8   : > { %2929 = vmatmul.mubr.f32.gmra.mrb[48].mxu1 %v12647_v56  ;;  %5527 = vmatmul.mubr.f32.gmra.mrb[48].mxu0 %v12648_v46 }
 0x3a9   : > { %2934 = vmatprep.mubr.f32.mxu1 %v12649_v44  ;;  %5532 = vmatprep.mubr.f32.mxu0 %v12650_v28 }
 0x3ac   : > { %2936 = vmatmul.mubr.f32.gmra.mrb[50].mxu1 %v12651_v53  ;;  %5534 = vmatmul.mubr.f32.gmra.mrb[50].mxu0 %v12652_v26 }
 0x3ad   : > { %2941 = vmatprep.mubr.f32.mxu1 %v12653_v14  ;;  %5539 = vmatprep.mubr.f32.mxu0 %v12654_v15 }
 0x3b0   : > { %2943 = vmatmul.mubr.f32.gmra.mrb[52].mxu1 %v12655_v22  ;;  %5541 = vmatmul.mubr.f32.gmra.mrb[52].mxu0 %v12656_v30 }
 0x3b1   : > { %2948 = vmatprep.mubr.f32.mxu1 %v12657_v32  ;;  %5546 = vmatprep.mubr.f32.mxu0 %v12658_v19 }
 0x3b4   : > { %2950 = vmatmul.mubr.f32.gmra.mrb[54].mxu1 %v12659_v43  ;;  %5548 = vmatmul.mubr.f32.gmra.mrb[54].mxu0 %v12660_v59 }
 0x3b5   : > { %2955 = vmatprep.mubr.f32.mxu1 %v12661_v29  ;;  %5553 = vmatprep.mubr.f32.mxu0 %v12662_v5 }
 0x3b8   : > { %2957 = vmatmul.mubr.f32.gmra.mrb[56].mxu1 %v12663_v34  ;;  %5555 = vmatmul.mubr.f32.gmra.mrb[56].mxu0 %v12664_v54 }
 0x3b9   : > { %2962 = vmatprep.mubr.f32.mxu1 %v12665_v55  ;;  %5560 = vmatprep.mubr.f32.mxu0 %v12591_v38 }
 0x3bc   : > { %2964 = vmatmul.mubr.f32.gmra.mrb[58].mxu1 %v12592_v41  ;;  %5562 = vmatmul.mubr.f32.gmra.mrb[58].mxu0 %v12593_v37 }
 0x3bd   : > { %2969 = vmatprep.mubr.f32.mxu1 %v12594_v35  ;;  %5567 = vmatprep.mubr.f32.mxu0 %v12595_v11 }
 0x3c0   : > { %2971 = vmatmul.mubr.f32.gmra.mrb[60].mxu1 %v12596_v45  ;;  %5569 = vmatmul.mubr.f32.gmra.mrb[60].mxu0 %v12597_v18 }
 0x3c1   : > { %2976 = vmatprep.mubr.f32.mxu1 %v12598_v52  ;;  %5574 = vmatprep.mubr.f32.mxu0 %v12599_v58 }
 0x3c4   : > { %2978 = vmatmul.mubr.f32.gmra.mrb[62].mxu1 %v12600_v61  ;;  %5576 = vmatmul.mubr.f32.gmra.mrb[62].mxu0 %v12601_v62 }
 0x41b   : > { %v2762_v38 = vpop.f32.mrb[0].mxu1  ;;  %v5360_v41 = vpop.f32.mrb[0].mxu0 }
 0x41c   : > { %v2764_v25 = vpop.f32.mrb[1].mxu1  ;;  %v5362_v37 = vpop.f32.mrb[1].mxu0  ;;  %v6333_v16 = vadd.f32 %v5360_v41, %v2762_v38 }
 0x41e   : > { %5581 = vxpose.xlu0.b32.start [1/16] (narrow) %v6333_v16, 8 }
 0x41f   : > { %v2769_v35 = vpop.f32.mrb[2].mxu1  ;;  %v5367_v11 = vpop.f32.mrb[2].mxu0 }
 0x420   : > { %v2771_v20 = vpop.f32.mrb[3].mxu1  ;;  %v6334_v45 = vadd.f32 %v5367_v11, %v2769_v35  ;;  %v5369_v42 = vpop.f32.mrb[3].mxu0 }
 0x422   : > { %5582 = vxpose.xlu0.b32.cont [2/16] (narrow) %v6334_v45, 8 }
 0x423   : > { %v2776_v18 = vpop.f32.mrb[4].mxu1  ;;  %v5374_v52 = vpop.f32.mrb[4].mxu0 }
 0x424   : > { %v2778_v47 = vpop.f32.mrb[5].mxu1  ;;  %v6335_v58 = vadd.f32 %v5374_v52, %v2776_v18  ;;  %v5376_v49 = vpop.f32.mrb[5].mxu0 }
 0x426   : > { %5583 = vxpose.xlu0.b32.cont [3/16] (narrow) %v6335_v58, 8 }
 0x427   : > { %v2783_v61 = vpop.f32.mrb[6].mxu1  ;;  %v5381_v62 = vpop.f32.mrb[6].mxu0 }
 0x428   : > { %v2785_v51 = vpop.f32.mrb[7].mxu1  ;;  %v6336_v2 = vadd.f32 %v5381_v62, %v2783_v61  ;;  %v5383_v27 = vpop.f32.mrb[7].mxu0 }
 0x42a   : > { %5584 = vxpose.xlu0.b32.cont [4/16] (narrow) %v6336_v2, 8 }
 0x42b   : > { %v2790_v10 = vpop.f32.mrb[8].mxu1  ;;  %v5388_v48 = vpop.f32.mrb[8].mxu0 }
 0x42c   : > { %v2792_v63 = vpop.f32.mrb[9].mxu1  ;;  %v6337_v6 = vadd.f32 %v5388_v48, %v2790_v10  ;;  %v5390_v9 = vpop.f32.mrb[9].mxu0 }
 0x42e   : > { %5585 = vxpose.xlu0.b32.cont [5/16] (narrow) %v6337_v6, 8 }
 0x42f   : > { %v2797_v3 = vpop.f32.mrb[10].mxu1  ;;  %v5395_v21 = vpop.f32.mrb[10].mxu0 }
 0x430   : > { %v2799_v23 = vpop.f32.mrb[11].mxu1  ;;  %v6338_v8 = vadd.f32 %v5395_v21, %v2797_v3  ;;  %v5397_v12 = vpop.f32.mrb[11].mxu0 }
 0x432   : > { %5586 = vxpose.xlu0.b32.cont [6/16] (narrow) %v6338_v8, 8 }
 0x433   : > { %v2804_v7 = vpop.f32.mrb[12].mxu1  ;;  %v5402_v33 = vpop.f32.mrb[12].mxu0 }
 0x434   : > { %v2806_v31 = vpop.f32.mrb[13].mxu1  ;;  %v6339_v50 = vadd.f32 %v5402_v33, %v2804_v7  ;;  %v5404_v40 = vpop.f32.mrb[13].mxu0 }
 0x436   : > { %5587 = vxpose.xlu0.b32.cont [7/16] (narrow) %v6339_v50, 8 }
 0x437   : > { %v2811_v57 = vpop.f32.mrb[14].mxu1  ;;  %v5409_v24 = vpop.f32.mrb[14].mxu0 }
 0x438   : > { %v2813_v39 = vpop.f32.mrb[15].mxu1  ;;  %v6340_v60 = vadd.f32 %v5409_v24, %v2811_v57  ;;  %v5411_v36 = vpop.f32.mrb[15].mxu0 }
 0x43a   : > { %5588 = vxpose.xlu0.b32.cont [8/16] (narrow) %v6340_v60, 8 }
 0x43b   : > { %v2818_v0 = vpop.f32.mrb[16].mxu1  ;;  %v5416_v1 = vpop.f32.mrb[16].mxu0 }
 0x43c   : > { %v2820_v17 = vpop.f32.mrb[17].mxu1  ;;  %v6341_v13 = vadd.f32 %v5416_v1, %v2818_v0  ;;  %v5418_v4 = vpop.f32.mrb[17].mxu0 }
 0x43e   : > { %5589 = vxpose.xlu0.b32.cont [9/16] (narrow) %v6341_v13, 8 }
 0x43f   : > { %v2825_v56 = vpop.f32.mrb[18].mxu1  ;;  %v5423_v46 = vpop.f32.mrb[18].mxu0 }
 0x440   : > { %v2827_v44 = vpop.f32.mrb[19].mxu1  ;;  %v6342_v28 = vadd.f32 %v5423_v46, %v2825_v56  ;;  %v5425_v53 = vpop.f32.mrb[19].mxu0 }
 0x442   : > { %5590 = vxpose.xlu0.b32.cont [10/16] (narrow) %v6342_v28, 8 }
 0x443   : > { %v2832_v26 = vpop.f32.mrb[20].mxu1  ;;  %v5430_v14 = vpop.f32.mrb[20].mxu0 }
 0x444   : > { %v2834_v15 = vpop.f32.mrb[21].mxu1  ;;  %v6343_v22 = vadd.f32 %v5430_v14, %v2832_v26  ;;  %v5432_v30 = vpop.f32.mrb[21].mxu0 }
 0x446   : > { %5591 = vxpose.xlu0.b32.cont [11/16] (narrow) %v6343_v22, 8 }
 0x447   : > { %v2839_v32 = vpop.f32.mrb[22].mxu1  ;;  %v5437_v19 = vpop.f32.mrb[22].mxu0 }
 0x448   : > { %v2841_v43 = vpop.f32.mrb[23].mxu1  ;;  %v6344_v59 = vadd.f32 %v5437_v19, %v2839_v32  ;;  %v5439_v29 = vpop.f32.mrb[23].mxu0 }
 0x44a   : > { %5592 = vxpose.xlu0.b32.cont [12/16] (narrow) %v6344_v59, 8 }
 0x44b   : > { %v2846_v5 = vpop.f32.mrb[24].mxu1  ;;  %v5444_v34 = vpop.f32.mrb[24].mxu0 }
 0x44c   : > { %v2848_v54 = vpop.f32.mrb[25].mxu1  ;;  %v6345_v55 = vadd.f32 %v5444_v34, %v2846_v5  ;;  %v5446_v38 = vpop.f32.mrb[25].mxu0 }
 0x44e   : > { %5593 = vxpose.xlu0.b32.cont [13/16] (narrow) %v6345_v55, 8 }
 0x44f   : > { %v2853_v41 = vpop.f32.mrb[26].mxu1  ;;  %v5451_v25 = vpop.f32.mrb[26].mxu0 }
 0x450   : > { %v2855_v37 = vpop.f32.mrb[27].mxu1  ;;  %v6346_v16 = vadd.f32 %v5451_v25, %v2853_v41  ;;  %v5453_v35 = vpop.f32.mrb[27].mxu0 }
 0x452   : > { %5594 = vxpose.xlu0.b32.cont [14/16] (narrow) %v6346_v16, 8 }
 0x453   : > { %v2860_v11 = vpop.f32.mrb[28].mxu1  ;;  %v5458_v20 = vpop.f32.mrb[28].mxu0 }
 0x454   : > { %v2862_v45 = vpop.f32.mrb[29].mxu1  ;;  %v6347_v42 = vadd.f32 %v5458_v20, %v2860_v11  ;;  %v5460_v18 = vpop.f32.mrb[29].mxu0 }
 0x456   : > { %5595 = vxpose.xlu0.b32.cont [15/16] (narrow) %v6347_v42, 8 }
 0x457   : > { %v2867_v52 = vpop.f32.mrb[30].mxu1  ;;  %v5465_v47 = vpop.f32.mrb[30].mxu0 }
 0x458   : > { %v2869_v58 = vpop.f32.mrb[31].mxu1  ;;  %v6348_v49 = vadd.f32 %v5465_v47, %v2867_v52  ;;  %v5467_v61 = vpop.f32.mrb[31].mxu0 }
 0x45a   : > { %5596 = vxpose.xlu0.b32.end [16/16] (narrow) %v6348_v49, 8 }
 0x45b   : > { %v2874_v62 = vpop.f32.mrb[32].mxu1  ;;  %v5472_v51 = vpop.f32.mrb[32].mxu0 }
 0x45c   : > { %v2876_v2 = vpop.f32.mrb[33].mxu1  ;;  %v5474_v27 = vpop.f32.mrb[33].mxu0  ;;  %v6349_v10 = vadd.f32 %v5472_v51, %v2874_v62 }
 0x45e   : > { %5613 = vxpose.xlu1.b32.start [1/16] (narrow) %v6349_v10, 8 }
 0x45f   : > { %v2881_v48 = vpop.f32.mrb[34].mxu1  ;;  %v5479_v63 = vpop.f32.mrb[34].mxu0 }
 0x460   : > { %v2883_v6 = vpop.f32.mrb[35].mxu1  ;;  %v6350_v9 = vadd.f32 %v5479_v63, %v2881_v48  ;;  %v5481_v3 = vpop.f32.mrb[35].mxu0 }
 0x462   : > { %5614 = vxpose.xlu1.b32.cont [2/16] (narrow) %v6350_v9, 8 }
 0x463   : > { %v2888_v21 = vpop.f32.mrb[36].mxu1  ;;  %v5486_v23 = vpop.f32.mrb[36].mxu0 }
 0x464   : > { %v2890_v8 = vpop.f32.mrb[37].mxu1  ;;  %v6351_v12 = vadd.f32 %v5486_v23, %v2888_v21  ;;  %v5488_v7 = vpop.f32.mrb[37].mxu0 }
 0x466   : > { %5615 = vxpose.xlu1.b32.cont [3/16] (narrow) %v6351_v12, 8 }
 0x467   : > { %v2895_v33 = vpop.f32.mrb[38].mxu1  ;;  %v5493_v31 = vpop.f32.mrb[38].mxu0 }
 0x468   : > { %v2897_v50 = vpop.f32.mrb[39].mxu1  ;;  %v6352_v40 = vadd.f32 %v5493_v31, %v2895_v33  ;;  %v5495_v57 = vpop.f32.mrb[39].mxu0 }
 0x46a   : > { %5616 = vxpose.xlu1.b32.cont [4/16] (narrow) %v6352_v40, 8 }
 0x46b   : > { %v2902_v24 = vpop.f32.mrb[40].mxu1  ;;  %v5500_v39 = vpop.f32.mrb[40].mxu0 }
 0x46c   : > { %v2904_v60 = vpop.f32.mrb[41].mxu1  ;;  %v6353_v36 = vadd.f32 %v5500_v39, %v2902_v24  ;;  %v5502_v0 = vpop.f32.mrb[41].mxu0 }
 0x46e   : > { %5617 = vxpose.xlu1.b32.cont [5/16] (narrow) %v6353_v36, 8 }
 0x46f   : > { %v2909_v1 = vpop.f32.mrb[42].mxu1  ;;  %v5507_v17 = vpop.f32.mrb[42].mxu0 }
 0x470   : > { %v2911_v13 = vpop.f32.mrb[43].mxu1  ;;  %v6354_v4 = vadd.f32 %v5507_v17, %v2909_v1  ;;  %v5509_v56 = vpop.f32.mrb[43].mxu0 }
 0x472   : > { %5618 = vxpose.xlu1.b32.cont [6/16] (narrow) %v6354_v4, 8 }
 0x473   : > { %v2916_v46 = vpop.f32.mrb[44].mxu1  ;;  %v5514_v44 = vpop.f32.mrb[44].mxu0 }
 0x474   : > { %v2918_v28 = vpop.f32.mrb[45].mxu1  ;;  %v6355_v53 = vadd.f32 %v5514_v44, %v2916_v46  ;;  %v5516_v26 = vpop.f32.mrb[45].mxu0 }
 0x476   : > { %5619 = vxpose.xlu1.b32.cont [7/16] (narrow) %v6355_v53, 8 }
 0x477   : > { %v2923_v14 = vpop.f32.mrb[46].mxu1  ;;  %v5521_v15 = vpop.f32.mrb[46].mxu0 }
 0x478   : > { %v2925_v22 = vpop.f32.mrb[47].mxu1  ;;  %v6356_v30 = vadd.f32 %v5521_v15, %v2923_v14  ;;  %v5523_v32 = vpop.f32.mrb[47].mxu0 }
 0x47a   : > { %5620 = vxpose.xlu1.b32.cont [8/16] (narrow) %v6356_v30, 8 }
 0x47b   : > { %v2930_v19 = vpop.f32.mrb[48].mxu1  ;;  %v5528_v43 = vpop.f32.mrb[48].mxu0 }
 0x47c   : > { %v2932_v59 = vpop.f32.mrb[49].mxu1  ;;  %v6357_v29 = vadd.f32 %v5528_v43, %v2930_v19  ;;  %v5530_v5 = vpop.f32.mrb[49].mxu0 }
 0x47e   : > { %5621 = vxpose.xlu1.b32.cont [9/16] (narrow) %v6357_v29, 8 }
 0x47f   : > { %v2937_v34 = vpop.f32.mrb[50].mxu1  ;;  %v5535_v54 = vpop.f32.mrb[50].mxu0 }
 0x480   : > { %v2939_v55 = vpop.f32.mrb[51].mxu1  ;;  %v6358_v38 = vadd.f32 %v5535_v54, %v2937_v34  ;;  %v5537_v41 = vpop.f32.mrb[51].mxu0 }
 0x482   : > { %5622 = vxpose.xlu1.b32.cont [10/16] (narrow) %v6358_v38, 8 }
 0x483   : > { %v2944_v25 = vpop.f32.mrb[52].mxu1  ;;  %v5542_v37 = vpop.f32.mrb[52].mxu0 }
 0x484   : > { %v2946_v16 = vpop.f32.mrb[53].mxu1  ;;  %v6359_v35 = vadd.f32 %v5542_v37, %v2944_v25  ;;  %v5544_v11 = vpop.f32.mrb[53].mxu0 }
 0x486   : > { %5623 = vxpose.xlu1.b32.cont [11/16] (narrow) %v6359_v35, 8 }
 0x487   : > { %v2951_v20 = vpop.f32.mrb[54].mxu1  ;;  %v5549_v45 = vpop.f32.mrb[54].mxu0 }
 0x488   : > { %v2953_v42 = vpop.f32.mrb[55].mxu1  ;;  %v6360_v18 = vadd.f32 %v5549_v45, %v2951_v20  ;;  %v5551_v52 = vpop.f32.mrb[55].mxu0 }
 0x48a   : > { %5624 = vxpose.xlu1.b32.cont [12/16] (narrow) %v6360_v18, 8 }
 0x48b   : > { %v2958_v47 = vpop.f32.mrb[56].mxu1  ;;  %v5556_v58 = vpop.f32.mrb[56].mxu0 }
 0x48c   : > { %v2960_v49 = vpop.f32.mrb[57].mxu1  ;;  %v6361_v61 = vadd.f32 %v5556_v58, %v2958_v47  ;;  %v5558_v62 = vpop.f32.mrb[57].mxu0 }
 0x48e   : > { %5625 = vxpose.xlu1.b32.cont [13/16] (narrow) %v6361_v61, 8 }
 0x48f   : > { %v2965_v51 = vpop.f32.mrb[58].mxu1  ;;  %v5563_v2 = vpop.f32.mrb[58].mxu0 }
 0x490   : > { %v2967_v27 = vpop.f32.mrb[59].mxu1  ;;  %v6362_v10 = vadd.f32 %v5563_v2, %v2965_v51  ;;  %v5565_v48 = vpop.f32.mrb[59].mxu0 }
 0x492   : > { %5626 = vxpose.xlu1.b32.cont [14/16] (narrow) %v6362_v10, 8 }
 0x493   : > { %v2972_v63 = vpop.f32.mrb[60].mxu1  ;;  %v5570_v6 = vpop.f32.mrb[60].mxu0 }
 0x494   : > { %v2974_v9 = vpop.f32.mrb[61].mxu1  ;;  %v6363_v3 = vadd.f32 %v5570_v6, %v2972_v63  ;;  %v5572_v21 = vpop.f32.mrb[61].mxu0 }
 0x496   : > { %5627 = vxpose.xlu1.b32.cont [15/16] (narrow) %v6363_v3, 8 }
 0x497   : > { %v2979_v23 = vpop.f32.mrb[62].mxu1  ;;  %v5577_v8 = vpop.f32.mrb[62].mxu0 }
 0x498   : > { %v2981_v12 = vpop.f32.mrb[63].mxu1  ;;  %v6364_v7 = vadd.f32 %v5577_v8, %v2979_v23  ;;  %v5579_v33 = vpop.f32.mrb[63].mxu0 }
 0x49a   : > { %5628 = vxpose.xlu1.b32.end [16/16] (narrow) %v6364_v7, 8 }
 0x49e   : > { %v5597_v31 = vpop.trf.xlu0 }
 0x49f   : > { %5645 = vst [vmem:[%s191_s9] sm:$0xff] %v5597_v31 }
 0x4de   : > { %v5629_v50 = vpop.trf.xlu1 }
 0x4df   : > { %5646 = vst [vmem:[%s191_s9 + $0x8] sm:$0xff] %v5629_v50 }
 0x4e0 PF: > { %s15_s14 = sadd.s32 1, %s7143_s14   ;;  %s12666_s9 = smov %s7127_s10 }
 0x4e1   : > { %p12_p9 = scmp.ge.s32.totalorder %s15_s14, 4   ;;  %s12667_s10 = smov %s7131_s11 }
 0x4e2   : > { %s12668_s11 = smov %s7213_s21  ;;  %s12669_s12 = smov %s7139_s13 }
 0x4e3   : > { %s12670_s13 = smov %s12672_s16  ;;  %14 = sbr.rel (!%p12_p9) target bundleno = 4 (0x4), region = 68 }
 0x4ea   :  { %5677 = vsyncpa [#allocation3], 1 }
 0x4eb   :  { %5679 = vsyncpa [#allocation3 + $0x1], 1 }

// kernel: _forward_impl.1
= control target key start
LH: loop header
LB: loop body
LE: loop exit
PB: predicated region body
PF: predicated region fallthrough
CT: control target
= control target key end

     0   :  { %7 = vsyncpa [#allocation3], 0  ;;  %s6033_s0 = inlined_call_operand.vmem [shape: f32[8,512], index: 0, kind: input, shape index: {}]   ;;  %s6034_s1 = inlined_call_operand.hbm [shape: f32[2,256,512], index: 1, kind: input, shape index: {}]   ;;  %s6035_s2 = inlined_call_operand.vmem [shape: f32[2,8,256], index: 2, kind: output, shape index: {}]  }
   0x1   :  { %9 = vsyncpa [#allocation3 + $0x1], 0  ;;  %s3952_s9 = smov 0   ;;  %s3954_s10 = smov 0  }
   0x2   :  { %s3956_s11 = smov 0   ;;  %s3958_s12 = smov 0  }
   0x3   :  { %s3960_s13 = smov 0   ;;  %s3962_s14 = smov 0  }
   0x4 LB: > { %s2990_s15 = sadd.s32 4294967295, %s3932_s14   ;;  %s27_s16 = sadd.s32 1, %s3928_s13  ;;  %s3932_s14 = sphi %s3962_s14, %s15_s14   ;;  %s3928_s13 = sphi %s3960_s13, %s7388_s13   ;;  %s3924_s12 = sphi %s3958_s12, %s7387_s12   ;;  %s3920_s11 = sphi %s3956_s11, %s7386_s11   ;;  %s3916_s10 = sphi %s3954_s10, %s7385_s10   ;;  %s3912_s9 = sphi %s3952_s9, %s7384_s9  }
   0x5   : > { %p29_p0 = scmp.ge.s32.totalorder %s27_s16, 2  ;;  %s57_s17 = sadd.s32 1, %s3920_s11 }
   0x6   : > { %p64_p1 = scmp.ne.s32.totalorder %s3920_s11, %s3916_s10  ;;  %p65_p2 = scmp.eq.s32.totalorder %s3932_s14, 0 }
   0x7   : > { %s7390_s16 = smov (%p29_p0, %s27_s16), 0  ;;  %p70_p4 = scmp.ne.s32.totalorder %s3916_s10, %s3912_s9 }
   0x8   : > { %p3988_p3 = por %p65_p2, %p64_p1  ;;  %s52_s19 = ssub.s32 %s3928_s13, %s7390_s16 }
   0x9   : > { %p71_p5 = scmp.eq.s32.totalorder %s2990_s15, 0  ;;  %p55_p6 = scmp.eq.s32.totalorder %s52_s19, 0 }
   0xa   : > { %p3801_p8 = scmp.lt.s32.totalorder %s3932_s14, 2  ;;  %s125_s22 = sand.u32 1, %s3920_s11  }
   0xb   : > { %p3995_p7 = por %p71_p5, %p70_p4  ;;  %s3003_s23 = sshll.u32 %s3928_s13, 14 }
   0xc   : > { %s4001_s21 = scalar_select %p55_p6, %s3920_s11, %s57_s17  }
   0xd   : > { %s2994_s24 = sshll.u32 %s125_s22, 10  ;;  %s4008_s27 = scalar_lea.hbm %s6034_s1, %s3003_s23 }
   0xe   : > { %s129_s28 = scalar_lea.vmem [#allocation2], %s2994_s24  ;;  %p4012_p9 = pnand %p3801_p8, %p3988_p3 }
   0xf   : > { %s139_s29 = sshll.u32 %s129_s28, 4  ;;  %s4018_s3 = scalar_lea.sflag [#allocation3], %s125_s22  ;;  %s4016_s29 = int_to_ptr.vmem [resolvable:$true] %s139_s29 }
  0x10   : > { %s3852_s4 = scalar_lea.hbm %s4008_s27, 16384  ;;  %p3854_p11 = pneg %p4012_p9 }
  0x11   : > { %p3853_p10 = scmp.ne.s32.totalorder %s4008_s27, %s3852_s4  ;;  %s3857_s7 = scalar_lea.hbm %s6034_s1, 32768 }
  0x12   : > { %p3858_p0 = scmp.lt.u32.totalorder %s4008_s27, %s6034_s1  ;;  %p3859_p1 = scmp.lt.u32.totalorder %s3857_s7, %s3852_s4 }
  0x13   : > { %p3855_p12 = pnand %p3854_p11, %p3853_p10  ;;  %p3861_p3 = scmp.lt.u32.totalorder %s3852_s4, %s4008_s27 }
  0x14   : > { %p3860_p2 = por %p3859_p1, %p3858_p0 }
  0x15   : > { %p3856_p13 = pneg %p3855_p12 }
  0x16   : > { %p3862_p4 = por %p3861_p3, %p3860_p2 }
  0x18   : > { %p3863_p5 = pnand %p3862_p4, %p3856_p13 }
  0x1a   : > { %3866 = shalt.err (!%p3863_p5)
}
  0x1b   : > { %s3867_s15 = scalar_lea.vmem %s4016_s29, 16384  ;;  %s3934_s17 = smov [#allocation2]  }
  0x1c   : > { %p3868_p6 = scmp.ne.s32.totalorder %s4016_s29, %s3867_s15  ;;  %s3872_s18 = sshll.u32 %s3934_s17, 4  ;;  %s3873_s18 = int_to_ptr.vmem [resolvable:$false] %s3872_s18 }
  0x1d   : > { %s3874_s19 = scalar_lea.vmem %s3873_s18, 32768  ;;  %p3875_p12 = scmp.lt.s32.totalorder %s4016_s29, %s3873_s18 }
  0x1e   : > { %p3870_p8 = pnand %p3868_p6, %p3854_p11  ;;  %p3876_p0 = scmp.lt.s32.totalorder %s3874_s19, %s3867_s15 }
  0x20   : > { %p3871_p10 = pneg %p3870_p8  ;;  %p3877_p1 = por %p3876_p0, %p3875_p12 }
  0x22   : > { %p3878_p2 = pnand %p3877_p1, %p3871_p10 }
  0x24   : > { %3881 = shalt.err (!%p3878_p2)
}
  0x25   : > { %s3935_s22 = smov 512   ;;  %s3936_s23 = smov 32  }
  0x26   : > { %3800 = dma.hbm_to_vmem [thread:$0]  (!%p4012_p9), %s4008_s27, 16384, %s4016_s29, %s4018_s3, %s3935_s22, %s3935_s22, %s3936_s23  }
  0x27   : > { %p2997_p11 = scmp.ge.s32.totalorder %s3932_s14, 1  ;;  %p147_p13 = scmp.lt.s32.totalorder %s3932_s14, 3 }
  0x29   : > { %p148_p3 = pnand %p2997_p11, %p147_p13 }
  0x2b   : > { %151 = sbr.rel (%p148_p3) target bundleno = 1061 (0x425), region = 28 }
  0x32   : > { %s153_s24 = sand.u32 1, %s3916_s10  }
  0x33   : > { %s2998_s25 = sshll.u32 %s153_s24, 10  ;;  %s154_s26 = scalar_lea.sflag [#allocation3], %s153_s24 }
  0x34   : > { %s4049_s28 = scalar_lea.vmem [#allocation2], %s2998_s25 }
  0x35   : > { %3907 = dma.done.wait (%p3995_p7), %s154_s26, 16384  }
  0x36   : > { %3909 = vsyncadd (%p3995_p7), %s154_s26, 4294950912  ;;  %v198_v0 = vld [vmem:[%s4049_s28 + $0x8] sm:$0xff]  ;;  %v200_v2 = vld [vmem:[%s4049_s28 + $0x18] sm:$0xff]  ;;  %p184_p7 = scmp.lt.s32.totalorder %s3924_s12, 1 }
  0x37   : > { %v202_v1 = vld [vmem:[%s4049_s28 + $0x28] sm:$0xff]  ;;  %v325_v3 = vand.u32 4294901760, %v198_v0  ;;  %v204_v5 = vld [vmem:[%s4049_s28 + $0x38] sm:$0xff]  ;;  %v1609_v6 = vand.u32 4294901760, %v200_v2  ;;  %v197_v7 = vld [vmem:[%s4049_s28] sm:$0xff] }
  0x38   : > { %v329_v4 = vand.u32 4294901760, %v202_v1  ;;  %v201_v8 = vld [vmem:[%s4049_s28 + $0x20] sm:$0xff]  ;;  %v1613_v9 = vand.u32 4294901760, %v204_v5  ;;  %v327_v10 = vand.u32 4294901760, %v197_v7  ;;  %v199_v12 = vld [vmem:[%s4049_s28 + $0x10] sm:$0xff]  ;;  %v206_v14 = vld [vmem:[%s4049_s28 + $0x48] sm:$0xff] }
  0x39   : > { %v331_v11 = vand.u32 4294901760, %v201_v8  ;;  %v203_v13 = vld [vmem:[%s4049_s28 + $0x30] sm:$0xff]  ;;  %v4066_v16 = vsub.f32 %v198_v0, %v325_v3  ;;  %v4070_v18 = vsub.f32 %v200_v2, %v1609_v6  ;;  %v210_v19 = vld [vmem:[%s4049_s28 + $0x68] sm:$0xff]  ;;  %v208_v20 = vld [vmem:[%s4049_s28 + $0x58] sm:$0xff]  ;;  %v1611_v28 = vand.u32 4294901760, %v199_v12  ;;  %s7392_s12 = smov (!%p184_p7, %s3924_s12), 1 }
  0x3a   : > { %v4064_v15 = vpack.c.bf16 %v329_v4, %v325_v3  ;;  %v4068_v17 = vsub.f32 %v202_v1, %v329_v4  ;;  %v212_v21 = vld [vmem:[%s4049_s28 + $0x78] sm:$0xff]  ;;  %v4075_v22 = vpack.c.bf16 %v1613_v9, %v1609_v6  ;;  %v4077_v23 = vsub.f32 %v204_v5, %v1613_v9  ;;  %v205_v26 = vld [vmem:[%s4049_s28 + $0x40] sm:$0xff]  ;;  %v207_v36 = vld [vmem:[%s4049_s28 + $0x50] sm:$0xff]  ;;  %s3004_s7 = sshll.u32 %s7392_s12, 4 }
  0x3b   : > { %6563 = vst [vmem:[#allocation6_spill] sm:$0xff] %v4066_v16  ;;  %6565 = vst [vmem:[#allocation8_spill] sm:$0xff] %v4070_v18  ;;  %v4079_v24 = vpack.c.bf16 %v331_v11, %v327_v10  ;;  %v4081_v25 = vsub.f32 %v197_v7, %v327_v10  ;;  %v4085_v27 = vsub.f32 %v201_v8, %v331_v11  ;;  %v1615_v29 = vand.u32 4294901760, %v203_v13  ;;  %v209_v31 = vld [vmem:[%s4049_s28 + $0x60] sm:$0xff]  ;;  %v211_v37 = vld [vmem:[%s4049_s28 + $0x70] sm:$0xff]  ;;  %s191_s15 = scalar_lea.vmem %s6035_s2, %s3004_s7 }
  0x3c   : > { %6562 = vst [vmem:[#allocation5_spill] sm:$0xff] %v4064_v15  ;;  %6564 = vst [vmem:[#allocation7_spill] sm:$0xff] %v4068_v17  ;;  %3006 = vmatprep.subr.bf16.mxu1 %v4064_v15  ;;  %v333_v30 = vand.u32 4294901760, %v206_v14  ;;  %3390 = vmatprep.subr.bf16.mxu0 %v4075_v22  ;;  %v337_v32 = vand.u32 4294901760, %v210_v19  ;;  %v1617_v33 = vand.u32 4294901760, %v208_v20  ;;  %v1621_v34 = vand.u32 4294901760, %v212_v21 }
  0x3d   : > { %6566 = vst [vmem:[#allocation9_spill] sm:$0xff] %v4075_v22  ;;  %6567 = vst [vmem:[#allocation10_spill] sm:$0xff] %v4077_v23  ;;  %3008 = vmatpush1.bf16.xpose.msra.mxu1 %v4079_v24  ;;  %v335_v35 = vand.u32 4294901760, %v205_v26  ;;  %v4092_v38 = vpack.c.bf16 %v1615_v29, %v1611_v28  ;;  %v4094_v39 = vsub.f32 %v199_v12, %v1611_v28  ;;  %v214_v42 = vld [vmem:[%s4049_s28 + $0x88] sm:$0xff]  ;;  %v216_v44 = vld [vmem:[%s4049_s28 + $0x98] sm:$0xff]  ;;  %v339_v51 = vand.u32 4294901760, %v209_v31 }
  0x3e   : > { %6568 = vst [vmem:[#allocation11_spill] sm:$0xff] %v4079_v24  ;;  %6569 = vst [vmem:[#allocation12_spill] sm:$0xff] %v4081_v25  ;;  %v4096_v40 = vsub.f32 %v203_v13, %v1615_v29  ;;  %v4098_v41 = vsub.f32 %v206_v14, %v333_v30  ;;  %v218_v43 = vld [vmem:[%s4049_s28 + $0xa8] sm:$0xff]  ;;  %v4103_v45 = vpack.c.bf16 %v337_v32, %v333_v30  ;;  %v220_v49 = vld [vmem:[%s4049_s28 + $0xb8] sm:$0xff]  ;;  %v1619_v53 = vand.u32 4294901760, %v207_v36 }
  0x3f   : > { %6570 = vst [vmem:[#allocation13_spill] sm:$0xff] %v4085_v27  ;;  %6571 = vst [vmem:[#allocation14_spill] sm:$0xff] %v4092_v38  ;;  %v4105_v46 = vsub.f32 %v210_v19, %v337_v32  ;;  %v4107_v47 = vpack.c.bf16 %v1621_v34, %v1617_v33  ;;  %v4109_v48 = vsub.f32 %v208_v20, %v1617_v33  ;;  %3392 = vmatpush1.bf16.xpose.msra.mxu0 %v4092_v38  ;;  %v213_v58 = vld [vmem:[%s4049_s28 + $0x80] sm:$0xff]  ;;  %v215_v0 = vld [vmem:[%s4049_s28 + $0x90] sm:$0xff] }
  0x40   : > { %6572 = vst [vmem:[#allocation15_spill] sm:$0xff] %v4094_v39  ;;  %6573 = vst [vmem:[#allocation16_spill] sm:$0xff] %v4096_v40  ;;  %v4113_v50 = vsub.f32 %v212_v21, %v1621_v34  ;;  %v4115_v52 = vsub.f32 %v205_v26, %v335_v35  ;;  %3010 = vmatprep.subr.bf16.mxu1 %v4103_v45  ;;  %v1623_v54 = vand.u32 4294901760, %v211_v37  ;;  %v341_v55 = vand.u32 4294901760, %v214_v42  ;;  %v217_v59 = vld [vmem:[%s4049_s28 + $0xa0] sm:$0xff]  ;;  %v219_v1 = vld [vmem:[%s4049_s28 + $0xb0] sm:$0xff] }
  0x41   : > { %6574 = vst [vmem:[#allocation17_spill] sm:$0xff] %v4098_v41  ;;  %6575 = vst [vmem:[#allocation18_spill] sm:$0xff] %v4103_v45  ;;  %3394 = vmatprep.subr.bf16.mxu0 %v4107_v47  ;;  %v345_v56 = vand.u32 4294901760, %v218_v43  ;;  %v1625_v57 = vand.u32 4294901760, %v216_v44  ;;  %v4121_v60 = vpack.c.bf16 %v339_v51, %v335_v35  ;;  %v4123_v61 = vsub.f32 %v209_v31, %v339_v51  ;;  %v222_v2 = vld [vmem:[%s4049_s28 + $0xc8] sm:$0xff]  ;;  %v224_v8 = vld [vmem:[%s4049_s28 + $0xd8] sm:$0xff] }
  0x42   : > { %6576 = vst [vmem:[#allocation19_spill] sm:$0xff] %v4105_v46  ;;  %6577 = vst [vmem:[#allocation20_spill] sm:$0xff] %v4107_v47  ;;  %v4125_v62 = vsub.f32 %v207_v36, %v1619_v53  ;;  %v1629_v63 = vand.u32 4294901760, %v220_v49  ;;  %v4130_v3 = vpack.c.bf16 %v1623_v54, %v1619_v53  ;;  %v4132_v4 = vsub.f32 %v211_v37, %v1623_v54  ;;  %v226_v7 = vld [vmem:[%s4049_s28 + $0xe8] sm:$0xff]  ;;  %v228_v9 = vld [vmem:[%s4049_s28 + $0xf8] sm:$0xff] }
  0x43   : > { %6578 = vst [vmem:[#allocation21_spill] sm:$0xff] %v4109_v48  ;;  %6579 = vst [vmem:[#allocation22_spill] sm:$0xff] %v4113_v50  ;;  %v4134_v5 = vpack.c.bf16 %v345_v56, %v341_v55  ;;  %v4136_v6 = vsub.f32 %v214_v42, %v341_v55  ;;  %v4141_v10 = vsub.f32 %v218_v43, %v345_v56  ;;  %v343_v14 = vand.u32 4294901760, %v213_v58  ;;  %v221_v31 = vld [vmem:[%s4049_s28 + $0xc0] sm:$0xff]  ;;  %v223_v37 = vld [vmem:[%s4049_s28 + $0xd0] sm:$0xff] }
  0x44   : > { %6580 = vst [vmem:[#allocation23_spill] sm:$0xff] %v4115_v52  ;;  %6581 = vst [vmem:[#allocation24_spill] sm:$0xff] %v4121_v60  ;;  %v4143_v11 = vpack.c.bf16 %v1629_v63, %v1625_v57  ;;  %v4145_v12 = vsub.f32 %v216_v44, %v1625_v57  ;;  %v4147_v13 = vsub.f32 %v220_v49, %v1629_v63  ;;  %v347_v19 = vand.u32 4294901760, %v217_v59  ;;  %v225_v32 = vld [vmem:[%s4049_s28 + $0xe0] sm:$0xff]  ;;  %v227_v42 = vld [vmem:[%s4049_s28 + $0xf0] sm:$0xff] }
  0x45   : > { %6582 = vst [vmem:[#allocation25_spill] sm:$0xff] %v4123_v61  ;;  %6583 = vst [vmem:[#allocation26_spill] sm:$0xff] %v4125_v62  ;;  %3012 = vmatpush1.bf16.xpose.msra.mxu1 %v4121_v60  ;;  %v1627_v20 = vand.u32 4294901760, %v215_v0  ;;  %v1631_v21 = vand.u32 4294901760, %v219_v1  ;;  %v349_v26 = vand.u32 4294901760, %v222_v2  ;;  %v353_v28 = vand.u32 4294901760, %v226_v7 }
  0x46   : > { %6584 = vst [vmem:[#allocation27_spill] sm:$0xff] %v4130_v3  ;;  %6585 = vst [vmem:[#allocation28_spill] sm:$0xff] %v4132_v4  ;;  %3014 = vmatprep.subr.bf16.mxu1 %v4134_v5  ;;  %v1633_v29 = vand.u32 4294901760, %v224_v8  ;;  %v1637_v30 = vand.u32 4294901760, %v228_v9  ;;  %v4153_v33 = vpack.c.bf16 %v347_v19, %v343_v14  ;;  %v4155_v34 = vsub.f32 %v213_v58, %v343_v14  ;;  %v230_v43 = vld [vmem:[%s4049_s28 + $0x108] sm:$0xff]  ;;  %v232_v55 = vld [vmem:[%s4049_s28 + $0x118] sm:$0xff] }
  0x47   : > { %6586 = vst [vmem:[#allocation29_spill] sm:$0xff] %v4134_v5  ;;  %6587 = vst [vmem:[#allocation30_spill] sm:$0xff] %v4136_v6  ;;  %v4157_v35 = vsub.f32 %v217_v59, %v347_v19  ;;  %v4159_v36 = vpack.c.bf16 %v1631_v21, %v1627_v20  ;;  %3396 = vmatpush1.bf16.xpose.msra.mxu0 %v4130_v3  ;;  %v4165_v44 = vsub.f32 %v215_v0, %v1627_v20  ;;  %v234_v54 = vld [vmem:[%s4049_s28 + $0x128] sm:$0xff]  ;;  %v236_v56 = vld [vmem:[%s4049_s28 + $0x138] sm:$0xff] }
  0x48   : > { %6588 = vst [vmem:[#allocation31_spill] sm:$0xff] %v4141_v10  ;;  %6589 = vst [vmem:[#allocation32_spill] sm:$0xff] %v4143_v11  ;;  %v4167_v49 = vsub.f32 %v219_v1, %v1631_v21  ;;  %v4169_v51 = vpack.c.bf16 %v353_v28, %v349_v26  ;;  %v4171_v53 = vsub.f32 %v222_v2, %v349_v26  ;;  %3398 = vmatprep.subr.bf16.mxu0 %v4143_v11  ;;  %v231_v11 = vld [vmem:[%s4049_s28 + $0x110] sm:$0xff]  ;;  %v238_v5 = vld [vmem:[%s4049_s28 + $0x148] sm:$0xff] }
  0x49   : > { %6590 = vst [vmem:[#allocation33_spill] sm:$0xff] %v4145_v12  ;;  %6591 = vst [vmem:[#allocation34_spill] sm:$0xff] %v4147_v13  ;;  %v4177_v57 = vsub.f32 %v226_v7, %v353_v28  ;;  %v4179_v58 = vpack.c.bf16 %v1637_v30, %v1633_v29  ;;  %v4181_v59 = vsub.f32 %v224_v8, %v1633_v29  ;;  %v351_v0 = vand.u32 4294901760, %v221_v31  ;;  %v229_v7 = vld [vmem:[%s4049_s28 + $0x100] sm:$0xff]  ;;  %v235_v3 = vld [vmem:[%s4049_s28 + $0x130] sm:$0xff] }
  0x4a   : > { %6592 = vst [vmem:[#allocation35_spill] sm:$0xff] %v4153_v33  ;;  %6593 = vst [vmem:[#allocation36_spill] sm:$0xff] %v4155_v34  ;;  %v4183_v63 = vsub.f32 %v228_v9, %v1637_v30  ;;  %v355_v1 = vand.u32 4294901760, %v225_v32  ;;  %v1635_v2 = vand.u32 4294901760, %v223_v37  ;;  %v1639_v14 = vand.u32 4294901760, %v227_v42  ;;  %v233_v28 = vld [vmem:[%s4049_s28 + $0x120] sm:$0xff] }
  0x4b   : > { %6594 = vst [vmem:[#allocation37_spill] sm:$0xff] %v4157_v35  ;;  %6595 = vst [vmem:[#allocation38_spill] sm:$0xff] %v4159_v36  ;;  %v357_v19 = vand.u32 4294901760, %v230_v43  ;;  %v361_v20 = vand.u32 4294901760, %v234_v54  ;;  %v1641_v21 = vand.u32 4294901760, %v232_v55  ;;  %v1645_v26 = vand.u32 4294901760, %v236_v56 }
  0x4c   : > { %6596 = vst [vmem:[#allocation39_spill] sm:$0xff] %v4165_v44  ;;  %6597 = vst [vmem:[#allocation40_spill] sm:$0xff] %v4167_v49  ;;  %v4187_v8 = vpack.c.bf16 %v355_v1, %v351_v0  ;;  %v4189_v29 = vsub.f32 %v221_v31, %v351_v0  ;;  %v4191_v9 = vsub.f32 %v225_v32, %v355_v1  ;;  %v242_v24 = vld [vmem:[%s4049_s28 + $0x168] sm:$0xff]  ;;  %v240_v31 = vld [vmem:[%s4049_s28 + $0x158] sm:$0xff] }
  0x4d   : > { %6598 = vst [vmem:[#allocation41_spill] sm:$0xff] %v4169_v51  ;;  %6599 = vst [vmem:[#allocation42_spill] sm:$0xff] %v4171_v53  ;;  %v4193_v30 = vpack.c.bf16 %v1639_v14, %v1635_v2  ;;  %3016 = vmatpush1.bf16.xpose.msra.mxu1 %v4153_v33  ;;  %v4199_v60 = vsub.f32 %v223_v37, %v1635_v2  ;;  %v4201_v47 = vsub.f32 %v227_v42, %v1639_v14  ;;  %v244_v32 = vld [vmem:[%s4049_s28 + $0x178] sm:$0xff]  ;;  %v282_v49 = vld [vmem:[%s4049_s28 + $0x2a8] sm:$0xff] }
  0x4e   : > { %6600 = vst [vmem:[#allocation43_spill] sm:$0xff] %v4177_v57  ;;  %6601 = vst [vmem:[#allocation44_spill] sm:$0xff] %v4179_v58  ;;  %v4203_v38 = vpack.c.bf16 %v361_v20, %v357_v19  ;;  %v4205_v45 = vsub.f32 %v230_v43, %v357_v19  ;;  %3018 = vmatprep.subr.bf16.mxu1 %v4169_v51  ;;  %v4211_v0 = vsub.f32 %v234_v54, %v361_v20  ;;  %v237_v20 = vld [vmem:[%s4049_s28 + $0x140] sm:$0xff]  ;;  %v264_v57 = vld [vmem:[%s4049_s28 + $0x218] sm:$0xff] }
  0x4f   : > { %6602 = vst [vmem:[#allocation45_spill] sm:$0xff] %v4181_v59  ;;  %6603 = vst [vmem:[#allocation46_spill] sm:$0xff] %v4183_v63  ;;  %v4213_v1 = vpack.c.bf16 %v1645_v26, %v1641_v21  ;;  %v4215_v33 = vsub.f32 %v232_v55, %v1641_v21  ;;  %v4217_v37 = vsub.f32 %v236_v56, %v1645_v26  ;;  %v359_v42 = vand.u32 4294901760, %v229_v7  ;;  %v241_v55 = vld [vmem:[%s4049_s28 + $0x160] sm:$0xff]  ;;  %v256_v63 = vld [vmem:[%s4049_s28 + $0x1d8] sm:$0xff] }
  0x50   : > { %6604 = vst [vmem:[#allocation47_spill] sm:$0xff] %v4187_v8  ;;  %6605 = vst [vmem:[#allocation48_spill] sm:$0xff] %v4189_v29  ;;  %v363_v2 = vand.u32 4294901760, %v233_v28  ;;  %v1643_v43 = vand.u32 4294901760, %v231_v11  ;;  %v1647_v14 = vand.u32 4294901760, %v235_v3  ;;  %3400 = vmatpush1.bf16.xpose.msra.mxu0 %v4159_v36  ;;  %v365_v19 = vand.u32 4294901760, %v238_v5 }
  0x51   : > { %6606 = vst [vmem:[#allocation49_spill] sm:$0xff] %v4191_v9  ;;  %6607 = vst [vmem:[#allocation50_spill] sm:$0xff] %v4193_v30  ;;  %v369_v22 = vand.u32 4294901760, %v242_v24  ;;  %v1649_v51 = vand.u32 4294901760, %v240_v31  ;;  %v1653_v54 = vand.u32 4294901760, %v244_v32  ;;  %3402 = vmatprep.subr.bf16.mxu0 %v4179_v58  ;;  %v4225_v21 = vsub.f32 %v229_v7, %v359_v42  ;;  %v239_v36 = vld [vmem:[%s4049_s28 + $0x150] sm:$0xff] }
  0x52   : > { %6608 = vst [vmem:[#allocation51_spill] sm:$0xff] %v4199_v60  ;;  %6609 = vst [vmem:[#allocation52_spill] sm:$0xff] %v4201_v47  ;;  %v4223_v56 = vpack.c.bf16 %v363_v2, %v359_v42  ;;  %v4227_v26 = vsub.f32 %v233_v28, %v363_v2  ;;  %v4229_v15 = vpack.c.bf16 %v1647_v14, %v1643_v43  ;;  %v250_v58 = vld [vmem:[%s4049_s28 + $0x1a8] sm:$0xff]  ;;  %v248_v9 = vld [vmem:[%s4049_s28 + $0x198] sm:$0xff] }
  0x53   : > { %6610 = vst [vmem:[#allocation53_spill] sm:$0xff] %v4203_v38  ;;  %6611 = vst [vmem:[#allocation54_spill] sm:$0xff] %v4205_v45  ;;  %v4236_v45 = vsub.f32 %v235_v3, %v1647_v14  ;;  %v4238_v47 = vpack.c.bf16 %v369_v22, %v365_v19  ;;  %v4240_v60 = vsub.f32 %v238_v5, %v365_v19  ;;  %v252_v7 = vld [vmem:[%s4049_s28 + $0x1b8] sm:$0xff]  ;;  %v371_v3 = vand.u32 4294901760, %v241_v55  ;;  %v266_v59 = vld [vmem:[%s4049_s28 + $0x228] sm:$0xff] }
  0x54   : > { %6612 = vst [vmem:[#allocation55_spill] sm:$0xff] %v4211_v0  ;;  %6613 = vst [vmem:[#allocation56_spill] sm:$0xff] %v4213_v1  ;;  %v4234_v0 = vsub.f32 %v231_v11, %v1643_v43  ;;  %v4245_v28 = vsub.f32 %v242_v24, %v369_v22  ;;  %v4247_v42 = vpack.c.bf16 %v1653_v54, %v1649_v51  ;;  %v367_v11 = vand.u32 4294901760, %v237_v20  ;;  %v245_v24 = vld [vmem:[%s4049_s28 + $0x180] sm:$0xff]  ;;  %v290_v44 = vld [vmem:[%s4049_s28 + $0x2e8] sm:$0xff] }
  0x55   : > { %6614 = vst [vmem:[#allocation57_spill] sm:$0xff] %v4215_v33  ;;  %6615 = vst [vmem:[#allocation58_spill] sm:$0xff] %v4217_v37  ;;  %v243_v37 = vld [vmem:[%s4049_s28 + $0x170] sm:$0xff]  ;;  %v246_v33 = vld [vmem:[%s4049_s28 + $0x188] sm:$0xff]  ;;  %v4249_v2 = vsub.f32 %v240_v31, %v1649_v51  ;;  %v1651_v43 = vand.u32 4294901760, %v239_v36  ;;  %3020 = vmatpush1.bf16.xpose.msra.mxu1 %v4187_v8  ;;  %v377_v19 = vand.u32 4294901760, %v250_v58 }
  0x56   : > { %6616 = vst [vmem:[#allocation59_spill] sm:$0xff] %v4223_v56  ;;  %6617 = vst [vmem:[#allocation60_spill] sm:$0xff] %v4225_v21  ;;  %v1655_v5 = vand.u32 4294901760, %v243_v37  ;;  %v373_v14 = vand.u32 4294901760, %v246_v33  ;;  %v1661_v22 = vand.u32 4294901760, %v252_v7  ;;  %v249_v51 = vld [vmem:[%s4049_s28 + $0x1a0] sm:$0xff]  ;;  %3022 = vmatprep.subr.bf16.mxu1 %v4203_v38  ;;  %v4257_v31 = vpack.c.bf16 %v371_v3, %v367_v11 }
  0x57   : > { %6618 = vst [vmem:[#allocation61_spill] sm:$0xff] %v4227_v26  ;;  %6619 = vst [vmem:[#allocation62_spill] sm:$0xff] %v4229_v15  ;;  %v4251_v26 = vsub.f32 %v244_v32, %v1653_v54  ;;  %v4259_v32 = vsub.f32 %v237_v20, %v367_v11  ;;  %v4261_v54 = vsub.f32 %v241_v55, %v371_v3  ;;  %v247_v8 = vld [vmem:[%s4049_s28 + $0x190] sm:$0xff]  ;;  %v258_v38 = vld [vmem:[%s4049_s28 + $0x1e8] sm:$0xff] }
  0x58   : > { %6620 = vst [vmem:[#allocation63_spill] sm:$0xff] %v4234_v0  ;;  %6621 = vst [vmem:[#allocation64_spill] sm:$0xff] %v4236_v45  ;;  %v4268_v45 = vsub.f32 %v239_v36, %v1651_v43  ;;  %v4270_v0 = vsub.f32 %v243_v37, %v1655_v5  ;;  %v4272_v21 = vpack.c.bf16 %v377_v19, %v373_v14  ;;  %v260_v20 = vld [vmem:[%s4049_s28 + $0x1f8] sm:$0xff]  ;;  %3404 = vmatpush1.bf16.xpose.msra.mxu0 %v4193_v30  ;;  %v298_v34 = vld [vmem:[%s4049_s28 + $0x328] sm:$0xff] }
  0x59   : > { %6622 = vst [vmem:[#allocation65_spill] sm:$0xff] %v4238_v47  ;;  %6623 = vst [vmem:[#allocation66_spill] sm:$0xff] %v4240_v60  ;;  %v1657_v60 = vand.u32 4294901760, %v248_v9  ;;  %v4274_v29 = vsub.f32 %v246_v33, %v373_v14  ;;  %v4280_v55 = vsub.f32 %v250_v58, %v377_v19  ;;  %v4286_v36 = vsub.f32 %v252_v7, %v1661_v22  ;;  %v288_v35 = vld [vmem:[%s4049_s28 + $0x2d8] sm:$0xff]  ;;  %v306_v12 = vld [vmem:[%s4049_s28 + $0x368] sm:$0xff] }
  0x5a   : > { %6624 = vst [vmem:[#allocation67_spill] sm:$0xff] %v4245_v28  ;;  %6625 = vst [vmem:[#allocation68_spill] sm:$0xff] %v4247_v42  ;;  %v254_v28 = vld [vmem:[%s4049_s28 + $0x1c8] sm:$0xff]  ;;  %3406 = vmatprep.subr.bf16.mxu0 %v4213_v1  ;;  %v375_v33 = vand.u32 4294901760, %v245_v24  ;;  %v379_v37 = vand.u32 4294901760, %v249_v51  ;;  %v1665_v58 = vand.u32 4294901760, %v256_v63 }
  0x5b   : > { %6626 = vst [vmem:[#allocation69_spill] sm:$0xff] %v4249_v2  ;;  %6627 = vst [vmem:[#allocation70_spill] sm:$0xff] %v4251_v26  ;;  %v4263_v26 = vpack.c.bf16 %v1655_v5, %v1651_v43  ;;  %v251_v2 = vld [vmem:[%s4049_s28 + $0x1b0] sm:$0xff]  ;;  %v4282_v11 = vpack.c.bf16 %v1661_v22, %v1657_v60  ;;  %v4284_v3 = vsub.f32 %v248_v9, %v1657_v60  ;;  %v1659_v43 = vand.u32 4294901760, %v247_v8  ;;  %v253_v60 = vld [vmem:[%s4049_s28 + $0x1c0] sm:$0xff] }
  0x5c   : > { %6628 = vst [vmem:[#allocation71_spill] sm:$0xff] %v4257_v31  ;;  %6629 = vst [vmem:[#allocation72_spill] sm:$0xff] %v4259_v32  ;;  %v1663_v5 = vand.u32 4294901760, %v251_v2  ;;  %v381_v14 = vand.u32 4294901760, %v254_v28  ;;  %v1669_v19 = vand.u32 4294901760, %v260_v20  ;;  %v257_v9 = vld [vmem:[%s4049_s28 + $0x1e0] sm:$0xff]  ;;  %v4291_v7 = vpack.c.bf16 %v379_v37, %v375_v33 }
  0x5d   : > { %6630 = vst [vmem:[#allocation73_spill] sm:$0xff] %v4261_v54  ;;  %6631 = vst [vmem:[#allocation74_spill] sm:$0xff] %v4263_v26  ;;  %v4293_v22 = vsub.f32 %v245_v24, %v375_v33  ;;  %v4295_v1 = vsub.f32 %v249_v51, %v379_v37  ;;  %v268_v24 = vld [vmem:[%s4049_s28 + $0x238] sm:$0xff]  ;;  %3024 = vmatpush1.bf16.xpose.msra.mxu1 %v4223_v56  ;;  %v4318_v37 = vsub.f32 %v256_v63, %v1665_v58  ;;  %v265_v63 = vld [vmem:[%s4049_s28 + $0x220] sm:$0xff] }
  0x5e   : > { %6632 = vst [vmem:[#allocation75_spill] sm:$0xff] %v4268_v45  ;;  %6633 = vst [vmem:[#allocation76_spill] sm:$0xff] %v4270_v0  ;;  %v4297_v30 = vpack.c.bf16 %v1663_v5, %v1659_v43  ;;  %v4302_v0 = vsub.f32 %v247_v8, %v1659_v43  ;;  %v4304_v45 = vsub.f32 %v251_v2, %v1663_v5  ;;  %3026 = vmatprep.subr.bf16.mxu1 %v4238_v47 }
  0x5f   : > { %6634 = vst [vmem:[#allocation77_spill] sm:$0xff] %v4272_v21  ;;  %6635 = vst [vmem:[#allocation78_spill] sm:$0xff] %v4274_v29  ;;  %v385_v29 = vand.u32 4294901760, %v258_v38  ;;  %v4308_v32 = vsub.f32 %v254_v28, %v381_v14  ;;  %v4316_v33 = vpack.c.bf16 %v1669_v19, %v1665_v58  ;;  %v4320_v8 = vsub.f32 %v260_v20, %v1669_v19 }
  0x60   : > { %6636 = vst [vmem:[#allocation79_spill] sm:$0xff] %v4280_v55  ;;  %6637 = vst [vmem:[#allocation80_spill] sm:$0xff] %v4282_v11  ;;  %v262_v55 = vld [vmem:[%s4049_s28 + $0x208] sm:$0xff]  ;;  %v383_v28 = vand.u32 4294901760, %v253_v60  ;;  %v387_v2 = vand.u32 4294901760, %v257_v9  ;;  %v1673_v56 = vand.u32 4294901760, %v264_v57  ;;  %3408 = vmatpush1.bf16.xpose.msra.mxu0 %v4229_v15 }
  0x61   : > { %6638 = vst [vmem:[#allocation81_spill] sm:$0xff] %v4284_v3  ;;  %6639 = vst [vmem:[#allocation82_spill] sm:$0xff] %v4286_v36  ;;  %v255_v36 = vld [vmem:[%s4049_s28 + $0x1d0] sm:$0xff]  ;;  %v4306_v54 = vpack.c.bf16 %v385_v29, %v381_v14  ;;  %v4314_v51 = vsub.f32 %v258_v38, %v385_v29  ;;  %v389_v14 = vand.u32 4294901760, %v262_v55  ;;  %v1677_v38 = vand.u32 4294901760, %v268_v24  ;;  %v261_v29 = vld [vmem:[%s4049_s28 + $0x200] sm:$0xff]  ;;  %3410 = vmatprep.subr.bf16.mxu0 %v4247_v42 }
  0x62   : > { %6640 = vst [vmem:[#allocation83_spill] sm:$0xff] %v4291_v7  ;;  %6641 = vst [vmem:[#allocation84_spill] sm:$0xff] %v4293_v22  ;;  %v259_v3 = vld [vmem:[%s4049_s28 + $0x1f0] sm:$0xff]  ;;  %v1667_v43 = vand.u32 4294901760, %v255_v36  ;;  %v4326_v20 = vpack.c.bf16 %v387_v2, %v383_v28  ;;  %v4328_v58 = vsub.f32 %v253_v60, %v383_v28  ;;  %v4330_v19 = vsub.f32 %v257_v9, %v387_v2  ;;  %v274_v60 = vld [vmem:[%s4049_s28 + $0x268] sm:$0xff] }
  0x63   : > { %6642 = vst [vmem:[#allocation85_spill] sm:$0xff] %v4295_v1  ;;  %6643 = vst [vmem:[#allocation86_spill] sm:$0xff] %v4297_v30  ;;  %v1671_v5 = vand.u32 4294901760, %v259_v3  ;;  %v4344_v15 = vsub.f32 %v262_v55, %v389_v14  ;;  %v272_v9 = vld [vmem:[%s4049_s28 + $0x258] sm:$0xff]  ;;  %v4355_v42 = vsub.f32 %v268_v24, %v1677_v38 }
  0x64   : > { %6644 = vst [vmem:[#allocation87_spill] sm:$0xff] %v4302_v0  ;;  %6645 = vst [vmem:[#allocation88_spill] sm:$0xff] %v4304_v45  ;;  %v4338_v45 = vsub.f32 %v255_v36, %v1667_v43  ;;  %v276_v28 = vld [vmem:[%s4049_s28 + $0x278] sm:$0xff]  ;;  %v395_v36 = vand.u32 4294901760, %v265_v63 }
  0x65   : > { %6646 = vst [vmem:[#allocation89_spill] sm:$0xff] %v4306_v54  ;;  %6647 = vst [vmem:[#allocation90_spill] sm:$0xff] %v4308_v32  ;;  %v393_v32 = vand.u32 4294901760, %v266_v59  ;;  %v4332_v47 = vpack.c.bf16 %v1671_v5, %v1667_v43  ;;  %v4340_v0 = vsub.f32 %v259_v3, %v1671_v5  ;;  %v391_v3 = vand.u32 4294901760, %v261_v29  ;;  %3028 = vmatpush1.bf16.xpose.msra.mxu1 %v4257_v31 }
  0x66   : > { %6648 = vst [vmem:[#allocation91_spill] sm:$0xff] %v4314_v51  ;;  %6649 = vst [vmem:[#allocation92_spill] sm:$0xff] %v4316_v33  ;;  %v270_v51 = vld [vmem:[%s4049_s28 + $0x248] sm:$0xff]  ;;  %v4364_v24 = vsub.f32 %v265_v63, %v395_v36  ;;  %3030 = vmatprep.subr.bf16.mxu1 %v4272_v21  ;;  %v284_v63 = vld [vmem:[%s4049_s28 + $0x2b8] sm:$0xff] }
  0x67   : > { %6650 = vst [vmem:[#allocation93_spill] sm:$0xff] %v4318_v37  ;;  %6651 = vst [vmem:[#allocation94_spill] sm:$0xff] %v4320_v8  ;;  %v263_v8 = vld [vmem:[%s4049_s28 + $0x210] sm:$0xff]  ;;  %v4342_v1 = vpack.c.bf16 %v393_v32, %v389_v14  ;;  %v4349_v2 = vsub.f32 %v266_v59, %v393_v32  ;;  %v397_v5 = vand.u32 4294901760, %v270_v51  ;;  %v401_v14 = vand.u32 4294901760, %v274_v60  ;;  %v269_v59 = vld [vmem:[%s4049_s28 + $0x240] sm:$0xff] }
  0x68   : > { %6652 = vst [vmem:[#allocation95_spill] sm:$0xff] %v4326_v20  ;;  %6653 = vst [vmem:[#allocation96_spill] sm:$0xff] %v4328_v58  ;;  %v267_v37 = vld [vmem:[%s4049_s28 + $0x230] sm:$0xff]  ;;  %v4353_v58 = vsub.f32 %v264_v57, %v1673_v56  ;;  %v1675_v55 = vand.u32 4294901760, %v263_v8  ;;  %v273_v32 = vld [vmem:[%s4049_s28 + $0x260] sm:$0xff]  ;;  %v4360_v57 = vpack.c.bf16 %v395_v36, %v391_v3  ;;  %3412 = vmatpush1.bf16.xpose.msra.mxu0 %v4263_v26 }
  0x69   : > { %6654 = vst [vmem:[#allocation97_spill] sm:$0xff] %v4330_v19  ;;  %6655 = vst [vmem:[#allocation98_spill] sm:$0xff] %v4332_v47  ;;  %v4351_v19 = vpack.c.bf16 %v1677_v38, %v1673_v56  ;;  %v1679_v43 = vand.u32 4294901760, %v267_v37  ;;  %v4362_v56 = vsub.f32 %v261_v29, %v391_v3  ;;  %v4376_v53 = vpack.c.bf16 %v401_v14, %v397_v5  ;;  %v280_v29 = vld [vmem:[%s4049_s28 + $0x298] sm:$0xff] }
  0x6a   : > { %6656 = vst [vmem:[#allocation99_spill] sm:$0xff] %v4338_v45  ;;  %6657 = vst [vmem:[#allocation100_spill] sm:$0xff] %v4340_v0  ;;  %v1685_v0 = vand.u32 4294901760, %v276_v28  ;;  %v4372_v45 = vsub.f32 %v263_v8, %v1675_v55  ;;  %v4378_v31 = vsub.f32 %v270_v51, %v397_v5  ;;  %v4383_v3 = vsub.f32 %v274_v60, %v401_v14 }
  0x6b   : > { %6658 = vst [vmem:[#allocation101_spill] sm:$0xff] %v4342_v1  ;;  %6659 = vst [vmem:[#allocation102_spill] sm:$0xff] %v4344_v15  ;;  %v1681_v15 = vand.u32 4294901760, %v272_v9  ;;  %v4366_v38 = vpack.c.bf16 %v1679_v43, %v1675_v55  ;;  %v4374_v22 = vsub.f32 %v267_v37, %v1679_v43  ;;  %v399_v37 = vand.u32 4294901760, %v269_v59  ;;  %3414 = vmatprep.subr.bf16.mxu0 %v4282_v11  ;;  %v286_v11 = vld [vmem:[%s4049_s28 + $0x2c8] sm:$0xff] }
  0x6c   : > { %6660 = vst [vmem:[#allocation103_spill] sm:$0xff] %v4349_v2  ;;  %6661 = vst [vmem:[#allocation104_spill] sm:$0xff] %v4351_v19  ;;  %v278_v2 = vld [vmem:[%s4049_s28 + $0x288] sm:$0xff]  ;;  %v4389_v21 = vsub.f32 %v276_v28, %v1685_v0  ;;  %v403_v51 = vand.u32 4294901760, %v273_v32  ;;  %v409_v60 = vand.u32 4294901760, %v282_v49  ;;  %v1689_v5 = vand.u32 4294901760, %v280_v29 }
  0x6d   : > { %6662 = vst [vmem:[#allocation105_spill] sm:$0xff] %v4353_v58  ;;  %6663 = vst [vmem:[#allocation106_spill] sm:$0xff] %v4355_v42  ;;  %v271_v42 = vld [vmem:[%s4049_s28 + $0x250] sm:$0xff]  ;;  %v4385_v36 = vpack.c.bf16 %v1685_v0, %v1681_v15  ;;  %v405_v43 = vand.u32 4294901760, %v278_v2  ;;  %v277_v0 = vld [vmem:[%s4049_s28 + $0x280] sm:$0xff]  ;;  %v4397_v14 = vsub.f32 %v269_v59, %v399_v37  ;;  %3032 = vmatpush1.bf16.xpose.msra.mxu1 %v4291_v7 }
  0x6e   : > { %6664 = vst [vmem:[#allocation107_spill] sm:$0xff] %v4360_v57  ;;  %6665 = vst [vmem:[#allocation108_spill] sm:$0xff] %v4362_v56  ;;  %v275_v58 = vld [vmem:[%s4049_s28 + $0x270] sm:$0xff]  ;;  %v1683_v8 = vand.u32 4294901760, %v271_v42  ;;  %v4395_v28 = vpack.c.bf16 %v403_v51, %v399_v37  ;;  %v4399_v26 = vsub.f32 %v273_v32, %v403_v51  ;;  %v292_v59 = vld [vmem:[%s4049_s28 + $0x2f8] sm:$0xff]  ;;  %v4417_v32 = vsub.f32 %v282_v49, %v409_v60 }
  0x6f   : > { %6666 = vst [vmem:[#allocation109_spill] sm:$0xff] %v4364_v24  ;;  %6667 = vst [vmem:[#allocation110_spill] sm:$0xff] %v4366_v38  ;;  %v4387_v24 = vsub.f32 %v272_v9, %v1681_v15  ;;  %v1687_v55 = vand.u32 4294901760, %v275_v58  ;;  %v1693_v15 = vand.u32 4294901760, %v284_v63  ;;  %v281_v9 = vld [vmem:[%s4049_s28 + $0x2a0] sm:$0xff]  ;;  %v4412_v56 = vsub.f32 %v278_v2, %v405_v43  ;;  %3034 = vmatprep.subr.bf16.mxu1 %v4306_v54  ;;  %v294_v54 = vld [vmem:[%s4049_s28 + $0x308] sm:$0xff] }
  0x70   : > { %6668 = vst [vmem:[#allocation111_spill] sm:$0xff] %v4372_v45  ;;  %6669 = vst [vmem:[#allocation112_spill] sm:$0xff] %v4374_v22  ;;  %v4410_v45 = vpack.c.bf16 %v409_v60, %v405_v43  ;;  %v4421_v51 = vsub.f32 %v280_v29, %v1689_v5  ;;  %v417_v49 = vand.u32 4294901760, %v290_v44  ;;  %v1697_v43 = vand.u32 4294901760, %v288_v35  ;;  %v285_v29 = vld [vmem:[%s4049_s28 + $0x2c0] sm:$0xff]  ;;  %3416 = vmatpush1.bf16.xpose.msra.mxu0 %v4297_v30 }
  0x71   : > { %6670 = vst [vmem:[#allocation113_spill] sm:$0xff] %v4376_v53  ;;  %6671 = vst [vmem:[#allocation114_spill] sm:$0xff] %v4378_v31  ;;  %v4406_v31 = vsub.f32 %v271_v42, %v1683_v8  ;;  %v4408_v22 = vsub.f32 %v275_v58, %v1687_v55  ;;  %v4419_v37 = vpack.c.bf16 %v1693_v15, %v1689_v5  ;;  %v407_v42 = vand.u32 4294901760, %v277_v0 }
  0x72   : > { %6672 = vst [vmem:[#allocation115_spill] sm:$0xff] %v4383_v3  ;;  %6673 = vst [vmem:[#allocation116_spill] sm:$0xff] %v4385_v36  ;;  %v283_v3 = vld [vmem:[%s4049_s28 + $0x2b0] sm:$0xff]  ;;  %v411_v58 = vand.u32 4294901760, %v281_v9  ;;  %v1701_v60 = vand.u32 4294901760, %v292_v59  ;;  %3418 = vmatprep.subr.bf16.mxu0 %v4316_v33  ;;  %v4457_v30 = vsub.f32 %v288_v35, %v1697_v43 }
  0x73   : > { %6674 = vst [vmem:[#allocation117_spill] sm:$0xff] %v4387_v24  ;;  %6675 = vst [vmem:[#allocation118_spill] sm:$0xff] %v4389_v21  ;;  %v4401_v21 = vpack.c.bf16 %v1687_v55, %v1683_v8  ;;  %v279_v24 = vld [vmem:[%s4049_s28 + $0x290] sm:$0xff]  ;;  %v1695_v8 = vand.u32 4294901760, %v283_v3  ;;  %v413_v55 = vand.u32 4294901760, %v286_v11 }
  0x74   : > { %6676 = vst [vmem:[#allocation119_spill] sm:$0xff] %v4395_v28  ;;  %6677 = vst [vmem:[#allocation120_spill] sm:$0xff] %v4397_v14  ;;  %v1691_v2 = vand.u32 4294901760, %v279_v24  ;;  %v4429_v5 = vpack.c.bf16 %v411_v58, %v407_v42  ;;  %v4433_v7 = vsub.f32 %v281_v9, %v411_v58  ;;  %v300_v9 = vld [vmem:[%s4049_s28 + $0x338] sm:$0xff]  ;;  %v4455_v58 = vpack.c.bf16 %v1701_v60, %v1697_v43 }
  0x75   : > { %6678 = vst [vmem:[#allocation121_spill] sm:$0xff] %v4399_v26  ;;  %6679 = vst [vmem:[#allocation122_spill] sm:$0xff] %v4401_v21  ;;  %v4423_v26 = vsub.f32 %v284_v63, %v1693_v15  ;;  %v289_v63 = vld [vmem:[%s4049_s28 + $0x2e0] sm:$0xff]  ;;  %v4431_v15 = vsub.f32 %v277_v0, %v407_v42  ;;  %v4447_v14 = vsub.f32 %v286_v11, %v413_v55  ;;  %v296_v0 = vld [vmem:[%s4049_s28 + $0x318] sm:$0xff]  ;;  %v1709_v33 = vand.u32 4294901760, %v300_v9 }
  0x76   : > { %6680 = vst [vmem:[#allocation123_spill] sm:$0xff] %v4406_v31  ;;  %6681 = vst [vmem:[#allocation124_spill] sm:$0xff] %v4408_v22  ;;  %v4443_v22 = vsub.f32 %v283_v3, %v1695_v8  ;;  %v4445_v31 = vpack.c.bf16 %v417_v49, %v413_v55  ;;  %v4453_v42 = vsub.f32 %v290_v44, %v417_v49  ;;  %v415_v3 = vand.u32 4294901760, %v285_v29  ;;  %v293_v44 = vld [vmem:[%s4049_s28 + $0x300] sm:$0xff] }
  0x77   : > { %6682 = vst [vmem:[#allocation125_spill] sm:$0xff] %v4410_v45  ;;  %6683 = vst [vmem:[#allocation126_spill] sm:$0xff] %v4412_v56  ;;  %v4441_v56 = vsub.f32 %v279_v24, %v1691_v2  ;;  %v4459_v24 = vsub.f32 %v292_v59, %v1701_v60  ;;  %v419_v11 = vand.u32 4294901760, %v289_v63  ;;  %v421_v55 = vand.u32 4294901760, %v294_v54  ;;  %v297_v49 = vld [vmem:[%s4049_s28 + $0x320] sm:$0xff]  ;;  %3036 = vmatpush1.bf16.xpose.msra.mxu1 %v4326_v20 }
  0x78   : > { %6684 = vst [vmem:[#allocation127_spill] sm:$0xff] %v4417_v32  ;;  %6685 = vst [vmem:[#allocation128_spill] sm:$0xff] %v4419_v37  ;;  %v291_v32 = vld [vmem:[%s4049_s28 + $0x2f0] sm:$0xff]  ;;  %v4465_v43 = vsub.f32 %v285_v29, %v415_v3  ;;  %v304_v29 = vld [vmem:[%s4049_s28 + $0x358] sm:$0xff]  ;;  %3038 = vmatprep.subr.bf16.mxu1 %v4342_v1  ;;  %3420 = vmatpush1.bf16.xpose.msra.mxu0 %v4332_v47 }
  0x79   : > { %6686 = vst [vmem:[#allocation129_spill] sm:$0xff] %v4421_v51  ;;  %6687 = vst [vmem:[#allocation130_spill] sm:$0xff] %v4423_v26  ;;  %v4435_v26 = vpack.c.bf16 %v1695_v8, %v1691_v2  ;;  %v287_v51 = vld [vmem:[%s4049_s28 + $0x2d0] sm:$0xff]  ;;  %v1703_v8 = vand.u32 4294901760, %v291_v32  ;;  %v4463_v35 = vpack.c.bf16 %v419_v11, %v415_v3  ;;  %v4467_v59 = vsub.f32 %v289_v63, %v419_v11  ;;  %v308_v63 = vld [vmem:[%s4049_s28 + $0x378] sm:$0xff] }
  0x7a   : > { %6688 = vst [vmem:[#allocation131_spill] sm:$0xff] %v4429_v5  ;;  %6689 = vst [vmem:[#allocation132_spill] sm:$0xff] %v4431_v15  ;;  %v1699_v2 = vand.u32 4294901760, %v287_v51  ;;  %v4481_v13 = vsub.f32 %v294_v54, %v421_v55  ;;  %v1713_v1 = vand.u32 4294901760, %v304_v29  ;;  %3422 = vmatprep.subr.bf16.mxu0 %v4351_v19  ;;  %v303_v47 = vld [vmem:[%s4049_s28 + $0x350] sm:$0xff]  ;;  %v314_v19 = vld [vmem:[%s4049_s28 + $0x3a8] sm:$0xff] }
  0x7b   : > { %6690 = vst [vmem:[#allocation133_spill] sm:$0xff] %v4433_v7  ;;  %6691 = vst [vmem:[#allocation134_spill] sm:$0xff] %v4435_v26  ;;  %v4477_v7 = vsub.f32 %v291_v32, %v1703_v8  ;;  %v423_v32 = vand.u32 4294901760, %v293_v44 }
  0x7c   : > { %6692 = vst [vmem:[#allocation135_spill] sm:$0xff] %v4441_v56  ;;  %6693 = vst [vmem:[#allocation136_spill] sm:$0xff] %v4443_v22  ;;  %v1705_v22 = vand.u32 4294901760, %v296_v0  ;;  %v4469_v60 = vpack.c.bf16 %v1703_v8, %v1699_v2  ;;  %v4475_v56 = vsub.f32 %v287_v51, %v1699_v2  ;;  %v4493_v51 = vsub.f32 %v300_v9, %v1709_v33 }
  0x7d   : > { %6694 = vst [vmem:[#allocation137_spill] sm:$0xff] %v4445_v31  ;;  %6695 = vst [vmem:[#allocation138_spill] sm:$0xff] %v4447_v14  ;;  %v425_v14 = vand.u32 4294901760, %v298_v34  ;;  %v427_v2 = vand.u32 4294901760, %v297_v49 }
  0x7e   : > { %6696 = vst [vmem:[#allocation139_spill] sm:$0xff] %v4453_v42  ;;  %6697 = vst [vmem:[#allocation140_spill] sm:$0xff] %v4455_v58  ;;  %v302_v42 = vld [vmem:[%s4049_s28 + $0x348] sm:$0xff]  ;;  %v4489_v11 = vpack.c.bf16 %v1709_v33, %v1705_v22  ;;  %v4491_v20 = vsub.f32 %v296_v0, %v1705_v22  ;;  %v305_v22 = vld [vmem:[%s4049_s28 + $0x360] sm:$0xff]  ;;  %v4501_v0 = vsub.f32 %v293_v44, %v423_v32 }
  0x7f   : > { %6698 = vst [vmem:[#allocation141_spill] sm:$0xff] %v4457_v30  ;;  %6699 = vst [vmem:[#allocation142_spill] sm:$0xff] %v4459_v24  ;;  %v295_v24 = vld [vmem:[%s4049_s28 + $0x310] sm:$0xff]  ;;  %v4479_v15 = vpack.c.bf16 %v425_v14, %v421_v55  ;;  %v4487_v3 = vsub.f32 %v298_v34, %v425_v14  ;;  %v429_v55 = vand.u32 4294901760, %v302_v42  ;;  %v1717_v34 = vand.u32 4294901760, %v308_v63  ;;  %v301_v14 = vld [vmem:[%s4049_s28 + $0x340] sm:$0xff]  ;;  %3040 = vmatpush1.bf16.xpose.msra.mxu1 %v4360_v57 }
  0x80   : > { %6700 = vst [vmem:[#allocation143_spill] sm:$0xff] %v4463_v35  ;;  %6701 = vst [vmem:[#allocation144_spill] sm:$0xff] %v4465_v43  ;;  %v299_v30 = vld [vmem:[%s4049_s28 + $0x330] sm:$0xff]  ;;  %v1707_v54 = vand.u32 4294901760, %v295_v24  ;;  %v4499_v33 = vpack.c.bf16 %v427_v2, %v423_v32  ;;  %v4503_v9 = vsub.f32 %v297_v49, %v427_v2  ;;  %v316_v44 = vld [vmem:[%s4049_s28 + $0x3b8] sm:$0xff]  ;;  %v4525_v2 = vsub.f32 %v304_v29, %v1713_v1 }
  0x81   : > { %6702 = vst [vmem:[#allocation145_spill] sm:$0xff] %v4467_v59  ;;  %6703 = vst [vmem:[#allocation146_spill] sm:$0xff] %v4469_v60  ;;  %v1711_v8 = vand.u32 4294901760, %v299_v30  ;;  %v4516_v43 = vsub.f32 %v302_v42, %v429_v55  ;;  %v4523_v32 = vpack.c.bf16 %v1717_v34, %v1713_v1  ;;  %v313_v1 = vld [vmem:[%s4049_s28 + $0x3a0] sm:$0xff]  ;;  %3042 = vmatprep.subr.bf16.mxu1 %v4376_v53  ;;  %v311_v57 = vld [vmem:[%s4049_s28 + $0x390] sm:$0xff]  ;;  %3424 = vmatpush1.bf16.xpose.msra.mxu0 %v4366_v38 }
  0x82   : > { %6704 = vst [vmem:[#allocation147_spill] sm:$0xff] %v4475_v56  ;;  %6705 = vst [vmem:[#allocation148_spill] sm:$0xff] %v4477_v7  ;;  %v4510_v7 = vsub.f32 %v295_v24, %v1707_v54  ;;  %v431_v24 = vand.u32 4294901760, %v301_v14  ;;  %v322_v53 = vld [vmem:[%s4049_s28 + $0x3e8] sm:$0xff]  ;;  %3426 = vmatprep.subr.bf16.mxu0 %v4385_v36  ;;  %v319_v36 = vld [vmem:[%s4049_s28 + $0x3d0] sm:$0xff] }
  0x83   : > { %6706 = vst [vmem:[#allocation149_spill] sm:$0xff] %v4479_v15  ;;  %6707 = vst [vmem:[#allocation150_spill] sm:$0xff] %v4481_v13  ;;  %v433_v13 = vand.u32 4294901760, %v306_v12  ;;  %v4512_v56 = vsub.f32 %v299_v30, %v1711_v8  ;;  %v435_v30 = vand.u32 4294901760, %v305_v22 }
  0x84   : > { %6708 = vst [vmem:[#allocation151_spill] sm:$0xff] %v4487_v3  ;;  %6709 = vst [vmem:[#allocation152_spill] sm:$0xff] %v4489_v11  ;;  %v310_v3 = vld [vmem:[%s4049_s28 + $0x388] sm:$0xff] }
  0x85   : > { %6710 = vst [vmem:[#allocation153_spill] sm:$0xff] %v4491_v20  ;;  %6711 = vst [vmem:[#allocation154_spill] sm:$0xff] %v4493_v51  ;;  %v4505_v51 = vpack.c.bf16 %v1711_v8, %v1707_v54  ;;  %v307_v20 = vld [vmem:[%s4049_s28 + $0x370] sm:$0xff]  ;;  %v4514_v59 = vpack.c.bf16 %v433_v13, %v429_v55  ;;  %v4521_v49 = vsub.f32 %v306_v12, %v433_v13  ;;  %v1715_v54 = vand.u32 4294901760, %v303_v47  ;;  %v309_v13 = vld [vmem:[%s4049_s28 + $0x380] sm:$0xff] }
  0x86   : > { %6712 = vst [vmem:[#allocation155_spill] sm:$0xff] %v4499_v33  ;;  %6713 = vst [vmem:[#allocation156_spill] sm:$0xff] %v4501_v0  ;;  %v312_v33 = vld [vmem:[%s4049_s28 + $0x398] sm:$0xff]  ;;  %v1719_v42 = vand.u32 4294901760, %v307_v20  ;;  %v437_v8 = vand.u32 4294901760, %v310_v3  ;;  %v441_v55 = vand.u32 4294901760, %v314_v19  ;;  %v4533_v29 = vpack.c.bf16 %v435_v30, %v431_v24 }
  0x87   : > { %6714 = vst [vmem:[#allocation157_spill] sm:$0xff] %v4503_v9  ;;  %6715 = vst [vmem:[#allocation158_spill] sm:$0xff] %v4505_v51  ;;  %v4527_v9 = vsub.f32 %v308_v63, %v1717_v34  ;;  %v1725_v12 = vand.u32 4294901760, %v316_v44  ;;  %v4535_v63 = vsub.f32 %v301_v14, %v431_v24  ;;  %v4537_v34 = vsub.f32 %v305_v22, %v435_v30  ;;  %v320_v51 = vld [vmem:[%s4049_s28 + $0x3d8] sm:$0xff] }
  0x88   : > { %6716 = vst [vmem:[#allocation159_spill] sm:$0xff] %v4510_v7  ;;  %6717 = vst [vmem:[#allocation160_spill] sm:$0xff] %v4512_v56  ;;  %v4544_v56 = vsub.f32 %v303_v47, %v1715_v54  ;;  %v4546_v7 = vsub.f32 %v307_v20, %v1719_v42  ;;  %v4548_v0 = vpack.c.bf16 %v441_v55, %v437_v8  ;;  %v324_v14 = vld [vmem:[%s4049_s28 + $0x3f8] sm:$0xff]  ;;  %v439_v20 = vand.u32 4294901760, %v309_v13 }
  0x89   : > { %6718 = vst [vmem:[#allocation161_spill] sm:$0xff] %v4514_v59  ;;  %6719 = vst [vmem:[#allocation162_spill] sm:$0xff] %v4516_v43  ;;  %v1721_v43 = vand.u32 4294901760, %v312_v33  ;;  %v4556_v22 = vsub.f32 %v314_v19, %v441_v55  ;;  %v4562_v47 = vsub.f32 %v316_v44, %v1725_v12  ;;  %v1729_v38 = vand.u32 4294901760, %v320_v51  ;;  %v317_v55 = vld [vmem:[%s4049_s28 + $0x3c0] sm:$0xff]  ;;  %3044 = vmatpush1.bf16.xpose.msra.mxu1 %v4395_v28 }
  0x8a   : > { %6720 = vst [vmem:[#allocation163_spill] sm:$0xff] %v4521_v49  ;;  %6721 = vst [vmem:[#allocation164_spill] sm:$0xff] %v4523_v32  ;;  %v318_v49 = vld [vmem:[%s4049_s28 + $0x3c8] sm:$0xff]  ;;  %v4550_v32 = vsub.f32 %v310_v3, %v437_v8  ;;  %v443_v3 = vand.u32 4294901760, %v313_v1  ;;  %v1733_v19 = vand.u32 4294901760, %v324_v14  ;;  %3046 = vmatprep.subr.bf16.mxu1 %v4410_v45  ;;  %3428 = vmatpush1.bf16.xpose.msra.mxu0 %v4401_v21 }
  0x8b   : > { %6722 = vst [vmem:[#allocation165_spill] sm:$0xff] %v4525_v2  ;;  %6723 = vst [vmem:[#allocation166_spill] sm:$0xff] %v4527_v9  ;;  %v4539_v9 = vpack.c.bf16 %v1719_v42, %v1715_v54  ;;  %v315_v2 = vld [vmem:[%s4049_s28 + $0x3b0] sm:$0xff]  ;;  %v4558_v24 = vpack.c.bf16 %v1725_v12, %v1721_v43  ;;  %v4560_v30 = vsub.f32 %v312_v33, %v1721_v43  ;;  %v1723_v54 = vand.u32 4294901760, %v311_v57  ;;  %v321_v12 = vld [vmem:[%s4049_s28 + $0x3e0] sm:$0xff] }
  0x8c   : > { %6724 = vst [vmem:[#allocation167_spill] sm:$0xff] %v4533_v29  ;;  %6725 = vst [vmem:[#allocation168_spill] sm:$0xff] %v4535_v63  ;;  %v1727_v42 = vand.u32 4294901760, %v315_v2  ;;  %v445_v8 = vand.u32 4294901760, %v318_v49  ;;  %v4568_v43 = vsub.f32 %v309_v13, %v439_v20  ;;  %v4570_v33 = vsub.f32 %v313_v1, %v443_v3  ;;  %v194_v13 = vld [vmem:[%s6033_s0 + $0x8] sm:$0xff]  ;;  %v196_v1 = vld [vmem:[%s6033_s0 + $0x18] sm:$0xff]  ;;  %3430 = vmatprep.subr.bf16.mxu0 %v4419_v37 }
  0x8d   : > { %6726 = vst [vmem:[#allocation169_spill] sm:$0xff] %v4537_v34  ;;  %6727 = vst [vmem:[#allocation170_spill] sm:$0xff] %v4539_v9  ;;  %v6225_v37 = vand.u32 4294901760, %v4070_v18 }
  0x8e   : > { %6728 = vst [vmem:[#allocation171_spill] sm:$0xff] %v4544_v56  ;;  %6729 = vst [vmem:[#allocation172_spill] sm:$0xff] %v4546_v7  ;;  %v4572_v44 = vpack.c.bf16 %v1727_v42, %v1723_v54  ;;  %v4579_v7 = vsub.f32 %v315_v2, %v1727_v42  ;;  %v4583_v34 = vsub.f32 %v318_v49, %v445_v8  ;;  %v447_v49 = vand.u32 4294901760, %v317_v55 }
  0x8f   : > { %6730 = vst [vmem:[#allocation173_spill] sm:$0xff] %v4548_v0  ;;  %6731 = vst [vmem:[#allocation174_spill] sm:$0xff] %v4550_v32  ;;  %v449_v32 = vand.u32 4294901760, %v322_v53  ;;  %v4596_v2 = vsub.f32 %v320_v51, %v1729_v38  ;;  %v1731_v42 = vand.u32 4294901760, %v319_v36 }
  0x90   : > { %6732 = vst [vmem:[#allocation175_spill] sm:$0xff] %v4556_v22  ;;  %6733 = vst [vmem:[#allocation176_spill] sm:$0xff] %v4558_v24  ;;  %v4566_v22 = vpack.c.bf16 %v443_v3, %v439_v20  ;;  %v4598_v3 = vsub.f32 %v324_v14, %v1733_v19  ;;  %v4610_v51 = vsub.f32 %v317_v55, %v447_v49  ;;  %v6757_v55 = vand.u32 4294901760, %v4066_v16 }
  0x91   : > { %6734 = vst [vmem:[#allocation177_spill] sm:$0xff] %v4560_v30  ;;  %6735 = vst [vmem:[#allocation178_spill] sm:$0xff] %v4562_v47  ;;  %v323_v47 = vld [vmem:[%s4049_s28 + $0x3f0] sm:$0xff]  ;;  %v4577_v30 = vsub.f32 %v311_v57, %v1723_v54  ;;  %v4581_v56 = vpack.c.bf16 %v449_v32, %v445_v8  ;;  %v4592_v20 = vsub.f32 %v322_v53, %v449_v32  ;;  %v451_v54 = vand.u32 4294901760, %v321_v12 }
  0x92   : > { %6736 = vst [vmem:[#allocation179_spill] sm:$0xff] %v4566_v22  ;;  %6737 = vst [vmem:[#allocation180_spill] sm:$0xff] %v4568_v43  ;;  %v4594_v57 = vpack.c.bf16 %v1733_v19, %v1729_v38  ;;  %v1735_v8 = vand.u32 4294901760, %v323_v47  ;;  %v4605_v53 = vand.u32 4294901760, %v196_v1  ;;  %v193_v19 = vld [vmem:[%s6033_s0] sm:$0xff]  ;;  %3048 = vmatpush1.bf16.xpose.msra.mxu1 %v4429_v5  ;;  %3432 = vmatpush1.bf16.xpose.msra.mxu0 %v4435_v26  ;;  %v6263_v26 = vand.u32 4294901760, %v4123_v61 }
  0x93   : > { %6738 = vst [vmem:[#allocation181_spill] sm:$0xff] %v4570_v33  ;;  %6739 = vst [vmem:[#allocation182_spill] sm:$0xff] %v4572_v44  ;;  %v4608_v38 = vpack.c.bf16 %v451_v54, %v447_v49  ;;  %v4612_v32 = vsub.f32 %v321_v12, %v451_v54  ;;  %v473_v12 = vsub.f32 %v4066_v16, %v6757_v55  ;;  %v6758_v49 = vand.u32 4294901760, %v4068_v17 }
  0x94   : > { %6740 = vst [vmem:[#allocation183_spill] sm:$0xff] %v4577_v30  ;;  %6741 = vst [vmem:[#allocation184_spill] sm:$0xff] %v4579_v7  ;;  %v4614_v14 = vpack.c.bf16 %v1735_v8, %v1731_v42  ;;  %v4620_v7 = vsub.f32 %v319_v36, %v1731_v42  ;;  %v4622_v28 = vsub.f32 %v323_v47, %v1735_v8  ;;  %v6226_v36 = vand.u32 4294901760, %v4077_v23 }
  0x95   : > { %6742 = vst [vmem:[#allocation185_spill] sm:$0xff] %v4581_v56  ;;  %6743 = vst [vmem:[#allocation186_spill] sm:$0xff] %v4583_v34  ;;  %v4601_v34 = vand.u32 4294901760, %v194_v13  ;;  %v485_v54 = vsub.f32 %v4068_v17, %v6758_v49  ;;  %v4634_v45 = vsub.f32 %v196_v1, %v4605_v53  ;;  %v474_v42 = vand.u32 4294901760, %v473_v12  ;;  %3050 = vmatprep.subr.bf16.mxu1 %v4445_v31 }
  0x96   : > { %6744 = vst [vmem:[#allocation187_spill] sm:$0xff] %v4592_v20  ;;  %6745 = vst [vmem:[#allocation188_spill] sm:$0xff] %v4594_v57  ;;  %v6236_v8 = vand.u32 4294901760, %v4081_v25  ;;  %v1757_v49 = vsub.f32 %v4070_v18, %v6225_v37  ;;  %v1769_v1 = vsub.f32 %v4077_v23, %v6226_v36  ;;  %v6244_v55 = vand.u32 4294901760, %v4085_v27  ;;  %v195_v37 = vld [vmem:[%s6033_s0 + $0x10] sm:$0xff]  ;;  %3434 = vmatprep.subr.bf16.mxu0 %v4455_v58 }
  0x97   : > { %6746 = vst [vmem:[#allocation189_spill] sm:$0xff] %v4596_v2  ;;  %6747 = vst [vmem:[#allocation190_spill] sm:$0xff] %v4598_v3  ;;  %v4625_v21 = vsub.f32 %v194_v13, %v4601_v34  ;;  %v4639_v13 = vand.u32 4294901760, %v193_v19  ;;  %v6762_v5 = vand.u32 4294901760, %v4634_v45  ;;  %v6258_v58 = vand.u32 4294901760, %v4115_v52 }
  0x98   : > { %6748 = vst [vmem:[#allocation191_spill] sm:$0xff] %v4601_v34  ;;  %6749 = vst [vmem:[#allocation192_spill] sm:$0xff] %v4605_v53 }
  0x99   : > { %6750 = vst [vmem:[#allocation193_spill] sm:$0xff] %v4608_v38  ;;  %6751 = vst [vmem:[#allocation194_spill] sm:$0xff] %v4610_v51  ;;  %v6229_v47 = vand.u32 4294901760, %v4625_v21  ;;  %v4654_v17 = vsub.f32 %v193_v19, %v4639_v13  ;;  %v1758_v19 = vand.u32 4294901760, %v1757_v49 }
  0x9a   : > { %6752 = vst [vmem:[#allocation195_spill] sm:$0xff] %v4612_v32  ;;  %6753 = vst [vmem:[#allocation196_spill] sm:$0xff] %v4614_v14  ;;  %3052 = vmatpush1.bf16.xpose.msra.mxu1 %v4463_v35  ;;  %3436 = vmatpush1.bf16.xpose.msra.mxu0 %v4469_v60  ;;  %v6274_v60 = vand.u32 4294901760, %v4136_v6 }
  0x9b   : > { %6754 = vst [vmem:[#allocation197_spill] sm:$0xff] %v4620_v7  ;;  %6755 = vst [vmem:[#allocation198_spill] sm:$0xff] %v4622_v28  ;;  %v486_v28 = vand.u32 4294901760, %v485_v54  ;;  %v456_v12 = vsub.f32 %v4625_v21, %v6229_v47  ;;  %v479_v54 = vsub.f32 %v4081_v25, %v6236_v8  ;;  %v1740_v47 = vsub.f32 %v4634_v45, %v6762_v5 }
  0x9c   : > { %6756 = vst [vmem:[#allocation199_spill] sm:$0xff] %v4625_v21  ;;  %6759 = vst [vmem:[#allocation200_spill] sm:$0xff] %v4634_v45  ;;  %v1770_v21 = vand.u32 4294901760, %v1769_v1  ;;  %v6243_v23 = vand.u32 4294901760, %v4654_v17  ;;  %v491_v25 = vsub.f32 %v4085_v27, %v6244_v55  ;;  %v6246_v1 = vand.u32 4294901760, %v4096_v40  ;;  %3054 = vmatprep.subr.bf16.mxu1 %v4479_v15  ;;  %3438 = vmatprep.subr.bf16.mxu0 %v4489_v11 }
  0x9d   : > { %6760 = vst [vmem:[#allocation201_spill] sm:$0xff] %v4639_v13  ;;  %6761 = vst [vmem:[#allocation202_spill] sm:$0xff] %v4654_v17  ;;  %v4664_v36 = vpack.c.bf16 %v486_v28, %v474_v42  ;;  %v457_v13 = vand.u32 4294901760, %v456_v12  ;;  %v480_v8 = vand.u32 4294901760, %v479_v54  ;;  %v1741_v18 = vand.u32 4294901760, %v1740_v47 }
  0x9e   : > { %v4674_v31 = vpack.c.bf16 %v1770_v21, %v1758_v19  ;;  %v4676_v28 = vand.u32 4294901760, %v195_v37  ;;  %v6245_v42 = vand.u32 4294901760, %v4094_v39  ;;  %v4683_v5 = vsub.f32 %v4654_v17, %v6243_v23 }
  0x9f   : > { %458 = vmatprep.mubr.f32.mxu1 %v457_v13  ;;  %v492_v49 = vand.u32 4294901760, %v491_v25  ;;  %v6250_v12 = vand.u32 4294901760, %v4098_v41  ;;  %1742 = vmatprep.mubr.f32.mxu0 %v1741_v18  ;;  %v6249_v13 = vand.u32 4294901760, %v4105_v46  ;;  %v6253_v54 = vand.u32 4294901760, %v4109_v48 }
  0xa0   : > { %6763 = vst [vmem:[#allocation203_spill] sm:$0xff] %v4676_v28  ;;  %v4688_v21 = vsub.f32 %v195_v37, %v4676_v28  ;;  %v1763_v47 = vsub.f32 %v4094_v39, %v6245_v42  ;;  %v1775_v25 = vsub.f32 %v4096_v40, %v6246_v1  ;;  %v6257_v1 = vand.u32 4294901760, %v4113_v50 }
  0xa1   : > { %v4696_v23 = vpack.c.bf16 %v492_v49, %v480_v8  ;;  %v497_v18 = vsub.f32 %v4098_v41, %v6250_v12  ;;  %v509_v42 = vsub.f32 %v4105_v46, %v6249_v13  ;;  %v1781_v8 = vsub.f32 %v4109_v48, %v6253_v54  ;;  %v6833_v46 = vld [vmem:[#allocation126_spill] sm:$0xff] }
  0xa2   : > { %6764 = vst [vmem:[#allocation204_spill] sm:$0xff] %v4688_v21  ;;  %v6256_v37 = vand.u32 4294901760, %v4688_v21  ;;  %v1764_v55 = vand.u32 4294901760, %v1763_v47  ;;  %v1776_v49 = vand.u32 4294901760, %v1775_v25  ;;  %v1793_v25 = vsub.f32 %v4113_v50, %v6257_v1 }
  0xa3   : > { %v498_v19 = vand.u32 4294901760, %v497_v18  ;;  %v510_v13 = vand.u32 4294901760, %v509_v42  ;;  %v1782_v12 = vand.u32 4294901760, %v1781_v8  ;;  %v503_v18 = vsub.f32 %v4115_v52, %v6258_v58  ;;  %v6775_v52 = vld [vmem:[#allocation164_spill] sm:$0xff] }
  0xa4   : > { %v4718_v47 = vsub.f32 %v4688_v21, %v6256_v37  ;;  %v4721_v54 = vpack.c.bf16 %v1776_v49, %v1764_v55  ;;  %v6268_v15 = vand.u32 4294901760, %v4125_v62  ;;  %v515_v55 = vsub.f32 %v4123_v61, %v6263_v26  ;;  %v6765_v26 = vld [vmem:[#allocation33_spill] sm:$0xff] }
  0xa5   : > { %v4732_v42 = vpack.c.bf16 %v510_v13, %v498_v19  ;;  %v6271_v8 = vand.u32 4294901760, %v4132_v4  ;;  %v1794_v49 = vand.u32 4294901760, %v1793_v25  ;;  %v504_v1 = vand.u32 4294901760, %v503_v18  ;;  %v6766_v18 = vld [vmem:[#allocation34_spill] sm:$0xff] }
  0xa6   : > { %v1787_v58 = vsub.f32 %v4125_v62, %v6268_v15  ;;  %v516_v35 = vand.u32 4294901760, %v515_v55  ;;  %v6277_v19 = vand.u32 4294901760, %v4141_v10  ;;  %v6284_v37 = vand.u32 4294901760, %v6765_v26 }
  0xa7   : > { %v1799_v13 = vsub.f32 %v4132_v4, %v6271_v8  ;;  %v4748_v21 = vpack.c.bf16 %v1794_v49, %v1782_v12  ;;  %v521_v25 = vsub.f32 %v4136_v6, %v6274_v60  ;;  %v6285_v15 = vand.u32 4294901760, %v6766_v18  ;;  %v6767_v12 = vld [vmem:[#allocation155_spill] sm:$0xff]  ;;  %v6768_v60 = vld [vmem:[#allocation36_spill] sm:$0xff] }
  0xa8   : > { %v1788_v11 = vand.u32 4294901760, %v1787_v58  ;;  %v4754_v17 = vpack.c.bf16 %v516_v35, %v504_v1  ;;  %v533_v8 = vsub.f32 %v4141_v10, %v6277_v19  ;;  %v1805_v4 = vsub.f32 %v6765_v26, %v6284_v37  ;;  %3056 = vmatpush1.bf16.xpose.msra.mxu1 %v6767_v12  ;;  %v6769_v35 = vld [vmem:[#allocation37_spill] sm:$0xff]  ;;  %v6770_v6 = vld [vmem:[#allocation39_spill] sm:$0xff]  ;;  %v6771_v12 = vld [vmem:[#allocation40_spill] sm:$0xff] }
  0xa9   : > { %v1800_v55 = vand.u32 4294901760, %v1799_v13  ;;  %v522_v58 = vand.u32 4294901760, %v521_v25  ;;  %v1817_v49 = vsub.f32 %v6766_v18, %v6285_v15  ;;  %v6292_v62 = vand.u32 4294901760, %v6768_v60  ;;  %3058 = vmatprep.subr.bf16.mxu1 %v4514_v59  ;;  %v6772_v26 = vld [vmem:[#allocation158_spill] sm:$0xff] }
  0xaa   : > { %v6294_v1 = vand.u32 4294901760, %v6769_v35  ;;  %v534_v19 = vand.u32 4294901760, %v533_v8  ;;  %v1806_v10 = vand.u32 4294901760, %v1805_v4  ;;  %v6295_v61 = vand.u32 4294901760, %v6770_v6  ;;  %3440 = vmatpush1.bf16.xpose.msra.mxu0 %v6772_v26 }
  0xab   : > { %v4769_v13 = vpack.c.bf16 %v1800_v55, %v1788_v11  ;;  %v1818_v37 = vand.u32 4294901760, %v1817_v49  ;;  %v527_v25 = vsub.f32 %v6768_v60, %v6292_v62  ;;  %v6302_v18 = vand.u32 4294901760, %v6771_v12  ;;  %v6773_v11 = vld [vmem:[#allocation42_spill] sm:$0xff]  ;;  %v6774_v55 = vld [vmem:[#allocation43_spill] sm:$0xff]  ;;  %3442 = vmatprep.subr.bf16.mxu0 %v6775_v52 }
  0xac   : > { %v539_v15 = vsub.f32 %v6769_v35, %v6294_v1  ;;  %v4780_v59 = vpack.c.bf16 %v534_v19, %v522_v58  ;;  %v1811_v4 = vsub.f32 %v6770_v6, %v6295_v61  ;;  %v6303_v8 = vand.u32 4294901760, %v6773_v11  ;;  %v6776_v6 = vld [vmem:[#allocation45_spill] sm:$0xff] }
  0xad   : > { %v6305_v49 = vand.u32 4294901760, %v6774_v55  ;;  %v4788_v62 = vpack.c.bf16 %v1818_v37, %v1806_v10  ;;  %v528_v60 = vand.u32 4294901760, %v527_v25  ;;  %v1823_v26 = vsub.f32 %v6771_v12, %v6302_v18  ;;  %v6777_v37 = vld [vmem:[#allocation46_spill] sm:$0xff]  ;;  %v6778_v25 = vld [vmem:[#allocation48_spill] sm:$0xff] }
  0xae   : > { %v540_v1 = vand.u32 4294901760, %v539_v15  ;;  %v1812_v19 = vand.u32 4294901760, %v1811_v4  ;;  %v545_v58 = vsub.f32 %v6773_v11, %v6303_v8  ;;  %v6306_v35 = vand.u32 4294901760, %v6776_v6  ;;  %v6779_v8 = vld [vmem:[#allocation49_spill] sm:$0xff]  ;;  %v6788_v11 = vld [vmem:[#allocation63_spill] sm:$0xff] }
  0xaf   : > { %v557_v61 = vsub.f32 %v6774_v55, %v6305_v49  ;;  %v1824_v10 = vand.u32 4294901760, %v1823_v26  ;;  %v6311_v15 = vand.u32 4294901760, %v6777_v37  ;;  %v6312_v45 = vand.u32 4294901760, %v6778_v25 }
  0xb0   : > { %v4800_v52 = vpack.c.bf16 %v540_v1, %v528_v60  ;;  %v546_v28 = vand.u32 4294901760, %v545_v58  ;;  %v1829_v4 = vsub.f32 %v6776_v6, %v6306_v35  ;;  %v6316_v12 = vand.u32 4294901760, %v6779_v8  ;;  %3060 = vmatpush1.bf16.xpose.msra.mxu1 %v4533_v29  ;;  %v6780_v1 = vld [vmem:[#allocation51_spill] sm:$0xff] }
  0xb1   : > { %v558_v18 = vand.u32 4294901760, %v557_v61  ;;  %v4809_v49 = vpack.c.bf16 %v1824_v10, %v1812_v19  ;;  %v1841_v26 = vsub.f32 %v6777_v37, %v6311_v15  ;;  %v551_v60 = vsub.f32 %v6778_v25, %v6312_v45  ;;  %3062 = vmatprep.subr.bf16.mxu1 %v4548_v0  ;;  %v6781_v10 = vld [vmem:[#allocation52_spill] sm:$0xff]  ;;  %v6782_v45 = vld [vmem:[#allocation54_spill] sm:$0xff] }
  0xb2   : > { %v6318_v61 = vand.u32 4294901760, %v6780_v1  ;;  %v1830_v35 = vand.u32 4294901760, %v1829_v4  ;;  %v563_v19 = vsub.f32 %v6779_v8, %v6316_v12  ;;  %v6323_v29 = vand.u32 4294901760, %v6781_v10  ;;  %3444 = vmatpush1.bf16.xpose.msra.mxu0 %v4539_v9  ;;  %v6784_v12 = vld [vmem:[#allocation57_spill] sm:$0xff] }
  0xb3   : > { %v4819_v58 = vpack.c.bf16 %v558_v18, %v546_v28  ;;  %v1842_v6 = vand.u32 4294901760, %v1841_v26  ;;  %v552_v55 = vand.u32 4294901760, %v551_v60  ;;  %v6326_v25 = vand.u32 4294901760, %v6782_v45  ;;  %v6783_v18 = vld [vmem:[#allocation55_spill] sm:$0xff]  ;;  %3446 = vmatprep.subr.bf16.mxu0 %v4558_v24 }
  0xb4   : > { %v1835_v15 = vsub.f32 %v6780_v1, %v6318_v61  ;;  %v564_v0 = vand.u32 4294901760, %v563_v19  ;;  %v1847_v28 = vsub.f32 %v6781_v10, %v6323_v29  ;;  %v6332_v4 = vand.u32 4294901760, %v6783_v18  ;;  %v6785_v1 = vld [vmem:[#allocation58_spill] sm:$0xff]  ;;  %v6787_v10 = vld [vmem:[#allocation61_spill] sm:$0xff] }
  0xb5   : > { %v6334_v8 = vand.u32 4294901760, %v6784_v12  ;;  %v4836_v26 = vpack.c.bf16 %v1842_v6, %v1830_v35  ;;  %v569_v61 = vsub.f32 %v6782_v45, %v6326_v25  ;;  %v6333_v9 = vand.u32 4294901760, %v6785_v1 }
  0xb6   : > { %v1836_v60 = vand.u32 4294901760, %v1835_v15  ;;  %v4842_v19 = vpack.c.bf16 %v564_v0, %v552_v55  ;;  %v1848_v37 = vand.u32 4294901760, %v1847_v28  ;;  %v581_v29 = vsub.f32 %v6783_v18, %v6332_v4  ;;  %v6786_v15 = vld [vmem:[#allocation60_spill] sm:$0xff] }
  0xb7   : > { %v1853_v24 = vsub.f32 %v6784_v12, %v6334_v8  ;;  %v570_v6 = vand.u32 4294901760, %v569_v61  ;;  %v1865_v35 = vsub.f32 %v6785_v1, %v6333_v9  ;;  %v6339_v25 = vand.u32 4294901760, %v6786_v15  ;;  %v6789_v8 = vld [vmem:[#allocation64_spill] sm:$0xff] }
  0xb8   : > { %v6341_v45 = vand.u32 4294901760, %v6787_v10  ;;  %v4855_v0 = vpack.c.bf16 %v1848_v37, %v1836_v60  ;;  %v582_v55 = vand.u32 4294901760, %v581_v29  ;;  %v6342_v50 = vand.u32 4294901760, %v6788_v11  ;;  %3064 = vmatpush1.bf16.xpose.msra.mxu1 %v4566_v22 }
  0xb9   : > { %v1854_v28 = vand.u32 4294901760, %v1853_v24  ;;  %v1866_v4 = vand.u32 4294901760, %v1865_v35  ;;  %v575_v61 = vsub.f32 %v6786_v15, %v6339_v25  ;;  %v6345_v1 = vand.u32 4294901760, %v6789_v8  ;;  %3066 = vmatprep.subr.bf16.mxu1 %v4581_v56  ;;  %v6790_v24 = vld [vmem:[#allocation66_spill] sm:$0xff]  ;;  %v6791_v35 = vld [vmem:[#allocation67_spill] sm:$0xff]  ;;  %v6792_v56 = vld [vmem:[#allocation69_spill] sm:$0xff] }
  0xba   : > { %v587_v9 = vsub.f32 %v6787_v10, %v6341_v45  ;;  %v4867_v37 = vpack.c.bf16 %v582_v55, %v570_v6  ;;  %v1859_v29 = vsub.f32 %v6788_v11, %v6342_v50  ;;  %v6350_v60 = vand.u32 4294901760, %v6790_v24  ;;  %3448 = vmatpush1.bf16.xpose.msra.mxu0 %v4572_v44 }
  0xbb   : > { %v6353_v22 = vand.u32 4294901760, %v6791_v35  ;;  %v4874_v12 = vpack.c.bf16 %v1866_v4, %v1854_v28  ;;  %v576_v25 = vand.u32 4294901760, %v575_v61  ;;  %v1871_v45 = vsub.f32 %v6789_v8, %v6345_v1  ;;  %3450 = vmatprep.subr.bf16.mxu0 %v4594_v57  ;;  %v6793_v61 = vld [vmem:[#allocation70_spill] sm:$0xff]  ;;  %v6794_v8 = vld [vmem:[#allocation72_spill] sm:$0xff] }
  0xbc   : > { %v588_v15 = vand.u32 4294901760, %v587_v9  ;;  %v1860_v6 = vand.u32 4294901760, %v1859_v29  ;;  %v593_v55 = vsub.f32 %v6790_v24, %v6350_v60  ;;  %v6356_v4 = vand.u32 4294901760, %v6792_v56  ;;  %v6795_v24 = vld [vmem:[#allocation73_spill] sm:$0xff] }
  0xbd   : > { %v605_v50 = vsub.f32 %v6791_v35, %v6353_v22  ;;  %v1872_v28 = vand.u32 4294901760, %v1871_v45  ;;  %v6359_v1 = vand.u32 4294901760, %v6793_v61  ;;  %v6360_v44 = vand.u32 4294901760, %v6794_v8 }
  0xbe   : > { %v4888_v9 = vpack.c.bf16 %v588_v15, %v576_v25  ;;  %v594_v29 = vand.u32 4294901760, %v593_v55  ;;  %v1877_v60 = vsub.f32 %v6792_v56, %v6356_v4  ;;  %v6362_v10 = vand.u32 4294901760, %v6795_v24  ;;  %v6796_v15 = vld [vmem:[#allocation75_spill] sm:$0xff]  ;;  %v6797_v56 = vld [vmem:[#allocation76_spill] sm:$0xff] }
  0xbf   : > { %v606_v11 = vand.u32 4294901760, %v605_v50  ;;  %v4896_v22 = vpack.c.bf16 %v1872_v28, %v1860_v6  ;;  %v1889_v25 = vsub.f32 %v6793_v61, %v6359_v1  ;;  %v599_v45 = vsub.f32 %v6794_v8, %v6360_v44  ;;  %v6798_v44 = vld [vmem:[#allocation78_spill] sm:$0xff] }
  0xc0   : > { %v6367_v57 = vand.u32 4294901760, %v6796_v15  ;;  %v1878_v50 = vand.u32 4294901760, %v1877_v60  ;;  %v611_v4 = vsub.f32 %v6795_v24, %v6362_v10  ;;  %v6369_v6 = vand.u32 4294901760, %v6797_v56  ;;  %3068 = vmatpush1.bf16.xpose.msra.mxu1 %v4608_v38  ;;  %v6800_v24 = vld [vmem:[#allocation81_spill] sm:$0xff] }
  0xc1   : > { %v4905_v55 = vpack.c.bf16 %v606_v11, %v594_v29  ;;  %v1890_v28 = vand.u32 4294901760, %v1889_v25  ;;  %v600_v35 = vand.u32 4294901760, %v599_v45  ;;  %v6370_v8 = vand.u32 4294901760, %v6798_v44  ;;  %3070 = vmatprep.subr.bf16.mxu1 %v4664_v36  ;;  %v6799_v29 = vld [vmem:[#allocation79_spill] sm:$0xff] }
  0xc2   : > { %v1883_v1 = vsub.f32 %v6796_v15, %v6367_v57  ;;  %v612_v11 = vand.u32 4294901760, %v611_v4  ;;  %v1895_v60 = vsub.f32 %v6797_v56, %v6369_v6  ;;  %v6375_v10 = vand.u32 4294901760, %v6799_v29  ;;  %v6801_v57 = vld [vmem:[#allocation82_spill] sm:$0xff]  ;;  %3452 = vmatpush1.bf16.xpose.msra.mxu0 %v4614_v14 }
  0xc3   : > { %v6379_v61 = vand.u32 4294901760, %v6800_v24  ;;  %v4922_v38 = vpack.c.bf16 %v1890_v28, %v1878_v50  ;;  %v617_v45 = vsub.f32 %v6798_v44, %v6370_v8  ;;  %v6378_v15 = vand.u32 4294901760, %v6801_v57  ;;  %3454 = vmatprep.subr.bf16.mxu0 %v4674_v31  ;;  %v6802_v8 = vld [vmem:[#allocation84_spill] sm:$0xff] }
  0xc4   : > { %v1884_v25 = vand.u32 4294901760, %v1883_v1  ;;  %v4929_v36 = vpack.c.bf16 %v612_v11, %v600_v35  ;;  %v1896_v4 = vand.u32 4294901760, %v1895_v60  ;;  %v629_v6 = vsub.f32 %v6799_v29, %v6375_v10  ;;  %v6803_v35 = vld [vmem:[#allocation85_spill] sm:$0xff]  ;;  %v6804_v10 = vld [vmem:[#allocation87_spill] sm:$0xff] }
  0xc5   : > { %v1901_v50 = vsub.f32 %v6800_v24, %v6379_v61  ;;  %v618_v1 = vand.u32 4294901760, %v617_v45  ;;  %v1913_v28 = vsub.f32 %v6801_v57, %v6378_v15  ;;  %v6382_v14 = vand.u32 4294901760, %v6802_v8  ;;  %v6805_v15 = vld [vmem:[#allocation88_spill] sm:$0xff] }
  0xc6   : > { %v6383_v11 = vand.u32 4294901760, %v6803_v35  ;;  %v4943_v60 = vpack.c.bf16 %v1896_v4, %v1884_v25  ;;  %v630_v56 = vand.u32 4294901760, %v629_v6  ;;  %v6386_v29 = vand.u32 4294901760, %v6804_v10  ;;  %v6807_v4 = vld [vmem:[#allocation90_spill] sm:$0xff] }
  0xc7   : > { %v1902_v44 = vand.u32 4294901760, %v1901_v50  ;;  %v1914_v18 = vand.u32 4294901760, %v1913_v28  ;;  %v623_v31 = vsub.f32 %v6802_v8, %v6382_v14  ;;  %v6385_v61 = vand.u32 4294901760, %v6805_v15  ;;  %v6808_v28 = vld [vmem:[#allocation91_spill] sm:$0xff]  ;;  %v6829_v8 = vld [vmem:[#allocation120_spill] sm:$0xff] }
  0xc8   : > { %v635_v45 = vsub.f32 %v6803_v35, %v6383_v11  ;;  %v6806_v57 = vand.u32 4294901760, %v4683_v5  ;;  %v4955_v25 = vpack.c.bf16 %v630_v56, %v618_v1  ;;  %v1907_v6 = vsub.f32 %v6804_v10, %v6386_v29 }
  0xc9   : > { %v6389_v50 = vand.u32 4294901760, %v6807_v4  ;;  %v6390_v24 = vand.u32 4294901760, %v6808_v28  ;;  %v4963_v14 = vpack.c.bf16 %v1914_v18, %v1902_v44  ;;  %v624_v11 = vand.u32 4294901760, %v623_v31  ;;  %v6809_v44 = vld [vmem:[#allocation93_spill] sm:$0xff] }
  0xca   : > { %464 = vmatmul.mubr.f32.vlgmr.msra.gmra.mrb[0].mxu1 %v6806_v57  ;;  %v636_v35 = vand.u32 4294901760, %v635_v45  ;;  %v1919_v57 = vsub.f32 %v6805_v15, %v6385_v61  ;;  %v1908_v56 = vand.u32 4294901760, %v1907_v6  ;;  %v6393_v18 = vand.u32 4294901760, %v6809_v44  ;;  %v6811_v61 = vld [vmem:[#allocation94_spill] sm:$0xff]  ;;  %v6813_v15 = vld [vmem:[#allocation97_spill] sm:$0xff] }
  0xcb   : > { %3072 = vmatpush1.bf16.xpose.msra.mxu1 %v4696_v23  ;;  %855 = vmatprep.mubr.f32.mxu1 %v4601_v34  ;;  %v641_v5 = vsub.f32 %v6807_v4, %v6389_v50  ;;  %v653_v23 = vsub.f32 %v6808_v28, %v6390_v24  ;;  %v6810_v1 = vand.u32 4294901760, %v4718_v47  ;;  %v6394_v29 = vand.u32 4294901760, %v6811_v61 }
  0xcc   : > { %3074 = vmatprep.subr.bf16.mxu1 %v4732_v42  ;;  %v4979_v31 = vpack.c.bf16 %v636_v35, %v624_v11  ;;  %v1920_v45 = vand.u32 4294901760, %v1919_v57  ;;  %v6812_v42 = vld [vmem:[#allocation96_spill] sm:$0xff]  ;;  %v1925_v24 = vsub.f32 %v6809_v44, %v6393_v18  ;;  %v6401_v10 = vand.u32 4294901760, %v6813_v15  ;;  %v6814_v11 = vld [vmem:[#allocation99_spill] sm:$0xff] }
  0xcd   : > { %1748 = vmatmul.mubr.f32.vlgmr.msra.gmra.mrb[0].mxu0 %v6810_v1  ;;  %v6398_v6 = vand.u32 4294901760, %v6812_v42  ;;  %v642_v34 = vand.u32 4294901760, %v641_v5  ;;  %v654_v50 = vand.u32 4294901760, %v653_v23  ;;  %v1937_v35 = vsub.f32 %v6811_v61, %v6394_v29 }
  0xce   : > { %3456 = vmatpush1.bf16.xpose.msra.mxu0 %v4721_v54  ;;  %2139 = vmatprep.mubr.f32.mxu0 %v4605_v53  ;;  %v4990_v47 = vpack.c.bf16 %v1920_v45, %v1908_v56  ;;  %v6402_v57 = vand.u32 4294901760, %v6814_v11  ;;  %v1926_v23 = vand.u32 4294901760, %v1925_v24  ;;  %v659_v1 = vsub.f32 %v6813_v15, %v6401_v10  ;;  %v6816_v53 = vld [vmem:[#allocation102_spill] sm:$0xff]  ;;  %v6817_v24 = vld [vmem:[#allocation103_spill] sm:$0xff] }
  0xcf   : > { %3458 = vmatprep.subr.bf16.mxu0 %v4748_v21  ;;  %v647_v54 = vsub.f32 %v6812_v42, %v6398_v6  ;;  %v4999_v5 = vpack.c.bf16 %v654_v50, %v642_v34  ;;  %v6815_v21 = vld [vmem:[#allocation100_spill] sm:$0xff]  ;;  %v1938_v45 = vand.u32 4294901760, %v1937_v35  ;;  %v6405_v61 = vand.u32 4294901760, %v6816_v53  ;;  %v6818_v42 = vld [vmem:[#allocation105_spill] sm:$0xff] }
  0xd0   : > { %v6404_v56 = vand.u32 4294901760, %v6815_v21  ;;  %v1931_v29 = vsub.f32 %v6814_v11, %v6402_v57  ;;  %v660_v6 = vand.u32 4294901760, %v659_v1  ;;  %v6408_v50 = vand.u32 4294901760, %v6817_v24  ;;  %v6819_v57 = vld [vmem:[#allocation106_spill] sm:$0xff] }
  0xd1   : > { %v648_v18 = vand.u32 4294901760, %v647_v54  ;;  %v5015_v10 = vpack.c.bf16 %v1938_v45, %v1926_v23  ;;  %v665_v54 = vsub.f32 %v6816_v53, %v6405_v61  ;;  %v6410_v11 = vand.u32 4294901760, %v6819_v57  ;;  %v6821_v61 = vld [vmem:[#allocation108_spill] sm:$0xff]  ;;  %v6822_v53 = vld [vmem:[#allocation109_spill] sm:$0xff] }
  0xd2   : > { %v1943_v34 = vsub.f32 %v6815_v21, %v6404_v56  ;;  %v1932_v35 = vand.u32 4294901760, %v1931_v29  ;;  %v677_v44 = vsub.f32 %v6817_v24, %v6408_v50  ;;  %v6414_v21 = vand.u32 4294901760, %v6821_v61  ;;  %v6823_v50 = vld [vmem:[#allocation111_spill] sm:$0xff] }
  0xd3   : > { %3076 = vmatpush1.bf16.xpose.msra.mxu1 %v4754_v17  ;;  %v5022_v1 = vpack.c.bf16 %v660_v6, %v648_v18  ;;  %v6820_v17 = vand.u32 4294901760, %v6818_v42  ;;  %v666_v29 = vand.u32 4294901760, %v665_v54  ;;  %v1961_v45 = vsub.f32 %v6819_v57, %v6410_v11  ;;  %v6824_v57 = vld [vmem:[#allocation112_spill] sm:$0xff] }
  0xd4   : > { %3078 = vmatprep.subr.bf16.mxu1 %v4780_v59  ;;  %v1944_v56 = vand.u32 4294901760, %v1943_v34  ;;  %v6415_v59 = vand.u32 4294901760, %v6822_v53  ;;  %v678_v6 = vand.u32 4294901760, %v677_v44  ;;  %v6417_v24 = vand.u32 4294901760, %v6823_v50 }
  0xd5   : > { %v1949_v23 = vsub.f32 %v6818_v42, %v6820_v17  ;;  %v1962_v17 = vand.u32 4294901760, %v1961_v45  ;;  %v671_v54 = vsub.f32 %v6821_v61, %v6414_v21  ;;  %v6420_v42 = vand.u32 4294901760, %v6824_v57 }
  0xd6   : > { %3460 = vmatpush1.bf16.xpose.msra.mxu0 %v4769_v13  ;;  %v5036_v18 = vpack.c.bf16 %v1944_v56, %v1932_v35  ;;  %v683_v11 = vsub.f32 %v6822_v53, %v6415_v59  ;;  %v5047_v13 = vpack.c.bf16 %v678_v6, %v666_v29  ;;  %v1955_v44 = vsub.f32 %v6823_v50, %v6417_v24  ;;  %v6825_v56 = vld [vmem:[#allocation114_spill] sm:$0xff]  ;;  %v6827_v24 = vld [vmem:[#allocation117_spill] sm:$0xff] }
  0xd7   : > { %v1950_v34 = vand.u32 4294901760, %v1949_v23  ;;  %3462 = vmatprep.subr.bf16.mxu0 %v4788_v62  ;;  %v6423_v35 = vand.u32 4294901760, %v6825_v56  ;;  %v6826_v62 = vld [vmem:[#allocation115_spill] sm:$0xff]  ;;  %v672_v15 = vand.u32 4294901760, %v671_v54  ;;  %v1967_v59 = vsub.f32 %v6824_v57, %v6420_v42 }
  0xd8   : > { %v6424_v23 = vand.u32 4294901760, %v6826_v62  ;;  %v684_v21 = vand.u32 4294901760, %v683_v11  ;;  %v1956_v28 = vand.u32 4294901760, %v1955_v44  ;;  %v6430_v4 = vand.u32 4294901760, %v6827_v24 }
  0xd9   : > { %v5054_v45 = vpack.c.bf16 %v1962_v17, %v1950_v34  ;;  %v689_v29 = vsub.f32 %v6825_v56, %v6423_v35  ;;  %v1968_v11 = vand.u32 4294901760, %v1967_v59  ;;  %v6828_v17 = vld [vmem:[#allocation118_spill] sm:$0xff]  ;;  %v6431_v42 = vand.u32 4294901760, %v6829_v8 }
  0xda   : > { %v701_v6 = vsub.f32 %v6826_v62, %v6424_v23  ;;  %v5067_v34 = vpack.c.bf16 %v684_v21, %v672_v15  ;;  %v6429_v54 = vand.u32 4294901760, %v6828_v17  ;;  %v1973_v35 = vsub.f32 %v6827_v24, %v6430_v4  ;;  %v6830_v23 = vld [vmem:[#allocation121_spill] sm:$0xff]  ;;  %v6831_v21 = vld [vmem:[#allocation123_spill] sm:$0xff] }
  0xdb   : > { %3080 = vmatpush1.bf16.xpose.msra.mxu1 %v4800_v52  ;;  %v690_v44 = vand.u32 4294901760, %v689_v29  ;;  %v6436_v40 = vand.u32 4294901760, %v6830_v23  ;;  %v5076_v39 = vpack.c.bf16 %v1968_v11, %v1956_v28  ;;  %v695_v15 = vsub.f32 %v6829_v8, %v6431_v42 }
  0xdc   : > { %3082 = vmatprep.subr.bf16.mxu1 %v4819_v58  ;;  %v702_v48 = vand.u32 4294901760, %v701_v6  ;;  %v1985_v52 = vsub.f32 %v6828_v17, %v6429_v54  ;;  %v6441_v58 = vand.u32 4294901760, %v6831_v21  ;;  %v1974_v29 = vand.u32 4294901760, %v1973_v35  ;;  %v6832_v6 = vld [vmem:[#allocation124_spill] sm:$0xff]  ;;  %v6834_v35 = vld [vmem:[#allocation127_spill] sm:$0xff] }
  0xdd   : > { %v707_v28 = vsub.f32 %v6830_v23, %v6436_v40  ;;  %v6443_v11 = vand.u32 4294901760, %v6832_v6  ;;  %v696_v4 = vand.u32 4294901760, %v695_v15  ;;  %v6445_v41 = vand.u32 4294901760, %v6833_v46  ;;  %v6835_v40 = vld [vmem:[#allocation129_spill] sm:$0xff]  ;;  %v6836_v15 = vld [vmem:[#allocation130_spill] sm:$0xff] }
  0xde   : > { %3464 = vmatpush1.bf16.xpose.msra.mxu0 %v4809_v49  ;;  %v5086_v59 = vpack.c.bf16 %v702_v48, %v690_v44  ;;  %v1986_v54 = vand.u32 4294901760, %v1985_v52  ;;  %v1979_v42 = vsub.f32 %v6831_v21, %v6441_v58  ;;  %v6446_v44 = vand.u32 4294901760, %v6834_v35 }
  0xdf   : > { %3466 = vmatprep.subr.bf16.mxu0 %v4836_v26  ;;  %v708_v49 = vand.u32 4294901760, %v707_v28  ;;  %v1991_v48 = vsub.f32 %v6832_v6, %v6443_v11  ;;  %v6450_v27 = vand.u32 4294901760, %v6835_v40  ;;  %v713_v52 = vsub.f32 %v6833_v46, %v6445_v41  ;;  %v6839_v46 = vld [vmem:[#allocation135_spill] sm:$0xff] }
  0xe0   : > { %v5102_v16 = vpack.c.bf16 %v1986_v54, %v1974_v29  ;;  %v1980_v26 = vand.u32 4294901760, %v1979_v42  ;;  %v6451_v58 = vand.u32 4294901760, %v6836_v15  ;;  %v725_v11 = vsub.f32 %v6834_v35, %v6446_v44  ;;  %v6837_v29 = vld [vmem:[#allocation132_spill] sm:$0xff] }
  0xe1   : > { %v5108_v21 = vpack.c.bf16 %v708_v49, %v696_v4  ;;  %v1992_v28 = vand.u32 4294901760, %v1991_v48  ;;  %v1997_v6 = vsub.f32 %v6835_v40, %v6450_v27  ;;  %v714_v42 = vand.u32 4294901760, %v713_v52  ;;  %v6838_v4 = vld [vmem:[#allocation133_spill] sm:$0xff] }
  0xe2   : > { %v2009_v54 = vsub.f32 %v6836_v15, %v6451_v58  ;;  %v6453_v41 = vand.u32 4294901760, %v6837_v29  ;;  %v6455_v49 = vand.u32 4294901760, %v6838_v4  ;;  %v726_v44 = vand.u32 4294901760, %v725_v11  ;;  %v6840_v58 = vld [vmem:[#allocation136_spill] sm:$0xff]  ;;  %v6841_v11 = vld [vmem:[#allocation138_spill] sm:$0xff] }
  0xe3   : > { %3084 = vmatpush1.bf16.xpose.msra.mxu1 %v4842_v19  ;;  %v5123_v48 = vpack.c.bf16 %v1992_v28, %v1980_v26  ;;  %v1998_v35 = vand.u32 4294901760, %v1997_v6  ;;  %v6456_v23 = vand.u32 4294901760, %v6839_v46  ;;  %v6460_v15 = vand.u32 4294901760, %v6840_v58  ;;  %v6842_v28 = vld [vmem:[#allocation139_spill] sm:$0xff] }
  0xe4   : > { %3086 = vmatprep.subr.bf16.mxu1 %v4867_v37  ;;  %v2010_v27 = vand.u32 4294901760, %v2009_v54  ;;  %v719_v19 = vsub.f32 %v6837_v29, %v6453_v41  ;;  %v731_v52 = vsub.f32 %v6838_v4, %v6455_v49  ;;  %v5134_v37 = vpack.c.bf16 %v726_v44, %v714_v42 }
  0xe5   : > { %v2003_v6 = vsub.f32 %v6839_v46, %v6456_v23  ;;  %v6461_v26 = vand.u32 4294901760, %v6841_v11  ;;  %v6463_v54 = vand.u32 4294901760, %v6842_v28  ;;  %v6844_v46 = vld [vmem:[#allocation141_spill] sm:$0xff] }
  0xe6   : > { %3468 = vmatpush1.bf16.xpose.msra.mxu0 %v4855_v0  ;;  %v5142_v41 = vpack.c.bf16 %v2010_v27, %v1998_v35  ;;  %v720_v29 = vand.u32 4294901760, %v719_v19  ;;  %v732_v49 = vand.u32 4294901760, %v731_v52  ;;  %v2015_v0 = vsub.f32 %v6840_v58, %v6460_v15  ;;  %v6845_v35 = vld [vmem:[#allocation142_spill] sm:$0xff]  ;;  %v6846_v52 = vld [vmem:[#allocation144_spill] sm:$0xff] }
  0xe7   : > { %3470 = vmatprep.subr.bf16.mxu0 %v4874_v12  ;;  %v2004_v44 = vand.u32 4294901760, %v2003_v6  ;;  %v737_v42 = vsub.f32 %v6841_v11, %v6461_v26  ;;  %v749_v23 = vsub.f32 %v6842_v28, %v6463_v54  ;;  %v6464_v4 = vand.u32 4294901760, %v6844_v46  ;;  %v6847_v26 = vld [vmem:[#allocation145_spill] sm:$0xff] }
  0xe8   : > { %6843 = vst [vmem:[#allocation108_spill] sm:$0xff] %v5142_v41  ;;  %v5154_v12 = vpack.c.bf16 %v732_v49, %v720_v29  ;;  %v2016_v27 = vand.u32 4294901760, %v2015_v0  ;;  %v6467_v19 = vand.u32 4294901760, %v6845_v35  ;;  %v6468_v41 = vand.u32 4294901760, %v6846_v52  ;;  %v6848_v0 = vld [vmem:[#allocation147_spill] sm:$0xff] }
  0xe9   : > { %v738_v40 = vand.u32 4294901760, %v737_v42  ;;  %v750_v15 = vand.u32 4294901760, %v749_v23  ;;  %v2021_v6 = vsub.f32 %v6844_v46, %v6464_v4  ;;  %v6470_v11 = vand.u32 4294901760, %v6847_v26 }
  0xea   : > { %v5163_v54 = vpack.c.bf16 %v2016_v27, %v2004_v44  ;;  %v2033_v29 = vsub.f32 %v6845_v35, %v6467_v19  ;;  %v743_v49 = vsub.f32 %v6846_v52, %v6468_v41  ;;  %v6472_v23 = vand.u32 4294901760, %v6848_v0  ;;  %v6849_v44 = vld [vmem:[#allocation148_spill] sm:$0xff]  ;;  %v6850_v41 = vld [vmem:[#allocation150_spill] sm:$0xff] }
  0xeb   : > { %3088 = vmatpush1.bf16.xpose.msra.mxu1 %v4888_v9  ;;  %v5173_v42 = vpack.c.bf16 %v750_v15, %v738_v40  ;;  %v2022_v4 = vand.u32 4294901760, %v2021_v6  ;;  %v755_v9 = vsub.f32 %v6847_v26, %v6470_v11  ;;  %v6475_v27 = vand.u32 4294901760, %v6849_v44  ;;  %v6851_v15 = vld [vmem:[#allocation151_spill] sm:$0xff]  ;;  %v6852_v11 = vld [vmem:[#allocation153_spill] sm:$0xff] }
  0xec   : > { %3090 = vmatprep.subr.bf16.mxu1 %v4905_v55  ;;  %v2034_v46 = vand.u32 4294901760, %v2033_v29  ;;  %v744_v28 = vand.u32 4294901760, %v743_v49  ;;  %v2027_v19 = vsub.f32 %v6848_v0, %v6472_v23  ;;  %v6476_v52 = vand.u32 4294901760, %v6850_v41  ;;  %v6854_v0 = vld [vmem:[#allocation154_spill] sm:$0xff] }
  0xed   : > { %v756_v55 = vand.u32 4294901760, %v755_v9  ;;  %v2039_v40 = vsub.f32 %v6849_v44, %v6475_v27  ;;  %v6479_v6 = vand.u32 4294901760, %v6851_v15  ;;  %v6481_v26 = vand.u32 4294901760, %v6852_v11 }
  0xee   : > { %3472 = vmatpush1.bf16.xpose.msra.mxu0 %v4896_v22  ;;  %v5190_v29 = vpack.c.bf16 %v2034_v46, %v2022_v4  ;;  %v2028_v49 = vand.u32 4294901760, %v2027_v19  ;;  %v761_v23 = vsub.f32 %v6850_v41, %v6476_v52  ;;  %v6480_v22 = vand.u32 4294901760, %v6854_v0  ;;  %v6856_v19 = vld [vmem:[#allocation156_spill] sm:$0xff]  ;;  %v6857_v41 = vld [vmem:[#allocation157_spill] sm:$0xff] }
  0xef   : > { %3474 = vmatprep.subr.bf16.mxu0 %v4922_v38  ;;  %v5196_v9 = vpack.c.bf16 %v756_v55, %v744_v28  ;;  %v2040_v35 = vand.u32 4294901760, %v2039_v40  ;;  %v773_v27 = vsub.f32 %v6851_v15, %v6479_v6  ;;  %v2045_v38 = vsub.f32 %v6852_v11, %v6481_v26  ;;  %v6859_v26 = vld [vmem:[#allocation160_spill] sm:$0xff] }
  0xf0   : > { %6853 = vst [vmem:[#allocation109_spill] sm:$0xff] %v5190_v29  ;;  %v762_v46 = vand.u32 4294901760, %v761_v23  ;;  %v2057_v4 = vsub.f32 %v6854_v0, %v6480_v22  ;;  %v6484_v52 = vand.u32 4294901760, %v6856_v19  ;;  %v6486_v44 = vand.u32 4294901760, %v6857_v41 }
  0xf1   : > { %6855 = vst [vmem:[#allocation111_spill] sm:$0xff] %v5196_v9  ;;  %v5209_v28 = vpack.c.bf16 %v2040_v35, %v2028_v49  ;;  %v774_v55 = vand.u32 4294901760, %v773_v27  ;;  %v2046_v40 = vand.u32 4294901760, %v2045_v38  ;;  %v6858_v9 = vld [vmem:[#allocation159_spill] sm:$0xff]  ;;  %v6488_v0 = vand.u32 4294901760, %v6859_v26 }
  0xf2   : > { %v6487_v29 = vand.u32 4294901760, %v6858_v9  ;;  %v2058_v6 = vand.u32 4294901760, %v2057_v4  ;;  %v767_v23 = vsub.f32 %v6856_v19, %v6484_v52  ;;  %v779_v22 = vsub.f32 %v6857_v41, %v6486_v44  ;;  %v6861_v38 = vld [vmem:[#allocation163_spill] sm:$0xff] }
  0xf3   : > { %3092 = vmatpush1.bf16.xpose.msra.mxu1 %v4929_v36  ;;  %v5221_v35 = vpack.c.bf16 %v774_v55, %v762_v46  ;;  %v6860_v36 = vld [vmem:[#allocation162_spill] sm:$0xff]  ;;  %v6493_v4 = vand.u32 4294901760, %v6861_v38  ;;  %v2063_v44 = vsub.f32 %v6859_v26, %v6488_v0 }
  0xf4   : > { %3094 = vmatprep.subr.bf16.mxu1 %v4955_v25  ;;  %v2051_v27 = vsub.f32 %v6858_v9, %v6487_v29  ;;  %v6490_v49 = vand.u32 4294901760, %v6860_v36  ;;  %v5228_v11 = vpack.c.bf16 %v2058_v6, %v2046_v40  ;;  %v768_v52 = vand.u32 4294901760, %v767_v23  ;;  %v6862_v29 = vld [vmem:[#allocation165_spill] sm:$0xff]  ;;  %v6863_v23 = vld [vmem:[#allocation166_spill] sm:$0xff] }
  0xf5   : > { %v780_v19 = vand.u32 4294901760, %v779_v22  ;;  %v797_v55 = vsub.f32 %v6861_v38, %v6493_v4  ;;  %v6494_v6 = vand.u32 4294901760, %v6862_v29  ;;  %v2064_v40 = vand.u32 4294901760, %v2063_v44  ;;  %v6865_v44 = vld [vmem:[#allocation171_spill] sm:$0xff] }
  0xf6   : > { %3476 = vmatpush1.bf16.xpose.msra.mxu0 %v4943_v60  ;;  %v2052_v25 = vand.u32 4294901760, %v2051_v27  ;;  %v785_v46 = vsub.f32 %v6860_v36, %v6490_v49  ;;  %v6497_v0 = vand.u32 4294901760, %v6863_v23  ;;  %v6498_v60 = vand.u32 4294901760, %v4535_v63  ;;  %v6864_v36 = vld [vmem:[#allocation169_spill] sm:$0xff] }
  0xf7   : > { %3478 = vmatprep.subr.bf16.mxu0 %v4963_v14  ;;  %v5242_v22 = vpack.c.bf16 %v780_v19, %v768_v52  ;;  %v798_v26 = vand.u32 4294901760, %v797_v55  ;;  %v2069_v49 = vsub.f32 %v6862_v29, %v6494_v6  ;;  %v6501_v9 = vand.u32 4294901760, %v6864_v36  ;;  %v6866_v29 = vld [vmem:[#allocation172_spill] sm:$0xff] }
  0xf8   : > { %v786_v27 = vand.u32 4294901760, %v785_v46  ;;  %v5250_v4 = vpack.c.bf16 %v2064_v40, %v2052_v25  ;;  %v2081_v14 = vsub.f32 %v6863_v23, %v6497_v0  ;;  %v791_v52 = vsub.f32 %v4535_v63, %v6498_v60  ;;  %v6867_v60 = vld [vmem:[#allocation174_spill] sm:$0xff] }
  0xf9   : > { %v6504_v19 = vand.u32 4294901760, %v6865_v44  ;;  %v2070_v55 = vand.u32 4294901760, %v2069_v49  ;;  %v803_v6 = vsub.f32 %v6864_v36, %v6501_v9  ;;  %v6506_v25 = vand.u32 4294901760, %v6866_v29  ;;  %v6869_v36 = vld [vmem:[#allocation177_spill] sm:$0xff] }
  0xfa   : > { %v5259_v46 = vpack.c.bf16 %v798_v26, %v786_v27  ;;  %v2082_v40 = vand.u32 4294901760, %v2081_v14  ;;  %v792_v38 = vand.u32 4294901760, %v791_v52  ;;  %v6507_v63 = vand.u32 4294901760, %v6867_v60  ;;  %v6868_v27 = vld [vmem:[#allocation175_spill] sm:$0xff] }
  0xfb   : > { %3096 = vmatpush1.bf16.xpose.msra.mxu1 %v4979_v31  ;;  %v2075_v0 = vsub.f32 %v6865_v44, %v6504_v19  ;;  %v804_v26 = vand.u32 4294901760, %v803_v6  ;;  %v2087_v49 = vsub.f32 %v6866_v29, %v6506_v25  ;;  %v6508_v9 = vand.u32 4294901760, %v6868_v27  ;;  %v6870_v19 = vld [vmem:[#allocation178_spill] sm:$0xff] }
  0xfc   : > { %3098 = vmatprep.subr.bf16.mxu1 %v4999_v5  ;;  %v6511_v23 = vand.u32 4294901760, %v6869_v36  ;;  %v5276_v31 = vpack.c.bf16 %v2082_v40, %v2070_v55  ;;  %v809_v52 = vsub.f32 %v6867_v60, %v6507_v63  ;;  %v6510_v44 = vand.u32 4294901760, %v6870_v19 }
  0xfd   : > { %v2076_v14 = vand.u32 4294901760, %v2075_v0  ;;  %v5283_v5 = vpack.c.bf16 %v804_v26, %v792_v38  ;;  %v2088_v6 = vand.u32 4294901760, %v2087_v49  ;;  %v821_v25 = vsub.f32 %v6868_v27, %v6508_v9 }
  0xfe   : > { %3480 = vmatpush1.bf16.xpose.msra.mxu0 %v4990_v47  ;;  %v2093_v55 = vsub.f32 %v6869_v36, %v6511_v23  ;;  %v810_v0 = vand.u32 4294901760, %v809_v52  ;;  %v2105_v40 = vsub.f32 %v6870_v19, %v6510_v44  ;;  %v6513_v47 = vand.u32 4294901760, %v4568_v43  ;;  %v6871_v44 = vld [vmem:[#allocation184_spill] sm:$0xff] }
  0xff   : > { %3482 = vmatprep.subr.bf16.mxu0 %v5015_v10  ;;  %v6516_v38 = vand.u32 4294901760, %v4570_v33  ;;  %v5297_v26 = vpack.c.bf16 %v2088_v6, %v2076_v14  ;;  %v822_v49 = vand.u32 4294901760, %v821_v25  ;;  %v6517_v9 = vand.u32 4294901760, %v4577_v30  ;;  %v6872_v14 = vld [vmem:[#allocation186_spill] sm:$0xff] }
 0x100   : > { %v2094_v63 = vand.u32 4294901760, %v2093_v55  ;;  %v2106_v27 = vand.u32 4294901760, %v2105_v40  ;;  %v815_v10 = vsub.f32 %v4568_v43, %v6513_v47  ;;  %v6518_v23 = vand.u32 4294901760, %v6871_v44 }
 0x101   : > { %v827_v52 = vsub.f32 %v4570_v33, %v6516_v38  ;;  %v5307_v19 = vpack.c.bf16 %v822_v49, %v810_v0  ;;  %v2099_v25 = vsub.f32 %v4577_v30, %v6517_v9  ;;  %v6519_v6 = vand.u32 4294901760, %v6872_v14 }
 0x102   : > { %v6520_v55 = vand.u32 4294901760, %v4592_v20  ;;  %v5315_v40 = vpack.c.bf16 %v2106_v27, %v2094_v63  ;;  %v816_v47 = vand.u32 4294901760, %v815_v10  ;;  %v2111_v38 = vsub.f32 %v6871_v44, %v6518_v23 }
 0x103   : > { %3100 = vmatpush1.bf16.xpose.msra.mxu1 %v5022_v1  ;;  %v828_v43 = vand.u32 4294901760, %v827_v52  ;;  %v2100_v0 = vand.u32 4294901760, %v2099_v25  ;;  %v833_v49 = vsub.f32 %v6872_v14, %v6519_v6  ;;  %v6521_v63 = vand.u32 4294901760, %v4596_v2 }
 0x104   : > { %3102 = vmatprep.subr.bf16.mxu1 %v5047_v13  ;;  %v845_v9 = vsub.f32 %v4592_v20, %v6520_v55  ;;  %v2112_v27 = vand.u32 4294901760, %v2111_v38  ;;  %v6522_v10 = vand.u32 4294901760, %v4598_v3  ;;  %v6525_v52 = vand.u32 4294901760, %v4610_v51 }
 0x105   : > { %v5328_v1 = vpack.c.bf16 %v828_v43, %v816_v47  ;;  %v834_v13 = vand.u32 4294901760, %v833_v49  ;;  %v2117_v23 = vsub.f32 %v4596_v2, %v6521_v63  ;;  %v6526_v6 = vand.u32 4294901760, %v4612_v32  ;;  %v6919_v2 = vld [vmem:[#allocation19_spill] sm:$0xff] }
 0x106   : > { %3484 = vmatpush1.bf16.xpose.msra.mxu0 %v5036_v18  ;;  %v846_v25 = vand.u32 4294901760, %v845_v9  ;;  %v5338_v55 = vpack.c.bf16 %v2112_v27, %v2100_v0  ;;  %v2129_v43 = vsub.f32 %v4598_v3, %v6522_v10  ;;  %v839_v18 = vsub.f32 %v4610_v51, %v6525_v52  ;;  %v6921_v51 = vld [vmem:[#allocation15_spill] sm:$0xff] }
 0x107   : > { %3486 = vmatprep.subr.bf16.mxu0 %v5054_v45  ;;  %v6528_v9 = vand.u32 4294901760, %v4620_v7  ;;  %v2118_v38 = vand.u32 4294901760, %v2117_v23  ;;  %v851_v49 = vsub.f32 %v4612_v32, %v6526_v6  ;;  %v6873_v45 = vld [vmem:[#allocation198_spill] sm:$0xff]  ;;  %v6925_v32 = vld [vmem:[#allocation199_spill] sm:$0xff] }
 0x108   : > { %v5347_v47 = vpack.c.bf16 %v846_v25, %v834_v13  ;;  %v6527_v0 = vand.u32 4294901760, %v6873_v45  ;;  %v2130_v27 = vand.u32 4294901760, %v2129_v43  ;;  %v840_v63 = vand.u32 4294901760, %v839_v18  ;;  %v6888_v18 = vld [vmem:[#allocation142_spill] sm:$0xff] }
 0x109   : > { %v2123_v10 = vsub.f32 %v4620_v7, %v6528_v9  ;;  %v852_v3 = vand.u32 4294901760, %v851_v49  ;;  %v6891_v49 = vld [vmem:[#allocation145_spill] sm:$0xff]  ;;  %v6904_v9 = vld [vmem:[#allocation166_spill] sm:$0xff] }
 0x10a   : > { %v2135_v52 = vsub.f32 %v6873_v45, %v6527_v0  ;;  %v3513_v23 = vpack.c.bf16 %v2130_v27, %v2118_v38  ;;  %v6889_v38 = vld [vmem:[#allocation109_spill] sm:$0xff]  ;;  %v6892_v0 = vld [vmem:[#allocation111_spill] sm:$0xff] }
 0x10b   : > { %3104 = vmatpush1.bf16.xpose.msra.mxu1 %v5067_v34  ;;  %v2124_v13 = vand.u32 4294901760, %v2123_v10  ;;  %v3131_v25 = vpack.c.bf16 %v852_v3, %v840_v63  ;;  %v6876_v63 = vld [vmem:[#allocation124_spill] sm:$0xff]  ;;  %v6878_v10 = vld [vmem:[#allocation127_spill] sm:$0xff]  ;;  %v6897_v3 = vld [vmem:[#allocation154_spill] sm:$0xff] }
 0x10c   : > { %3106 = vmatprep.subr.bf16.mxu1 %v5086_v59  ;;  %v2136_v6 = vand.u32 4294901760, %v2135_v52  ;;  %v6887_v59 = vld [vmem:[#allocation141_spill] sm:$0xff]  ;;  %v6912_v34 = vld [vmem:[#allocation6_spill] sm:$0xff] }
 0x10d   : > { %v6906_v52 = vld [vmem:[#allocation169_spill] sm:$0xff] }
 0x10e   : > { %3488 = vmatpush1.bf16.xpose.msra.mxu0 %v5076_v39  ;;  %v3515_v43 = vpack.c.bf16 %v2136_v6, %v2124_v13  ;;  %v6874_v39 = vld [vmem:[#allocation121_spill] sm:$0xff]  ;;  %v6881_v13 = vld [vmem:[#allocation108_spill] sm:$0xff]  ;;  %v6913_v6 = vld [vmem:[#allocation7_spill] sm:$0xff] }
 0x10f   : > { %3490 = vmatprep.subr.bf16.mxu0 %v5102_v16  ;;  %v6875_v16 = vld [vmem:[#allocation123_spill] sm:$0xff] }
 0x113   : > { %3108 = vmatpush1.bf16.xpose.msra.mxu1 %v5108_v21  ;;  %v6886_v21 = vld [vmem:[#allocation139_spill] sm:$0xff] }
 0x114   : > { %3110 = vmatprep.subr.bf16.mxu1 %v5134_v37  ;;  %v6877_v37 = vld [vmem:[#allocation126_spill] sm:$0xff] }
 0x116   : > { %3492 = vmatpush1.bf16.xpose.msra.mxu0 %v5123_v48  ;;  %v6885_v48 = vld [vmem:[#allocation138_spill] sm:$0xff] }
 0x117   : > { %3494 = vmatprep.subr.bf16.mxu0 %v6881_v13  ;;  %v6900_v13 = vld [vmem:[#allocation160_spill] sm:$0xff] }
 0x11b   : > { %3112 = vmatpush1.bf16.xpose.msra.mxu1 %v5154_v12  ;;  %v6903_v12 = vld [vmem:[#allocation165_spill] sm:$0xff] }
 0x11c   : > { %3114 = vmatprep.subr.bf16.mxu1 %v5173_v42  ;;  %v6909_v42 = vld [vmem:[#allocation178_spill] sm:$0xff] }
 0x11e   : > { %3496 = vmatpush1.bf16.xpose.msra.mxu0 %v5163_v54  ;;  %v6895_v54 = vld [vmem:[#allocation150_spill] sm:$0xff] }
 0x11f   : > { %3498 = vmatprep.subr.bf16.mxu0 %v6889_v38  ;;  %v6898_v38 = vld [vmem:[#allocation156_spill] sm:$0xff] }
 0x123   : > { %3116 = vmatpush1.bf16.xpose.msra.mxu1 %v6892_v0  ;;  %v6899_v0 = vld [vmem:[#allocation159_spill] sm:$0xff] }
 0x124   : > { %3118 = vmatprep.subr.bf16.mxu1 %v5221_v35  ;;  %v6902_v35 = vld [vmem:[#allocation163_spill] sm:$0xff] }
 0x126   : > { %3500 = vmatpush1.bf16.xpose.msra.mxu0 %v5209_v28  ;;  %v6901_v28 = vld [vmem:[#allocation162_spill] sm:$0xff] }
 0x127   : > { %3502 = vmatprep.subr.bf16.mxu0 %v5228_v11  ;;  %v6905_v11 = vld [vmem:[#allocation168_spill] sm:$0xff] }
 0x12b   : > { %3120 = vmatpush1.bf16.xpose.msra.mxu1 %v5242_v22  ;;  %v6907_v22 = vld [vmem:[#allocation171_spill] sm:$0xff] }
 0x12c   : > { %3122 = vmatprep.subr.bf16.mxu1 %v5259_v46  ;;  %v6914_v46 = vld [vmem:[#allocation8_spill] sm:$0xff] }
 0x12e   : > { %3504 = vmatpush1.bf16.xpose.msra.mxu0 %v5250_v4  ;;  %v6908_v4 = vld [vmem:[#allocation175_spill] sm:$0xff] }
 0x12f   : > { %3506 = vmatprep.subr.bf16.mxu0 %v5276_v31  ;;  %v6910_v31 = vld [vmem:[#allocation180_spill] sm:$0xff] }
 0x133   : > { %3124 = vmatpush1.bf16.xpose.msra.mxu1 %v5283_v5  ;;  %v6915_v5 = vld [vmem:[#allocation10_spill] sm:$0xff] }
 0x134   : > { %3126 = vmatprep.subr.bf16.mxu1 %v5307_v19  ;;  %v3517_v30 = vpack.c.bf16 %v6915_v5, %v6914_v46  ;;  %v6917_v19 = vld [vmem:[#allocation13_spill] sm:$0xff]  ;;  %v6924_v5 = vld [vmem:[#allocation22_spill] sm:$0xff] }
 0x136   : > { %3508 = vmatpush1.bf16.xpose.msra.mxu0 %v5297_v26 }
 0x137   : > { %3510 = vmatprep.subr.bf16.mxu0 %v5315_v40  ;;  %v6920_v40 = vld [vmem:[#allocation201_spill] sm:$0xff] }
 0x13b   : > { %3128 = vmatpush1.bf16.xpose.msra.mxu1 %v5328_v1  ;;  %v3133_v1 = vpack.c.bf16 %v6913_v6, %v6912_v34  ;;  %v6922_v6 = vld [vmem:[#allocation16_spill] sm:$0xff]  ;;  %v6923_v34 = vld [vmem:[#allocation21_spill] sm:$0xff] }
 0x13c   : > { %3130 = vmatprep.subr.bf16.mxu1 %v5347_v47  ;;  %v6916_v47 = vld [vmem:[#allocation12_spill] sm:$0xff]  ;;  %v3521_v46 = vpack.c.bf16 %v6924_v5, %v6923_v34  ;;  %v6934_v5 = vld [vmem:[#allocation33_spill] sm:$0xff]  ;;  %v6935_v34 = vld [vmem:[#allocation34_spill] sm:$0xff] }
 0x13d   : > { %v3135_v27 = vpack.c.bf16 %v6917_v19, %v6916_v47  ;;  %v3525_v47 = vpack.c.bf16 %v6935_v34, %v6934_v5  ;;  %v6947_v34 = vld [vmem:[#allocation55_spill] sm:$0xff] }
 0x13e   : > { %3512 = vmatpush1.bf16.xpose.msra.mxu0 %v5338_v55  ;;  %v6929_v55 = vld [vmem:[#allocation25_spill] sm:$0xff] }
 0x13f   : > { %3514 = vmatprep.subr.bf16.mxu0 %v3513_v23  ;;  %v6918_v23 = vld [vmem:[#allocation17_spill] sm:$0xff] }
 0x140   : > { %v3137_v26 = vpack.c.bf16 %v6919_v2, %v6918_v23  ;;  %v6931_v23 = vld [vmem:[#allocation31_spill] sm:$0xff] }
 0x143   : > { %3132 = vmatpush1.bf16.xpose.msra.mxu1 %v3131_v25  ;;  %v3519_v25 = vpack.c.bf16 %v6922_v6, %v6921_v51  ;;  %v6932_v6 = vld [vmem:[#allocation26_spill] sm:$0xff] }
 0x144   : > { %3134 = vmatprep.subr.bf16.mxu1 %v3133_v1  ;;  %v6928_v1 = vld [vmem:[#allocation23_spill] sm:$0xff] }
 0x145   : > { %v3139_v2 = vpack.c.bf16 %v6929_v55, %v6928_v1  ;;  %v6940_v55 = vld [vmem:[#allocation39_spill] sm:$0xff]  ;;  %v6941_v1 = vld [vmem:[#allocation40_spill] sm:$0xff] }
 0x146   : > { %3516 = vmatpush1.bf16.xpose.msra.mxu0 %v3515_v43  ;;  %v6926_v43 = vld [vmem:[#allocation203_spill] sm:$0xff]  ;;  %v3527_v7 = vpack.c.bf16 %v6941_v1, %v6940_v55 }
 0x147   : > { %3518 = vmatprep.subr.bf16.mxu0 %v3517_v30  ;;  %v6927_v30 = vld [vmem:[#allocation200_spill] sm:$0xff] }
 0x14a   : > { %857 = vmatmul.mubr.f32.vlgmr.msra.gmra.mrb[0].mxu1 %v6920_v40  ;;  %v6930_v40 = vld [vmem:[#allocation30_spill] sm:$0xff] }
 0x14b   : > { %3136 = vmatpush1.bf16.xpose.msra.mxu1 %v3135_v27  ;;  %1057 = vmatprep.mubr.f32.mxu1 %v6925_v32  ;;  %v3141_v19 = vpack.c.bf16 %v6931_v23, %v6930_v40  ;;  %v6933_v27 = vld [vmem:[#allocation28_spill] sm:$0xff]  ;;  %v6942_v23 = vld [vmem:[#allocation45_spill] sm:$0xff]  ;;  %v6943_v40 = vld [vmem:[#allocation46_spill] sm:$0xff] }
 0x14c   : > { %3138 = vmatprep.subr.bf16.mxu1 %v3137_v26  ;;  %v3523_v51 = vpack.c.bf16 %v6933_v27, %v6932_v6  ;;  %v6936_v26 = vld [vmem:[#allocation36_spill] sm:$0xff]  ;;  %v3529_v27 = vpack.c.bf16 %v6943_v40, %v6942_v23  ;;  %v6955_v40 = vld [vmem:[#allocation67_spill] sm:$0xff] }
 0x14d   : > { %2141 = vmatmul.mubr.f32.vlgmr.msra.gmra.mrb[0].mxu0 %v6926_v43 }
 0x14e   : > { %3520 = vmatpush1.bf16.xpose.msra.mxu0 %v3519_v25  ;;  %2341 = vmatprep.mubr.f32.mxu0 %v6927_v30  ;;  %v6937_v25 = vld [vmem:[#allocation37_spill] sm:$0xff]  ;;  %v6939_v30 = vld [vmem:[#allocation43_spill] sm:$0xff] }
 0x14f   : > { %3522 = vmatprep.subr.bf16.mxu0 %v3521_v46  ;;  %v3143_v43 = vpack.c.bf16 %v6937_v25, %v6936_v26  ;;  %v6938_v46 = vld [vmem:[#allocation42_spill] sm:$0xff]  ;;  %v6948_v25 = vld [vmem:[#allocation51_spill] sm:$0xff]  ;;  %v6949_v26 = vld [vmem:[#allocation52_spill] sm:$0xff] }
 0x150   : > { %v3145_v32 = vpack.c.bf16 %v6939_v30, %v6938_v46  ;;  %v3531_v6 = vpack.c.bf16 %v6949_v26, %v6948_v25  ;;  %v6950_v30 = vld [vmem:[#allocation57_spill] sm:$0xff]  ;;  %v6951_v46 = vld [vmem:[#allocation58_spill] sm:$0xff] }
 0x151   : > { %v3533_v1 = vpack.c.bf16 %v6951_v46, %v6950_v30  ;;  %v6963_v46 = vld [vmem:[#allocation79_spill] sm:$0xff] }
 0x153   : > { %3140 = vmatpush1.bf16.xpose.msra.mxu1 %v3139_v2  ;;  %v6944_v2 = vld [vmem:[#allocation48_spill] sm:$0xff] }
 0x154   : > { %3142 = vmatprep.subr.bf16.mxu1 %v3141_v19  ;;  %v6945_v19 = vld [vmem:[#allocation49_spill] sm:$0xff] }
 0x156   : > { %3524 = vmatpush1.bf16.xpose.msra.mxu0 %v3523_v51  ;;  %v3147_v51 = vpack.c.bf16 %v6945_v19, %v6944_v2  ;;  %v6956_v19 = vld [vmem:[#allocation63_spill] sm:$0xff]  ;;  %v6957_v2 = vld [vmem:[#allocation64_spill] sm:$0xff] }
 0x157   : > { %3526 = vmatprep.subr.bf16.mxu0 %v3525_v47  ;;  %v6946_v47 = vld [vmem:[#allocation54_spill] sm:$0xff]  ;;  %v3535_v55 = vpack.c.bf16 %v6957_v2, %v6956_v19 }
 0x158   : > { %v3149_v5 = vpack.c.bf16 %v6947_v34, %v6946_v47  ;;  %v6958_v34 = vld [vmem:[#allocation69_spill] sm:$0xff]  ;;  %v6959_v47 = vld [vmem:[#allocation70_spill] sm:$0xff] }
 0x159   : > { %v3537_v26 = vpack.c.bf16 %v6959_v47, %v6958_v34  ;;  %v6971_v47 = vld [vmem:[#allocation91_spill] sm:$0xff] }
 0x15b   : > { %3144 = vmatpush1.bf16.xpose.msra.mxu1 %v3143_v43  ;;  %v6952_v43 = vld [vmem:[#allocation60_spill] sm:$0xff] }
 0x15c   : > { %3146 = vmatprep.subr.bf16.mxu1 %v3145_v32  ;;  %v6953_v32 = vld [vmem:[#allocation61_spill] sm:$0xff] }
 0x15e   : > { %3528 = vmatpush1.bf16.xpose.msra.mxu0 %v3527_v7  ;;  %v3151_v7 = vpack.c.bf16 %v6953_v32, %v6952_v43  ;;  %v6964_v32 = vld [vmem:[#allocation75_spill] sm:$0xff]  ;;  %v6965_v43 = vld [vmem:[#allocation76_spill] sm:$0xff] }
 0x15f   : > { %3530 = vmatprep.subr.bf16.mxu0 %v3529_v27  ;;  %v6954_v27 = vld [vmem:[#allocation66_spill] sm:$0xff]  ;;  %v3539_v25 = vpack.c.bf16 %v6965_v43, %v6964_v32 }
 0x160   : > { %v3153_v23 = vpack.c.bf16 %v6955_v40, %v6954_v27  ;;  %v6966_v40 = vld [vmem:[#allocation81_spill] sm:$0xff]  ;;  %v6967_v27 = vld [vmem:[#allocation82_spill] sm:$0xff] }
 0x161   : > { %v3541_v2 = vpack.c.bf16 %v6967_v27, %v6966_v40  ;;  %v6979_v27 = vld [vmem:[#allocation103_spill] sm:$0xff] }
 0x163   : > { %3148 = vmatpush1.bf16.xpose.msra.mxu1 %v3147_v51  ;;  %v6960_v51 = vld [vmem:[#allocation72_spill] sm:$0xff] }
 0x164   : > { %3150 = vmatprep.subr.bf16.mxu1 %v3149_v5  ;;  %v6961_v5 = vld [vmem:[#allocation73_spill] sm:$0xff] }
 0x166   : > { %3532 = vmatpush1.bf16.xpose.msra.mxu0 %v3531_v6  ;;  %v3155_v6 = vpack.c.bf16 %v6961_v5, %v6960_v51  ;;  %v6972_v5 = vld [vmem:[#allocation87_spill] sm:$0xff]  ;;  %v6973_v51 = vld [vmem:[#allocation88_spill] sm:$0xff] }
 0x167   : > { %3534 = vmatprep.subr.bf16.mxu0 %v3533_v1  ;;  %v6962_v1 = vld [vmem:[#allocation78_spill] sm:$0xff]  ;;  %v3543_v19 = vpack.c.bf16 %v6973_v51, %v6972_v5 }
 0x168   : > { %v3157_v30 = vpack.c.bf16 %v6963_v46, %v6962_v1  ;;  %v6974_v46 = vld [vmem:[#allocation93_spill] sm:$0xff]  ;;  %v6975_v1 = vld [vmem:[#allocation94_spill] sm:$0xff] }
 0x169   : > { %v3545_v43 = vpack.c.bf16 %v6975_v1, %v6974_v46 }
 0x16b   : > { %3152 = vmatpush1.bf16.xpose.msra.mxu1 %v3151_v7  ;;  %v6968_v7 = vld [vmem:[#allocation84_spill] sm:$0xff] }
 0x16c   : > { %3154 = vmatprep.subr.bf16.mxu1 %v3153_v23  ;;  %v6969_v23 = vld [vmem:[#allocation85_spill] sm:$0xff] }
 0x16e   : > { %3536 = vmatpush1.bf16.xpose.msra.mxu0 %v3535_v55  ;;  %v3159_v55 = vpack.c.bf16 %v6969_v23, %v6968_v7  ;;  %v6980_v23 = vld [vmem:[#allocation99_spill] sm:$0xff]  ;;  %v6981_v7 = vld [vmem:[#allocation100_spill] sm:$0xff] }
 0x16f   : > { %3538 = vmatprep.subr.bf16.mxu0 %v3537_v26  ;;  %v6970_v26 = vld [vmem:[#allocation90_spill] sm:$0xff]  ;;  %v3547_v32 = vpack.c.bf16 %v6981_v7, %v6980_v23 }
 0x170   : > { %v3161_v34 = vpack.c.bf16 %v6971_v47, %v6970_v26  ;;  %v6982_v47 = vld [vmem:[#allocation105_spill] sm:$0xff]  ;;  %v6983_v26 = vld [vmem:[#allocation106_spill] sm:$0xff] }
 0x171   : > { %v3549_v51 = vpack.c.bf16 %v6983_v26, %v6982_v47 }
 0x173   : > { %3156 = vmatpush1.bf16.xpose.msra.mxu1 %v3155_v6  ;;  %v6976_v6 = vld [vmem:[#allocation96_spill] sm:$0xff] }
 0x174   : > { %3158 = vmatprep.subr.bf16.mxu1 %v3157_v30  ;;  %v6977_v30 = vld [vmem:[#allocation97_spill] sm:$0xff] }
 0x176   : > { %3540 = vmatpush1.bf16.xpose.msra.mxu0 %v3539_v25  ;;  %v3163_v25 = vpack.c.bf16 %v6977_v30, %v6976_v6 }
 0x177   : > { %3542 = vmatprep.subr.bf16.mxu0 %v3541_v2  ;;  %v6978_v2 = vld [vmem:[#allocation102_spill] sm:$0xff] }
 0x178   : > { %v3165_v40 = vpack.c.bf16 %v6979_v27, %v6978_v2 }
 0x17b   : > { %3160 = vmatpush1.bf16.xpose.msra.mxu1 %v3159_v55  ;;  %v6987_v55 = vpack.c.bf16 %v6828_v17, %v6827_v24 }
 0x17c   : > { %3162 = vmatprep.subr.bf16.mxu1 %v3161_v34  ;;  %v6984_v34 = vpack.c.bf16 %v6822_v53, %v6821_v61 }
 0x17e   : > { %3544 = vmatpush1.bf16.xpose.msra.mxu0 %v3543_v19  ;;  %v6985_v19 = vpack.c.bf16 %v6826_v62, %v6825_v56 }
 0x17f   : > { %3546 = vmatprep.subr.bf16.mxu0 %v3545_v43  ;;  %v6986_v43 = vpack.c.bf16 %v6824_v57, %v6823_v50  ;;  %v6995_v57 = vld [vmem:[#allocation132_spill] sm:$0xff] }
 0x183   : > { %3164 = vmatpush1.bf16.xpose.msra.mxu1 %v3163_v25  ;;  %v6991_v25 = vld [vmem:[#allocation130_spill] sm:$0xff] }
 0x184   : > { %3166 = vmatprep.subr.bf16.mxu1 %v3165_v40  ;;  %v6988_v40 = vpack.c.bf16 %v6874_v39, %v6829_v8 }
 0x186   : > { %3548 = vmatpush1.bf16.xpose.msra.mxu0 %v3547_v32  ;;  %v6989_v32 = vpack.c.bf16 %v6878_v10, %v6877_v37 }
 0x187   : > { %3550 = vmatprep.subr.bf16.mxu0 %v3549_v51  ;;  %v6990_v51 = vpack.c.bf16 %v6876_v63, %v6875_v16 }
 0x18b   : > { %3168 = vmatpush1.bf16.xpose.msra.mxu1 %v6984_v34  ;;  %v6992_v34 = vld [vmem:[#allocation129_spill] sm:$0xff] }
 0x18c   : > { %3170 = vmatprep.subr.bf16.mxu1 %v6985_v19  ;;  %v6993_v19 = vpack.c.bf16 %v6991_v25, %v6992_v34 }
 0x18e   : > { %3552 = vmatpush1.bf16.xpose.msra.mxu0 %v6986_v43  ;;  %v6994_v43 = vld [vmem:[#allocation133_spill] sm:$0xff] }
 0x18f   : > { %3554 = vmatprep.subr.bf16.mxu0 %v6987_v55  ;;  %v6996_v17 = vpack.c.bf16 %v6994_v43, %v6995_v57  ;;  %v6997_v55 = vpack.c.bf16 %v6886_v21, %v6885_v48  ;;  %v7005_v43 = vld [vmem:[#allocation147_spill] sm:$0xff] }
 0x193   : > { %3172 = vmatpush1.bf16.xpose.msra.mxu1 %v6988_v40  ;;  %v6998_v40 = vld [vmem:[#allocation135_spill] sm:$0xff] }
 0x194   : > { %3174 = vmatprep.subr.bf16.mxu1 %v6989_v32  ;;  %v6999_v10 = vpack.c.bf16 %v6840_v58, %v6998_v40  ;;  %v7000_v32 = vpack.c.bf16 %v6888_v18, %v6887_v59 }
 0x196   : > { %3556 = vmatpush1.bf16.xpose.msra.mxu0 %v6990_v51  ;;  %v7001_v51 = vld [vmem:[#allocation144_spill] sm:$0xff] }
 0x197   : > { %3558 = vmatprep.subr.bf16.mxu0 %v6993_v19  ;;  %v7002_v25 = vpack.c.bf16 %v6891_v49, %v7001_v51  ;;  %v7003_v19 = vpack.c.bf16 %v6851_v15, %v6895_v54 }
 0x19b   : > { %3176 = vmatpush1.bf16.xpose.msra.mxu1 %v6996_v17  ;;  %v7004_v17 = vld [vmem:[#allocation148_spill] sm:$0xff] }
 0x19c   : > { %3178 = vmatprep.subr.bf16.mxu1 %v6997_v55  ;;  %v7006_v21 = vpack.c.bf16 %v7004_v17, %v7005_v43  ;;  %v7007_v55 = vld [vmem:[#allocation153_spill] sm:$0xff] }
 0x19d   : > { %v7008_v58 = vpack.c.bf16 %v6897_v3, %v7007_v55 }
 0x19e   : > { %3560 = vmatpush1.bf16.xpose.msra.mxu0 %v6999_v10  ;;  %v7009_v10 = vpack.c.bf16 %v6857_v41, %v6898_v38 }
 0x19f   : > { %3562 = vmatprep.subr.bf16.mxu0 %v7000_v32  ;;  %v7010_v32 = vpack.c.bf16 %v6902_v35, %v6901_v28 }
 0x1a3   : > { %3180 = vmatpush1.bf16.xpose.msra.mxu1 %v7002_v25  ;;  %v7011_v25 = vpack.c.bf16 %v6900_v13, %v6899_v0 }
 0x1a4   : > { %3182 = vmatprep.subr.bf16.mxu1 %v7003_v19  ;;  %v7012_v19 = vpack.c.bf16 %v6904_v9, %v6903_v12 }
 0x1a6   : > { %3564 = vmatpush1.bf16.xpose.msra.mxu0 %v7006_v21  ;;  %v7013_v21 = vpack.c.bf16 %v6906_v52, %v6905_v11 }
 0x1a7   : > { %3566 = vmatprep.subr.bf16.mxu0 %v7008_v58  ;;  %v7014_v58 = vpack.c.bf16 %v6908_v4, %v6867_v60  ;;  %v7022_v60 = vld [vmem:[#allocation189_spill] sm:$0xff] }
 0x1ab   : > { %3184 = vmatpush1.bf16.xpose.msra.mxu1 %v7009_v10  ;;  %v7015_v10 = vpack.c.bf16 %v6866_v29, %v6907_v22  ;;  %v7025_v22 = vld [vmem:[#allocation194_spill] sm:$0xff] }
 0x1ac   : > { %3186 = vmatprep.subr.bf16.mxu1 %v7010_v32  ;;  %v7016_v32 = vpack.c.bf16 %v6909_v42, %v6869_v36  ;;  %v7109_v36 = vld [vmem:[#allocation13_spill] sm:$0xff] }
 0x1ae   : > { %3568 = vmatpush1.bf16.xpose.msra.mxu0 %v7011_v25  ;;  %v7017_v25 = vpack.c.bf16 %v4570_v33, %v6910_v31 }
 0x1af   : > { %3570 = vmatprep.subr.bf16.mxu0 %v7012_v19  ;;  %v7018_v19 = vpack.c.bf16 %v4592_v20, %v6872_v14  ;;  %v7030_v20 = vld [vmem:[#allocation9_spill] sm:$0xff] }
 0x1b3   : > { %3188 = vmatpush1.bf16.xpose.msra.mxu1 %v7013_v21  ;;  %v7019_v21 = vld [vmem:[#allocation183_spill] sm:$0xff] }
 0x1b4   : > { %3190 = vmatprep.subr.bf16.mxu1 %v7014_v58  ;;  %v7020_v4 = vpack.c.bf16 %v6871_v44, %v7019_v21  ;;  %v7021_v58 = vld [vmem:[#allocation190_spill] sm:$0xff]  ;;  %v7032_v44 = vld [vmem:[#allocation11_spill] sm:$0xff] }
 0x1b5   : > { %v7023_v29 = vpack.c.bf16 %v7021_v58, %v7022_v60  ;;  %v7036_v58 = vld [vmem:[#allocation204_spill] sm:$0xff] }
 0x1b6   : > { %3572 = vmatpush1.bf16.xpose.msra.mxu0 %v7015_v10  ;;  %v7024_v10 = vld [vmem:[#allocation195_spill] sm:$0xff] }
 0x1b7   : > { %3574 = vmatprep.subr.bf16.mxu0 %v7016_v32  ;;  %v7026_v42 = vpack.c.bf16 %v7024_v10, %v7025_v22  ;;  %v7027_v32 = vld [vmem:[#allocation5_spill] sm:$0xff]  ;;  %v7099_v22 = vld [vmem:[#allocation7_spill] sm:$0xff] }
 0x1bb   : > { %3192 = vmatpush1.bf16.xpose.msra.mxu1 %v7017_v25  ;;  %v7028_v25 = vld [vmem:[#allocation197_spill] sm:$0xff] }
 0x1bc   : > { %3194 = vmatprep.subr.bf16.mxu1 %v7018_v19  ;;  %v7029_v33 = vpack.c.bf16 %v6873_v45, %v7028_v25  ;;  %v7031_v19 = vld [vmem:[#allocation202_spill] sm:$0xff]  ;;  %v7040_v45 = vld [vmem:[#allocation20_spill] sm:$0xff]  ;;  %v7043_v25 = vld [vmem:[#allocation27_spill] sm:$0xff] }
 0x1be   : > { %3576 = vmatpush1.bf16.xpose.msra.mxu0 %v7020_v4  ;;  %v7033_v4 = vld [vmem:[#allocation199_spill] sm:$0xff] }
 0x1bf   : > { %3578 = vmatprep.subr.bf16.mxu0 %v7023_v29  ;;  %v7034_v21 = vand.u32 4294901760, %v7033_v4  ;;  %v7035_v29 = vld [vmem:[#allocation18_spill] sm:$0xff]  ;;  %v7046_v4 = vld [vmem:[#allocation41_spill] sm:$0xff] }
 0x1c3   : > { %3196 = vmatpush1.bf16.xpose.msra.mxu1 %v7026_v42  ;;  %v7037_v42 = vld [vmem:[#allocation14_spill] sm:$0xff] }
 0x1c4   : > { %3198 = vmatprep.subr.bf16.mxu1 %v7027_v32  ;;  %v7038_v32 = vld [vmem:[#allocation200_spill] sm:$0xff] }
 0x1c5   : > { %v7039_v10 = vand.u32 4294901760, %v7038_v32  ;;  %v7049_v32 = vld [vmem:[#allocation47_spill] sm:$0xff] }
 0x1c6   : > { %3580 = vmatpush1.bf16.xpose.msra.mxu0 %v7029_v33  ;;  %v7041_v33 = vld [vmem:[#allocation24_spill] sm:$0xff] }
 0x1c7   : > { %3582 = vmatprep.subr.bf16.mxu0 %v7030_v20  ;;  %v7042_v20 = vld [vmem:[#allocation29_spill] sm:$0xff] }
 0x1ca   : > { %1060 = vmatmul.mubr.f32.vlgmr.msra.gmra.mrb[0].mxu1 %v7031_v19 }
 0x1cb   : > { %3200 = vmatpush1.bf16.xpose.msra.mxu1 %v7032_v44  ;;  %1197 = vmatprep.mubr.f32.mxu1 %v7034_v21  ;;  %v7044_v44 = vld [vmem:[#allocation32_spill] sm:$0xff]  ;;  %v7045_v21 = vld [vmem:[#allocation35_spill] sm:$0xff] }
 0x1cc   : > { %3202 = vmatprep.subr.bf16.mxu1 %v7035_v29  ;;  %v7047_v29 = vld [vmem:[#allocation38_spill] sm:$0xff] }
 0x1cd   : > { %2344 = vmatmul.mubr.f32.vlgmr.msra.gmra.mrb[0].mxu0 %v7036_v58 }
 0x1ce   : > { %3584 = vmatpush1.bf16.xpose.msra.mxu0 %v7037_v42  ;;  %2481 = vmatprep.mubr.f32.mxu0 %v7039_v10  ;;  %v7048_v42 = vld [vmem:[#allocation44_spill] sm:$0xff]  ;;  %v7050_v10 = vld [vmem:[#allocation53_spill] sm:$0xff] }
 0x1cf   : > { %3586 = vmatprep.subr.bf16.mxu0 %v7040_v45  ;;  %v7051_v45 = vld [vmem:[#allocation50_spill] sm:$0xff] }
 0x1d3   : > { %3204 = vmatpush1.bf16.xpose.msra.mxu1 %v7041_v33  ;;  %v7052_v33 = vld [vmem:[#allocation56_spill] sm:$0xff] }
 0x1d4   : > { %3206 = vmatprep.subr.bf16.mxu1 %v7042_v20  ;;  %v7053_v20 = vld [vmem:[#allocation59_spill] sm:$0xff] }
 0x1d6   : > { %3588 = vmatpush1.bf16.xpose.msra.mxu0 %v7043_v25  ;;  %v7054_v25 = vld [vmem:[#allocation65_spill] sm:$0xff] }
 0x1d7   : > { %3590 = vmatprep.subr.bf16.mxu0 %v7044_v44  ;;  %v7055_v44 = vld [vmem:[#allocation62_spill] sm:$0xff] }
 0x1db   : > { %3208 = vmatpush1.bf16.xpose.msra.mxu1 %v7045_v21  ;;  %v7056_v21 = vld [vmem:[#allocation68_spill] sm:$0xff] }
 0x1dc   : > { %3210 = vmatprep.subr.bf16.mxu1 %v7046_v4  ;;  %v7057_v4 = vld [vmem:[#allocation71_spill] sm:$0xff] }
 0x1de   : > { %3592 = vmatpush1.bf16.xpose.msra.mxu0 %v7047_v29  ;;  %v7058_v29 = vld [vmem:[#allocation77_spill] sm:$0xff] }
 0x1df   : > { %3594 = vmatprep.subr.bf16.mxu0 %v7048_v42  ;;  %v7059_v42 = vld [vmem:[#allocation74_spill] sm:$0xff] }
 0x1e3   : > { %3212 = vmatpush1.bf16.xpose.msra.mxu1 %v7049_v32  ;;  %v7060_v32 = vld [vmem:[#allocation80_spill] sm:$0xff] }
 0x1e4   : > { %3214 = vmatprep.subr.bf16.mxu1 %v7050_v10  ;;  %v7061_v10 = vld [vmem:[#allocation83_spill] sm:$0xff] }
 0x1e6   : > { %3596 = vmatpush1.bf16.xpose.msra.mxu0 %v7051_v45  ;;  %v7062_v45 = vld [vmem:[#allocation89_spill] sm:$0xff] }
 0x1e7   : > { %3598 = vmatprep.subr.bf16.mxu0 %v7052_v33  ;;  %v7063_v33 = vld [vmem:[#allocation86_spill] sm:$0xff] }
 0x1eb   : > { %3216 = vmatpush1.bf16.xpose.msra.mxu1 %v7053_v20  ;;  %v7064_v20 = vld [vmem:[#allocation92_spill] sm:$0xff] }
 0x1ec   : > { %3218 = vmatprep.subr.bf16.mxu1 %v7054_v25  ;;  %v7065_v25 = vld [vmem:[#allocation95_spill] sm:$0xff] }
 0x1ee   : > { %3600 = vmatpush1.bf16.xpose.msra.mxu0 %v7055_v44  ;;  %v7066_v44 = vld [vmem:[#allocation101_spill] sm:$0xff] }
 0x1ef   : > { %3602 = vmatprep.subr.bf16.mxu0 %v7056_v21  ;;  %v7067_v21 = vld [vmem:[#allocation98_spill] sm:$0xff] }
 0x1f3   : > { %3220 = vmatpush1.bf16.xpose.msra.mxu1 %v7057_v4  ;;  %v7068_v4 = vld [vmem:[#allocation104_spill] sm:$0xff] }
 0x1f4   : > { %3222 = vmatprep.subr.bf16.mxu1 %v7058_v29  ;;  %v7069_v29 = vld [vmem:[#allocation107_spill] sm:$0xff] }
 0x1f6   : > { %3604 = vmatpush1.bf16.xpose.msra.mxu0 %v7059_v42  ;;  %v7070_v42 = vld [vmem:[#allocation113_spill] sm:$0xff] }
 0x1f7   : > { %3606 = vmatprep.subr.bf16.mxu0 %v7060_v32  ;;  %v7071_v32 = vld [vmem:[#allocation110_spill] sm:$0xff] }
 0x1fb   : > { %3224 = vmatpush1.bf16.xpose.msra.mxu1 %v7061_v10  ;;  %v7072_v10 = vld [vmem:[#allocation116_spill] sm:$0xff] }
 0x1fc   : > { %3226 = vmatprep.subr.bf16.mxu1 %v7062_v45  ;;  %v7073_v45 = vld [vmem:[#allocation119_spill] sm:$0xff] }
 0x1fe   : > { %3608 = vmatpush1.bf16.xpose.msra.mxu0 %v7063_v33  ;;  %v7074_v33 = vld [vmem:[#allocation125_spill] sm:$0xff] }
 0x1ff   : > { %3610 = vmatprep.subr.bf16.mxu0 %v7064_v20  ;;  %v7075_v20 = vld [vmem:[#allocation122_spill] sm:$0xff] }
 0x203   : > { %3228 = vmatpush1.bf16.xpose.msra.mxu1 %v7065_v25  ;;  %v7076_v25 = vld [vmem:[#allocation128_spill] sm:$0xff] }
 0x204   : > { %3230 = vmatprep.subr.bf16.mxu1 %v7066_v44  ;;  %v7077_v44 = vld [vmem:[#allocation131_spill] sm:$0xff] }
 0x206   : > { %3612 = vmatpush1.bf16.xpose.msra.mxu0 %v7067_v21  ;;  %v7078_v21 = vld [vmem:[#allocation137_spill] sm:$0xff] }
 0x207   : > { %3614 = vmatprep.subr.bf16.mxu0 %v7068_v4  ;;  %v7079_v4 = vld [vmem:[#allocation134_spill] sm:$0xff] }
 0x20b   : > { %3232 = vmatpush1.bf16.xpose.msra.mxu1 %v7069_v29  ;;  %v7080_v29 = vld [vmem:[#allocation140_spill] sm:$0xff] }
 0x20c   : > { %3234 = vmatprep.subr.bf16.mxu1 %v7070_v42  ;;  %v7081_v42 = vld [vmem:[#allocation143_spill] sm:$0xff] }
 0x20e   : > { %3616 = vmatpush1.bf16.xpose.msra.mxu0 %v7071_v32  ;;  %v7082_v32 = vld [vmem:[#allocation149_spill] sm:$0xff] }
 0x20f   : > { %3618 = vmatprep.subr.bf16.mxu0 %v7072_v10  ;;  %v7083_v10 = vld [vmem:[#allocation146_spill] sm:$0xff] }
 0x213   : > { %3236 = vmatpush1.bf16.xpose.msra.mxu1 %v7073_v45  ;;  %v7084_v45 = vld [vmem:[#allocation152_spill] sm:$0xff] }
 0x214   : > { %3238 = vmatprep.subr.bf16.mxu1 %v7074_v33  ;;  %v7085_v33 = vld [vmem:[#allocation155_spill] sm:$0xff] }
 0x216   : > { %3620 = vmatpush1.bf16.xpose.msra.mxu0 %v7075_v20  ;;  %v7086_v20 = vld [vmem:[#allocation161_spill] sm:$0xff] }
 0x217   : > { %3622 = vmatprep.subr.bf16.mxu0 %v7076_v25  ;;  %v7087_v25 = vld [vmem:[#allocation158_spill] sm:$0xff] }
 0x21b   : > { %3240 = vmatpush1.bf16.xpose.msra.mxu1 %v7077_v44  ;;  %v7088_v44 = vld [vmem:[#allocation164_spill] sm:$0xff] }
 0x21c   : > { %3242 = vmatprep.subr.bf16.mxu1 %v7078_v21  ;;  %v7089_v21 = vld [vmem:[#allocation167_spill] sm:$0xff] }
 0x21e   : > { %3624 = vmatpush1.bf16.xpose.msra.mxu0 %v7079_v4  ;;  %v7090_v4 = vld [vmem:[#allocation173_spill] sm:$0xff] }
 0x21f   : > { %3626 = vmatprep.subr.bf16.mxu0 %v7080_v29  ;;  %v7091_v29 = vld [vmem:[#allocation170_spill] sm:$0xff] }
 0x223   : > { %3244 = vmatpush1.bf16.xpose.msra.mxu1 %v7081_v42  ;;  %v7092_v42 = vld [vmem:[#allocation176_spill] sm:$0xff] }
 0x224   : > { %3246 = vmatprep.subr.bf16.mxu1 %v7082_v32  ;;  %v7093_v32 = vld [vmem:[#allocation179_spill] sm:$0xff] }
 0x226   : > { %3628 = vmatpush1.bf16.xpose.msra.mxu0 %v7083_v10  ;;  %v7094_v10 = vld [vmem:[#allocation185_spill] sm:$0xff] }
 0x227   : > { %3630 = vmatprep.subr.bf16.mxu0 %v7084_v45  ;;  %v7095_v45 = vld [vmem:[#allocation182_spill] sm:$0xff] }
 0x22b   : > { %3248 = vmatpush1.bf16.xpose.msra.mxu1 %v7085_v33  ;;  %v7096_v33 = vld [vmem:[#allocation188_spill] sm:$0xff] }
 0x22c   : > { %3250 = vmatprep.subr.bf16.mxu1 %v7086_v20  ;;  %v7097_v20 = vld [vmem:[#allocation6_spill] sm:$0xff] }
 0x22e   : > { %3632 = vmatpush1.bf16.xpose.msra.mxu0 %v7087_v25  ;;  %v7098_v25 = vand.u32 4294901760, %v7097_v20  ;;  %v7111_v20 = vld [vmem:[#allocation17_spill] sm:$0xff] }
 0x22f   : > { %3634 = vmatprep.subr.bf16.mxu0 %v7088_v44  ;;  %v7100_v44 = vand.u32 4294901760, %v7099_v22  ;;  %v7112_v11 = vand.u32 4294901760, %v7111_v20  ;;  %v7113_v22 = vld [vmem:[#allocation19_spill] sm:$0xff]  ;;  %v7129_v20 = vld [vmem:[#allocation25_spill] sm:$0xff] }
 0x231   : > { %v3261_v60 = vpack.c.bf16 %v7100_v44, %v7098_v25  ;;  %v7114_v44 = vand.u32 4294901760, %v7113_v22  ;;  %v7130_v22 = vand.u32 4294901760, %v7129_v20  ;;  %v7145_v20 = vld [vmem:[#allocation37_spill] sm:$0xff] }
 0x233   : > { %3252 = vmatpush1.bf16.xpose.msra.mxu1 %v7089_v21  ;;  %v7101_v21 = vld [vmem:[#allocation193_spill] sm:$0xff]  ;;  %v3265_v25 = vpack.c.bf16 %v7114_v44, %v7112_v11  ;;  %v7126_v11 = vld [vmem:[#allocation192_spill] sm:$0xff]  ;;  %v7131_v44 = vld [vmem:[#allocation30_spill] sm:$0xff] }
 0x234   : > { %3254 = vmatprep.subr.bf16.mxu1 %v7090_v4  ;;  %v7102_v4 = vld [vmem:[#allocation8_spill] sm:$0xff] }
 0x235   : > { %v7103_v14 = vand.u32 4294901760, %v7102_v4  ;;  %v7116_v4 = vld [vmem:[#allocation15_spill] sm:$0xff] }
 0x236   : > { %3636 = vmatpush1.bf16.xpose.msra.mxu0 %v7091_v29  ;;  %v7104_v29 = vld [vmem:[#allocation10_spill] sm:$0xff] }
 0x237   : > { %3638 = vmatprep.subr.bf16.mxu0 %v7092_v42  ;;  %v7105_v31 = vand.u32 4294901760, %v7104_v29  ;;  %v7117_v29 = vand.u32 4294901760, %v7116_v4  ;;  %v7132_v4 = vand.u32 4294901760, %v7131_v44 }
 0x239   : > { %v3645_v42 = vpack.c.bf16 %v7105_v31, %v7103_v14  ;;  %v7118_v14 = vld [vmem:[#allocation16_spill] sm:$0xff] }
 0x23b   : > { %3256 = vmatpush1.bf16.xpose.msra.mxu1 %v7093_v32  ;;  %v7106_v32 = vld [vmem:[#allocation196_spill] sm:$0xff] }
 0x23c   : > { %3258 = vmatprep.subr.bf16.mxu1 %v7094_v10  ;;  %v7107_v10 = vld [vmem:[#allocation12_spill] sm:$0xff] }
 0x23e   : > { %3640 = vmatpush1.bf16.xpose.msra.mxu0 %v7095_v45  ;;  %v7108_v45 = vand.u32 4294901760, %v7107_v10  ;;  %v7122_v10 = vld [vmem:[#allocation22_spill] sm:$0xff] }
 0x23f   : > { %3642 = vmatprep.subr.bf16.mxu0 %v7096_v33  ;;  %v7110_v33 = vand.u32 4294901760, %v7109_v36  ;;  %v7123_v9 = vand.u32 4294901760, %v7122_v10 }
 0x241   : > { %v3263_v52 = vpack.c.bf16 %v7110_v33, %v7108_v45  ;;  %v7124_v45 = vld [vmem:[#allocation191_spill] sm:$0xff]  ;;  %v7125_v33 = vand.u32 4294901760, %v7036_v58 }
 0x243   : > { %3260 = vmatpush1.bf16.xpose.msra.mxu1 %v7101_v21  ;;  %v7115_v21 = vand.u32 4294901760, %v7031_v19  ;;  %v7127_v19 = vld [vmem:[#allocation23_spill] sm:$0xff] }
 0x244   : > { %3262 = vmatprep.subr.bf16.mxu1 %v3261_v60  ;;  %v7119_v60 = vand.u32 4294901760, %v7118_v14 }
 0x246   : > { %3644 = vmatpush1.bf16.xpose.msra.mxu0 %v7106_v32  ;;  %v3647_v31 = vpack.c.bf16 %v7119_v60, %v7117_v29  ;;  %v7133_v29 = vld [vmem:[#allocation31_spill] sm:$0xff] }
 0x247   : > { %3646 = vmatprep.subr.bf16.mxu0 %v3645_v42  ;;  %v7120_v42 = vld [vmem:[#allocation21_spill] sm:$0xff]  ;;  %v7134_v14 = vand.u32 4294901760, %v7133_v29 }
 0x248   : > { %v7121_v32 = vand.u32 4294901760, %v7120_v42 }
 0x24a   : > { %1201 = vmatmul.mubr.f32.vlgmr.msra.gmra.mrb[0].mxu1 %v7115_v21  ;;  %v3649_v36 = vpack.c.bf16 %v7123_v9, %v7121_v32  ;;  %v7128_v21 = vand.u32 4294901760, %v7127_v19  ;;  %v3269_v9 = vpack.c.bf16 %v7134_v14, %v7132_v4  ;;  %v7135_v32 = vld [vmem:[#allocation26_spill] sm:$0xff]  ;;  %v7143_v19 = vld [vmem:[#allocation36_spill] sm:$0xff]  ;;  %v7149_v14 = vld [vmem:[#allocation43_spill] sm:$0xff] }
 0x24b   : > { %3264 = vmatpush1.bf16.xpose.msra.mxu1 %v3263_v52  ;;  %1464 = vmatprep.mubr.f32.mxu1 %v7124_v45  ;;  %v7136_v60 = vand.u32 4294901760, %v7135_v32  ;;  %v7147_v4 = vld [vmem:[#allocation42_spill] sm:$0xff]  ;;  %v7150_v32 = vand.u32 4294901760, %v7149_v14  ;;  %v7165_v14 = vld [vmem:[#allocation55_spill] sm:$0xff] }
 0x24c   : > { %3266 = vmatprep.subr.bf16.mxu1 %v3265_v25  ;;  %v3267_v52 = vpack.c.bf16 %v7130_v22, %v7128_v21  ;;  %v7137_v25 = vld [vmem:[#allocation28_spill] sm:$0xff]  ;;  %v7144_v21 = vand.u32 4294901760, %v7143_v19  ;;  %v7146_v22 = vand.u32 4294901760, %v7145_v20  ;;  %v7148_v29 = vand.u32 4294901760, %v7147_v4  ;;  %v7163_v4 = vld [vmem:[#allocation54_spill] sm:$0xff] }
 0x24d   : > { %2485 = vmatmul.mubr.f32.vlgmr.msra.gmra.mrb[0].mxu0 %v7125_v33  ;;  %v7138_v42 = vand.u32 4294901760, %v7137_v25  ;;  %v7141_v33 = vld [vmem:[#allocation34_spill] sm:$0xff] }
 0x24e   : > { %3648 = vmatpush1.bf16.xpose.msra.mxu0 %v3647_v31  ;;  %2748 = vmatprep.mubr.f32.mxu0 %v7126_v11  ;;  %v7139_v31 = vld [vmem:[#allocation33_spill] sm:$0xff]  ;;  %v3271_v44 = vpack.c.bf16 %v7146_v22, %v7144_v21  ;;  %v3273_v25 = vpack.c.bf16 %v7150_v32, %v7148_v29  ;;  %v7164_v29 = vand.u32 4294901760, %v7163_v4  ;;  %v7166_v32 = vand.u32 4294901760, %v7165_v14  ;;  %v7179_v4 = vld [vmem:[#allocation66_spill] sm:$0xff]  ;;  %v7181_v14 = vld [vmem:[#allocation67_spill] sm:$0xff] }
 0x24f   : > { %3650 = vmatprep.subr.bf16.mxu0 %v3649_v36  ;;  %v3651_v58 = vpack.c.bf16 %v7138_v42, %v7136_v60  ;;  %v7140_v10 = vand.u32 4294901760, %v7139_v31  ;;  %v7142_v36 = vand.u32 4294901760, %v7141_v33  ;;  %v7151_v60 = vld [vmem:[#allocation39_spill] sm:$0xff]  ;;  %v7153_v42 = vld [vmem:[#allocation40_spill] sm:$0xff]  ;;  %v7161_v21 = vld [vmem:[#allocation49_spill] sm:$0xff] }
 0x250   : > { %v7154_v31 = vand.u32 4294901760, %v7153_v42  ;;  %v7162_v20 = vand.u32 4294901760, %v7161_v21  ;;  %v7169_v42 = vld [vmem:[#allocation52_spill] sm:$0xff] }
 0x251   : > { %v3653_v11 = vpack.c.bf16 %v7142_v36, %v7140_v10  ;;  %v7155_v10 = vld [vmem:[#allocation45_spill] sm:$0xff]  ;;  %v7159_v36 = vld [vmem:[#allocation48_spill] sm:$0xff] }
 0x252   : > { %v7160_v19 = vand.u32 4294901760, %v7159_v36 }
 0x253   : > { %3268 = vmatpush1.bf16.xpose.msra.mxu1 %v3267_v52  ;;  %v7152_v52 = vand.u32 4294901760, %v7151_v60  ;;  %v3277_v60 = vpack.c.bf16 %v7166_v32, %v7164_v29  ;;  %v7180_v29 = vand.u32 4294901760, %v7179_v4  ;;  %v7182_v32 = vand.u32 4294901760, %v7181_v14  ;;  %v7195_v4 = vld [vmem:[#allocation78_spill] sm:$0xff]  ;;  %v7197_v14 = vld [vmem:[#allocation79_spill] sm:$0xff] }
 0x254   : > { %3270 = vmatprep.subr.bf16.mxu1 %v3269_v9  ;;  %v7156_v9 = vand.u32 4294901760, %v7155_v10  ;;  %v3275_v22 = vpack.c.bf16 %v7162_v20, %v7160_v19  ;;  %v7177_v19 = vld [vmem:[#allocation61_spill] sm:$0xff] }
 0x255   : > { %v3655_v45 = vpack.c.bf16 %v7154_v31, %v7152_v52  ;;  %v7167_v52 = vld [vmem:[#allocation51_spill] sm:$0xff]  ;;  %v7170_v31 = vand.u32 4294901760, %v7169_v42  ;;  %v7178_v21 = vand.u32 4294901760, %v7177_v19  ;;  %v7185_v42 = vld [vmem:[#allocation64_spill] sm:$0xff] }
 0x256   : > { %3652 = vmatpush1.bf16.xpose.msra.mxu0 %v3651_v58  ;;  %v7157_v58 = vld [vmem:[#allocation46_spill] sm:$0xff] }
 0x257   : > { %3654 = vmatprep.subr.bf16.mxu0 %v3653_v11  ;;  %v7158_v11 = vand.u32 4294901760, %v7157_v58 }
 0x259   : > { %v3657_v33 = vpack.c.bf16 %v7158_v11, %v7156_v9  ;;  %v7171_v9 = vld [vmem:[#allocation57_spill] sm:$0xff] }
 0x25b   : > { %3272 = vmatpush1.bf16.xpose.msra.mxu1 %v3271_v44  ;;  %v7168_v44 = vand.u32 4294901760, %v7167_v52  ;;  %v3281_v52 = vpack.c.bf16 %v7182_v32, %v7180_v29  ;;  %v7196_v29 = vand.u32 4294901760, %v7195_v4  ;;  %v7198_v32 = vand.u32 4294901760, %v7197_v14  ;;  %v7211_v4 = vld [vmem:[#allocation90_spill] sm:$0xff]  ;;  %v7213_v14 = vld [vmem:[#allocation91_spill] sm:$0xff] }
 0x25c   : > { %3274 = vmatprep.subr.bf16.mxu1 %v3273_v25  ;;  %v7172_v25 = vand.u32 4294901760, %v7171_v9 }
 0x25d   : > { %v3659_v10 = vpack.c.bf16 %v7170_v31, %v7168_v44  ;;  %v7183_v44 = vld [vmem:[#allocation63_spill] sm:$0xff]  ;;  %v7186_v31 = vand.u32 4294901760, %v7185_v42  ;;  %v7201_v42 = vld [vmem:[#allocation76_spill] sm:$0xff] }
 0x25e   : > { %3656 = vmatpush1.bf16.xpose.msra.mxu0 %v3655_v45  ;;  %v7173_v45 = vld [vmem:[#allocation58_spill] sm:$0xff] }
 0x25f   : > { %3658 = vmatprep.subr.bf16.mxu0 %v3657_v33  ;;  %v7174_v58 = vand.u32 4294901760, %v7173_v45  ;;  %v7175_v33 = vld [vmem:[#allocation60_spill] sm:$0xff] }
 0x260   : > { %v7176_v36 = vand.u32 4294901760, %v7175_v33 }
 0x261   : > { %v3661_v11 = vpack.c.bf16 %v7174_v58, %v7172_v25  ;;  %v7187_v25 = vld [vmem:[#allocation69_spill] sm:$0xff] }
 0x262   : > { %v3279_v20 = vpack.c.bf16 %v7178_v21, %v7176_v36  ;;  %v7193_v36 = vld [vmem:[#allocation73_spill] sm:$0xff] }
 0x263   : > { %3276 = vmatpush1.bf16.xpose.msra.mxu1 %v3275_v22  ;;  %v7184_v22 = vand.u32 4294901760, %v7183_v44  ;;  %v7194_v19 = vand.u32 4294901760, %v7193_v36  ;;  %v3285_v44 = vpack.c.bf16 %v7198_v32, %v7196_v29  ;;  %v7212_v29 = vand.u32 4294901760, %v7211_v4 }
 0x264   : > { %3278 = vmatprep.subr.bf16.mxu1 %v3277_v60  ;;  %v7188_v60 = vand.u32 4294901760, %v7187_v25  ;;  %v7214_v32 = vand.u32 4294901760, %v7213_v14  ;;  %v7232_v4 = vand.u32 4294901760, %v6823_v50  ;;  %v7241_v50 = vld [vmem:[#allocation127_spill] sm:$0xff] }
 0x265   : > { %v3663_v9 = vpack.c.bf16 %v7186_v31, %v7184_v22  ;;  %v7199_v22 = vld [vmem:[#allocation75_spill] sm:$0xff]  ;;  %v7202_v31 = vand.u32 4294901760, %v7201_v42 }
 0x266   : > { %3660 = vmatpush1.bf16.xpose.msra.mxu0 %v3659_v10  ;;  %v7189_v10 = vld [vmem:[#allocation70_spill] sm:$0xff] }
 0x267   : > { %3662 = vmatprep.subr.bf16.mxu0 %v3661_v11  ;;  %v7190_v45 = vand.u32 4294901760, %v7189_v10  ;;  %v7191_v11 = vld [vmem:[#allocation72_spill] sm:$0xff] }
 0x268   : > { %v7192_v33 = vand.u32 4294901760, %v7191_v11 }
 0x269   : > { %v3665_v58 = vpack.c.bf16 %v7190_v45, %v7188_v60  ;;  %v7203_v60 = vld [vmem:[#allocation81_spill] sm:$0xff] }
 0x26a   : > { %v3283_v21 = vpack.c.bf16 %v7194_v19, %v7192_v33  ;;  %v7209_v33 = vld [vmem:[#allocation85_spill] sm:$0xff] }
 0x26b   : > { %3280 = vmatpush1.bf16.xpose.msra.mxu1 %v3279_v20  ;;  %v7200_v20 = vand.u32 4294901760, %v7199_v22  ;;  %v7210_v36 = vand.u32 4294901760, %v7209_v33  ;;  %v3289_v22 = vpack.c.bf16 %v7214_v32, %v7212_v29  ;;  %v7233_v29 = vld [vmem:[#allocation112_spill] sm:$0xff]  ;;  %v7236_v32 = vld [vmem:[#allocation118_spill] sm:$0xff] }
 0x26c   : > { %3282 = vmatprep.subr.bf16.mxu1 %v3281_v52  ;;  %v7204_v52 = vand.u32 4294901760, %v7203_v60 }
 0x26d   : > { %v3667_v25 = vpack.c.bf16 %v7202_v31, %v7200_v20  ;;  %v7216_v20 = vld [vmem:[#allocation88_spill] sm:$0xff] }
 0x26e   : > { %3664 = vmatpush1.bf16.xpose.msra.mxu0 %v3663_v9  ;;  %v7205_v9 = vld [vmem:[#allocation82_spill] sm:$0xff]  ;;  %v7217_v42 = vand.u32 4294901760, %v7216_v20  ;;  %v7242_v20 = vand.u32 4294901760, %v7241_v50 }
 0x26f   : > { %3666 = vmatprep.subr.bf16.mxu0 %v3665_v58  ;;  %v7206_v10 = vand.u32 4294901760, %v7205_v9  ;;  %v7207_v58 = vld [vmem:[#allocation84_spill] sm:$0xff]  ;;  %v7221_v9 = vand.u32 4294901760, %v6977_v30  ;;  %v7229_v30 = vand.u32 4294901760, %v6822_v53  ;;  %v7238_v53 = vand.u32 4294901760, %v6829_v8 }
 0x270   : > { %v7208_v11 = vand.u32 4294901760, %v7207_v58  ;;  %v7248_v8 = vand.u32 4294901760, %v6995_v57  ;;  %v7259_v57 = vand.u32 4294901760, %v7001_v51  ;;  %v7269_v51 = vand.u32 4294901760, %v6901_v28  ;;  %v7278_v28 = vld [vmem:[#allocation169_spill] sm:$0xff] }
 0x271   : > { %v3669_v45 = vpack.c.bf16 %v7206_v10, %v7204_v52  ;;  %v7220_v52 = vand.u32 4294901760, %v6976_v6  ;;  %v7228_v6 = vand.u32 4294901760, %v6821_v61  ;;  %v7239_v61 = vand.u32 4294901760, %v6874_v39  ;;  %v7249_v39 = vld [vmem:[#allocation133_spill] sm:$0xff] }
 0x272   : > { %v3287_v19 = vpack.c.bf16 %v7210_v36, %v7208_v11  ;;  %v7224_v11 = vand.u32 4294901760, %v6980_v23  ;;  %v7227_v36 = vand.u32 4294901760, %v6983_v26  ;;  %v7231_v23 = vand.u32 4294901760, %v6826_v62 }
 0x273   : > { %3284 = vmatpush1.bf16.xpose.msra.mxu1 %v3283_v21  ;;  %v7215_v21 = vand.u32 4294901760, %v6972_v5  ;;  %v3291_v10 = vpack.c.bf16 %v7221_v9, %v7220_v52  ;;  %v7223_v5 = vand.u32 4294901760, %v6979_v27  ;;  %v3295_v27 = vpack.c.bf16 %v7229_v30, %v7228_v6 }
 0x274   : > { %3286 = vmatprep.subr.bf16.mxu1 %v3285_v44  ;;  %v7218_v44 = vand.u32 4294901760, %v6974_v46  ;;  %v7225_v46 = vand.u32 4294901760, %v6981_v7  ;;  %v7235_v26 = vand.u32 4294901760, %v6827_v24  ;;  %v7240_v62 = vand.u32 4294901760, %v6877_v37 }
 0x275   : > { %v3671_v31 = vpack.c.bf16 %v7217_v42, %v7215_v21  ;;  %v7244_v24 = vand.u32 4294901760, %v6876_v63  ;;  %v7250_v37 = vand.u32 4294901760, %v7249_v39  ;;  %v7261_v6 = vand.u32 4294901760, %v6895_v54  ;;  %v7296_v39 = vld [vmem:[#allocation186_spill] sm:$0xff] }
 0x276   : > { %3668 = vmatpush1.bf16.xpose.msra.mxu0 %v3667_v25  ;;  %v7219_v25 = vand.u32 4294901760, %v6975_v1  ;;  %v3675_v33 = vpack.c.bf16 %v7225_v46, %v7224_v11  ;;  %v7226_v1 = vand.u32 4294901760, %v6982_v47  ;;  %v7234_v47 = vand.u32 4294901760, %v7233_v29  ;;  %v7255_v11 = vld [vmem:[#allocation136_spill] sm:$0xff] }
 0x277   : > { %3670 = vmatprep.subr.bf16.mxu0 %v3669_v45  ;;  %v7222_v45 = vand.u32 4294901760, %v6978_v2  ;;  %v7230_v2 = vand.u32 4294901760, %v6825_v56  ;;  %v3299_v56 = vpack.c.bf16 %v7239_v61, %v7238_v53  ;;  %v3301_v42 = vpack.c.bf16 %v7242_v20, %v7240_v62  ;;  %v7284_v61 = vld [vmem:[#allocation171_spill] sm:$0xff]  ;;  %v7286_v62 = vld [vmem:[#allocation172_spill] sm:$0xff]  ;;  %v7288_v20 = vld [vmem:[#allocation177_spill] sm:$0xff] }
 0x278   : > { %v3673_v60 = vpack.c.bf16 %v7219_v25, %v7218_v44  ;;  %v3679_v14 = vpack.c.bf16 %v7234_v47, %v7232_v4  ;;  %v7245_v25 = vand.u32 4294901760, %v6992_v34  ;;  %v7256_v34 = vand.u32 4294901760, %v7255_v11  ;;  %v7274_v47 = vld [vmem:[#allocation166_spill] sm:$0xff] }
 0x279   : > { %v3293_v58 = vpack.c.bf16 %v7223_v5, %v7222_v45  ;;  %v3297_v7 = vpack.c.bf16 %v7231_v23, %v7230_v2  ;;  %v7251_v45 = vand.u32 4294901760, %v6885_v48  ;;  %v7260_v48 = vand.u32 4294901760, %v6891_v49 }
 0x27a   : > { %v7266_v23 = vand.u32 4294901760, %v6897_v3  ;;  %v7267_v49 = vand.u32 4294901760, %v6898_v38  ;;  %v7268_v54 = vand.u32 4294901760, %v6857_v41  ;;  %v7271_v4 = vand.u32 4294901760, %v6899_v0  ;;  %v7276_v41 = vld [vmem:[#allocation168_spill] sm:$0xff]  ;;  %v7282_v0 = vld [vmem:[#allocation175_spill] sm:$0xff] }
 0x27b   : > { %3288 = vmatpush1.bf16.xpose.msra.mxu1 %v3287_v19  ;;  %v3677_v19 = vpack.c.bf16 %v7227_v36, %v7226_v1  ;;  %v7258_v1 = vand.u32 4294901760, %v6888_v18  ;;  %v7265_v18 = vand.u32 4294901760, %v7007_v55  ;;  %v7272_v55 = vand.u32 4294901760, %v6900_v13 }
 0x27c   : > { %3290 = vmatprep.subr.bf16.mxu1 %v3289_v22  ;;  %v7237_v22 = vand.u32 4294901760, %v7236_v32  ;;  %v7273_v3 = vand.u32 4294901760, %v6903_v12  ;;  %v7277_v38 = vand.u32 4294901760, %v7276_v41  ;;  %v7279_v32 = vand.u32 4294901760, %v7278_v28  ;;  %v7330_v41 = vld [vmem:[#allocation35_spill] sm:$0xff]  ;;  %v7332_v28 = vld [vmem:[#allocation38_spill] sm:$0xff] }
 0x27d   : > { %v3695_v29 = vpack.c.bf16 %v7272_v55, %v7271_v4  ;;  %v7283_v53 = vand.u32 4294901760, %v7282_v0  ;;  %v7287_v12 = vand.u32 4294901760, %v7286_v62  ;;  %v7323_v4 = vld [vmem:[#allocation14_spill] sm:$0xff]  ;;  %v7324_v55 = vld [vmem:[#allocation192_spill] sm:$0xff]  ;;  %v7342_v62 = vld [vmem:[#allocation71_spill] sm:$0xff] }
 0x27e   : > { %3672 = vmatpush1.bf16.xpose.msra.mxu0 %v3671_v31  ;;  %v3681_v21 = vpack.c.bf16 %v7237_v22, %v7235_v26  ;;  %v7243_v31 = vand.u32 4294901760, %v6875_v16  ;;  %v7252_v16 = vld [vmem:[#allocation139_spill] sm:$0xff]  ;;  %v7280_v22 = vld [vmem:[#allocation174_spill] sm:$0xff]  ;;  %v7337_v0 = vld [vmem:[#allocation56_spill] sm:$0xff] }
 0x27f   : > { %3674 = vmatprep.subr.bf16.mxu0 %v3673_v60  ;;  %v7246_v60 = vld [vmem:[#allocation130_spill] sm:$0xff]  ;;  %v7253_v5 = vand.u32 4294901760, %v7252_v16 }
 0x280   : > { %v3683_v44 = vpack.c.bf16 %v7244_v24, %v7243_v31  ;;  %v7247_v52 = vand.u32 4294901760, %v7246_v60  ;;  %v7290_v31 = vld [vmem:[#allocation178_spill] sm:$0xff] }
 0x281   : > { %v3305_v63 = vpack.c.bf16 %v7253_v5, %v7251_v45  ;;  %v7291_v24 = vand.u32 4294901760, %v7290_v31  ;;  %v7300_v5 = vld [vmem:[#allocation183_spill] sm:$0xff]  ;;  %v7347_v31 = vld [vmem:[#allocation89_spill] sm:$0xff] }
 0x282   : > { %v3685_v9 = vpack.c.bf16 %v7247_v52, %v7245_v25  ;;  %v7292_v25 = vld [vmem:[#allocation180_spill] sm:$0xff]  ;;  %v7294_v52 = vld [vmem:[#allocation181_spill] sm:$0xff] }
 0x283   : > { %3292 = vmatpush1.bf16.xpose.msra.mxu1 %v3291_v10  ;;  %v3303_v10 = vpack.c.bf16 %v7250_v37, %v7248_v8  ;;  %v7293_v60 = vand.u32 4294901760, %v7292_v25  ;;  %v7297_v37 = vand.u32 4294901760, %v7296_v39  ;;  %v7350_v25 = vld [vmem:[#allocation95_spill] sm:$0xff]  ;;  %v7355_v39 = vld [vmem:[#allocation113_spill] sm:$0xff] }
 0x284   : > { %3294 = vmatprep.subr.bf16.mxu1 %v3293_v58  ;;  %v7254_v58 = vand.u32 4294901760, %v6998_v40  ;;  %v7262_v40 = vand.u32 4294901760, %v6851_v15  ;;  %v3311_v15 = vpack.c.bf16 %v7268_v54, %v7267_v49  ;;  %v7317_v49 = vld [vmem:[#allocation9_spill] sm:$0xff] }
 0x285   : > { %v7318_v54 = vld [vmem:[#allocation201_spill] sm:$0xff] }
 0x286   : > { %3676 = vmatpush1.bf16.xpose.msra.mxu0 %v3675_v33  ;;  %v3687_v46 = vpack.c.bf16 %v7256_v34, %v7254_v58  ;;  %v7257_v33 = vand.u32 4294901760, %v6887_v59  ;;  %v3309_v30 = vpack.c.bf16 %v7262_v40, %v7261_v6  ;;  %v7264_v59 = vand.u32 4294901760, %v7004_v17  ;;  %v7302_v58 = vld [vmem:[#allocation184_spill] sm:$0xff]  ;;  %v7310_v6 = vld [vmem:[#allocation195_spill] sm:$0xff] }
 0x287   : > { %3678 = vmatprep.subr.bf16.mxu0 %v3677_v19  ;;  %v3307_v19 = vpack.c.bf16 %v7260_v48, %v7259_v57  ;;  %v7303_v11 = vand.u32 4294901760, %v7302_v58  ;;  %v7308_v48 = vld [vmem:[#allocation194_spill] sm:$0xff]  ;;  %v7311_v40 = vand.u32 4294901760, %v7310_v6  ;;  %v7362_v58 = vld [vmem:[#allocation131_spill] sm:$0xff] }
 0x288   : > { %v3689_v36 = vpack.c.bf16 %v7258_v1, %v7257_v33  ;;  %v7306_v1 = vld [vmem:[#allocation190_spill] sm:$0xff] }
 0x289   : > { %v7372_v6 = vld [vmem:[#allocation158_spill] sm:$0xff] }
 0x28b   : > { %3296 = vmatpush1.bf16.xpose.msra.mxu1 %v3295_v27  ;;  %v7263_v27 = vand.u32 4294901760, %v7005_v43  ;;  %v7270_v43 = vand.u32 4294901760, %v6902_v35  ;;  %v3315_v35 = vpack.c.bf16 %v7279_v32, %v7277_v38  ;;  %v7331_v38 = vld [vmem:[#allocation41_spill] sm:$0xff]  ;;  %v7333_v32 = vld [vmem:[#allocation44_spill] sm:$0xff] }
 0x28c   : > { %3298 = vmatprep.subr.bf16.mxu1 %v3297_v7  ;;  %v3693_v7 = vpack.c.bf16 %v7266_v23, %v7265_v18 }
 0x28d   : > { %v3691_v2 = vpack.c.bf16 %v7264_v59, %v7263_v27  ;;  %v3313_v17 = vpack.c.bf16 %v7270_v43, %v7269_v51  ;;  %v7312_v27 = vld [vmem:[#allocation197_spill] sm:$0xff]  ;;  %v7320_v51 = vld [vmem:[#allocation191_spill] sm:$0xff]  ;;  %v7321_v43 = vld [vmem:[#allocation18_spill] sm:$0xff] }
 0x28e   : > { %3680 = vmatpush1.bf16.xpose.msra.mxu0 %v3679_v14  ;;  %v7275_v14 = vand.u32 4294901760, %v7274_v47  ;;  %v7313_v59 = vand.u32 4294901760, %v7312_v27  ;;  %v7327_v47 = vld [vmem:[#allocation29_spill] sm:$0xff] }
 0x28f   : > { %3682 = vmatprep.subr.bf16.mxu0 %v3681_v21  ;;  %v7281_v21 = vand.u32 4294901760, %v7280_v22  ;;  %v7335_v22 = vld [vmem:[#allocation53_spill] sm:$0xff] }
 0x290   : > { %v3697_v26 = vpack.c.bf16 %v7275_v14, %v7273_v3  ;;  %v7326_v3 = vld [vmem:[#allocation24_spill] sm:$0xff]  ;;  %v7328_v14 = vld [vmem:[#allocation27_spill] sm:$0xff]  ;;  %v7375_v27 = vld [vmem:[#allocation173_spill] sm:$0xff] }
 0x291   : > { %v3317_v13 = vpack.c.bf16 %v7283_v53, %v7281_v21  ;;  %v7336_v21 = vld [vmem:[#allocation50_spill] sm:$0xff]  ;;  %v7338_v53 = vld [vmem:[#allocation59_spill] sm:$0xff] }
 0x293   : > { %3300 = vmatpush1.bf16.xpose.msra.mxu1 %v3299_v56  ;;  %v7285_v56 = vand.u32 4294901760, %v7284_v61  ;;  %v7340_v61 = vld [vmem:[#allocation62_spill] sm:$0xff] }
 0x294   : > { %3302 = vmatprep.subr.bf16.mxu1 %v3301_v42  ;;  %v7289_v42 = vand.u32 4294901760, %v7288_v20  ;;  %v7345_v20 = vld [vmem:[#allocation80_spill] sm:$0xff] }
 0x295   : > { %v3699_v50 = vpack.c.bf16 %v7287_v12, %v7285_v56  ;;  %v7341_v56 = vld [vmem:[#allocation68_spill] sm:$0xff]  ;;  %v7343_v12 = vld [vmem:[#allocation77_spill] sm:$0xff] }
 0x296   : > { %3684 = vmatpush1.bf16.xpose.msra.mxu0 %v3683_v44  ;;  %v3701_v44 = vpack.c.bf16 %v7291_v24, %v7289_v42  ;;  %v7346_v42 = vld [vmem:[#allocation83_spill] sm:$0xff]  ;;  %v7348_v24 = vld [vmem:[#allocation86_spill] sm:$0xff] }
 0x297   : > { %3686 = vmatprep.subr.bf16.mxu0 %v3685_v9  ;;  %v7295_v9 = vand.u32 4294901760, %v7294_v52  ;;  %v7352_v52 = vld [vmem:[#allocation98_spill] sm:$0xff] }
 0x299   : > { %v3319_v8 = vpack.c.bf16 %v7295_v9, %v7293_v60  ;;  %v7351_v60 = vld [vmem:[#allocation101_spill] sm:$0xff]  ;;  %v7353_v9 = vld [vmem:[#allocation104_spill] sm:$0xff] }
 0x29b   : > { %3304 = vmatpush1.bf16.xpose.msra.mxu1 %v3303_v10  ;;  %v7298_v10 = vld [vmem:[#allocation187_spill] sm:$0xff] }
 0x29c   : > { %3306 = vmatprep.subr.bf16.mxu1 %v3305_v63  ;;  %v7299_v45 = vand.u32 4294901760, %v7298_v10  ;;  %v7301_v63 = vand.u32 4294901760, %v7300_v5  ;;  %v7357_v10 = vld [vmem:[#allocation116_spill] sm:$0xff]  ;;  %v7360_v5 = vld [vmem:[#allocation122_spill] sm:$0xff] }
 0x29e   : > { %3688 = vmatpush1.bf16.xpose.msra.mxu0 %v3687_v46  ;;  %v3321_v16 = vpack.c.bf16 %v7299_v45, %v7297_v37  ;;  %v3703_v34 = vpack.c.bf16 %v7303_v11, %v7301_v63  ;;  %v7304_v46 = vld [vmem:[#allocation189_spill] sm:$0xff]  ;;  %v7356_v37 = vld [vmem:[#allocation110_spill] sm:$0xff]  ;;  %v7358_v45 = vld [vmem:[#allocation119_spill] sm:$0xff] }
 0x29f   : > { %3690 = vmatprep.subr.bf16.mxu0 %v3689_v36  ;;  %v7305_v33 = vand.u32 4294901760, %v7304_v46  ;;  %v7307_v36 = vand.u32 4294901760, %v7306_v1  ;;  %v7361_v63 = vld [vmem:[#allocation128_spill] sm:$0xff]  ;;  %v7363_v11 = vld [vmem:[#allocation137_spill] sm:$0xff] }
 0x2a0   : > { %v7365_v46 = vld [vmem:[#allocation140_spill] sm:$0xff]  ;;  %v7367_v1 = vld [vmem:[#allocation149_spill] sm:$0xff] }
 0x2a1   : > { %v3705_v57 = vpack.c.bf16 %v7307_v36, %v7305_v33  ;;  %v7366_v33 = vld [vmem:[#allocation143_spill] sm:$0xff]  ;;  %v7368_v36 = vld [vmem:[#allocation146_spill] sm:$0xff] }
 0x2a3   : > { %3308 = vmatpush1.bf16.xpose.msra.mxu1 %v3307_v19  ;;  %v7309_v19 = vand.u32 4294901760, %v7308_v48  ;;  %v7370_v48 = vld [vmem:[#allocation155_spill] sm:$0xff] }
 0x2a4   : > { %3310 = vmatprep.subr.bf16.mxu1 %v3309_v30 }
 0x2a5   : > { %v3323_v30 = vpack.c.bf16 %v7311_v40, %v7309_v19  ;;  %v7371_v19 = vld [vmem:[#allocation161_spill] sm:$0xff]  ;;  %v7373_v40 = vld [vmem:[#allocation164_spill] sm:$0xff] }
 0x2a6   : > { %3692 = vmatpush1.bf16.xpose.msra.mxu0 %v3691_v2  ;;  %v7314_v2 = vld [vmem:[#allocation198_spill] sm:$0xff] }
 0x2a7   : > { %3694 = vmatprep.subr.bf16.mxu0 %v3693_v7  ;;  %v7315_v18 = vand.u32 4294901760, %v7314_v2  ;;  %v7316_v7 = vld [vmem:[#allocation5_spill] sm:$0xff]  ;;  %v7377_v2 = vld [vmem:[#allocation176_spill] sm:$0xff] }
 0x2a9   : > { %v3707_v23 = vpack.c.bf16 %v7315_v18, %v7313_v59  ;;  %v7376_v59 = vld [vmem:[#allocation170_spill] sm:$0xff]  ;;  %v7378_v18 = vld [vmem:[#allocation179_spill] sm:$0xff] }
 0x2ab   : > { %3312 = vmatpush1.bf16.xpose.msra.mxu1 %v3311_v15  ;;  %v7319_v15 = vld [vmem:[#allocation11_spill] sm:$0xff] }
 0x2ac   : > { %3314 = vmatprep.subr.bf16.mxu1 %v3313_v17  ;;  %v7322_v17 = vld [vmem:[#allocation203_spill] sm:$0xff] }
 0x2ae   : > { %3696 = vmatpush1.bf16.xpose.msra.mxu0 %v3695_v29  ;;  %v7325_v29 = vld [vmem:[#allocation20_spill] sm:$0xff] }
 0x2af   : > { %3698 = vmatprep.subr.bf16.mxu0 %v3697_v26  ;;  %v7329_v26 = vld [vmem:[#allocation32_spill] sm:$0xff] }
 0x2b3   : > { %3316 = vmatpush1.bf16.xpose.msra.mxu1 %v3315_v35  ;;  %v7334_v35 = vld [vmem:[#allocation47_spill] sm:$0xff] }
 0x2b4   : > { %3318 = vmatprep.subr.bf16.mxu1 %v3317_v13  ;;  %v7339_v13 = vld [vmem:[#allocation65_spill] sm:$0xff] }
 0x2b6   : > { %3700 = vmatpush1.bf16.xpose.msra.mxu0 %v3699_v50  ;;  %v7344_v50 = vld [vmem:[#allocation74_spill] sm:$0xff] }
 0x2b7   : > { %3702 = vmatprep.subr.bf16.mxu0 %v3701_v44  ;;  %v7349_v44 = vld [vmem:[#allocation92_spill] sm:$0xff] }
 0x2bb   : > { %3320 = vmatpush1.bf16.xpose.msra.mxu1 %v3319_v8  ;;  %v7354_v8 = vld [vmem:[#allocation107_spill] sm:$0xff] }
 0x2bc   : > { %3322 = vmatprep.subr.bf16.mxu1 %v3321_v16  ;;  %v7359_v16 = vld [vmem:[#allocation125_spill] sm:$0xff] }
 0x2be   : > { %3704 = vmatpush1.bf16.xpose.msra.mxu0 %v3703_v34  ;;  %v7364_v34 = vld [vmem:[#allocation134_spill] sm:$0xff] }
 0x2bf   : > { %3706 = vmatprep.subr.bf16.mxu0 %v3705_v57  ;;  %v7369_v57 = vld [vmem:[#allocation152_spill] sm:$0xff] }
 0x2c3   : > { %3324 = vmatpush1.bf16.xpose.msra.mxu1 %v3323_v30  ;;  %v7374_v30 = vld [vmem:[#allocation167_spill] sm:$0xff] }
 0x2c4   : > { %3326 = vmatprep.subr.bf16.mxu1 %v7316_v7  ;;  %v7380_v7 = vld [vmem:[#allocation182_spill] sm:$0xff] }
 0x2c6   : > { %3708 = vmatpush1.bf16.xpose.msra.mxu0 %v3707_v23  ;;  %v7379_v23 = vld [vmem:[#allocation185_spill] sm:$0xff] }
 0x2c7   : > { %3710 = vmatprep.subr.bf16.mxu0 %v7317_v49  ;;  %v7381_v49 = vld [vmem:[#allocation188_spill] sm:$0xff] }
 0x2ca   : > { %1466 = vmatmul.mubr.f32.vlgmr.msra.gmra.mrb[0].mxu1 %v7318_v54 }
 0x2cb   : > { %3328 = vmatpush1.bf16.xpose.msra.mxu1 %v7319_v15  ;;  %1601 = vmatprep.mubr.f32.mxu1 %v7320_v51  ;;  %v7382_v15 = vld [vmem:[#allocation193_spill] sm:$0xff]  ;;  %v7383_v51 = vld [vmem:[#allocation196_spill] sm:$0xff] }
 0x2cc   : > { %3330 = vmatprep.subr.bf16.mxu1 %v7321_v43 }
 0x2cd   : > { %2750 = vmatmul.mubr.f32.vlgmr.msra.gmra.mrb[0].mxu0 %v7322_v17 }
 0x2ce   : > { %3712 = vmatpush1.bf16.xpose.msra.mxu0 %v7323_v4  ;;  %2885 = vmatprep.mubr.f32.mxu0 %v7324_v55 }
 0x2cf   : > { %3714 = vmatprep.subr.bf16.mxu0 %v7325_v29 }
 0x2d3   : > { %3332 = vmatpush1.bf16.xpose.msra.mxu1 %v7326_v3 }
 0x2d4   : > { %3334 = vmatprep.subr.bf16.mxu1 %v7327_v47 }
 0x2d6   : > { %3716 = vmatpush1.bf16.xpose.msra.mxu0 %v7328_v14 }
 0x2d7   : > { %3718 = vmatprep.subr.bf16.mxu0 %v7329_v26 }
 0x2db   : > { %3336 = vmatpush1.bf16.xpose.msra.mxu1 %v7330_v41 }
 0x2dc   : > { %3338 = vmatprep.subr.bf16.mxu1 %v7331_v38 }
 0x2de   : > { %3720 = vmatpush1.bf16.xpose.msra.mxu0 %v7332_v28 }
 0x2df   : > { %3722 = vmatprep.subr.bf16.mxu0 %v7333_v32 }
 0x2e3   : > { %3340 = vmatpush1.bf16.xpose.msra.mxu1 %v7334_v35 }
 0x2e4   : > { %3342 = vmatprep.subr.bf16.mxu1 %v7335_v22 }
 0x2e6   : > { %3724 = vmatpush1.bf16.xpose.msra.mxu0 %v7336_v21 }
 0x2e7   : > { %3726 = vmatprep.subr.bf16.mxu0 %v7337_v0 }
 0x2eb   : > { %3344 = vmatpush1.bf16.xpose.msra.mxu1 %v7338_v53 }
 0x2ec   : > { %3346 = vmatprep.subr.bf16.mxu1 %v7339_v13 }
 0x2ee   : > { %3728 = vmatpush1.bf16.xpose.msra.mxu0 %v7340_v61 }
 0x2ef   : > { %3730 = vmatprep.subr.bf16.mxu0 %v7341_v56 }
 0x2f3   : > { %3348 = vmatpush1.bf16.xpose.msra.mxu1 %v7342_v62 }
 0x2f4   : > { %3350 = vmatprep.subr.bf16.mxu1 %v7343_v12 }
 0x2f6   : > { %3732 = vmatpush1.bf16.xpose.msra.mxu0 %v7344_v50 }
 0x2f7   : > { %3734 = vmatprep.subr.bf16.mxu0 %v7345_v20 }
 0x2fb   : > { %3352 = vmatpush1.bf16.xpose.msra.mxu1 %v7346_v42 }
 0x2fc   : > { %3354 = vmatprep.subr.bf16.mxu1 %v7347_v31 }
 0x2fe   : > { %3736 = vmatpush1.bf16.xpose.msra.mxu0 %v7348_v24 }
 0x2ff   : > { %3738 = vmatprep.subr.bf16.mxu0 %v7349_v44 }
 0x303   : > { %3356 = vmatpush1.bf16.xpose.msra.mxu1 %v7350_v25 }
 0x304   : > { %3358 = vmatprep.subr.bf16.mxu1 %v7351_v60 }
 0x306   : > { %3740 = vmatpush1.bf16.xpose.msra.mxu0 %v7352_v52 }
 0x307   : > { %3742 = vmatprep.subr.bf16.mxu0 %v7353_v9 }
 0x30b   : > { %3360 = vmatpush1.bf16.xpose.msra.mxu1 %v7354_v8 }
 0x30c   : > { %3362 = vmatprep.subr.bf16.mxu1 %v7355_v39 }
 0x30e   : > { %3744 = vmatpush1.bf16.xpose.msra.mxu0 %v7356_v37 }
 0x30f   : > { %3746 = vmatprep.subr.bf16.mxu0 %v7357_v10 }
 0x313   : > { %3364 = vmatpush1.bf16.xpose.msra.mxu1 %v7358_v45 }
 0x314   : > { %3366 = vmatprep.subr.bf16.mxu1 %v7359_v16 }
 0x316   : > { %3748 = vmatpush1.bf16.xpose.msra.mxu0 %v7360_v5 }
 0x317   : > { %3750 = vmatprep.subr.bf16.mxu0 %v7361_v63 }
 0x31b   : > { %3368 = vmatpush1.bf16.xpose.msra.mxu1 %v7362_v58 }
 0x31c   : > { %3370 = vmatprep.subr.bf16.mxu1 %v7363_v11 }
 0x31e   : > { %3752 = vmatpush1.bf16.xpose.msra.mxu0 %v7364_v34 }
 0x31f   : > { %3754 = vmatprep.subr.bf16.mxu0 %v7365_v46 }
 0x323   : > { %3372 = vmatpush1.bf16.xpose.msra.mxu1 %v7366_v33 }
 0x324   : > { %3374 = vmatprep.subr.bf16.mxu1 %v7367_v1 }
 0x326   : > { %3756 = vmatpush1.bf16.xpose.msra.mxu0 %v7368_v36 }
 0x327   : > { %3758 = vmatprep.subr.bf16.mxu0 %v7369_v57 }
 0x32b   : > { %3376 = vmatpush1.bf16.xpose.msra.mxu1 %v7370_v48 }
 0x32c   : > { %3378 = vmatprep.subr.bf16.mxu1 %v7371_v19 }
 0x32e   : > { %3760 = vmatpush1.bf16.xpose.msra.mxu0 %v7372_v6 }
 0x32f   : > { %3762 = vmatprep.subr.bf16.mxu0 %v7373_v40 }
 0x333   : > { %3380 = vmatpush1.bf16.xpose.msra.mxu1 %v7374_v30 }
 0x334   : > { %3382 = vmatprep.subr.bf16.mxu1 %v7375_v27 }
 0x336   : > { %3764 = vmatpush1.bf16.xpose.msra.mxu0 %v7376_v59 }
 0x337   : > { %3766 = vmatprep.subr.bf16.mxu0 %v7377_v2 }
 0x33b   : > { %3384 = vmatpush1.bf16.xpose.msra.mxu1 %v7378_v18 }
 0x33c   : > { %3386 = vmatprep.subr.bf16.mxu1 %v7379_v23 }
 0x33e   : > { %3768 = vmatpush1.bf16.xpose.msra.mxu0 %v7380_v7 }
 0x33f   : > { %3770 = vmatprep.subr.bf16.mxu0 %v7381_v49 }
 0x343   : > { %3388 = vmatpush1.bf16.xpose.msra.mxu1 %v7382_v15 }
 0x346   : > { %3772 = vmatpush1.bf16.xpose.msra.mxu0 %v7383_v51 }
 0x34a   : > { %1603 = vmatmul.mubr.f32.vlgmr.msra.gmra.mrb[0].mxu1 %v7318_v54 }
 0x34d   : > { %2887 = vmatmul.mubr.f32.vlgmr.msra.gmra.mrb[0].mxu0 %v7322_v17 }
 0x41d   : > { %v1604_v43 = vpop.f32.mrb[0].mxu1 }
 0x41e   : > { %v1606_v4 = vpop.f32.mrb[1].mxu1 }
 0x420   : > { %v2888_v55 = vpop.f32.mrb[0].mxu0 }
 0x421   : > { %v3773_v29 = vadd.f32 %v2888_v55, %v1604_v43  ;;  %v2890_v3 = vpop.f32.mrb[1].mxu0 }
 0x422   : > { %v3774_v47 = vadd.f32 %v2890_v3, %v1606_v4 }
 0x423   : > { %2893 = vst [vmem:[%s191_s15] sm:$0xff] %v3773_v29 }
 0x424   : > { %2894 = vst [vmem:[%s191_s15 + $0x8] sm:$0xff] %v3774_v47 }
 0x425 PF: > { %s15_s14 = sadd.s32 1, %s3932_s14   ;;  %s7384_s9 = smov %s3916_s10 }
 0x426   : > { %p12_p9 = scmp.ge.s32.totalorder %s15_s14, 4   ;;  %s7385_s10 = smov %s3920_s11 }
 0x427   : > { %s7386_s11 = smov %s4001_s21  ;;  %s7387_s12 = smov %s3928_s13 }
 0x428   : > { %s7388_s13 = smov %s7390_s16  ;;  %14 = sbr.rel (!%p12_p9) target bundleno = 4 (0x4), region = 68 }
 0x42f   :  { %2925 = vsyncpa [#allocation3], 1 }
 0x430   :  { %2927 = vsyncpa [#allocation3 + $0x1], 1 }

</bundles_post_ra>
